<compile_context>
chip_gen: v7x
topology: tpu7x:2x2x1
jax: 0.10.0
libtpu: 0.0.40
codegen_flags: <defaults>
</compile_context>

<pallas_src>
import functools

import jax
import jax.numpy as jnp
from jax import lax
from jax.experimental import pallas as pl
from jax.experimental.pallas import tpu as pltpu

_VMEM_LIMIT = 32 * 1024 * 1024   # safe scoped-VMEM budget on v5e/v6e/v7x
# TODO(synk): on v7x switch the leading grid axes to pltpu.CORE_PARALLEL to
# shard across the two TensorCores; plain "parallel" is kept here because it
# is portable across all generations (and interpret mode).
_PAR = "parallel"
_ARB = "arbitrary"


def _round_up(x, m):
    return ((x + m - 1) // m) * m


# ---------------------------------------------------------------------------
# Fused (grouped) matmul:  out[:, g] = act((A_g @ W_g) * scale_g + shift_g)
# ---------------------------------------------------------------------------
def _gmm_kernel(a_ref, w_ref, *rest, act, has_scale):
    if has_scale:
        scale_ref, shift_ref, o_ref, acc_ref = rest
    else:
        scale_ref = None
        shift_ref, o_ref, acc_ref = rest

    k = pl.program_id(3)

    @pl.when(k == 0)
    def _init():
        acc_ref[...] = jnp.zeros_like(acc_ref)

    acc_ref[...] += jnp.dot(a_ref[...], w_ref[0],
                            preferred_element_type=jnp.float32)

    @pl.when(k == pl.num_programs(3) - 1)
    def _epilogue():
        y = acc_ref[...]                     # f32 epilogue math (v5e-safe)
        if has_scale:
            y = y * scale_ref[0]
        y = y + shift_ref[0]
        if act == "relu":
            y = jnp.maximum(y, 0.0)
        elif act == "sigmoid":
            y = jax.nn.sigmoid(y)
        o_ref[...] = y.astype(o_ref.dtype)


def grouped_matmul_bn_act(a, w, scale, shift, act="none", out_dtype=jnp.float32):
    """a: (M, G, Kg)  w: (G, Kg, Ng)  scale/shift: (G, Ng); scale may be None.

    bf16 MXU operands, f32 accumulation in VMEM scratch over a K grid axis,
    per-group N padded to a 128-lane multiple so stores are lane-dense.
    Returns (M, G, Ng) with dtype out_dtype.
    """
    M, G, Kg = a.shape
    Gw, Kg2, Ng = w.shape
    assert Gw == G and Kg2 == Kg

    tk = min(512, _round_up(Kg, 128))
    Kgp = _round_up(Kg, tk)
    tn = min(512, _round_up(Ng, 128))
    Ngp = _round_up(Ng, tn)
    tm = min(512, _round_up(M, 8))
    Mp = _round_up(M, tm)
    nkb, nnb, nmb = Kgp // tk, Ngp // tn, Mp // tm

    a_p = jnp.pad(a, ((0, Mp - M), (0, 0), (0, Kgp - Kg)))
    a_p = a_p.reshape(Mp, G * Kgp).astype(jnp.bfloat16)
    w_p = jnp.pad(w, ((0, 0), (0, Kgp - Kg), (0, Ngp - Ng))).astype(jnp.bfloat16)
    shift_p = jnp.pad(shift.astype(jnp.float32), ((0, 0), (0, Ngp - Ng)))
    shift_p = shift_p.reshape(G, 1, Ngp)

    operands = [a_p, w_p]
    in_specs = [
        pl.BlockSpec((tm, tk), lambda i, g, n, k: (i, g * nkb + k)),
        pl.BlockSpec((1, tk, tn), lambda i, g, n, k: (g, k, n)),
    ]
    has_scale = scale is not None
    if has_scale:
        scale_p = jnp.pad(scale.astype(jnp.float32), ((0, 0), (0, Ngp - Ng)))
        operands.append(scale_p.reshape(G, 1, Ngp))
        in_specs.append(pl.BlockSpec((1, 1, tn), lambda i, g, n, k: (g, 0, n)))
    operands.append(shift_p)
    in_specs.append(pl.BlockSpec((1, 1, tn), lambda i, g, n, k: (g, 0, n)))

    out = pl.pallas_call(
        functools.partial(_gmm_kernel, act=act, has_scale=has_scale),
        out_shape=jax.ShapeDtypeStruct((Mp, G * Ngp), out_dtype),
        grid=(nmb, G, nnb, nkb),
        in_specs=in_specs,
        out_specs=pl.BlockSpec((tm, tn), lambda i, g, n, k: (i, g * nnb + n)),
        scratch_shapes=[pltpu.VMEM((tm, tn), jnp.float32)],
        compiler_params=pltpu.CompilerParams(
            dimension_semantics=(_PAR, _PAR, _PAR, _ARB),
            vmem_limit_bytes=_VMEM_LIMIT),
    )(*operands)
    return out[:M].reshape(M, G, Ngp)[:, :, :Ng]


def linear_pallas(a, w_torch, b, act="none", out_dtype=jnp.float32):
    """PyTorch-layout Linear (bias-only epilogue): w_torch (out, in), b (out,)."""
    M, K = a.shape
    n_out = w_torch.shape[0]
    out = grouped_matmul_bn_act(a.reshape(M, 1, K),
                                jnp.transpose(w_torch).reshape(1, K, n_out),
                                None, b.reshape(1, n_out), act=act,
                                out_dtype=out_dtype)
    return out.reshape(M, n_out)


# ---------------------------------------------------------------------------
# Convolution glue + fused grouped matmul
# ---------------------------------------------------------------------------
def _pick_gsub(G, Ng, target=256):
    """Largest divisor of G so the packed (block-diag) output width <= target lanes."""
    for d in range(G, 0, -1):
        if G % d == 0 and d * Ng <= max(target, Ng):
            return d
    return 1


def conv2d_bn_act(x, w, bn_scale, bn_shift, stride=1, padding=0, groups=1,
                  act="none", out_dtype=jnp.bfloat16):
    """NHWC conv (bias-free, torch weight layout (Cout, Cin/g, kh, kw)) with
    folded-BN scale/shift + activation fused into the matmul epilogue."""
    N, H, W, C = x.shape
    Cout, Cing, kh, kw = w.shape
    G = groups
    Ng = Cout // G

    # ---- fast path: 1x1 conv = plain matmul on the (strided) pixels --------
    if kh == 1 and kw == 1 and padding == 0 and G == 1:
        xs = x[:, ::stride, ::stride, :] if stride > 1 else x
        OH, OW = xs.shape[1], xs.shape[2]
        M = N * OH * OW
        a = xs.reshape(M, 1, C)
        wg = jnp.transpose(w.reshape(Cout, C)).reshape(1, C, Cout)
        out = grouped_matmul_bn_act(a, wg, bn_scale.reshape(1, Cout),
                                    bn_shift.reshape(1, Cout), act=act,
                                    out_dtype=out_dtype)
        return out.reshape(N, OH, OW, Cout)

    # ---- general kxk (possibly grouped) path --------------------------------
    xp = jnp.pad(x, ((0, 0), (padding, padding), (padding, padding), (0, 0)))
    OH = (H + 2 * padding - kh) // stride + 1
    OW = (W + 2 * padding - kw) // stride + 1
    # TODO(synk): im2col still materializes the kh*kw patch tensor in HBM; a
    # fully implicit conv would fold the (ky,kx) taps into the K grid axis with
    # shifted-window DMA on the NHWC input.
    cols = [xp[:, ky:ky + (OH - 1) * stride + 1:stride,
               kx:kx + (OW - 1) * stride + 1:stride, :]
            for ky in range(kh) for kx in range(kw)]
    patches = jnp.stack(cols, axis=3)                    # (N, OH, OW, T, C)
    M = N * OH * OW
    T = kh * kw

    # pack gsub groups into one lane-dense block-diagonal "super group"
    gsub = _pick_gsub(G, Ng)
    Gs = G // gsub
    if Gs == 1:
        # no activation-side transpose needed: K order = (tap, sub-group, cin)
        a = patches.reshape(M, 1, T * C)
    else:
        a = patches.reshape(M, T, Gs, gsub * Cing)
        a = jnp.transpose(a, (0, 2, 1, 3)).reshape(M, Gs, T * gsub * Cing)

    # block-diagonal weight per super group, K order matching A: (tap, sub, cin)
    w6 = w.reshape(Gs, gsub, Ng, Cing, kh, kw)
    wt = jnp.transpose(w6, (0, 4, 5, 1, 3, 2))           # (Gs, ky, kx, sub, cin, ng)
    eye = jnp.eye(gsub, dtype=w.dtype)
    wbd = jnp.einsum('gabicn,ij->gabicjn', wt, eye)
    wbd = wbd.reshape(Gs, T * gsub * Cing, gsub * Ng)

    out = grouped_matmul_bn_act(a, wbd,
                                bn_scale.reshape(Gs, gsub * Ng),
                                bn_shift.reshape(Gs, gsub * Ng),
                                act=act, out_dtype=out_dtype)
    return out.reshape(M, Cout).reshape(N, OH, OW, Cout)


def max_pool_ceil(x, k=3, s=2):
    # TODO(synk): max-pool (ceil_mode=True) left as lax.reduce_window glue.
    N, H, W, C = x.shape
    OH = -((H - k) // -s) + 1
    OW = -((W - k) // -s) + 1
    pad_h = (OH - 1) * s + k - H
    pad_w = (OW - 1) * s + k - W
    neg_inf = jnp.array(-jnp.inf, dtype=x.dtype)
    xp = jnp.pad(x, ((0, 0), (0, pad_h), (0, pad_w), (0, 0)),
                 constant_values=neg_inf)
    return lax.reduce_window(xp, neg_inf, lax.max, (1, k, k, 1), (1, s, s, 1),
                             "VALID")


# ---------------------------------------------------------------------------
# Pooling / SE kernels
# ---------------------------------------------------------------------------
def _gap_kernel(x_ref, o_ref, acc_ref, *, inv_hw):
    j = pl.program_id(1)

    @pl.when(j == 0)
    def _():
        acc_ref[...] = jnp.zeros_like(acc_ref)

    acc_ref[...] += jnp.sum(x_ref[0].astype(jnp.float32), axis=0, keepdims=True)

    @pl.when(j == pl.num_programs(1) - 1)
    def _():
        o_ref[0] = (acc_ref[...] * inv_hw).astype(o_ref.dtype)


def global_avg_pool(x):
    """(N, H, W, C) -> (N, C); HW tiled as a reduction grid axis (bounded VMEM)."""
    N, H, W, C = x.shape
    HW = H * W
    thw = min(1024, _round_up(HW, 8))
    HWp = _round_up(HW, thw)
    xf = x.reshape(N, HW, C)
    if HWp != HW:
        xf = jnp.pad(xf, ((0, 0), (0, HWp - HW), (0, 0)))
    out = pl.pallas_call(
        functools.partial(_gap_kernel, inv_hw=1.0 / HW),
        out_shape=jax.ShapeDtypeStruct((N, 1, C), jnp.float32),
        grid=(N, HWp // thw),
        in_specs=[pl.BlockSpec((1, thw, C), lambda n, j: (n, j, 0))],
        out_specs=pl.BlockSpec((1, 1, C), lambda n, j: (n, 0, 0)),
        scratch_shapes=[pltpu.VMEM((1, C), jnp.float32)],
        compiler_params=pltpu.CompilerParams(
            dimension_semantics=(_PAR, _ARB), vmem_limit_bytes=_VMEM_LIMIT),
    )(xf)
    return out.reshape(N, C)


def _se_kernel(x_ref, w1_ref, b1_ref, w2_ref, b2_ref, o_ref, acc_ref, *, inv_hw):
    """Fused SE squeeze/excite: HW-tiled mean, then fc1+relu, fc2+sigmoid."""
    j = pl.program_id(1)

    @pl.when(j == 0)
    def _():
        acc_ref[...] = jnp.zeros_like(acc_ref)

    acc_ref[...] += jnp.sum(x_ref[0].astype(jnp.float32), axis=0, keepdims=True)

    @pl.when(j == pl.num_programs(1) - 1)
    def _():
        pooled = acc_ref[...] * inv_hw                                   # (1, C)
        z = jnp.dot(pooled, w1_ref[...],
                    preferred_element_type=jnp.float32) + b1_ref[...]
        z = jnp.maximum(z, 0.0)
        s = jnp.dot(z, w2_ref[...],
                    preferred_element_type=jnp.float32) + b2_ref[...]
        o_ref[0] = jax.nn.sigmoid(s).astype(o_ref.dtype)


def se_squeeze_excite(x, w1_t, b1, w2_t, b2):
    """x: (N,H,W,C).  torch fc weights (out,in).  Returns the (N,C) SE scale."""
    N, H, W, C = x.shape
    HW = H * W
    Cr = w1_t.shape[0]
    thw = min(1024, _round_up(HW, 8))
    HWp = _round_up(HW, thw)
    xf = x.reshape(N, HW, C)
    if HWp != HW:
        xf = jnp.pad(xf, ((0, 0), (0, HWp - HW), (0, 0)))
    w1 = jnp.transpose(w1_t).astype(jnp.float32)          # (C, Cr)
    w2 = jnp.transpose(w2_t).astype(jnp.float32)          # (Cr, C)
    out = pl.pallas_call(
        functools.partial(_se_kernel, inv_hw=1.0 / HW),
        out_shape=jax.ShapeDtypeStruct((N, 1, C), jnp.float32),
        grid=(N, HWp // thw),
        in_specs=[pl.BlockSpec((1, thw, C), lambda n, j: (n, j, 0)),
                  pl.BlockSpec((C, Cr), lambda n, j: (0, 0)),
                  pl.BlockSpec((1, Cr), lambda n, j: (0, 0)),
                  pl.BlockSpec((Cr, C), lambda n, j: (0, 0)),
                  pl.BlockSpec((1, C), lambda n, j: (0, 0))],
        out_specs=pl.BlockSpec((1, 1, C), lambda n, j: (n, 0, 0)),
        scratch_shapes=[pltpu.VMEM((1, C), jnp.float32)],
        compiler_params=pltpu.CompilerParams(
            dimension_semantics=(_PAR, _ARB), vmem_limit_bytes=_VMEM_LIMIT),
    )(xf, w1, b1.reshape(1, Cr).astype(jnp.float32), w2,
      b2.reshape(1, C).astype(jnp.float32))
    return out.reshape(N, C)


def _se_res_relu_kernel(x_ref, s_ref, r_ref, o_ref):
    y = (x_ref[...].astype(jnp.float32) * s_ref[...].astype(jnp.float32)
         + r_ref[...].astype(jnp.float32))
    o_ref[...] = jnp.maximum(y, 0.0).astype(o_ref.dtype)


def se_residual_relu(x, se_scale, residual, out_dtype=jnp.bfloat16):
    """relu(x * se_scale[:, None, None, :] + residual), tiled over (N, rows)."""
    N, H, W, C = x.shape
    HW = H * W
    tr = min(2048, _round_up(HW, 8))
    HWp = _round_up(HW, tr)
    xf = x.reshape(N, HW, C)
    rf = residual.reshape(N, HW, C)
    if HWp != HW:
        pad = ((0, 0), (0, HWp - HW), (0, 0))
        xf = jnp.pad(xf, pad)
        rf = jnp.pad(rf, pad)
    out = pl.pallas_call(
        _se_res_relu_kernel,
        out_shape=jax.ShapeDtypeStruct((N, HWp, C), out_dtype),
        grid=(N, HWp // tr),
        in_specs=[pl.BlockSpec((1, tr, C), lambda n, j: (n, j, 0)),
                  pl.BlockSpec((1, 1, C), lambda n, j: (n, 0, 0)),
                  pl.BlockSpec((1, tr, C), lambda n, j: (n, j, 0))],
        out_specs=pl.BlockSpec((1, tr, C), lambda n, j: (n, j, 0)),
        compiler_params=pltpu.CompilerParams(
            dimension_semantics=(_PAR, _PAR), vmem_limit_bytes=_VMEM_LIMIT),
    )(xf, se_scale.reshape(N, 1, C).astype(jnp.float32), rf)
    return out[:, :HW].reshape(N, H, W, C)


# ---------------------------------------------------------------------------
# LSTM: hoisted input projection + per-timestep recurrence kernel
# ---------------------------------------------------------------------------
def _lstm_step_kernel(gx_ref, whh_ref, o_ref, h_ref, c_ref, *, hp):
    t = pl.program_id(0)

    @pl.when(t == 0)
    def _init():
        h_ref[...] = jnp.zeros_like(h_ref)
        c_ref[...] = jnp.zeros_like(c_ref)

    # gates precomputed from x; recurrent term uses bf16 MXU operands with f32
    # accumulate, state kept f32.
    gates = gx_ref[0] + jnp.dot(h_ref[...].astype(jnp.bfloat16), whh_ref[...],
                                preferred_element_type=jnp.float32)
    i_g = jax.nn.sigmoid(gates[:, 0 * hp:1 * hp])
    f_g = jax.nn.sigmoid(gates[:, 1 * hp:2 * hp])
    g_g = jnp.tanh(gates[:, 2 * hp:3 * hp])
    o_g = jax.nn.sigmoid(gates[:, 3 * hp:4 * hp])
    c_new = f_g * c_ref[...] + i_g * g_g
    h_new = o_g * jnp.tanh(c_new)
    c_ref[...] = c_new
    h_ref[...] = h_new
    o_ref[0] = h_new.astype(o_ref.dtype)


def lstm_forward(x_bsf, w_ih, w_hh, b_ih, b_hh):
    """x: (B, S, F) batch_first; PyTorch weights w_ih (4H,F), w_hh (4H,H),
    gate order (i, f, g, o).  Hidden padded to 128 lanes; padded gate columns
    stay exactly zero so results match the unpadded recurrence."""
    B, S, F = x_bsf.shape
    H = w_hh.shape[1]
    Hp = _round_up(H, 128)
    Bp = _round_up(B, 8)

    w_ih_p = jnp.pad(w_ih.reshape(4, H, F), ((0, 0), (0, Hp - H), (0, 0)))
    w_ih_p = w_ih_p.reshape(4 * Hp, F)
    bias_p = jnp.pad((b_ih + b_hh).reshape(4, H), ((0, 0), (0, Hp - H)))
    bias_p = bias_p.reshape(4 * Hp)
    w_hh_p = jnp.pad(w_hh.reshape(4, H, H), ((0, 0), (0, Hp - H), (0, 0)))
    w_hh_p = jnp.transpose(w_hh_p, (2, 0, 1)).reshape(H, 4 * Hp)
    w_hh_p = jnp.pad(w_hh_p, ((0, Hp - H), (0, 0)))

    # hoisted time-parallel input projection: one (B*S, F) @ (F, 4Hp) matmul
    gx = linear_pallas(x_bsf.reshape(B * S, F).astype(jnp.float32), w_ih_p, bias_p)
    gx = gx.reshape(B, S, 4 * Hp).transpose(1, 0, 2)           # (S, B, 4Hp)
    gx = jnp.pad(gx, ((0, 0), (0, Bp - B), (0, 0)))

    # TODO(synk): pipeline_mode=pl.Buffered(3) on the gx spec would deepen the
    # serial-grid prefetch; omitted to stay portable across toolchains.
    out = pl.pallas_call(
        functools.partial(_lstm_step_kernel, hp=Hp),
        out_shape=jax.ShapeDtypeStruct((S, Bp, Hp), jnp.bfloat16),
        grid=(S,),
        in_specs=[pl.BlockSpec((1, Bp, 4 * Hp), lambda t: (t, 0, 0)),
                  pl.BlockSpec((Hp, 4 * Hp), lambda t: (0, 0))],
        out_specs=pl.BlockSpec((1, Bp, Hp), lambda t: (t, 0, 0)),
        scratch_shapes=[pltpu.VMEM((Bp, Hp), jnp.float32),
                        pltpu.VMEM((Bp, Hp), jnp.float32)],
        compiler_params=pltpu.CompilerParams(
            dimension_semantics=(_ARB,), vmem_limit_bytes=_VMEM_LIMIT),
    )(gx.astype(jnp.float32), w_hh_p.astype(jnp.bfloat16))
    return out[:, :B, :H].transpose(1, 0, 2)                   # (B, S, H) bf16


# ---------------------------------------------------------------------------
# Parameter / static-config init (deterministic, synthetic)
# ---------------------------------------------------------------------------
def init_conv_bn(key, cin, cout, k, groups=1):
    kw_, kg = jax.random.split(key)
    fan_in = (cin // groups) * k * k
    w = jax.random.normal(kw_, (cout, cin // groups, k, k), jnp.float32) / jnp.sqrt(fan_in)
    gamma = 1.0 + 0.05 * jax.random.normal(kg, (cout,), jnp.float32)
    beta = jnp.zeros((cout,), jnp.float32)
    running_mean = jnp.zeros((cout,), jnp.float32)
    running_var = jnp.ones((cout,), jnp.float32)
    eps = 1e-5
    scale = gamma / jnp.sqrt(running_var + eps)
    shift = beta - running_mean * scale
    return dict(w=w, scale=scale, shift=shift)


def init_linear(key, cin, cout):
    k1, k2 = jax.random.split(key)
    w = jax.random.normal(k1, (cout, cin), jnp.float32) / jnp.sqrt(cin)
    b = 0.01 * jax.random.normal(k2, (cout,), jnp.float32)
    return dict(w=w, b=b)


def init_block(key, cin, planes, groups, reduction, stride, downsample):
    keys = jax.random.split(key, 6)
    width = planes            # scaled-down stand-in for floor(planes*4/64)*groups
    cout = planes * 4
    p = {
        "conv1": init_conv_bn(keys[0], cin, width, 1),
        "conv2": init_conv_bn(keys[1], width, width, 3, groups=groups),
        "conv3": init_conv_bn(keys[2], width, cout, 1),
        "se_fc1": init_linear(keys[3], cout, cout // reduction),
        "se_fc2": init_linear(keys[4], cout // reduction, cout),
    }
    if downsample:
        p["down"] = init_conv_bn(keys[5], cin, cout, 1)
    cfg = dict(stride=stride, groups=groups, downsample=downsample)
    return p, cfg


def init_params(key, num_classes=10, hidden_size=32):
    keys = jax.random.split(key, 10)
    params = {"layer0": init_conv_bn(keys[0], 3, 8, 7)}
    config = {"layers": []}
    groups, reduction = 4, 4
    # (planes, stride, n_blocks) -- scaled down from (64,128,256,512) x (3,4,23,3)
    cfg_layers = [(4, 1, 1), (8, 2, 1), (16, 2, 1), (32, 2, 1)]
    cin = 8
    for li, (planes, stride, nblocks) in enumerate(cfg_layers):
        blocks, bcfgs = [], []
        bkeys = jax.random.split(keys[1 + li], nblocks)
        for bi in range(nblocks):
            p, c = init_block(bkeys[bi], cin, planes, groups, reduction,
                              stride if bi == 0 else 1, downsample=(bi == 0))
            blocks.append(p)
            bcfgs.append(c)
            cin = planes * 4
        params[f"layer{li + 1}"] = blocks
        config["layers"].append(bcfgs)
    feat = cin  # last_linear.in_features analogue (128 here)
    k_lstm = jax.random.split(keys[8], 4)
    H = hidden_size
    params["lstm"] = dict(
        w_ih=jax.random.normal(k_lstm[0], (4 * H, feat), jnp.float32) / jnp.sqrt(feat),
        w_hh=jax.random.normal(k_lstm[1], (4 * H, H), jnp.float32) / jnp.sqrt(H),
        b_ih=0.01 * jax.random.normal(k_lstm[2], (4 * H,), jnp.float32),
        b_hh=0.01 * jax.random.normal(k_lstm[3], (4 * H,), jnp.float32),
    )
    params["fc"] = init_linear(keys[9], H, num_classes)
    return params, config, feat


# ---------------------------------------------------------------------------
# Model forward
# ---------------------------------------------------------------------------
def run_block(x, p, cfg):
    c1, c2, c3 = p["conv1"], p["conv2"], p["conv3"]
    out = conv2d_bn_act(x, c1["w"], c1["scale"], c1["shift"], 1, 0, 1, "relu")
    out = conv2d_bn_act(out, c2["w"], c2["scale"], c2["shift"],
                        cfg["stride"], 1, cfg["groups"], "relu")
    out = conv2d_bn_act(out, c3["w"], c3["scale"], c3["shift"], 1, 0, 1, "none")
    if cfg["downsample"]:
        d = p["down"]
        residual = conv2d_bn_act(x, d["w"], d["scale"], d["shift"],
                                 cfg["stride"], 0, 1, "none")
    else:
        residual = x
    # fused SE squeeze/excite (one Pallas kernel) + scale/residual/relu kernel
    s = se_squeeze_excite(out, p["se_fc1"]["w"], p["se_fc1"]["b"],
                          p["se_fc2"]["w"], p["se_fc2"]["b"])
    return se_residual_relu(out, s, residual)


def se_resnext_lstm_forward(x_bschw, params, config):
    b, s, c, h, w = x_bschw.shape
    frames = x_bschw.reshape(b * s, c, h, w)
    x = jnp.transpose(frames, (0, 2, 3, 1)).astype(jnp.float32)  # NCHW -> NHWC

    # encode
    l0 = params["layer0"]
    x = conv2d_bn_act(x, l0["w"], l0["scale"], l0["shift"],
                      stride=2, padding=3, groups=1, act="relu")
    x = max_pool_ceil(x, 3, 2)
    for li, name in enumerate(("layer1", "layer2", "layer3", "layer4")):
        for bi, blk in enumerate(params[name]):
            x = run_block(x, blk, config["layers"][li][bi])
    feat = global_avg_pool(x)      # avg_pool + view(b*s, -1); dropout None -> no-op

    # decode
    seq = feat.reshape(b, s, -1)
    lp = params["lstm"]
    h_seq = lstm_forward(seq, lp["w_ih"], lp["w_hh"], lp["b_ih"], lp["b_hh"])
    h_flat = h_seq.reshape(b * s, -1)
    logits = linear_pallas(h_flat, params["fc"]["w"], params["fc"]["b"], act="none")
    return logits


# ---------------------------------------------------------------------------
if __name__ == "__main__":
    key = jax.random.PRNGKey(0)
    kp, kx = jax.random.split(key)

    num_classes, hidden_size = 10, 32
    params, config, feat_dim = init_params(kp, num_classes=num_classes,
                                           hidden_size=hidden_size)

    b, s, c, h, w = 2, 2, 3, 32, 32
    x = jax.random.normal(kx, (b, s, c, h, w), jnp.float32)

    # config holds only static Python ints/bools -> bind it outside the jit
    # arguments so stride/groups stay static (fixes the tracer-slice error).
    fwd = jax.jit(functools.partial(se_resnext_lstm_forward, config=config))
    out = fwd(x, params)
    out = jax.block_until_ready(out)

    assert out.shape == (b * s, num_classes), out.shape
    assert bool(jnp.all(jnp.isfinite(out)))
    print("KERNEL_OK")
</pallas_src>

<mosaic_0001>
module attributes {stable_mosaic.version = 11 : i64} {
  func.func @_gmm_kernel(%arg0: i32, %arg1: i32, %arg2: i32, %arg3: i32, %arg4: memref<512x256xbf16, #tpu.memory_space<vmem>>, %arg5: memref<1x256x128xbf16, #tpu.memory_space<vmem>>, %arg6: memref<1x1x128xf32, #tpu.memory_space<vmem>>, %arg7: memref<1x1x128xf32, #tpu.memory_space<vmem>>, %arg8: memref<512x128xbf16, #tpu.memory_space<vmem>>, %arg9: memref<512x128xf32, #tpu.memory_space<vmem>>) attributes {dimension_semantics = [#tpu.dimension_semantics<parallel>, #tpu.dimension_semantics<parallel>, #tpu.dimension_semantics<parallel>, #tpu.dimension_semantics<arbitrary>], iteration_bounds = array<i64: 2, 1, 1, 1>, scalar_prefetch = 0 : i64, scratch_operands = 1 : i64, tpu.core_type = #tpu.core_type<tc>, window_params = [{transform_indices = @transform_0, window_bounds = array<i64: 512, 256>}, {transform_indices = @transform_1, window_bounds = array<i64: 1, 256, 128>}, {transform_indices = @transform_2, window_bounds = array<i64: 1, 1, 128>}, {transform_indices = @transform_3, window_bounds = array<i64: 1, 1, 128>}, {transform_indices = @transform_4, window_bounds = array<i64: 512, 128>}]} {
    %c0_i32 = arith.constant 0 : i32
    %0 = arith.cmpi eq, %arg3, %c0_i32 : i32
    %1 = arith.extui %0 : i1 to i32
    %c0_i32_0 = arith.constant 0 : i32
    %2 = arith.cmpi ne, %1, %c0_i32_0 : i32
    scf.if %2 {
      %cst_11 = arith.constant 0.000000e+00 : f32
      %13 = vector.broadcast %cst_11 : f32 to vector<512x128xf32>
      %c0_12 = arith.constant 0 : index
      %c0_13 = arith.constant 0 : index
      %14 = vector.load %arg9[%c0_12, %c0_13] : memref<512x128xf32, #tpu.memory_space<vmem>>, vector<512x128xf32>
      tpu.vector_store %arg9[%c0_12, %c0_13], %13 {strides = array<i32>} : memref<512x128xf32, #tpu.memory_space<vmem>>, vector<512x128xf32>,
    } else {
    }
    %c0 = arith.constant 0 : index
    %c0_1 = arith.constant 0 : index
    %3 = vector.load %arg9[%c0, %c0_1] : memref<512x128xf32, #tpu.memory_space<vmem>>, vector<512x128xf32>
    %c0_2 = arith.constant 0 : index
    %c0_3 = arith.constant 0 : index
    %4 = vector.load %arg4[%c0_2, %c0_3] : memref<512x256xbf16, #tpu.memory_space<vmem>>, vector<512x256xbf16>
    %c0_4 = arith.constant 0 : index
    %c0_5 = arith.constant 0 : index
    %c0_6 = arith.constant 0 : index
    %5 = vector.load %arg5[%c0_4, %c0_5, %c0_6] : memref<1x256x128xbf16, #tpu.memory_space<vmem>>, vector<1x256x128xbf16>
    %6 = vector.shape_cast %5 : vector<1x256x128xbf16> to vector<256x128xbf16>
    %cst = arith.constant dense<0.000000e+00> : vector<512x128xf32>
    %7 = tpu.matmul %4, %6, %cst {dimension_numbers = #tpu.dot_dimension_numbers<[1], [0], [0], [1], [0, 0, 1, 1], [], []>} : vector<512x256xbf16>, vector<256x128xbf16>, vector<512x128xf32> -> vector<512x128xf32>
    %8 = arith.addf %3, %7 : vector<512x128xf32>
    %c0_7 = arith.constant 0 : index
    %c0_8 = arith.constant 0 : index
    %9 = vector.load %arg9[%c0_7, %c0_8] : memref<512x128xf32, #tpu.memory_space<vmem>>, vector<512x128xf32>
    tpu.vector_store %arg9[%c0_7, %c0_8], %8 {strides = array<i32>} : memref<512x128xf32, #tpu.memory_space<vmem>>, vector<512x128xf32>,
    %c0_i32_9 = arith.constant 0 : i32
    %10 = arith.cmpi eq, %arg3, %c0_i32_9 : i32
    %11 = arith.extui %10 : i1 to i32
    %c0_i32_10 = arith.constant 0 : i32
    %12 = arith.cmpi ne, %11, %c0_i32_10 : i32
    scf.if %12 {
      %c0_11 = arith.constant 0 : index
      %c0_12 = arith.constant 0 : index
      %13 = vector.load %arg9[%c0_11, %c0_12] : memref<512x128xf32, #tpu.memory_space<vmem>>, vector<512x128xf32>
      %c0_13 = arith.constant 0 : index
      %c0_14 = arith.constant 0 : index
      %c0_15 = arith.constant 0 : index
      %14 = vector.load %arg6[%c0_13, %c0_14, %c0_15] : memref<1x1x128xf32, #tpu.memory_space<vmem>>, vector<1x1x128xf32>
      %15 = vector.shape_cast %14 : vector<1x1x128xf32> to vector<1x128xf32>
      %16 = vector.broadcast %15 : vector<1x128xf32> to vector<512x128xf32>
      %17 = arith.mulf %13, %16 : vector<512x128xf32>
      %c0_16 = arith.constant 0 : index
      %c0_17 = arith.constant 0 : index
      %c0_18 = arith.constant 0 : index
      %18 = vector.load %arg7[%c0_16, %c0_17, %c0_18] : memref<1x1x128xf32, #tpu.memory_space<vmem>>, vector<1x1x128xf32>
      %19 = vector.shape_cast %18 : vector<1x1x128xf32> to vector<1x128xf32>
      %20 = vector.broadcast %19 : vector<1x128xf32> to vector<512x128xf32>
      %21 = arith.addf %17, %20 : vector<512x128xf32>
      %cst_19 = arith.constant 0.000000e+00 : f32
      %22 = vector.broadcast %cst_19 : f32 to vector<512x128xf32>
      %23 = arith.maximumf %21, %22 : vector<512x128xf32>
      %24 = arith.truncf %23 : vector<512x128xf32> to vector<512x128xbf16>
      %c0_20 = arith.constant 0 : index
      %c0_21 = arith.constant 0 : index
      %25 = vector.load %arg8[%c0_20, %c0_21] : memref<512x128xbf16, #tpu.memory_space<vmem>>, vector<512x128xbf16>
      tpu.vector_store %arg8[%c0_20, %c0_21], %24 {strides = array<i32>} : memref<512x128xbf16, #tpu.memory_space<vmem>>, vector<512x128xbf16>,
    } else {
    }
    return
  }
  func.func @transform_0(%arg0: i32, %arg1: i32, %arg2: i32, %arg3: i32) -> (i32, i32) {
    %c1_i32 = arith.constant 1 : i32
    %0 = arith.muli %arg1, %c1_i32 : i32
    %1 = arith.addi %0, %arg3 : i32
    %c0_i32 = arith.constant 0 : i32
    return %arg0, %1 : i32, i32
  }
  func.func @transform_1(%arg0: i32, %arg1: i32, %arg2: i32, %arg3: i32) -> (i32, i32, i32) {
    %c0_i32 = arith.constant 0 : i32
    return %arg1, %arg3, %arg2 : i32, i32, i32
  }
  func.func @transform_2(%arg0: i32, %arg1: i32, %arg2: i32, %arg3: i32) -> (i32, i32, i32) {
    %c0_i32 = arith.constant 0 : i32
    %c0_i32_0 = arith.constant 0 : i32
    return %arg1, %c0_i32, %arg2 : i32, i32, i32
  }
  func.func @transform_3(%arg0: i32, %arg1: i32, %arg2: i32, %arg3: i32) -> (i32, i32, i32) {
    %c0_i32 = arith.constant 0 : i32
    %c0_i32_0 = arith.constant 0 : i32
    return %arg1, %c0_i32, %arg2 : i32, i32, i32
  }
  func.func @transform_4(%arg0: i32, %arg1: i32, %arg2: i32, %arg3: i32) -> (i32, i32) {
    %c1_i32 = arith.constant 1 : i32
    %0 = arith.muli %arg1, %c1_i32 : i32
    %1 = arith.addi %0, %arg2 : i32
    %c0_i32 = arith.constant 0 : i32
    return %arg0, %1 : i32, i32
  }
}

module attributes {stable_mosaic.version = 11 : i64} {
  func.func @_gmm_kernel(%arg0: i32, %arg1: i32, %arg2: i32, %arg3: i32, %arg4: memref<256x128xbf16, #tpu.memory_space<vmem>>, %arg5: memref<1x128x128xbf16, #tpu.memory_space<vmem>>, %arg6: memref<1x1x128xf32, #tpu.memory_space<vmem>>, %arg7: memref<1x1x128xf32, #tpu.memory_space<vmem>>, %arg8: memref<256x128xbf16, #tpu.memory_space<vmem>>, %arg9: memref<256x128xf32, #tpu.memory_space<vmem>>) attributes {dimension_semantics = [#tpu.dimension_semantics<parallel>, #tpu.dimension_semantics<parallel>, #tpu.dimension_semantics<parallel>, #tpu.dimension_semantics<arbitrary>], iteration_bounds = array<i64: 1, 1, 1, 1>, scalar_prefetch = 0 : i64, scratch_operands = 1 : i64, tpu.core_type = #tpu.core_type<tc>, window_params = [{transform_indices = @transform_0, window_bounds = array<i64: 256, 128>}, {transform_indices = @transform_1, window_bounds = array<i64: 1, 128, 128>}, {transform_indices = @transform_2, window_bounds = array<i64: 1, 1, 128>}, {transform_indices = @transform_3, window_bounds = array<i64: 1, 1, 128>}, {transform_indices = @transform_4, window_bounds = array<i64: 256, 128>}]} {
    %c0_i32 = arith.constant 0 : i32
    %0 = arith.cmpi eq, %arg3, %c0_i32 : i32
    %1 = arith.extui %0 : i1 to i32
    %c0_i32_0 = arith.constant 0 : i32
    %2 = arith.cmpi ne, %1, %c0_i32_0 : i32
    scf.if %2 {
      %cst_11 = arith.constant 0.000000e+00 : f32
      %13 = vector.broadcast %cst_11 : f32 to vector<256x128xf32>
      %c0_12 = arith.constant 0 : index
      %c0_13 = arith.constant 0 : index
      %14 = vector.load %arg9[%c0_12, %c0_13] : memref<256x128xf32, #tpu.memory_space<vmem>>, vector<256x128xf32>
      tpu.vector_store %arg9[%c0_12, %c0_13], %13 {strides = array<i32>} : memref<256x128xf32, #tpu.memory_space<vmem>>, vector<256x128xf32>,
    } else {
    }
    %c0 = arith.constant 0 : index
    %c0_1 = arith.constant 0 : index
    %3 = vector.load %arg9[%c0, %c0_1] : memref<256x128xf32, #tpu.memory_space<vmem>>, vector<256x128xf32>
    %c0_2 = arith.constant 0 : index
    %c0_3 = arith.constant 0 : index
    %4 = vector.load %arg4[%c0_2, %c0_3] : memref<256x128xbf16, #tpu.memory_space<vmem>>, vector<256x128xbf16>
    %c0_4 = arith.constant 0 : index
    %c0_5 = arith.constant 0 : index
    %c0_6 = arith.constant 0 : index
    %5 = vector.load %arg5[%c0_4, %c0_5, %c0_6] : memref<1x128x128xbf16, #tpu.memory_space<vmem>>, vector<1x128x128xbf16>
    %6 = vector.shape_cast %5 : vector<1x128x128xbf16> to vector<128x128xbf16>
    %cst = arith.constant dense<0.000000e+00> : vector<256x128xf32>
    %7 = tpu.matmul %4, %6, %cst {dimension_numbers = #tpu.dot_dimension_numbers<[1], [0], [0], [1], [0, 0, 1, 1], [], []>} : vector<256x128xbf16>, vector<128x128xbf16>, vector<256x128xf32> -> vector<256x128xf32>
    %8 = arith.addf %3, %7 : vector<256x128xf32>
    %c0_7 = arith.constant 0 : index
    %c0_8 = arith.constant 0 : index
    %9 = vector.load %arg9[%c0_7, %c0_8] : memref<256x128xf32, #tpu.memory_space<vmem>>, vector<256x128xf32>
    tpu.vector_store %arg9[%c0_7, %c0_8], %8 {strides = array<i32>} : memref<256x128xf32, #tpu.memory_space<vmem>>, vector<256x128xf32>,
    %c0_i32_9 = arith.constant 0 : i32
    %10 = arith.cmpi eq, %arg3, %c0_i32_9 : i32
    %11 = arith.extui %10 : i1 to i32
    %c0_i32_10 = arith.constant 0 : i32
    %12 = arith.cmpi ne, %11, %c0_i32_10 : i32
    scf.if %12 {
      %c0_11 = arith.constant 0 : index
      %c0_12 = arith.constant 0 : index
      %13 = vector.load %arg9[%c0_11, %c0_12] : memref<256x128xf32, #tpu.memory_space<vmem>>, vector<256x128xf32>
      %c0_13 = arith.constant 0 : index
      %c0_14 = arith.constant 0 : index
      %c0_15 = arith.constant 0 : index
      %14 = vector.load %arg6[%c0_13, %c0_14, %c0_15] : memref<1x1x128xf32, #tpu.memory_space<vmem>>, vector<1x1x128xf32>
      %15 = vector.shape_cast %14 : vector<1x1x128xf32> to vector<1x128xf32>
      %16 = vector.broadcast %15 : vector<1x128xf32> to vector<256x128xf32>
      %17 = arith.mulf %13, %16 : vector<256x128xf32>
      %c0_16 = arith.constant 0 : index
      %c0_17 = arith.constant 0 : index
      %c0_18 = arith.constant 0 : index
      %18 = vector.load %arg7[%c0_16, %c0_17, %c0_18] : memref<1x1x128xf32, #tpu.memory_space<vmem>>, vector<1x1x128xf32>
      %19 = vector.shape_cast %18 : vector<1x1x128xf32> to vector<1x128xf32>
      %20 = vector.broadcast %19 : vector<1x128xf32> to vector<256x128xf32>
      %21 = arith.addf %17, %20 : vector<256x128xf32>
      %cst_19 = arith.constant 0.000000e+00 : f32
      %22 = vector.broadcast %cst_19 : f32 to vector<256x128xf32>
      %23 = arith.maximumf %21, %22 : vector<256x128xf32>
      %24 = arith.truncf %23 : vector<256x128xf32> to vector<256x128xbf16>
      %c0_20 = arith.constant 0 : index
      %c0_21 = arith.constant 0 : index
      %25 = vector.load %arg8[%c0_20, %c0_21] : memref<256x128xbf16, #tpu.memory_space<vmem>>, vector<256x128xbf16>
      tpu.vector_store %arg8[%c0_20, %c0_21], %24 {strides = array<i32>} : memref<256x128xbf16, #tpu.memory_space<vmem>>, vector<256x128xbf16>,
    } else {
    }
    return
  }
  func.func @transform_0(%arg0: i32, %arg1: i32, %arg2: i32, %arg3: i32) -> (i32, i32) {
    %c1_i32 = arith.constant 1 : i32
    %0 = arith.muli %arg1, %c1_i32 : i32
    %1 = arith.addi %0, %arg3 : i32
    %c0_i32 = arith.constant 0 : i32
    return %arg0, %1 : i32, i32
  }
  func.func @transform_1(%arg0: i32, %arg1: i32, %arg2: i32, %arg3: i32) -> (i32, i32, i32) {
    %c0_i32 = arith.constant 0 : i32
    return %arg1, %arg3, %arg2 : i32, i32, i32
  }
  func.func @transform_2(%arg0: i32, %arg1: i32, %arg2: i32, %arg3: i32) -> (i32, i32, i32) {
    %c0_i32 = arith.constant 0 : i32
    %c0_i32_0 = arith.constant 0 : i32
    return %arg1, %c0_i32, %arg2 : i32, i32, i32
  }
  func.func @transform_3(%arg0: i32, %arg1: i32, %arg2: i32, %arg3: i32) -> (i32, i32, i32) {
    %c0_i32 = arith.constant 0 : i32
    %c0_i32_0 = arith.constant 0 : i32
    return %arg1, %c0_i32, %arg2 : i32, i32, i32
  }
  func.func @transform_4(%arg0: i32, %arg1: i32, %arg2: i32, %arg3: i32) -> (i32, i32) {
    %c1_i32 = arith.constant 1 : i32
    %0 = arith.muli %arg1, %c1_i32 : i32
    %1 = arith.addi %0, %arg2 : i32
    %c0_i32 = arith.constant 0 : i32
    return %arg0, %1 : i32, i32
  }
}

module attributes {stable_mosaic.version = 11 : i64} {
  func.func @_gmm_kernel(%arg0: i32, %arg1: i32, %arg2: i32, %arg3: i32, %arg4: memref<256x128xbf16, #tpu.memory_space<vmem>>, %arg5: memref<1x128x128xbf16, #tpu.memory_space<vmem>>, %arg6: memref<1x1x128xf32, #tpu.memory_space<vmem>>, %arg7: memref<1x1x128xf32, #tpu.memory_space<vmem>>, %arg8: memref<256x128xbf16, #tpu.memory_space<vmem>>, %arg9: memref<256x128xf32, #tpu.memory_space<vmem>>) attributes {dimension_semantics = [#tpu.dimension_semantics<parallel>, #tpu.dimension_semantics<parallel>, #tpu.dimension_semantics<parallel>, #tpu.dimension_semantics<arbitrary>], iteration_bounds = array<i64: 1, 1, 1, 1>, scalar_prefetch = 0 : i64, scratch_operands = 1 : i64, tpu.core_type = #tpu.core_type<tc>, window_params = [{transform_indices = @transform_0, window_bounds = array<i64: 256, 128>}, {transform_indices = @transform_1, window_bounds = array<i64: 1, 128, 128>}, {transform_indices = @transform_2, window_bounds = array<i64: 1, 1, 128>}, {transform_indices = @transform_3, window_bounds = array<i64: 1, 1, 128>}, {transform_indices = @transform_4, window_bounds = array<i64: 256, 128>}]} {
    %c0_i32 = arith.constant 0 : i32
    %0 = arith.cmpi eq, %arg3, %c0_i32 : i32
    %1 = arith.extui %0 : i1 to i32
    %c0_i32_0 = arith.constant 0 : i32
    %2 = arith.cmpi ne, %1, %c0_i32_0 : i32
    scf.if %2 {
      %cst_11 = arith.constant 0.000000e+00 : f32
      %13 = vector.broadcast %cst_11 : f32 to vector<256x128xf32>
      %c0_12 = arith.constant 0 : index
      %c0_13 = arith.constant 0 : index
      %14 = vector.load %arg9[%c0_12, %c0_13] : memref<256x128xf32, #tpu.memory_space<vmem>>, vector<256x128xf32>
      tpu.vector_store %arg9[%c0_12, %c0_13], %13 {strides = array<i32>} : memref<256x128xf32, #tpu.memory_space<vmem>>, vector<256x128xf32>,
    } else {
    }
    %c0 = arith.constant 0 : index
    %c0_1 = arith.constant 0 : index
    %3 = vector.load %arg9[%c0, %c0_1] : memref<256x128xf32, #tpu.memory_space<vmem>>, vector<256x128xf32>
    %c0_2 = arith.constant 0 : index
    %c0_3 = arith.constant 0 : index
    %4 = vector.load %arg4[%c0_2, %c0_3] : memref<256x128xbf16, #tpu.memory_space<vmem>>, vector<256x128xbf16>
    %c0_4 = arith.constant 0 : index
    %c0_5 = arith.constant 0 : index
    %c0_6 = arith.constant 0 : index
    %5 = vector.load %arg5[%c0_4, %c0_5, %c0_6] : memref<1x128x128xbf16, #tpu.memory_space<vmem>>, vector<1x128x128xbf16>
    %6 = vector.shape_cast %5 : vector<1x128x128xbf16> to vector<128x128xbf16>
    %cst = arith.constant dense<0.000000e+00> : vector<256x128xf32>
    %7 = tpu.matmul %4, %6, %cst {dimension_numbers = #tpu.dot_dimension_numbers<[1], [0], [0], [1], [0, 0, 1, 1], [], []>} : vector<256x128xbf16>, vector<128x128xbf16>, vector<256x128xf32> -> vector<256x128xf32>
    %8 = arith.addf %3, %7 : vector<256x128xf32>
    %c0_7 = arith.constant 0 : index
    %c0_8 = arith.constant 0 : index
    %9 = vector.load %arg9[%c0_7, %c0_8] : memref<256x128xf32, #tpu.memory_space<vmem>>, vector<256x128xf32>
    tpu.vector_store %arg9[%c0_7, %c0_8], %8 {strides = array<i32>} : memref<256x128xf32, #tpu.memory_space<vmem>>, vector<256x128xf32>,
    %c0_i32_9 = arith.constant 0 : i32
    %10 = arith.cmpi eq, %arg3, %c0_i32_9 : i32
    %11 = arith.extui %10 : i1 to i32
    %c0_i32_10 = arith.constant 0 : i32
    %12 = arith.cmpi ne, %11, %c0_i32_10 : i32
    scf.if %12 {
      %c0_11 = arith.constant 0 : index
      %c0_12 = arith.constant 0 : index
      %13 = vector.load %arg9[%c0_11, %c0_12] : memref<256x128xf32, #tpu.memory_space<vmem>>, vector<256x128xf32>
      %c0_13 = arith.constant 0 : index
      %c0_14 = arith.constant 0 : index
      %c0_15 = arith.constant 0 : index
      %14 = vector.load %arg6[%c0_13, %c0_14, %c0_15] : memref<1x1x128xf32, #tpu.memory_space<vmem>>, vector<1x1x128xf32>
      %15 = vector.shape_cast %14 : vector<1x1x128xf32> to vector<1x128xf32>
      %16 = vector.broadcast %15 : vector<1x128xf32> to vector<256x128xf32>
      %17 = arith.mulf %13, %16 : vector<256x128xf32>
      %c0_16 = arith.constant 0 : index
      %c0_17 = arith.constant 0 : index
      %c0_18 = arith.constant 0 : index
      %18 = vector.load %arg7[%c0_16, %c0_17, %c0_18] : memref<1x1x128xf32, #tpu.memory_space<vmem>>, vector<1x1x128xf32>
      %19 = vector.shape_cast %18 : vector<1x1x128xf32> to vector<1x128xf32>
      %20 = vector.broadcast %19 : vector<1x128xf32> to vector<256x128xf32>
      %21 = arith.addf %17, %20 : vector<256x128xf32>
      %22 = arith.truncf %21 : vector<256x128xf32> to vector<256x128xbf16>
      %c0_19 = arith.constant 0 : index
      %c0_20 = arith.constant 0 : index
      %23 = vector.load %arg8[%c0_19, %c0_20] : memref<256x128xbf16, #tpu.memory_space<vmem>>, vector<256x128xbf16>
      tpu.vector_store %arg8[%c0_19, %c0_20], %22 {strides = array<i32>} : memref<256x128xbf16, #tpu.memory_space<vmem>>, vector<256x128xbf16>,
    } else {
    }
    return
  }
  func.func @transform_0(%arg0: i32, %arg1: i32, %arg2: i32, %arg3: i32) -> (i32, i32) {
    %c1_i32 = arith.constant 1 : i32
    %0 = arith.muli %arg1, %c1_i32 : i32
    %1 = arith.addi %0, %arg3 : i32
    %c0_i32 = arith.constant 0 : i32
    return %arg0, %1 : i32, i32
  }
  func.func @transform_1(%arg0: i32, %arg1: i32, %arg2: i32, %arg3: i32) -> (i32, i32, i32) {
    %c0_i32 = arith.constant 0 : i32
    return %arg1, %arg3, %arg2 : i32, i32, i32
  }
  func.func @transform_2(%arg0: i32, %arg1: i32, %arg2: i32, %arg3: i32) -> (i32, i32, i32) {
    %c0_i32 = arith.constant 0 : i32
    %c0_i32_0 = arith.constant 0 : i32
    return %arg1, %c0_i32, %arg2 : i32, i32, i32
  }
  func.func @transform_3(%arg0: i32, %arg1: i32, %arg2: i32, %arg3: i32) -> (i32, i32, i32) {
    %c0_i32 = arith.constant 0 : i32
    %c0_i32_0 = arith.constant 0 : i32
    return %arg1, %c0_i32, %arg2 : i32, i32, i32
  }
  func.func @transform_4(%arg0: i32, %arg1: i32, %arg2: i32, %arg3: i32) -> (i32, i32) {
    %c1_i32 = arith.constant 1 : i32
    %0 = arith.muli %arg1, %c1_i32 : i32
    %1 = arith.addi %0, %arg2 : i32
    %c0_i32 = arith.constant 0 : i32
    return %arg0, %1 : i32, i32
  }
}

module attributes {stable_mosaic.version = 11 : i64} {
  func.func @_se_kernel(%arg0: i32, %arg1: i32, %arg2: memref<1x64x16xbf16, #tpu.memory_space<vmem>>, %arg3: memref<16x4xf32, #tpu.memory_space<vmem>>, %arg4: memref<1x4xf32, #tpu.memory_space<vmem>>, %arg5: memref<4x16xf32, #tpu.memory_space<vmem>>, %arg6: memref<1x16xf32, #tpu.memory_space<vmem>>, %arg7: memref<1x1x16xf32, #tpu.memory_space<vmem>>, %arg8: memref<1x16xf32, #tpu.memory_space<vmem>>) attributes {dimension_semantics = [#tpu.dimension_semantics<parallel>, #tpu.dimension_semantics<arbitrary>], iteration_bounds = array<i64: 4, 1>, scalar_prefetch = 0 : i64, scratch_operands = 1 : i64, tpu.core_type = #tpu.core_type<tc>, window_params = [{transform_indices = @transform_0, window_bounds = array<i64: 1, 64, 16>}, {pipeline_mode = #tpu.pipeline_mode<synchronous>, transform_indices = @transform_1, window_bounds = array<i64: 16, 4>}, {pipeline_mode = #tpu.pipeline_mode<synchronous>, transform_indices = @transform_2, window_bounds = array<i64: 1, 4>}, {pipeline_mode = #tpu.pipeline_mode<synchronous>, transform_indices = @transform_3, window_bounds = array<i64: 4, 16>}, {pipeline_mode = #tpu.pipeline_mode<synchronous>, transform_indices = @transform_4, window_bounds = array<i64: 1, 16>}, {transform_indices = @transform_5, window_bounds = array<i64: 1, 1, 16>}]} {
    %c0_i32 = arith.constant 0 : i32
    %0 = arith.cmpi eq, %arg1, %c0_i32 : i32
    %1 = arith.extui %0 : i1 to i32
    %c0_i32_0 = arith.constant 0 : i32
    %2 = arith.cmpi ne, %1, %c0_i32_0 : i32
    scf.if %2 {
      %cst_9 = arith.constant 0.000000e+00 : f32
      %14 = vector.broadcast %cst_9 : f32 to vector<1x16xf32>
      %c0_10 = arith.constant 0 : index
      %c0_11 = arith.constant 0 : index
      %15 = vector.load %arg8[%c0_10, %c0_11] : memref<1x16xf32, #tpu.memory_space<vmem>>, vector<1x16xf32>
      tpu.vector_store %arg8[%c0_10, %c0_11], %14 {strides = array<i32>} : memref<1x16xf32, #tpu.memory_space<vmem>>, vector<1x16xf32>,
    } else {
    }
    %c0 = arith.constant 0 : index
    %c0_1 = arith.constant 0 : index
    %3 = vector.load %arg8[%c0, %c0_1] : memref<1x16xf32, #tpu.memory_space<vmem>>, vector<1x16xf32>
    %c0_2 = arith.constant 0 : index
    %c0_3 = arith.constant 0 : index
    %c0_4 = arith.constant 0 : index
    %4 = vector.load %arg2[%c0_2, %c0_3, %c0_4] : memref<1x64x16xbf16, #tpu.memory_space<vmem>>, vector<1x64x16xbf16>
    %5 = vector.shape_cast %4 : vector<1x64x16xbf16> to vector<64x16xbf16>
    %6 = arith.extf %5 : vector<64x16xbf16> to vector<64x16xf32>
    %cst = arith.constant dense<0.000000e+00> : vector<16xf32>
    %7 = vector.multi_reduction <add>, %6, %cst [0] : vector<64x16xf32> to vector<16xf32>
    %8 = vector.shape_cast %7 : vector<16xf32> to vector<1x16xf32>
    %9 = arith.addf %3, %8 : vector<1x16xf32>
    %c0_5 = arith.constant 0 : index
    %c0_6 = arith.constant 0 : index
    %10 = vector.load %arg8[%c0_5, %c0_6] : memref<1x16xf32, #tpu.memory_space<vmem>>, vector<1x16xf32>
    tpu.vector_store %arg8[%c0_5, %c0_6], %9 {strides = array<i32>} : memref<1x16xf32, #tpu.memory_space<vmem>>, vector<1x16xf32>,
    %c0_i32_7 = arith.constant 0 : i32
    %11 = arith.cmpi eq, %arg1, %c0_i32_7 : i32
    %12 = arith.extui %11 : i1 to i32
    %c0_i32_8 = arith.constant 0 : i32
    %13 = arith.cmpi ne, %12, %c0_i32_8 : i32
    scf.if %13 {
      %c0_9 = arith.constant 0 : index
      %c0_10 = arith.constant 0 : index
      %14 = vector.load %arg8[%c0_9, %c0_10] : memref<1x16xf32, #tpu.memory_space<vmem>>, vector<1x16xf32>
      %cst_11 = arith.constant 1.562500e-02 : f32
      %15 = vector.broadcast %cst_11 : f32 to vector<1x16xf32>
      %16 = arith.mulf %14, %15 : vector<1x16xf32>
      %c0_12 = arith.constant 0 : index
      %c0_13 = arith.constant 0 : index
      %17 = vector.load %arg3[%c0_12, %c0_13] : memref<16x4xf32, #tpu.memory_space<vmem>>, vector<16x4xf32>
      %cst_14 = arith.constant dense<0.000000e+00> : vector<1x4xf32>
      %18 = tpu.matmul %16, %17, %cst_14 {dimension_numbers = #tpu.dot_dimension_numbers<[1], [0], [0], [1], [0, 0, 1, 1], [], []>} : vector<1x16xf32>, vector<16x4xf32>, vector<1x4xf32> -> vector<1x4xf32>
      %c0_15 = arith.constant 0 : index
      %c0_16 = arith.constant 0 : index
      %19 = vector.load %arg4[%c0_15, %c0_16] : memref<1x4xf32, #tpu.memory_space<vmem>>, vector<1x4xf32>
      %20 = arith.addf %18, %19 : vector<1x4xf32>
      %cst_17 = arith.constant 0.000000e+00 : f32
      %21 = vector.broadcast %cst_17 : f32 to vector<1x4xf32>
      %22 = arith.maximumf %20, %21 : vector<1x4xf32>
      %c0_18 = arith.constant 0 : index
      %c0_19 = arith.constant 0 : index
      %23 = vector.load %arg5[%c0_18, %c0_19] : memref<4x16xf32, #tpu.memory_space<vmem>>, vector<4x16xf32>
      %cst_20 = arith.constant dense<0.000000e+00> : vector<1x16xf32>
      %24 = tpu.matmul %22, %23, %cst_20 {dimension_numbers = #tpu.dot_dimension_numbers<[1], [0], [0], [1], [0, 0, 1, 1], [], []>} : vector<1x4xf32>, vector<4x16xf32>, vector<1x16xf32> -> vector<1x16xf32>
      %c0_21 = arith.constant 0 : index
      %c0_22 = arith.constant 0 : index
      %25 = vector.load %arg6[%c0_21, %c0_22] : memref<1x16xf32, #tpu.memory_space<vmem>>, vector<1x16xf32>
      %26 = arith.addf %24, %25 : vector<1x16xf32>
      %27 = arith.negf %26 : vector<1x16xf32>
      %28 = math.exp %27 : vector<1x16xf32>
      %cst_23 = arith.constant 1.000000e+00 : f32
      %29 = vector.broadcast %cst_23 : f32 to vector<1x16xf32>
      %30 = arith.addf %29, %28 : vector<1x16xf32>
      %31 = arith.divf %29, %30 : vector<1x16xf32>
      %c0_24 = arith.constant 0 : index
      %c0_25 = arith.constant 0 : index
      %c0_26 = arith.constant 0 : index
      %32 = vector.load %arg7[%c0_24, %c0_25, %c0_26] : memref<1x1x16xf32, #tpu.memory_space<vmem>>, vector<1x1x16xf32>
      %33 = vector.shape_cast %32 : vector<1x1x16xf32> to vector<1x16xf32>
      %34 = vector.shape_cast %31 : vector<1x16xf32> to vector<1x1x16xf32>
      tpu.vector_store %arg7[%c0_24, %c0_25, %c0_26], %34 {strides = array<i32>} : memref<1x1x16xf32, #tpu.memory_space<vmem>>, vector<1x1x16xf32>,
    } else {
    }
    return
  }
  func.func @transform_0(%arg0: i32, %arg1: i32) -> (i32, i32, i32) {
    %c0_i32 = arith.constant 0 : i32
    %c0_i32_0 = arith.constant 0 : i32
    return %arg0, %arg1, %c0_i32 : i32, i32, i32
  }
  func.func @transform_1(%arg0: i32, %arg1: i32) -> (i32, i32) {
    %c0_i32 = arith.constant 0 : i32
    %c0_i32_0 = arith.constant 0 : i32
    %c0_i32_1 = arith.constant 0 : i32
    return %c0_i32, %c0_i32_0 : i32, i32
  }
  func.func @transform_2(%arg0: i32, %arg1: i32) -> (i32, i32) {
    %c0_i32 = arith.constant 0 : i32
    %c0_i32_0 = arith.constant 0 : i32
    %c0_i32_1 = arith.constant 0 : i32
    return %c0_i32, %c0_i32_0 : i32, i32
  }
  func.func @transform_3(%arg0: i32, %arg1: i32) -> (i32, i32) {
    %c0_i32 = arith.constant 0 : i32
    %c0_i32_0 = arith.constant 0 : i32
    %c0_i32_1 = arith.constant 0 : i32
    return %c0_i32, %c0_i32_0 : i32, i32
  }
  func.func @transform_4(%arg0: i32, %arg1: i32) -> (i32, i32) {
    %c0_i32 = arith.constant 0 : i32
    %c0_i32_0 = arith.constant 0 : i32
    %c0_i32_1 = arith.constant 0 : i32
    return %c0_i32, %c0_i32_0 : i32, i32
  }
  func.func @transform_5(%arg0: i32, %arg1: i32) -> (i32, i32, i32) {
    %c0_i32 = arith.constant 0 : i32
    %c0_i32_0 = arith.constant 0 : i32
    %c0_i32_1 = arith.constant 0 : i32
    return %arg0, %c0_i32, %c0_i32_0 : i32, i32, i32
  }
}

module attributes {stable_mosaic.version = 11 : i64} {
  func.func @_se_res_relu_kernel(%arg0: i32, %arg1: i32, %arg2: memref<1x64x16xbf16, #tpu.memory_space<vmem>>, %arg3: memref<1x1x16xf32, #tpu.memory_space<vmem>>, %arg4: memref<1x64x16xbf16, #tpu.memory_space<vmem>>, %arg5: memref<1x64x16xbf16, #tpu.memory_space<vmem>>) attributes {dimension_semantics = [#tpu.dimension_semantics<parallel>, #tpu.dimension_semantics<parallel>], iteration_bounds = array<i64: 4, 1>, scalar_prefetch = 0 : i64, scratch_operands = 0 : i64, tpu.core_type = #tpu.core_type<tc>, window_params = [{transform_indices = @transform_0, window_bounds = array<i64: 1, 64, 16>}, {transform_indices = @transform_1, window_bounds = array<i64: 1, 1, 16>}, {transform_indices = @transform_2, window_bounds = array<i64: 1, 64, 16>}, {transform_indices = @transform_3, window_bounds = array<i64: 1, 64, 16>}]} {
    %c0 = arith.constant 0 : index
    %c0_0 = arith.constant 0 : index
    %c0_1 = arith.constant 0 : index
    %0 = vector.load %arg2[%c0, %c0_0, %c0_1] : memref<1x64x16xbf16, #tpu.memory_space<vmem>>, vector<1x64x16xbf16>
    %1 = arith.extf %0 : vector<1x64x16xbf16> to vector<1x64x16xf32>
    %c0_2 = arith.constant 0 : index
    %c0_3 = arith.constant 0 : index
    %c0_4 = arith.constant 0 : index
    %2 = vector.load %arg3[%c0_2, %c0_3, %c0_4] : memref<1x1x16xf32, #tpu.memory_space<vmem>>, vector<1x1x16xf32>
    %3 = vector.broadcast %2 : vector<1x1x16xf32> to vector<1x64x16xf32>
    %4 = arith.mulf %1, %3 : vector<1x64x16xf32>
    %c0_5 = arith.constant 0 : index
    %c0_6 = arith.constant 0 : index
    %c0_7 = arith.constant 0 : index
    %5 = vector.load %arg4[%c0_5, %c0_6, %c0_7] : memref<1x64x16xbf16, #tpu.memory_space<vmem>>, vector<1x64x16xbf16>
    %6 = arith.extf %5 : vector<1x64x16xbf16> to vector<1x64x16xf32>
    %7 = arith.addf %4, %6 : vector<1x64x16xf32>
    %cst = arith.constant 0.000000e+00 : f32
    %8 = vector.broadcast %cst : f32 to vector<1x64x16xf32>
    %9 = arith.maximumf %7, %8 : vector<1x64x16xf32>
    %10 = arith.truncf %9 : vector<1x64x16xf32> to vector<1x64x16xbf16>
    %c0_8 = arith.constant 0 : index
    %c0_9 = arith.constant 0 : index
    %c0_10 = arith.constant 0 : index
    %11 = vector.load %arg5[%c0_8, %c0_9, %c0_10] : memref<1x64x16xbf16, #tpu.memory_space<vmem>>, vector<1x64x16xbf16>
    tpu.vector_store %arg5[%c0_8, %c0_9, %c0_10], %10 {strides = array<i32>} : memref<1x64x16xbf16, #tpu.memory_space<vmem>>, vector<1x64x16xbf16>,
    return
  }
  func.func @transform_0(%arg0: i32, %arg1: i32) -> (i32, i32, i32) {
    %c0_i32 = arith.constant 0 : i32
    %c0_i32_0 = arith.constant 0 : i32
    return %arg0, %arg1, %c0_i32 : i32, i32, i32
  }
  func.func @transform_1(%arg0: i32, %arg1: i32) -> (i32, i32, i32) {
    %c0_i32 = arith.constant 0 : i32
    %c0_i32_0 = arith.constant 0 : i32
    %c0_i32_1 = arith.constant 0 : i32
    return %arg0, %c0_i32, %c0_i32_0 : i32, i32, i32
  }
  func.func @transform_2(%arg0: i32, %arg1: i32) -> (i32, i32, i32) {
    %c0_i32 = arith.constant 0 : i32
    %c0_i32_0 = arith.constant 0 : i32
    return %arg0, %arg1, %c0_i32 : i32, i32, i32
  }
  func.func @transform_3(%arg0: i32, %arg1: i32) -> (i32, i32, i32) {
    %c0_i32 = arith.constant 0 : i32
    %c0_i32_0 = arith.constant 0 : i32
    return %arg0, %arg1, %c0_i32 : i32, i32, i32
  }
}

module attributes {stable_mosaic.version = 11 : i64} {
  func.func @_gmm_kernel(%arg0: i32, %arg1: i32, %arg2: i32, %arg3: i32, %arg4: memref<64x128xbf16, #tpu.memory_space<vmem>>, %arg5: memref<1x128x128xbf16, #tpu.memory_space<vmem>>, %arg6: memref<1x1x128xf32, #tpu.memory_space<vmem>>, %arg7: memref<1x1x128xf32, #tpu.memory_space<vmem>>, %arg8: memref<64x128xbf16, #tpu.memory_space<vmem>>, %arg9: memref<64x128xf32, #tpu.memory_space<vmem>>) attributes {dimension_semantics = [#tpu.dimension_semantics<parallel>, #tpu.dimension_semantics<parallel>, #tpu.dimension_semantics<parallel>, #tpu.dimension_semantics<arbitrary>], iteration_bounds = array<i64: 1, 1, 1, 1>, scalar_prefetch = 0 : i64, scratch_operands = 1 : i64, tpu.core_type = #tpu.core_type<tc>, window_params = [{transform_indices = @transform_0, window_bounds = array<i64: 64, 128>}, {transform_indices = @transform_1, window_bounds = array<i64: 1, 128, 128>}, {transform_indices = @transform_2, window_bounds = array<i64: 1, 1, 128>}, {transform_indices = @transform_3, window_bounds = array<i64: 1, 1, 128>}, {transform_indices = @transform_4, window_bounds = array<i64: 64, 128>}]} {
    %c0_i32 = arith.constant 0 : i32
    %0 = arith.cmpi eq, %arg3, %c0_i32 : i32
    %1 = arith.extui %0 : i1 to i32
    %c0_i32_0 = arith.constant 0 : i32
    %2 = arith.cmpi ne, %1, %c0_i32_0 : i32
    scf.if %2 {
      %cst_11 = arith.constant 0.000000e+00 : f32
      %13 = vector.broadcast %cst_11 : f32 to vector<64x128xf32>
      %c0_12 = arith.constant 0 : index
      %c0_13 = arith.constant 0 : index
      %14 = vector.load %arg9[%c0_12, %c0_13] : memref<64x128xf32, #tpu.memory_space<vmem>>, vector<64x128xf32>
      tpu.vector_store %arg9[%c0_12, %c0_13], %13 {strides = array<i32>} : memref<64x128xf32, #tpu.memory_space<vmem>>, vector<64x128xf32>,
    } else {
    }
    %c0 = arith.constant 0 : index
    %c0_1 = arith.constant 0 : index
    %3 = vector.load %arg9[%c0, %c0_1] : memref<64x128xf32, #tpu.memory_space<vmem>>, vector<64x128xf32>
    %c0_2 = arith.constant 0 : index
    %c0_3 = arith.constant 0 : index
    %4 = vector.load %arg4[%c0_2, %c0_3] : memref<64x128xbf16, #tpu.memory_space<vmem>>, vector<64x128xbf16>
    %c0_4 = arith.constant 0 : index
    %c0_5 = arith.constant 0 : index
    %c0_6 = arith.constant 0 : index
    %5 = vector.load %arg5[%c0_4, %c0_5, %c0_6] : memref<1x128x128xbf16, #tpu.memory_space<vmem>>, vector<1x128x128xbf16>
    %6 = vector.shape_cast %5 : vector<1x128x128xbf16> to vector<128x128xbf16>
    %cst = arith.constant dense<0.000000e+00> : vector<64x128xf32>
    %7 = tpu.matmul %4, %6, %cst {dimension_numbers = #tpu.dot_dimension_numbers<[1], [0], [0], [1], [0, 0, 1, 1], [], []>} : vector<64x128xbf16>, vector<128x128xbf16>, vector<64x128xf32> -> vector<64x128xf32>
    %8 = arith.addf %3, %7 : vector<64x128xf32>
    %c0_7 = arith.constant 0 : index
    %c0_8 = arith.constant 0 : index
    %9 = vector.load %arg9[%c0_7, %c0_8] : memref<64x128xf32, #tpu.memory_space<vmem>>, vector<64x128xf32>
    tpu.vector_store %arg9[%c0_7, %c0_8], %8 {strides = array<i32>} : memref<64x128xf32, #tpu.memory_space<vmem>>, vector<64x128xf32>,
    %c0_i32_9 = arith.constant 0 : i32
    %10 = arith.cmpi eq, %arg3, %c0_i32_9 : i32
    %11 = arith.extui %10 : i1 to i32
    %c0_i32_10 = arith.constant 0 : i32
    %12 = arith.cmpi ne, %11, %c0_i32_10 : i32
    scf.if %12 {
      %c0_11 = arith.constant 0 : index
      %c0_12 = arith.constant 0 : index
      %13 = vector.load %arg9[%c0_11, %c0_12] : memref<64x128xf32, #tpu.memory_space<vmem>>, vector<64x128xf32>
      %c0_13 = arith.constant 0 : index
      %c0_14 = arith.constant 0 : index
      %c0_15 = arith.constant 0 : index
      %14 = vector.load %arg6[%c0_13, %c0_14, %c0_15] : memref<1x1x128xf32, #tpu.memory_space<vmem>>, vector<1x1x128xf32>
      %15 = vector.shape_cast %14 : vector<1x1x128xf32> to vector<1x128xf32>
      %16 = vector.broadcast %15 : vector<1x128xf32> to vector<64x128xf32>
      %17 = arith.mulf %13, %16 : vector<64x128xf32>
      %c0_16 = arith.constant 0 : index
      %c0_17 = arith.constant 0 : index
      %c0_18 = arith.constant 0 : index
      %18 = vector.load %arg7[%c0_16, %c0_17, %c0_18] : memref<1x1x128xf32, #tpu.memory_space<vmem>>, vector<1x1x128xf32>
      %19 = vector.shape_cast %18 : vector<1x1x128xf32> to vector<1x128xf32>
      %20 = vector.broadcast %19 : vector<1x128xf32> to vector<64x128xf32>
      %21 = arith.addf %17, %20 : vector<64x128xf32>
      %cst_19 = arith.constant 0.000000e+00 : f32
      %22 = vector.broadcast %cst_19 : f32 to vector<64x128xf32>
      %23 = arith.maximumf %21, %22 : vector<64x128xf32>
      %24 = arith.truncf %23 : vector<64x128xf32> to vector<64x128xbf16>
      %c0_20 = arith.constant 0 : index
      %c0_21 = arith.constant 0 : index
      %25 = vector.load %arg8[%c0_20, %c0_21] : memref<64x128xbf16, #tpu.memory_space<vmem>>, vector<64x128xbf16>
      tpu.vector_store %arg8[%c0_20, %c0_21], %24 {strides = array<i32>} : memref<64x128xbf16, #tpu.memory_space<vmem>>, vector<64x128xbf16>,
    } else {
    }
    return
  }
  func.func @transform_0(%arg0: i32, %arg1: i32, %arg2: i32, %arg3: i32) -> (i32, i32) {
    %c1_i32 = arith.constant 1 : i32
    %0 = arith.muli %arg1, %c1_i32 : i32
    %1 = arith.addi %0, %arg3 : i32
    %c0_i32 = arith.constant 0 : i32
    return %arg0, %1 : i32, i32
  }
  func.func @transform_1(%arg0: i32, %arg1: i32, %arg2: i32, %arg3: i32) -> (i32, i32, i32) {
    %c0_i32 = arith.constant 0 : i32
    return %arg1, %arg3, %arg2 : i32, i32, i32
  }
  func.func @transform_2(%arg0: i32, %arg1: i32, %arg2: i32, %arg3: i32) -> (i32, i32, i32) {
    %c0_i32 = arith.constant 0 : i32
    %c0_i32_0 = arith.constant 0 : i32
    return %arg1, %c0_i32, %arg2 : i32, i32, i32
  }
  func.func @transform_3(%arg0: i32, %arg1: i32, %arg2: i32, %arg3: i32) -> (i32, i32, i32) {
    %c0_i32 = arith.constant 0 : i32
    %c0_i32_0 = arith.constant 0 : i32
    return %arg1, %c0_i32, %arg2 : i32, i32, i32
  }
  func.func @transform_4(%arg0: i32, %arg1: i32, %arg2: i32, %arg3: i32) -> (i32, i32) {
    %c1_i32 = arith.constant 1 : i32
    %0 = arith.muli %arg1, %c1_i32 : i32
    %1 = arith.addi %0, %arg2 : i32
    %c0_i32 = arith.constant 0 : i32
    return %arg0, %1 : i32, i32
  }
}

module attributes {stable_mosaic.version = 11 : i64} {
  func.func @_gmm_kernel(%arg0: i32, %arg1: i32, %arg2: i32, %arg3: i32, %arg4: memref<64x128xbf16, #tpu.memory_space<vmem>>, %arg5: memref<1x128x128xbf16, #tpu.memory_space<vmem>>, %arg6: memref<1x1x128xf32, #tpu.memory_space<vmem>>, %arg7: memref<1x1x128xf32, #tpu.memory_space<vmem>>, %arg8: memref<64x128xbf16, #tpu.memory_space<vmem>>, %arg9: memref<64x128xf32, #tpu.memory_space<vmem>>) attributes {dimension_semantics = [#tpu.dimension_semantics<parallel>, #tpu.dimension_semantics<parallel>, #tpu.dimension_semantics<parallel>, #tpu.dimension_semantics<arbitrary>], iteration_bounds = array<i64: 1, 1, 1, 1>, scalar_prefetch = 0 : i64, scratch_operands = 1 : i64, tpu.core_type = #tpu.core_type<tc>, window_params = [{transform_indices = @transform_0, window_bounds = array<i64: 64, 128>}, {transform_indices = @transform_1, window_bounds = array<i64: 1, 128, 128>}, {transform_indices = @transform_2, window_bounds = array<i64: 1, 1, 128>}, {transform_indices = @transform_3, window_bounds = array<i64: 1, 1, 128>}, {transform_indices = @transform_4, window_bounds = array<i64: 64, 128>}]} {
    %c0_i32 = arith.constant 0 : i32
    %0 = arith.cmpi eq, %arg3, %c0_i32 : i32
    %1 = arith.extui %0 : i1 to i32
    %c0_i32_0 = arith.constant 0 : i32
    %2 = arith.cmpi ne, %1, %c0_i32_0 : i32
    scf.if %2 {
      %cst_11 = arith.constant 0.000000e+00 : f32
      %13 = vector.broadcast %cst_11 : f32 to vector<64x128xf32>
      %c0_12 = arith.constant 0 : index
      %c0_13 = arith.constant 0 : index
      %14 = vector.load %arg9[%c0_12, %c0_13] : memref<64x128xf32, #tpu.memory_space<vmem>>, vector<64x128xf32>
      tpu.vector_store %arg9[%c0_12, %c0_13], %13 {strides = array<i32>} : memref<64x128xf32, #tpu.memory_space<vmem>>, vector<64x128xf32>,
    } else {
    }
    %c0 = arith.constant 0 : index
    %c0_1 = arith.constant 0 : index
    %3 = vector.load %arg9[%c0, %c0_1] : memref<64x128xf32, #tpu.memory_space<vmem>>, vector<64x128xf32>
    %c0_2 = arith.constant 0 : index
    %c0_3 = arith.constant 0 : index
    %4 = vector.load %arg4[%c0_2, %c0_3] : memref<64x128xbf16, #tpu.memory_space<vmem>>, vector<64x128xbf16>
    %c0_4 = arith.constant 0 : index
    %c0_5 = arith.constant 0 : index
    %c0_6 = arith.constant 0 : index
    %5 = vector.load %arg5[%c0_4, %c0_5, %c0_6] : memref<1x128x128xbf16, #tpu.memory_space<vmem>>, vector<1x128x128xbf16>
    %6 = vector.shape_cast %5 : vector<1x128x128xbf16> to vector<128x128xbf16>
    %cst = arith.constant dense<0.000000e+00> : vector<64x128xf32>
    %7 = tpu.matmul %4, %6, %cst {dimension_numbers = #tpu.dot_dimension_numbers<[1], [0], [0], [1], [0, 0, 1, 1], [], []>} : vector<64x128xbf16>, vector<128x128xbf16>, vector<64x128xf32> -> vector<64x128xf32>
    %8 = arith.addf %3, %7 : vector<64x128xf32>
    %c0_7 = arith.constant 0 : index
    %c0_8 = arith.constant 0 : index
    %9 = vector.load %arg9[%c0_7, %c0_8] : memref<64x128xf32, #tpu.memory_space<vmem>>, vector<64x128xf32>
    tpu.vector_store %arg9[%c0_7, %c0_8], %8 {strides = array<i32>} : memref<64x128xf32, #tpu.memory_space<vmem>>, vector<64x128xf32>,
    %c0_i32_9 = arith.constant 0 : i32
    %10 = arith.cmpi eq, %arg3, %c0_i32_9 : i32
    %11 = arith.extui %10 : i1 to i32
    %c0_i32_10 = arith.constant 0 : i32
    %12 = arith.cmpi ne, %11, %c0_i32_10 : i32
    scf.if %12 {
      %c0_11 = arith.constant 0 : index
      %c0_12 = arith.constant 0 : index
      %13 = vector.load %arg9[%c0_11, %c0_12] : memref<64x128xf32, #tpu.memory_space<vmem>>, vector<64x128xf32>
      %c0_13 = arith.constant 0 : index
      %c0_14 = arith.constant 0 : index
      %c0_15 = arith.constant 0 : index
      %14 = vector.load %arg6[%c0_13, %c0_14, %c0_15] : memref<1x1x128xf32, #tpu.memory_space<vmem>>, vector<1x1x128xf32>
      %15 = vector.shape_cast %14 : vector<1x1x128xf32> to vector<1x128xf32>
      %16 = vector.broadcast %15 : vector<1x128xf32> to vector<64x128xf32>
      %17 = arith.mulf %13, %16 : vector<64x128xf32>
      %c0_16 = arith.constant 0 : index
      %c0_17 = arith.constant 0 : index
      %c0_18 = arith.constant 0 : index
      %18 = vector.load %arg7[%c0_16, %c0_17, %c0_18] : memref<1x1x128xf32, #tpu.memory_space<vmem>>, vector<1x1x128xf32>
      %19 = vector.shape_cast %18 : vector<1x1x128xf32> to vector<1x128xf32>
      %20 = vector.broadcast %19 : vector<1x128xf32> to vector<64x128xf32>
      %21 = arith.addf %17, %20 : vector<64x128xf32>
      %22 = arith.truncf %21 : vector<64x128xf32> to vector<64x128xbf16>
      %c0_19 = arith.constant 0 : index
      %c0_20 = arith.constant 0 : index
      %23 = vector.load %arg8[%c0_19, %c0_20] : memref<64x128xbf16, #tpu.memory_space<vmem>>, vector<64x128xbf16>
      tpu.vector_store %arg8[%c0_19, %c0_20], %22 {strides = array<i32>} : memref<64x128xbf16, #tpu.memory_space<vmem>>, vector<64x128xbf16>,
    } else {
    }
    return
  }
  func.func @transform_0(%arg0: i32, %arg1: i32, %arg2: i32, %arg3: i32) -> (i32, i32) {
    %c1_i32 = arith.constant 1 : i32
    %0 = arith.muli %arg1, %c1_i32 : i32
    %1 = arith.addi %0, %arg3 : i32
    %c0_i32 = arith.constant 0 : i32
    return %arg0, %1 : i32, i32
  }
  func.func @transform_1(%arg0: i32, %arg1: i32, %arg2: i32, %arg3: i32) -> (i32, i32, i32) {
    %c0_i32 = arith.constant 0 : i32
    return %arg1, %arg3, %arg2 : i32, i32, i32
  }
  func.func @transform_2(%arg0: i32, %arg1: i32, %arg2: i32, %arg3: i32) -> (i32, i32, i32) {
    %c0_i32 = arith.constant 0 : i32
    %c0_i32_0 = arith.constant 0 : i32
    return %arg1, %c0_i32, %arg2 : i32, i32, i32
  }
  func.func @transform_3(%arg0: i32, %arg1: i32, %arg2: i32, %arg3: i32) -> (i32, i32, i32) {
    %c0_i32 = arith.constant 0 : i32
    %c0_i32_0 = arith.constant 0 : i32
    return %arg1, %c0_i32, %arg2 : i32, i32, i32
  }
  func.func @transform_4(%arg0: i32, %arg1: i32, %arg2: i32, %arg3: i32) -> (i32, i32) {
    %c1_i32 = arith.constant 1 : i32
    %0 = arith.muli %arg1, %c1_i32 : i32
    %1 = arith.addi %0, %arg2 : i32
    %c0_i32 = arith.constant 0 : i32
    return %arg0, %1 : i32, i32
  }
}

module attributes {stable_mosaic.version = 11 : i64} {
  func.func @_se_kernel(%arg0: i32, %arg1: i32, %arg2: memref<1x16x32xbf16, #tpu.memory_space<vmem>>, %arg3: memref<32x8xf32, #tpu.memory_space<vmem>>, %arg4: memref<1x8xf32, #tpu.memory_space<vmem>>, %arg5: memref<8x32xf32, #tpu.memory_space<vmem>>, %arg6: memref<1x32xf32, #tpu.memory_space<vmem>>, %arg7: memref<1x1x32xf32, #tpu.memory_space<vmem>>, %arg8: memref<1x32xf32, #tpu.memory_space<vmem>>) attributes {dimension_semantics = [#tpu.dimension_semantics<parallel>, #tpu.dimension_semantics<arbitrary>], iteration_bounds = array<i64: 4, 1>, scalar_prefetch = 0 : i64, scratch_operands = 1 : i64, tpu.core_type = #tpu.core_type<tc>, window_params = [{transform_indices = @transform_0, window_bounds = array<i64: 1, 16, 32>}, {pipeline_mode = #tpu.pipeline_mode<synchronous>, transform_indices = @transform_1, window_bounds = array<i64: 32, 8>}, {pipeline_mode = #tpu.pipeline_mode<synchronous>, transform_indices = @transform_2, window_bounds = array<i64: 1, 8>}, {pipeline_mode = #tpu.pipeline_mode<synchronous>, transform_indices = @transform_3, window_bounds = array<i64: 8, 32>}, {pipeline_mode = #tpu.pipeline_mode<synchronous>, transform_indices = @transform_4, window_bounds = array<i64: 1, 32>}, {transform_indices = @transform_5, window_bounds = array<i64: 1, 1, 32>}]} {
    %c0_i32 = arith.constant 0 : i32
    %0 = arith.cmpi eq, %arg1, %c0_i32 : i32
    %1 = arith.extui %0 : i1 to i32
    %c0_i32_0 = arith.constant 0 : i32
    %2 = arith.cmpi ne, %1, %c0_i32_0 : i32
    scf.if %2 {
      %cst_9 = arith.constant 0.000000e+00 : f32
      %14 = vector.broadcast %cst_9 : f32 to vector<1x32xf32>
      %c0_10 = arith.constant 0 : index
      %c0_11 = arith.constant 0 : index
      %15 = vector.load %arg8[%c0_10, %c0_11] : memref<1x32xf32, #tpu.memory_space<vmem>>, vector<1x32xf32>
      tpu.vector_store %arg8[%c0_10, %c0_11], %14 {strides = array<i32>} : memref<1x32xf32, #tpu.memory_space<vmem>>, vector<1x32xf32>,
    } else {
    }
    %c0 = arith.constant 0 : index
    %c0_1 = arith.constant 0 : index
    %3 = vector.load %arg8[%c0, %c0_1] : memref<1x32xf32, #tpu.memory_space<vmem>>, vector<1x32xf32>
    %c0_2 = arith.constant 0 : index
    %c0_3 = arith.constant 0 : index
    %c0_4 = arith.constant 0 : index
    %4 = vector.load %arg2[%c0_2, %c0_3, %c0_4] : memref<1x16x32xbf16, #tpu.memory_space<vmem>>, vector<1x16x32xbf16>
    %5 = vector.shape_cast %4 : vector<1x16x32xbf16> to vector<16x32xbf16>
    %6 = arith.extf %5 : vector<16x32xbf16> to vector<16x32xf32>
    %cst = arith.constant dense<0.000000e+00> : vector<32xf32>
    %7 = vector.multi_reduction <add>, %6, %cst [0] : vector<16x32xf32> to vector<32xf32>
    %8 = vector.shape_cast %7 : vector<32xf32> to vector<1x32xf32>
    %9 = arith.addf %3, %8 : vector<1x32xf32>
    %c0_5 = arith.constant 0 : index
    %c0_6 = arith.constant 0 : index
    %10 = vector.load %arg8[%c0_5, %c0_6] : memref<1x32xf32, #tpu.memory_space<vmem>>, vector<1x32xf32>
    tpu.vector_store %arg8[%c0_5, %c0_6], %9 {strides = array<i32>} : memref<1x32xf32, #tpu.memory_space<vmem>>, vector<1x32xf32>,
    %c0_i32_7 = arith.constant 0 : i32
    %11 = arith.cmpi eq, %arg1, %c0_i32_7 : i32
    %12 = arith.extui %11 : i1 to i32
    %c0_i32_8 = arith.constant 0 : i32
    %13 = arith.cmpi ne, %12, %c0_i32_8 : i32
    scf.if %13 {
      %c0_9 = arith.constant 0 : index
      %c0_10 = arith.constant 0 : index
      %14 = vector.load %arg8[%c0_9, %c0_10] : memref<1x32xf32, #tpu.memory_space<vmem>>, vector<1x32xf32>
      %cst_11 = arith.constant 6.250000e-02 : f32
      %15 = vector.broadcast %cst_11 : f32 to vector<1x32xf32>
      %16 = arith.mulf %14, %15 : vector<1x32xf32>
      %c0_12 = arith.constant 0 : index
      %c0_13 = arith.constant 0 : index
      %17 = vector.load %arg3[%c0_12, %c0_13] : memref<32x8xf32, #tpu.memory_space<vmem>>, vector<32x8xf32>
      %cst_14 = arith.constant dense<0.000000e+00> : vector<1x8xf32>
      %18 = tpu.matmul %16, %17, %cst_14 {dimension_numbers = #tpu.dot_dimension_numbers<[1], [0], [0], [1], [0, 0, 1, 1], [], []>} : vector<1x32xf32>, vector<32x8xf32>, vector<1x8xf32> -> vector<1x8xf32>
      %c0_15 = arith.constant 0 : index
      %c0_16 = arith.constant 0 : index
      %19 = vector.load %arg4[%c0_15, %c0_16] : memref<1x8xf32, #tpu.memory_space<vmem>>, vector<1x8xf32>
      %20 = arith.addf %18, %19 : vector<1x8xf32>
      %cst_17 = arith.constant 0.000000e+00 : f32
      %21 = vector.broadcast %cst_17 : f32 to vector<1x8xf32>
      %22 = arith.maximumf %20, %21 : vector<1x8xf32>
      %c0_18 = arith.constant 0 : index
      %c0_19 = arith.constant 0 : index
      %23 = vector.load %arg5[%c0_18, %c0_19] : memref<8x32xf32, #tpu.memory_space<vmem>>, vector<8x32xf32>
      %cst_20 = arith.constant dense<0.000000e+00> : vector<1x32xf32>
      %24 = tpu.matmul %22, %23, %cst_20 {dimension_numbers = #tpu.dot_dimension_numbers<[1], [0], [0], [1], [0, 0, 1, 1], [], []>} : vector<1x8xf32>, vector<8x32xf32>, vector<1x32xf32> -> vector<1x32xf32>
      %c0_21 = arith.constant 0 : index
      %c0_22 = arith.constant 0 : index
      %25 = vector.load %arg6[%c0_21, %c0_22] : memref<1x32xf32, #tpu.memory_space<vmem>>, vector<1x32xf32>
      %26 = arith.addf %24, %25 : vector<1x32xf32>
      %27 = arith.negf %26 : vector<1x32xf32>
      %28 = math.exp %27 : vector<1x32xf32>
      %cst_23 = arith.constant 1.000000e+00 : f32
      %29 = vector.broadcast %cst_23 : f32 to vector<1x32xf32>
      %30 = arith.addf %29, %28 : vector<1x32xf32>
      %31 = arith.divf %29, %30 : vector<1x32xf32>
      %c0_24 = arith.constant 0 : index
      %c0_25 = arith.constant 0 : index
      %c0_26 = arith.constant 0 : index
      %32 = vector.load %arg7[%c0_24, %c0_25, %c0_26] : memref<1x1x32xf32, #tpu.memory_space<vmem>>, vector<1x1x32xf32>
      %33 = vector.shape_cast %32 : vector<1x1x32xf32> to vector<1x32xf32>
      %34 = vector.shape_cast %31 : vector<1x32xf32> to vector<1x1x32xf32>
      tpu.vector_store %arg7[%c0_24, %c0_25, %c0_26], %34 {strides = array<i32>} : memref<1x1x32xf32, #tpu.memory_space<vmem>>, vector<1x1x32xf32>,
    } else {
    }
    return
  }
  func.func @transform_0(%arg0: i32, %arg1: i32) -> (i32, i32, i32) {
    %c0_i32 = arith.constant 0 : i32
    %c0_i32_0 = arith.constant 0 : i32
    return %arg0, %arg1, %c0_i32 : i32, i32, i32
  }
  func.func @transform_1(%arg0: i32, %arg1: i32) -> (i32, i32) {
    %c0_i32 = arith.constant 0 : i32
    %c0_i32_0 = arith.constant 0 : i32
    %c0_i32_1 = arith.constant 0 : i32
    return %c0_i32, %c0_i32_0 : i32, i32
  }
  func.func @transform_2(%arg0: i32, %arg1: i32) -> (i32, i32) {
    %c0_i32 = arith.constant 0 : i32
    %c0_i32_0 = arith.constant 0 : i32
    %c0_i32_1 = arith.constant 0 : i32
    return %c0_i32, %c0_i32_0 : i32, i32
  }
  func.func @transform_3(%arg0: i32, %arg1: i32) -> (i32, i32) {
    %c0_i32 = arith.constant 0 : i32
    %c0_i32_0 = arith.constant 0 : i32
    %c0_i32_1 = arith.constant 0 : i32
    return %c0_i32, %c0_i32_0 : i32, i32
  }
  func.func @transform_4(%arg0: i32, %arg1: i32) -> (i32, i32) {
    %c0_i32 = arith.constant 0 : i32
    %c0_i32_0 = arith.constant 0 : i32
    %c0_i32_1 = arith.constant 0 : i32
    return %c0_i32, %c0_i32_0 : i32, i32
  }
  func.func @transform_5(%arg0: i32, %arg1: i32) -> (i32, i32, i32) {
    %c0_i32 = arith.constant 0 : i32
    %c0_i32_0 = arith.constant 0 : i32
    %c0_i32_1 = arith.constant 0 : i32
    return %arg0, %c0_i32, %c0_i32_0 : i32, i32, i32
  }
}

module attributes {stable_mosaic.version = 11 : i64} {
  func.func @_se_res_relu_kernel(%arg0: i32, %arg1: i32, %arg2: memref<1x16x32xbf16, #tpu.memory_space<vmem>>, %arg3: memref<1x1x32xf32, #tpu.memory_space<vmem>>, %arg4: memref<1x16x32xbf16, #tpu.memory_space<vmem>>, %arg5: memref<1x16x32xbf16, #tpu.memory_space<vmem>>) attributes {dimension_semantics = [#tpu.dimension_semantics<parallel>, #tpu.dimension_semantics<parallel>], iteration_bounds = array<i64: 4, 1>, scalar_prefetch = 0 : i64, scratch_operands = 0 : i64, tpu.core_type = #tpu.core_type<tc>, window_params = [{transform_indices = @transform_0, window_bounds = array<i64: 1, 16, 32>}, {transform_indices = @transform_1, window_bounds = array<i64: 1, 1, 32>}, {transform_indices = @transform_2, window_bounds = array<i64: 1, 16, 32>}, {transform_indices = @transform_3, window_bounds = array<i64: 1, 16, 32>}]} {
    %c0 = arith.constant 0 : index
    %c0_0 = arith.constant 0 : index
    %c0_1 = arith.constant 0 : index
    %0 = vector.load %arg2[%c0, %c0_0, %c0_1] : memref<1x16x32xbf16, #tpu.memory_space<vmem>>, vector<1x16x32xbf16>
    %1 = arith.extf %0 : vector<1x16x32xbf16> to vector<1x16x32xf32>
    %c0_2 = arith.constant 0 : index
    %c0_3 = arith.constant 0 : index
    %c0_4 = arith.constant 0 : index
    %2 = vector.load %arg3[%c0_2, %c0_3, %c0_4] : memref<1x1x32xf32, #tpu.memory_space<vmem>>, vector<1x1x32xf32>
    %3 = vector.broadcast %2 : vector<1x1x32xf32> to vector<1x16x32xf32>
    %4 = arith.mulf %1, %3 : vector<1x16x32xf32>
    %c0_5 = arith.constant 0 : index
    %c0_6 = arith.constant 0 : index
    %c0_7 = arith.constant 0 : index
    %5 = vector.load %arg4[%c0_5, %c0_6, %c0_7] : memref<1x16x32xbf16, #tpu.memory_space<vmem>>, vector<1x16x32xbf16>
    %6 = arith.extf %5 : vector<1x16x32xbf16> to vector<1x16x32xf32>
    %7 = arith.addf %4, %6 : vector<1x16x32xf32>
    %cst = arith.constant 0.000000e+00 : f32
    %8 = vector.broadcast %cst : f32 to vector<1x16x32xf32>
    %9 = arith.maximumf %7, %8 : vector<1x16x32xf32>
    %10 = arith.truncf %9 : vector<1x16x32xf32> to vector<1x16x32xbf16>
    %c0_8 = arith.constant 0 : index
    %c0_9 = arith.constant 0 : index
    %c0_10 = arith.constant 0 : index
    %11 = vector.load %arg5[%c0_8, %c0_9, %c0_10] : memref<1x16x32xbf16, #tpu.memory_space<vmem>>, vector<1x16x32xbf16>
    tpu.vector_store %arg5[%c0_8, %c0_9, %c0_10], %10 {strides = array<i32>} : memref<1x16x32xbf16, #tpu.memory_space<vmem>>, vector<1x16x32xbf16>,
    return
  }
  func.func @transform_0(%arg0: i32, %arg1: i32) -> (i32, i32, i32) {
    %c0_i32 = arith.constant 0 : i32
    %c0_i32_0 = arith.constant 0 : i32
    return %arg0, %arg1, %c0_i32 : i32, i32, i32
  }
  func.func @transform_1(%arg0: i32, %arg1: i32) -> (i32, i32, i32) {
    %c0_i32 = arith.constant 0 : i32
    %c0_i32_0 = arith.constant 0 : i32
    %c0_i32_1 = arith.constant 0 : i32
    return %arg0, %c0_i32, %c0_i32_0 : i32, i32, i32
  }
  func.func @transform_2(%arg0: i32, %arg1: i32) -> (i32, i32, i32) {
    %c0_i32 = arith.constant 0 : i32
    %c0_i32_0 = arith.constant 0 : i32
    return %arg0, %arg1, %c0_i32 : i32, i32, i32
  }
  func.func @transform_3(%arg0: i32, %arg1: i32) -> (i32, i32, i32) {
    %c0_i32 = arith.constant 0 : i32
    %c0_i32_0 = arith.constant 0 : i32
    return %arg0, %arg1, %c0_i32 : i32, i32, i32
  }
}

module attributes {stable_mosaic.version = 11 : i64} {
  func.func @_gmm_kernel(%arg0: i32, %arg1: i32, %arg2: i32, %arg3: i32, %arg4: memref<16x256xbf16, #tpu.memory_space<vmem>>, %arg5: memref<1x256x128xbf16, #tpu.memory_space<vmem>>, %arg6: memref<1x1x128xf32, #tpu.memory_space<vmem>>, %arg7: memref<1x1x128xf32, #tpu.memory_space<vmem>>, %arg8: memref<16x128xbf16, #tpu.memory_space<vmem>>, %arg9: memref<16x128xf32, #tpu.memory_space<vmem>>) attributes {dimension_semantics = [#tpu.dimension_semantics<parallel>, #tpu.dimension_semantics<parallel>, #tpu.dimension_semantics<parallel>, #tpu.dimension_semantics<arbitrary>], iteration_bounds = array<i64: 1, 1, 1, 1>, scalar_prefetch = 0 : i64, scratch_operands = 1 : i64, tpu.core_type = #tpu.core_type<tc>, window_params = [{transform_indices = @transform_0, window_bounds = array<i64: 16, 256>}, {transform_indices = @transform_1, window_bounds = array<i64: 1, 256, 128>}, {transform_indices = @transform_2, window_bounds = array<i64: 1, 1, 128>}, {transform_indices = @transform_3, window_bounds = array<i64: 1, 1, 128>}, {transform_indices = @transform_4, window_bounds = array<i64: 16, 128>}]} {
    %c0_i32 = arith.constant 0 : i32
    %0 = arith.cmpi eq, %arg3, %c0_i32 : i32
    %1 = arith.extui %0 : i1 to i32
    %c0_i32_0 = arith.constant 0 : i32
    %2 = arith.cmpi ne, %1, %c0_i32_0 : i32
    scf.if %2 {
      %cst_11 = arith.constant 0.000000e+00 : f32
      %13 = vector.broadcast %cst_11 : f32 to vector<16x128xf32>
      %c0_12 = arith.constant 0 : index
      %c0_13 = arith.constant 0 : index
      %14 = vector.load %arg9[%c0_12, %c0_13] : memref<16x128xf32, #tpu.memory_space<vmem>>, vector<16x128xf32>
      tpu.vector_store %arg9[%c0_12, %c0_13], %13 {strides = array<i32>} : memref<16x128xf32, #tpu.memory_space<vmem>>, vector<16x128xf32>,
    } else {
    }
    %c0 = arith.constant 0 : index
    %c0_1 = arith.constant 0 : index
    %3 = vector.load %arg9[%c0, %c0_1] : memref<16x128xf32, #tpu.memory_space<vmem>>, vector<16x128xf32>
    %c0_2 = arith.constant 0 : index
    %c0_3 = arith.constant 0 : index
    %4 = vector.load %arg4[%c0_2, %c0_3] : memref<16x256xbf16, #tpu.memory_space<vmem>>, vector<16x256xbf16>
    %c0_4 = arith.constant 0 : index
    %c0_5 = arith.constant 0 : index
    %c0_6 = arith.constant 0 : index
    %5 = vector.load %arg5[%c0_4, %c0_5, %c0_6] : memref<1x256x128xbf16, #tpu.memory_space<vmem>>, vector<1x256x128xbf16>
    %6 = vector.shape_cast %5 : vector<1x256x128xbf16> to vector<256x128xbf16>
    %cst = arith.constant dense<0.000000e+00> : vector<16x128xf32>
    %7 = tpu.matmul %4, %6, %cst {dimension_numbers = #tpu.dot_dimension_numbers<[1], [0], [0], [1], [0, 0, 1, 1], [], []>} : vector<16x256xbf16>, vector<256x128xbf16>, vector<16x128xf32> -> vector<16x128xf32>
    %8 = arith.addf %3, %7 : vector<16x128xf32>
    %c0_7 = arith.constant 0 : index
    %c0_8 = arith.constant 0 : index
    %9 = vector.load %arg9[%c0_7, %c0_8] : memref<16x128xf32, #tpu.memory_space<vmem>>, vector<16x128xf32>
    tpu.vector_store %arg9[%c0_7, %c0_8], %8 {strides = array<i32>} : memref<16x128xf32, #tpu.memory_space<vmem>>, vector<16x128xf32>,
    %c0_i32_9 = arith.constant 0 : i32
    %10 = arith.cmpi eq, %arg3, %c0_i32_9 : i32
    %11 = arith.extui %10 : i1 to i32
    %c0_i32_10 = arith.constant 0 : i32
    %12 = arith.cmpi ne, %11, %c0_i32_10 : i32
    scf.if %12 {
      %c0_11 = arith.constant 0 : index
      %c0_12 = arith.constant 0 : index
      %13 = vector.load %arg9[%c0_11, %c0_12] : memref<16x128xf32, #tpu.memory_space<vmem>>, vector<16x128xf32>
      %c0_13 = arith.constant 0 : index
      %c0_14 = arith.constant 0 : index
      %c0_15 = arith.constant 0 : index
      %14 = vector.load %arg6[%c0_13, %c0_14, %c0_15] : memref<1x1x128xf32, #tpu.memory_space<vmem>>, vector<1x1x128xf32>
      %15 = vector.shape_cast %14 : vector<1x1x128xf32> to vector<1x128xf32>
      %16 = vector.broadcast %15 : vector<1x128xf32> to vector<16x128xf32>
      %17 = arith.mulf %13, %16 : vector<16x128xf32>
      %c0_16 = arith.constant 0 : index
      %c0_17 = arith.constant 0 : index
      %c0_18 = arith.constant 0 : index
      %18 = vector.load %arg7[%c0_16, %c0_17, %c0_18] : memref<1x1x128xf32, #tpu.memory_space<vmem>>, vector<1x1x128xf32>
      %19 = vector.shape_cast %18 : vector<1x1x128xf32> to vector<1x128xf32>
      %20 = vector.broadcast %19 : vector<1x128xf32> to vector<16x128xf32>
      %21 = arith.addf %17, %20 : vector<16x128xf32>
      %cst_19 = arith.constant 0.000000e+00 : f32
      %22 = vector.broadcast %cst_19 : f32 to vector<16x128xf32>
      %23 = arith.maximumf %21, %22 : vector<16x128xf32>
      %24 = arith.truncf %23 : vector<16x128xf32> to vector<16x128xbf16>
      %c0_20 = arith.constant 0 : index
      %c0_21 = arith.constant 0 : index
      %25 = vector.load %arg8[%c0_20, %c0_21] : memref<16x128xbf16, #tpu.memory_space<vmem>>, vector<16x128xbf16>
      tpu.vector_store %arg8[%c0_20, %c0_21], %24 {strides = array<i32>} : memref<16x128xbf16, #tpu.memory_space<vmem>>, vector<16x128xbf16>,
    } else {
    }
    return
  }
  func.func @transform_0(%arg0: i32, %arg1: i32, %arg2: i32, %arg3: i32) -> (i32, i32) {
    %c1_i32 = arith.constant 1 : i32
    %0 = arith.muli %arg1, %c1_i32 : i32
    %1 = arith.addi %0, %arg3 : i32
    %c0_i32 = arith.constant 0 : i32
    return %arg0, %1 : i32, i32
  }
  func.func @transform_1(%arg0: i32, %arg1: i32, %arg2: i32, %arg3: i32) -> (i32, i32, i32) {
    %c0_i32 = arith.constant 0 : i32
    return %arg1, %arg3, %arg2 : i32, i32, i32
  }
  func.func @transform_2(%arg0: i32, %arg1: i32, %arg2: i32, %arg3: i32) -> (i32, i32, i32) {
    %c0_i32 = arith.constant 0 : i32
    %c0_i32_0 = arith.constant 0 : i32
    return %arg1, %c0_i32, %arg2 : i32, i32, i32
  }
  func.func @transform_3(%arg0: i32, %arg1: i32, %arg2: i32, %arg3: i32) -> (i32, i32, i32) {
    %c0_i32 = arith.constant 0 : i32
    %c0_i32_0 = arith.constant 0 : i32
    return %arg1, %c0_i32, %arg2 : i32, i32, i32
  }
  func.func @transform_4(%arg0: i32, %arg1: i32, %arg2: i32, %arg3: i32) -> (i32, i32) {
    %c1_i32 = arith.constant 1 : i32
    %0 = arith.muli %arg1, %c1_i32 : i32
    %1 = arith.addi %0, %arg2 : i32
    %c0_i32 = arith.constant 0 : i32
    return %arg0, %1 : i32, i32
  }
}

module attributes {stable_mosaic.version = 11 : i64} {
  func.func @_gmm_kernel(%arg0: i32, %arg1: i32, %arg2: i32, %arg3: i32, %arg4: memref<16x128xbf16, #tpu.memory_space<vmem>>, %arg5: memref<1x128x128xbf16, #tpu.memory_space<vmem>>, %arg6: memref<1x1x128xf32, #tpu.memory_space<vmem>>, %arg7: memref<1x1x128xf32, #tpu.memory_space<vmem>>, %arg8: memref<16x128xbf16, #tpu.memory_space<vmem>>, %arg9: memref<16x128xf32, #tpu.memory_space<vmem>>) attributes {dimension_semantics = [#tpu.dimension_semantics<parallel>, #tpu.dimension_semantics<parallel>, #tpu.dimension_semantics<parallel>, #tpu.dimension_semantics<arbitrary>], iteration_bounds = array<i64: 1, 1, 1, 1>, scalar_prefetch = 0 : i64, scratch_operands = 1 : i64, tpu.core_type = #tpu.core_type<tc>, window_params = [{transform_indices = @transform_0, window_bounds = array<i64: 16, 128>}, {transform_indices = @transform_1, window_bounds = array<i64: 1, 128, 128>}, {transform_indices = @transform_2, window_bounds = array<i64: 1, 1, 128>}, {transform_indices = @transform_3, window_bounds = array<i64: 1, 1, 128>}, {transform_indices = @transform_4, window_bounds = array<i64: 16, 128>}]} {
    %c0_i32 = arith.constant 0 : i32
    %0 = arith.cmpi eq, %arg3, %c0_i32 : i32
    %1 = arith.extui %0 : i1 to i32
    %c0_i32_0 = arith.constant 0 : i32
    %2 = arith.cmpi ne, %1, %c0_i32_0 : i32
    scf.if %2 {
      %cst_11 = arith.constant 0.000000e+00 : f32
      %13 = vector.broadcast %cst_11 : f32 to vector<16x128xf32>
      %c0_12 = arith.constant 0 : index
      %c0_13 = arith.constant 0 : index
      %14 = vector.load %arg9[%c0_12, %c0_13] : memref<16x128xf32, #tpu.memory_space<vmem>>, vector<16x128xf32>
      tpu.vector_store %arg9[%c0_12, %c0_13], %13 {strides = array<i32>} : memref<16x128xf32, #tpu.memory_space<vmem>>, vector<16x128xf32>,
    } else {
    }
    %c0 = arith.constant 0 : index
    %c0_1 = arith.constant 0 : index
    %3 = vector.load %arg9[%c0, %c0_1] : memref<16x128xf32, #tpu.memory_space<vmem>>, vector<16x128xf32>
    %c0_2 = arith.constant 0 : index
    %c0_3 = arith.constant 0 : index
    %4 = vector.load %arg4[%c0_2, %c0_3] : memref<16x128xbf16, #tpu.memory_space<vmem>>, vector<16x128xbf16>
    %c0_4 = arith.constant 0 : index
    %c0_5 = arith.constant 0 : index
    %c0_6 = arith.constant 0 : index
    %5 = vector.load %arg5[%c0_4, %c0_5, %c0_6] : memref<1x128x128xbf16, #tpu.memory_space<vmem>>, vector<1x128x128xbf16>
    %6 = vector.shape_cast %5 : vector<1x128x128xbf16> to vector<128x128xbf16>
    %cst = arith.constant dense<0.000000e+00> : vector<16x128xf32>
    %7 = tpu.matmul %4, %6, %cst {dimension_numbers = #tpu.dot_dimension_numbers<[1], [0], [0], [1], [0, 0, 1, 1], [], []>} : vector<16x128xbf16>, vector<128x128xbf16>, vector<16x128xf32> -> vector<16x128xf32>
    %8 = arith.addf %3, %7 : vector<16x128xf32>
    %c0_7 = arith.constant 0 : index
    %c0_8 = arith.constant 0 : index
    %9 = vector.load %arg9[%c0_7, %c0_8] : memref<16x128xf32, #tpu.memory_space<vmem>>, vector<16x128xf32>
    tpu.vector_store %arg9[%c0_7, %c0_8], %8 {strides = array<i32>} : memref<16x128xf32, #tpu.memory_space<vmem>>, vector<16x128xf32>,
    %c0_i32_9 = arith.constant 0 : i32
    %10 = arith.cmpi eq, %arg3, %c0_i32_9 : i32
    %11 = arith.extui %10 : i1 to i32
    %c0_i32_10 = arith.constant 0 : i32
    %12 = arith.cmpi ne, %11, %c0_i32_10 : i32
    scf.if %12 {
      %c0_11 = arith.constant 0 : index
      %c0_12 = arith.constant 0 : index
      %13 = vector.load %arg9[%c0_11, %c0_12] : memref<16x128xf32, #tpu.memory_space<vmem>>, vector<16x128xf32>
      %c0_13 = arith.constant 0 : index
      %c0_14 = arith.constant 0 : index
      %c0_15 = arith.constant 0 : index
      %14 = vector.load %arg6[%c0_13, %c0_14, %c0_15] : memref<1x1x128xf32, #tpu.memory_space<vmem>>, vector<1x1x128xf32>
      %15 = vector.shape_cast %14 : vector<1x1x128xf32> to vector<1x128xf32>
      %16 = vector.broadcast %15 : vector<1x128xf32> to vector<16x128xf32>
      %17 = arith.mulf %13, %16 : vector<16x128xf32>
      %c0_16 = arith.constant 0 : index
      %c0_17 = arith.constant 0 : index
      %c0_18 = arith.constant 0 : index
      %18 = vector.load %arg7[%c0_16, %c0_17, %c0_18] : memref<1x1x128xf32, #tpu.memory_space<vmem>>, vector<1x1x128xf32>
      %19 = vector.shape_cast %18 : vector<1x1x128xf32> to vector<1x128xf32>
      %20 = vector.broadcast %19 : vector<1x128xf32> to vector<16x128xf32>
      %21 = arith.addf %17, %20 : vector<16x128xf32>
      %22 = arith.truncf %21 : vector<16x128xf32> to vector<16x128xbf16>
      %c0_19 = arith.constant 0 : index
      %c0_20 = arith.constant 0 : index
      %23 = vector.load %arg8[%c0_19, %c0_20] : memref<16x128xbf16, #tpu.memory_space<vmem>>, vector<16x128xbf16>
      tpu.vector_store %arg8[%c0_19, %c0_20], %22 {strides = array<i32>} : memref<16x128xbf16, #tpu.memory_space<vmem>>, vector<16x128xbf16>,
    } else {
    }
    return
  }
  func.func @transform_0(%arg0: i32, %arg1: i32, %arg2: i32, %arg3: i32) -> (i32, i32) {
    %c1_i32 = arith.constant 1 : i32
    %0 = arith.muli %arg1, %c1_i32 : i32
    %1 = arith.addi %0, %arg3 : i32
    %c0_i32 = arith.constant 0 : i32
    return %arg0, %1 : i32, i32
  }
  func.func @transform_1(%arg0: i32, %arg1: i32, %arg2: i32, %arg3: i32) -> (i32, i32, i32) {
    %c0_i32 = arith.constant 0 : i32
    return %arg1, %arg3, %arg2 : i32, i32, i32
  }
  func.func @transform_2(%arg0: i32, %arg1: i32, %arg2: i32, %arg3: i32) -> (i32, i32, i32) {
    %c0_i32 = arith.constant 0 : i32
    %c0_i32_0 = arith.constant 0 : i32
    return %arg1, %c0_i32, %arg2 : i32, i32, i32
  }
  func.func @transform_3(%arg0: i32, %arg1: i32, %arg2: i32, %arg3: i32) -> (i32, i32, i32) {
    %c0_i32 = arith.constant 0 : i32
    %c0_i32_0 = arith.constant 0 : i32
    return %arg1, %c0_i32, %arg2 : i32, i32, i32
  }
  func.func @transform_4(%arg0: i32, %arg1: i32, %arg2: i32, %arg3: i32) -> (i32, i32) {
    %c1_i32 = arith.constant 1 : i32
    %0 = arith.muli %arg1, %c1_i32 : i32
    %1 = arith.addi %0, %arg2 : i32
    %c0_i32 = arith.constant 0 : i32
    return %arg0, %1 : i32, i32
  }
}

module attributes {stable_mosaic.version = 11 : i64} {
  func.func @_se_kernel(%arg0: i32, %arg1: i32, %arg2: memref<1x8x64xbf16, #tpu.memory_space<vmem>>, %arg3: memref<64x16xf32, #tpu.memory_space<vmem>>, %arg4: memref<1x16xf32, #tpu.memory_space<vmem>>, %arg5: memref<16x64xf32, #tpu.memory_space<vmem>>, %arg6: memref<1x64xf32, #tpu.memory_space<vmem>>, %arg7: memref<1x1x64xf32, #tpu.memory_space<vmem>>, %arg8: memref<1x64xf32, #tpu.memory_space<vmem>>) attributes {dimension_semantics = [#tpu.dimension_semantics<parallel>, #tpu.dimension_semantics<arbitrary>], iteration_bounds = array<i64: 4, 1>, scalar_prefetch = 0 : i64, scratch_operands = 1 : i64, tpu.core_type = #tpu.core_type<tc>, window_params = [{transform_indices = @transform_0, window_bounds = array<i64: 1, 8, 64>}, {pipeline_mode = #tpu.pipeline_mode<synchronous>, transform_indices = @transform_1, window_bounds = array<i64: 64, 16>}, {pipeline_mode = #tpu.pipeline_mode<synchronous>, transform_indices = @transform_2, window_bounds = array<i64: 1, 16>}, {pipeline_mode = #tpu.pipeline_mode<synchronous>, transform_indices = @transform_3, window_bounds = array<i64: 16, 64>}, {pipeline_mode = #tpu.pipeline_mode<synchronous>, transform_indices = @transform_4, window_bounds = array<i64: 1, 64>}, {transform_indices = @transform_5, window_bounds = array<i64: 1, 1, 64>}]} {
    %c0_i32 = arith.constant 0 : i32
    %0 = arith.cmpi eq, %arg1, %c0_i32 : i32
    %1 = arith.extui %0 : i1 to i32
    %c0_i32_0 = arith.constant 0 : i32
    %2 = arith.cmpi ne, %1, %c0_i32_0 : i32
    scf.if %2 {
      %cst_9 = arith.constant 0.000000e+00 : f32
      %14 = vector.broadcast %cst_9 : f32 to vector<1x64xf32>
      %c0_10 = arith.constant 0 : index
      %c0_11 = arith.constant 0 : index
      %15 = vector.load %arg8[%c0_10, %c0_11] : memref<1x64xf32, #tpu.memory_space<vmem>>, vector<1x64xf32>
      tpu.vector_store %arg8[%c0_10, %c0_11], %14 {strides = array<i32>} : memref<1x64xf32, #tpu.memory_space<vmem>>, vector<1x64xf32>,
    } else {
    }
    %c0 = arith.constant 0 : index
    %c0_1 = arith.constant 0 : index
    %3 = vector.load %arg8[%c0, %c0_1] : memref<1x64xf32, #tpu.memory_space<vmem>>, vector<1x64xf32>
    %c0_2 = arith.constant 0 : index
    %c0_3 = arith.constant 0 : index
    %c0_4 = arith.constant 0 : index
    %4 = vector.load %arg2[%c0_2, %c0_3, %c0_4] : memref<1x8x64xbf16, #tpu.memory_space<vmem>>, vector<1x8x64xbf16>
    %5 = vector.shape_cast %4 : vector<1x8x64xbf16> to vector<8x64xbf16>
    %6 = arith.extf %5 : vector<8x64xbf16> to vector<8x64xf32>
    %cst = arith.constant dense<0.000000e+00> : vector<64xf32>
    %7 = vector.multi_reduction <add>, %6, %cst [0] : vector<8x64xf32> to vector<64xf32>
    %8 = vector.shape_cast %7 : vector<64xf32> to vector<1x64xf32>
    %9 = arith.addf %3, %8 : vector<1x64xf32>
    %c0_5 = arith.constant 0 : index
    %c0_6 = arith.constant 0 : index
    %10 = vector.load %arg8[%c0_5, %c0_6] : memref<1x64xf32, #tpu.memory_space<vmem>>, vector<1x64xf32>
    tpu.vector_store %arg8[%c0_5, %c0_6], %9 {strides = array<i32>} : memref<1x64xf32, #tpu.memory_space<vmem>>, vector<1x64xf32>,
    %c0_i32_7 = arith.constant 0 : i32
    %11 = arith.cmpi eq, %arg1, %c0_i32_7 : i32
    %12 = arith.extui %11 : i1 to i32
    %c0_i32_8 = arith.constant 0 : i32
    %13 = arith.cmpi ne, %12, %c0_i32_8 : i32
    scf.if %13 {
      %c0_9 = arith.constant 0 : index
      %c0_10 = arith.constant 0 : index
      %14 = vector.load %arg8[%c0_9, %c0_10] : memref<1x64xf32, #tpu.memory_space<vmem>>, vector<1x64xf32>
      %cst_11 = arith.constant 2.500000e-01 : f32
      %15 = vector.broadcast %cst_11 : f32 to vector<1x64xf32>
      %16 = arith.mulf %14, %15 : vector<1x64xf32>
      %c0_12 = arith.constant 0 : index
      %c0_13 = arith.constant 0 : index
      %17 = vector.load %arg3[%c0_12, %c0_13] : memref<64x16xf32, #tpu.memory_space<vmem>>, vector<64x16xf32>
      %cst_14 = arith.constant dense<0.000000e+00> : vector<1x16xf32>
      %18 = tpu.matmul %16, %17, %cst_14 {dimension_numbers = #tpu.dot_dimension_numbers<[1], [0], [0], [1], [0, 0, 1, 1], [], []>} : vector<1x64xf32>, vector<64x16xf32>, vector<1x16xf32> -> vector<1x16xf32>
      %c0_15 = arith.constant 0 : index
      %c0_16 = arith.constant 0 : index
      %19 = vector.load %arg4[%c0_15, %c0_16] : memref<1x16xf32, #tpu.memory_space<vmem>>, vector<1x16xf32>
      %20 = arith.addf %18, %19 : vector<1x16xf32>
      %cst_17 = arith.constant 0.000000e+00 : f32
      %21 = vector.broadcast %cst_17 : f32 to vector<1x16xf32>
      %22 = arith.maximumf %20, %21 : vector<1x16xf32>
      %c0_18 = arith.constant 0 : index
      %c0_19 = arith.constant 0 : index
      %23 = vector.load %arg5[%c0_18, %c0_19] : memref<16x64xf32, #tpu.memory_space<vmem>>, vector<16x64xf32>
      %cst_20 = arith.constant dense<0.000000e+00> : vector<1x64xf32>
      %24 = tpu.matmul %22, %23, %cst_20 {dimension_numbers = #tpu.dot_dimension_numbers<[1], [0], [0], [1], [0, 0, 1, 1], [], []>} : vector<1x16xf32>, vector<16x64xf32>, vector<1x64xf32> -> vector<1x64xf32>
      %c0_21 = arith.constant 0 : index
      %c0_22 = arith.constant 0 : index
      %25 = vector.load %arg6[%c0_21, %c0_22] : memref<1x64xf32, #tpu.memory_space<vmem>>, vector<1x64xf32>
      %26 = arith.addf %24, %25 : vector<1x64xf32>
      %27 = arith.negf %26 : vector<1x64xf32>
      %28 = math.exp %27 : vector<1x64xf32>
      %cst_23 = arith.constant 1.000000e+00 : f32
      %29 = vector.broadcast %cst_23 : f32 to vector<1x64xf32>
      %30 = arith.addf %29, %28 : vector<1x64xf32>
      %31 = arith.divf %29, %30 : vector<1x64xf32>
      %c0_24 = arith.constant 0 : index
      %c0_25 = arith.constant 0 : index
      %c0_26 = arith.constant 0 : index
      %32 = vector.load %arg7[%c0_24, %c0_25, %c0_26] : memref<1x1x64xf32, #tpu.memory_space<vmem>>, vector<1x1x64xf32>
      %33 = vector.shape_cast %32 : vector<1x1x64xf32> to vector<1x64xf32>
      %34 = vector.shape_cast %31 : vector<1x64xf32> to vector<1x1x64xf32>
      tpu.vector_store %arg7[%c0_24, %c0_25, %c0_26], %34 {strides = array<i32>} : memref<1x1x64xf32, #tpu.memory_space<vmem>>, vector<1x1x64xf32>,
    } else {
    }
    return
  }
  func.func @transform_0(%arg0: i32, %arg1: i32) -> (i32, i32, i32) {
    %c0_i32 = arith.constant 0 : i32
    %c0_i32_0 = arith.constant 0 : i32
    return %arg0, %arg1, %c0_i32 : i32, i32, i32
  }
  func.func @transform_1(%arg0: i32, %arg1: i32) -> (i32, i32) {
    %c0_i32 = arith.constant 0 : i32
    %c0_i32_0 = arith.constant 0 : i32
    %c0_i32_1 = arith.constant 0 : i32
    return %c0_i32, %c0_i32_0 : i32, i32
  }
  func.func @transform_2(%arg0: i32, %arg1: i32) -> (i32, i32) {
    %c0_i32 = arith.constant 0 : i32
    %c0_i32_0 = arith.constant 0 : i32
    %c0_i32_1 = arith.constant 0 : i32
    return %c0_i32, %c0_i32_0 : i32, i32
  }
  func.func @transform_3(%arg0: i32, %arg1: i32) -> (i32, i32) {
    %c0_i32 = arith.constant 0 : i32
    %c0_i32_0 = arith.constant 0 : i32
    %c0_i32_1 = arith.constant 0 : i32
    return %c0_i32, %c0_i32_0 : i32, i32
  }
  func.func @transform_4(%arg0: i32, %arg1: i32) -> (i32, i32) {
    %c0_i32 = arith.constant 0 : i32
    %c0_i32_0 = arith.constant 0 : i32
    %c0_i32_1 = arith.constant 0 : i32
    return %c0_i32, %c0_i32_0 : i32, i32
  }
  func.func @transform_5(%arg0: i32, %arg1: i32) -> (i32, i32, i32) {
    %c0_i32 = arith.constant 0 : i32
    %c0_i32_0 = arith.constant 0 : i32
    %c0_i32_1 = arith.constant 0 : i32
    return %arg0, %c0_i32, %c0_i32_0 : i32, i32, i32
  }
}

module attributes {stable_mosaic.version = 11 : i64} {
  func.func @_se_res_relu_kernel(%arg0: i32, %arg1: i32, %arg2: memref<1x8x64xbf16, #tpu.memory_space<vmem>>, %arg3: memref<1x1x64xf32, #tpu.memory_space<vmem>>, %arg4: memref<1x8x64xbf16, #tpu.memory_space<vmem>>, %arg5: memref<1x8x64xbf16, #tpu.memory_space<vmem>>) attributes {dimension_semantics = [#tpu.dimension_semantics<parallel>, #tpu.dimension_semantics<parallel>], iteration_bounds = array<i64: 4, 1>, scalar_prefetch = 0 : i64, scratch_operands = 0 : i64, tpu.core_type = #tpu.core_type<tc>, window_params = [{transform_indices = @transform_0, window_bounds = array<i64: 1, 8, 64>}, {transform_indices = @transform_1, window_bounds = array<i64: 1, 1, 64>}, {transform_indices = @transform_2, window_bounds = array<i64: 1, 8, 64>}, {transform_indices = @transform_3, window_bounds = array<i64: 1, 8, 64>}]} {
    %c0 = arith.constant 0 : index
    %c0_0 = arith.constant 0 : index
    %c0_1 = arith.constant 0 : index
    %0 = vector.load %arg2[%c0, %c0_0, %c0_1] : memref<1x8x64xbf16, #tpu.memory_space<vmem>>, vector<1x8x64xbf16>
    %1 = arith.extf %0 : vector<1x8x64xbf16> to vector<1x8x64xf32>
    %c0_2 = arith.constant 0 : index
    %c0_3 = arith.constant 0 : index
    %c0_4 = arith.constant 0 : index
    %2 = vector.load %arg3[%c0_2, %c0_3, %c0_4] : memref<1x1x64xf32, #tpu.memory_space<vmem>>, vector<1x1x64xf32>
    %3 = vector.broadcast %2 : vector<1x1x64xf32> to vector<1x8x64xf32>
    %4 = arith.mulf %1, %3 : vector<1x8x64xf32>
    %c0_5 = arith.constant 0 : index
    %c0_6 = arith.constant 0 : index
    %c0_7 = arith.constant 0 : index
    %5 = vector.load %arg4[%c0_5, %c0_6, %c0_7] : memref<1x8x64xbf16, #tpu.memory_space<vmem>>, vector<1x8x64xbf16>
    %6 = arith.extf %5 : vector<1x8x64xbf16> to vector<1x8x64xf32>
    %7 = arith.addf %4, %6 : vector<1x8x64xf32>
    %cst = arith.constant 0.000000e+00 : f32
    %8 = vector.broadcast %cst : f32 to vector<1x8x64xf32>
    %9 = arith.maximumf %7, %8 : vector<1x8x64xf32>
    %10 = arith.truncf %9 : vector<1x8x64xf32> to vector<1x8x64xbf16>
    %c0_8 = arith.constant 0 : index
    %c0_9 = arith.constant 0 : index
    %c0_10 = arith.constant 0 : index
    %11 = vector.load %arg5[%c0_8, %c0_9, %c0_10] : memref<1x8x64xbf16, #tpu.memory_space<vmem>>, vector<1x8x64xbf16>
    tpu.vector_store %arg5[%c0_8, %c0_9, %c0_10], %10 {strides = array<i32>} : memref<1x8x64xbf16, #tpu.memory_space<vmem>>, vector<1x8x64xbf16>,
    return
  }
  func.func @transform_0(%arg0: i32, %arg1: i32) -> (i32, i32, i32) {
    %c0_i32 = arith.constant 0 : i32
    %c0_i32_0 = arith.constant 0 : i32
    return %arg0, %arg1, %c0_i32 : i32, i32, i32
  }
  func.func @transform_1(%arg0: i32, %arg1: i32) -> (i32, i32, i32) {
    %c0_i32 = arith.constant 0 : i32
    %c0_i32_0 = arith.constant 0 : i32
    %c0_i32_1 = arith.constant 0 : i32
    return %arg0, %c0_i32, %c0_i32_0 : i32, i32, i32
  }
  func.func @transform_2(%arg0: i32, %arg1: i32) -> (i32, i32, i32) {
    %c0_i32 = arith.constant 0 : i32
    %c0_i32_0 = arith.constant 0 : i32
    return %arg0, %arg1, %c0_i32 : i32, i32, i32
  }
  func.func @transform_3(%arg0: i32, %arg1: i32) -> (i32, i32, i32) {
    %c0_i32 = arith.constant 0 : i32
    %c0_i32_0 = arith.constant 0 : i32
    return %arg0, %arg1, %c0_i32 : i32, i32, i32
  }
}

module attributes {stable_mosaic.version = 11 : i64} {
  func.func @_gmm_kernel(%arg0: i32, %arg1: i32, %arg2: i32, %arg3: i32, %arg4: memref<16x128xbf16, #tpu.memory_space<vmem>>, %arg5: memref<1x128x128xbf16, #tpu.memory_space<vmem>>, %arg6: memref<1x1x128xf32, #tpu.memory_space<vmem>>, %arg7: memref<1x1x128xf32, #tpu.memory_space<vmem>>, %arg8: memref<16x128xbf16, #tpu.memory_space<vmem>>, %arg9: memref<16x128xf32, #tpu.memory_space<vmem>>) attributes {dimension_semantics = [#tpu.dimension_semantics<parallel>, #tpu.dimension_semantics<parallel>, #tpu.dimension_semantics<parallel>, #tpu.dimension_semantics<arbitrary>], iteration_bounds = array<i64: 1, 1, 1, 1>, scalar_prefetch = 0 : i64, scratch_operands = 1 : i64, tpu.core_type = #tpu.core_type<tc>, window_params = [{transform_indices = @transform_0, window_bounds = array<i64: 16, 128>}, {transform_indices = @transform_1, window_bounds = array<i64: 1, 128, 128>}, {transform_indices = @transform_2, window_bounds = array<i64: 1, 1, 128>}, {transform_indices = @transform_3, window_bounds = array<i64: 1, 1, 128>}, {transform_indices = @transform_4, window_bounds = array<i64: 16, 128>}]} {
    %c0_i32 = arith.constant 0 : i32
    %0 = arith.cmpi eq, %arg3, %c0_i32 : i32
    %1 = arith.extui %0 : i1 to i32
    %c0_i32_0 = arith.constant 0 : i32
    %2 = arith.cmpi ne, %1, %c0_i32_0 : i32
    scf.if %2 {
      %cst_11 = arith.constant 0.000000e+00 : f32
      %13 = vector.broadcast %cst_11 : f32 to vector<16x128xf32>
      %c0_12 = arith.constant 0 : index
      %c0_13 = arith.constant 0 : index
      %14 = vector.load %arg9[%c0_12, %c0_13] : memref<16x128xf32, #tpu.memory_space<vmem>>, vector<16x128xf32>
      tpu.vector_store %arg9[%c0_12, %c0_13], %13 {strides = array<i32>} : memref<16x128xf32, #tpu.memory_space<vmem>>, vector<16x128xf32>,
    } else {
    }
    %c0 = arith.constant 0 : index
    %c0_1 = arith.constant 0 : index
    %3 = vector.load %arg9[%c0, %c0_1] : memref<16x128xf32, #tpu.memory_space<vmem>>, vector<16x128xf32>
    %c0_2 = arith.constant 0 : index
    %c0_3 = arith.constant 0 : index
    %4 = vector.load %arg4[%c0_2, %c0_3] : memref<16x128xbf16, #tpu.memory_space<vmem>>, vector<16x128xbf16>
    %c0_4 = arith.constant 0 : index
    %c0_5 = arith.constant 0 : index
    %c0_6 = arith.constant 0 : index
    %5 = vector.load %arg5[%c0_4, %c0_5, %c0_6] : memref<1x128x128xbf16, #tpu.memory_space<vmem>>, vector<1x128x128xbf16>
    %6 = vector.shape_cast %5 : vector<1x128x128xbf16> to vector<128x128xbf16>
    %cst = arith.constant dense<0.000000e+00> : vector<16x128xf32>
    %7 = tpu.matmul %4, %6, %cst {dimension_numbers = #tpu.dot_dimension_numbers<[1], [0], [0], [1], [0, 0, 1, 1], [], []>} : vector<16x128xbf16>, vector<128x128xbf16>, vector<16x128xf32> -> vector<16x128xf32>
    %8 = arith.addf %3, %7 : vector<16x128xf32>
    %c0_7 = arith.constant 0 : index
    %c0_8 = arith.constant 0 : index
    %9 = vector.load %arg9[%c0_7, %c0_8] : memref<16x128xf32, #tpu.memory_space<vmem>>, vector<16x128xf32>
    tpu.vector_store %arg9[%c0_7, %c0_8], %8 {strides = array<i32>} : memref<16x128xf32, #tpu.memory_space<vmem>>, vector<16x128xf32>,
    %c0_i32_9 = arith.constant 0 : i32
    %10 = arith.cmpi eq, %arg3, %c0_i32_9 : i32
    %11 = arith.extui %10 : i1 to i32
    %c0_i32_10 = arith.constant 0 : i32
    %12 = arith.cmpi ne, %11, %c0_i32_10 : i32
    scf.if %12 {
      %c0_11 = arith.constant 0 : index
      %c0_12 = arith.constant 0 : index
      %13 = vector.load %arg9[%c0_11, %c0_12] : memref<16x128xf32, #tpu.memory_space<vmem>>, vector<16x128xf32>
      %c0_13 = arith.constant 0 : index
      %c0_14 = arith.constant 0 : index
      %c0_15 = arith.constant 0 : index
      %14 = vector.load %arg6[%c0_13, %c0_14, %c0_15] : memref<1x1x128xf32, #tpu.memory_space<vmem>>, vector<1x1x128xf32>
      %15 = vector.shape_cast %14 : vector<1x1x128xf32> to vector<1x128xf32>
      %16 = vector.broadcast %15 : vector<1x128xf32> to vector<16x128xf32>
      %17 = arith.mulf %13, %16 : vector<16x128xf32>
      %c0_16 = arith.constant 0 : index
      %c0_17 = arith.constant 0 : index
      %c0_18 = arith.constant 0 : index
      %18 = vector.load %arg7[%c0_16, %c0_17, %c0_18] : memref<1x1x128xf32, #tpu.memory_space<vmem>>, vector<1x1x128xf32>
      %19 = vector.shape_cast %18 : vector<1x1x128xf32> to vector<1x128xf32>
      %20 = vector.broadcast %19 : vector<1x128xf32> to vector<16x128xf32>
      %21 = arith.addf %17, %20 : vector<16x128xf32>
      %cst_19 = arith.constant 0.000000e+00 : f32
      %22 = vector.broadcast %cst_19 : f32 to vector<16x128xf32>
      %23 = arith.maximumf %21, %22 : vector<16x128xf32>
      %24 = arith.truncf %23 : vector<16x128xf32> to vector<16x128xbf16>
      %c0_20 = arith.constant 0 : index
      %c0_21 = arith.constant 0 : index
      %25 = vector.load %arg8[%c0_20, %c0_21] : memref<16x128xbf16, #tpu.memory_space<vmem>>, vector<16x128xbf16>
      tpu.vector_store %arg8[%c0_20, %c0_21], %24 {strides = array<i32>} : memref<16x128xbf16, #tpu.memory_space<vmem>>, vector<16x128xbf16>,
    } else {
    }
    return
  }
  func.func @transform_0(%arg0: i32, %arg1: i32, %arg2: i32, %arg3: i32) -> (i32, i32) {
    %c1_i32 = arith.constant 1 : i32
    %0 = arith.muli %arg1, %c1_i32 : i32
    %1 = arith.addi %0, %arg3 : i32
    %c0_i32 = arith.constant 0 : i32
    return %arg0, %1 : i32, i32
  }
  func.func @transform_1(%arg0: i32, %arg1: i32, %arg2: i32, %arg3: i32) -> (i32, i32, i32) {
    %c0_i32 = arith.constant 0 : i32
    return %arg1, %arg3, %arg2 : i32, i32, i32
  }
  func.func @transform_2(%arg0: i32, %arg1: i32, %arg2: i32, %arg3: i32) -> (i32, i32, i32) {
    %c0_i32 = arith.constant 0 : i32
    %c0_i32_0 = arith.constant 0 : i32
    return %arg1, %c0_i32, %arg2 : i32, i32, i32
  }
  func.func @transform_3(%arg0: i32, %arg1: i32, %arg2: i32, %arg3: i32) -> (i32, i32, i32) {
    %c0_i32 = arith.constant 0 : i32
    %c0_i32_0 = arith.constant 0 : i32
    return %arg1, %c0_i32, %arg2 : i32, i32, i32
  }
  func.func @transform_4(%arg0: i32, %arg1: i32, %arg2: i32, %arg3: i32) -> (i32, i32) {
    %c1_i32 = arith.constant 1 : i32
    %0 = arith.muli %arg1, %c1_i32 : i32
    %1 = arith.addi %0, %arg2 : i32
    %c0_i32 = arith.constant 0 : i32
    return %arg0, %1 : i32, i32
  }
}

module attributes {stable_mosaic.version = 11 : i64} {
  func.func @_gmm_kernel(%arg0: i32, %arg1: i32, %arg2: i32, %arg3: i32, %arg4: memref<8x384xbf16, #tpu.memory_space<vmem>>, %arg5: memref<1x384x128xbf16, #tpu.memory_space<vmem>>, %arg6: memref<1x1x128xf32, #tpu.memory_space<vmem>>, %arg7: memref<1x1x128xf32, #tpu.memory_space<vmem>>, %arg8: memref<8x128xbf16, #tpu.memory_space<vmem>>, %arg9: memref<8x128xf32, #tpu.memory_space<vmem>>) attributes {dimension_semantics = [#tpu.dimension_semantics<parallel>, #tpu.dimension_semantics<parallel>, #tpu.dimension_semantics<parallel>, #tpu.dimension_semantics<arbitrary>], iteration_bounds = array<i64: 1, 1, 1, 1>, scalar_prefetch = 0 : i64, scratch_operands = 1 : i64, tpu.core_type = #tpu.core_type<tc>, window_params = [{transform_indices = @transform_0, window_bounds = array<i64: 8, 384>}, {transform_indices = @transform_1, window_bounds = array<i64: 1, 384, 128>}, {transform_indices = @transform_2, window_bounds = array<i64: 1, 1, 128>}, {transform_indices = @transform_3, window_bounds = array<i64: 1, 1, 128>}, {transform_indices = @transform_4, window_bounds = array<i64: 8, 128>}]} {
    %c0_i32 = arith.constant 0 : i32
    %0 = arith.cmpi eq, %arg3, %c0_i32 : i32
    %1 = arith.extui %0 : i1 to i32
    %c0_i32_0 = arith.constant 0 : i32
    %2 = arith.cmpi ne, %1, %c0_i32_0 : i32
    scf.if %2 {
      %cst_11 = arith.constant 0.000000e+00 : f32
      %13 = vector.broadcast %cst_11 : f32 to vector<8x128xf32>
      %c0_12 = arith.constant 0 : index
      %c0_13 = arith.constant 0 : index
      %14 = vector.load %arg9[%c0_12, %c0_13] : memref<8x128xf32, #tpu.memory_space<vmem>>, vector<8x128xf32>
      tpu.vector_store %arg9[%c0_12, %c0_13], %13 {strides = array<i32>} : memref<8x128xf32, #tpu.memory_space<vmem>>, vector<8x128xf32>,
    } else {
    }
    %c0 = arith.constant 0 : index
    %c0_1 = arith.constant 0 : index
    %3 = vector.load %arg9[%c0, %c0_1] : memref<8x128xf32, #tpu.memory_space<vmem>>, vector<8x128xf32>
    %c0_2 = arith.constant 0 : index
    %c0_3 = arith.constant 0 : index
    %4 = vector.load %arg4[%c0_2, %c0_3] : memref<8x384xbf16, #tpu.memory_space<vmem>>, vector<8x384xbf16>
    %c0_4 = arith.constant 0 : index
    %c0_5 = arith.constant 0 : index
    %c0_6 = arith.constant 0 : index
    %5 = vector.load %arg5[%c0_4, %c0_5, %c0_6] : memref<1x384x128xbf16, #tpu.memory_space<vmem>>, vector<1x384x128xbf16>
    %6 = vector.shape_cast %5 : vector<1x384x128xbf16> to vector<384x128xbf16>
    %cst = arith.constant dense<0.000000e+00> : vector<8x128xf32>
    %7 = tpu.matmul %4, %6, %cst {dimension_numbers = #tpu.dot_dimension_numbers<[1], [0], [0], [1], [0, 0, 1, 1], [], []>} : vector<8x384xbf16>, vector<384x128xbf16>, vector<8x128xf32> -> vector<8x128xf32>
    %8 = arith.addf %3, %7 : vector<8x128xf32>
    %c0_7 = arith.constant 0 : index
    %c0_8 = arith.constant 0 : index
    %9 = vector.load %arg9[%c0_7, %c0_8] : memref<8x128xf32, #tpu.memory_space<vmem>>, vector<8x128xf32>
    tpu.vector_store %arg9[%c0_7, %c0_8], %8 {strides = array<i32>} : memref<8x128xf32, #tpu.memory_space<vmem>>, vector<8x128xf32>,
    %c0_i32_9 = arith.constant 0 : i32
    %10 = arith.cmpi eq, %arg3, %c0_i32_9 : i32
    %11 = arith.extui %10 : i1 to i32
    %c0_i32_10 = arith.constant 0 : i32
    %12 = arith.cmpi ne, %11, %c0_i32_10 : i32
    scf.if %12 {
      %c0_11 = arith.constant 0 : index
      %c0_12 = arith.constant 0 : index
      %13 = vector.load %arg9[%c0_11, %c0_12] : memref<8x128xf32, #tpu.memory_space<vmem>>, vector<8x128xf32>
      %c0_13 = arith.constant 0 : index
      %c0_14 = arith.constant 0 : index
      %c0_15 = arith.constant 0 : index
      %14 = vector.load %arg6[%c0_13, %c0_14, %c0_15] : memref<1x1x128xf32, #tpu.memory_space<vmem>>, vector<1x1x128xf32>
      %15 = vector.shape_cast %14 : vector<1x1x128xf32> to vector<1x128xf32>
      %16 = vector.broadcast %15 : vector<1x128xf32> to vector<8x128xf32>
      %17 = arith.mulf %13, %16 : vector<8x128xf32>
      %c0_16 = arith.constant 0 : index
      %c0_17 = arith.constant 0 : index
      %c0_18 = arith.constant 0 : index
      %18 = vector.load %arg7[%c0_16, %c0_17, %c0_18] : memref<1x1x128xf32, #tpu.memory_space<vmem>>, vector<1x1x128xf32>
      %19 = vector.shape_cast %18 : vector<1x1x128xf32> to vector<1x128xf32>
      %20 = vector.broadcast %19 : vector<1x128xf32> to vector<8x128xf32>
      %21 = arith.addf %17, %20 : vector<8x128xf32>
      %cst_19 = arith.constant 0.000000e+00 : f32
      %22 = vector.broadcast %cst_19 : f32 to vector<8x128xf32>
      %23 = arith.maximumf %21, %22 : vector<8x128xf32>
      %24 = arith.truncf %23 : vector<8x128xf32> to vector<8x128xbf16>
      %c0_20 = arith.constant 0 : index
      %c0_21 = arith.constant 0 : index
      %25 = vector.load %arg8[%c0_20, %c0_21] : memref<8x128xbf16, #tpu.memory_space<vmem>>, vector<8x128xbf16>
      tpu.vector_store %arg8[%c0_20, %c0_21], %24 {strides = array<i32>} : memref<8x128xbf16, #tpu.memory_space<vmem>>, vector<8x128xbf16>,
    } else {
    }
    return
  }
  func.func @transform_0(%arg0: i32, %arg1: i32, %arg2: i32, %arg3: i32) -> (i32, i32) {
    %c1_i32 = arith.constant 1 : i32
    %0 = arith.muli %arg1, %c1_i32 : i32
    %1 = arith.addi %0, %arg3 : i32
    %c0_i32 = arith.constant 0 : i32
    return %arg0, %1 : i32, i32
  }
  func.func @transform_1(%arg0: i32, %arg1: i32, %arg2: i32, %arg3: i32) -> (i32, i32, i32) {
    %c0_i32 = arith.constant 0 : i32
    return %arg1, %arg3, %arg2 : i32, i32, i32
  }
  func.func @transform_2(%arg0: i32, %arg1: i32, %arg2: i32, %arg3: i32) -> (i32, i32, i32) {
    %c0_i32 = arith.constant 0 : i32
    %c0_i32_0 = arith.constant 0 : i32
    return %arg1, %c0_i32, %arg2 : i32, i32, i32
  }
  func.func @transform_3(%arg0: i32, %arg1: i32, %arg2: i32, %arg3: i32) -> (i32, i32, i32) {
    %c0_i32 = arith.constant 0 : i32
    %c0_i32_0 = arith.constant 0 : i32
    return %arg1, %c0_i32, %arg2 : i32, i32, i32
  }
  func.func @transform_4(%arg0: i32, %arg1: i32, %arg2: i32, %arg3: i32) -> (i32, i32) {
    %c1_i32 = arith.constant 1 : i32
    %0 = arith.muli %arg1, %c1_i32 : i32
    %1 = arith.addi %0, %arg2 : i32
    %c0_i32 = arith.constant 0 : i32
    return %arg0, %1 : i32, i32
  }
}

module attributes {stable_mosaic.version = 11 : i64} {
  func.func @_gmm_kernel(%arg0: i32, %arg1: i32, %arg2: i32, %arg3: i32, %arg4: memref<8x128xbf16, #tpu.memory_space<vmem>>, %arg5: memref<1x128x128xbf16, #tpu.memory_space<vmem>>, %arg6: memref<1x1x128xf32, #tpu.memory_space<vmem>>, %arg7: memref<1x1x128xf32, #tpu.memory_space<vmem>>, %arg8: memref<8x128xbf16, #tpu.memory_space<vmem>>, %arg9: memref<8x128xf32, #tpu.memory_space<vmem>>) attributes {dimension_semantics = [#tpu.dimension_semantics<parallel>, #tpu.dimension_semantics<parallel>, #tpu.dimension_semantics<parallel>, #tpu.dimension_semantics<arbitrary>], iteration_bounds = array<i64: 1, 1, 1, 1>, scalar_prefetch = 0 : i64, scratch_operands = 1 : i64, tpu.core_type = #tpu.core_type<tc>, window_params = [{transform_indices = @transform_0, window_bounds = array<i64: 8, 128>}, {transform_indices = @transform_1, window_bounds = array<i64: 1, 128, 128>}, {transform_indices = @transform_2, window_bounds = array<i64: 1, 1, 128>}, {transform_indices = @transform_3, window_bounds = array<i64: 1, 1, 128>}, {transform_indices = @transform_4, window_bounds = array<i64: 8, 128>}]} {
    %c0_i32 = arith.constant 0 : i32
    %0 = arith.cmpi eq, %arg3, %c0_i32 : i32
    %1 = arith.extui %0 : i1 to i32
    %c0_i32_0 = arith.constant 0 : i32
    %2 = arith.cmpi ne, %1, %c0_i32_0 : i32
    scf.if %2 {
      %cst_11 = arith.constant 0.000000e+00 : f32
      %13 = vector.broadcast %cst_11 : f32 to vector<8x128xf32>
      %c0_12 = arith.constant 0 : index
      %c0_13 = arith.constant 0 : index
      %14 = vector.load %arg9[%c0_12, %c0_13] : memref<8x128xf32, #tpu.memory_space<vmem>>, vector<8x128xf32>
      tpu.vector_store %arg9[%c0_12, %c0_13], %13 {strides = array<i32>} : memref<8x128xf32, #tpu.memory_space<vmem>>, vector<8x128xf32>,
    } else {
    }
    %c0 = arith.constant 0 : index
    %c0_1 = arith.constant 0 : index
    %3 = vector.load %arg9[%c0, %c0_1] : memref<8x128xf32, #tpu.memory_space<vmem>>, vector<8x128xf32>
    %c0_2 = arith.constant 0 : index
    %c0_3 = arith.constant 0 : index
    %4 = vector.load %arg4[%c0_2, %c0_3] : memref<8x128xbf16, #tpu.memory_space<vmem>>, vector<8x128xbf16>
    %c0_4 = arith.constant 0 : index
    %c0_5 = arith.constant 0 : index
    %c0_6 = arith.constant 0 : index
    %5 = vector.load %arg5[%c0_4, %c0_5, %c0_6] : memref<1x128x128xbf16, #tpu.memory_space<vmem>>, vector<1x128x128xbf16>
    %6 = vector.shape_cast %5 : vector<1x128x128xbf16> to vector<128x128xbf16>
    %cst = arith.constant dense<0.000000e+00> : vector<8x128xf32>
    %7 = tpu.matmul %4, %6, %cst {dimension_numbers = #tpu.dot_dimension_numbers<[1], [0], [0], [1], [0, 0, 1, 1], [], []>} : vector<8x128xbf16>, vector<128x128xbf16>, vector<8x128xf32> -> vector<8x128xf32>
    %8 = arith.addf %3, %7 : vector<8x128xf32>
    %c0_7 = arith.constant 0 : index
    %c0_8 = arith.constant 0 : index
    %9 = vector.load %arg9[%c0_7, %c0_8] : memref<8x128xf32, #tpu.memory_space<vmem>>, vector<8x128xf32>
    tpu.vector_store %arg9[%c0_7, %c0_8], %8 {strides = array<i32>} : memref<8x128xf32, #tpu.memory_space<vmem>>, vector<8x128xf32>,
    %c0_i32_9 = arith.constant 0 : i32
    %10 = arith.cmpi eq, %arg3, %c0_i32_9 : i32
    %11 = arith.extui %10 : i1 to i32
    %c0_i32_10 = arith.constant 0 : i32
    %12 = arith.cmpi ne, %11, %c0_i32_10 : i32
    scf.if %12 {
      %c0_11 = arith.constant 0 : index
      %c0_12 = arith.constant 0 : index
      %13 = vector.load %arg9[%c0_11, %c0_12] : memref<8x128xf32, #tpu.memory_space<vmem>>, vector<8x128xf32>
      %c0_13 = arith.constant 0 : index
      %c0_14 = arith.constant 0 : index
      %c0_15 = arith.constant 0 : index
      %14 = vector.load %arg6[%c0_13, %c0_14, %c0_15] : memref<1x1x128xf32, #tpu.memory_space<vmem>>, vector<1x1x128xf32>
      %15 = vector.shape_cast %14 : vector<1x1x128xf32> to vector<1x128xf32>
      %16 = vector.broadcast %15 : vector<1x128xf32> to vector<8x128xf32>
      %17 = arith.mulf %13, %16 : vector<8x128xf32>
      %c0_16 = arith.constant 0 : index
      %c0_17 = arith.constant 0 : index
      %c0_18 = arith.constant 0 : index
      %18 = vector.load %arg7[%c0_16, %c0_17, %c0_18] : memref<1x1x128xf32, #tpu.memory_space<vmem>>, vector<1x1x128xf32>
      %19 = vector.shape_cast %18 : vector<1x1x128xf32> to vector<1x128xf32>
      %20 = vector.broadcast %19 : vector<1x128xf32> to vector<8x128xf32>
      %21 = arith.addf %17, %20 : vector<8x128xf32>
      %22 = arith.truncf %21 : vector<8x128xf32> to vector<8x128xbf16>
      %c0_19 = arith.constant 0 : index
      %c0_20 = arith.constant 0 : index
      %23 = vector.load %arg8[%c0_19, %c0_20] : memref<8x128xbf16, #tpu.memory_space<vmem>>, vector<8x128xbf16>
      tpu.vector_store %arg8[%c0_19, %c0_20], %22 {strides = array<i32>} : memref<8x128xbf16, #tpu.memory_space<vmem>>, vector<8x128xbf16>,
    } else {
    }
    return
  }
  func.func @transform_0(%arg0: i32, %arg1: i32, %arg2: i32, %arg3: i32) -> (i32, i32) {
    %c1_i32 = arith.constant 1 : i32
    %0 = arith.muli %arg1, %c1_i32 : i32
    %1 = arith.addi %0, %arg3 : i32
    %c0_i32 = arith.constant 0 : i32
    return %arg0, %1 : i32, i32
  }
  func.func @transform_1(%arg0: i32, %arg1: i32, %arg2: i32, %arg3: i32) -> (i32, i32, i32) {
    %c0_i32 = arith.constant 0 : i32
    return %arg1, %arg3, %arg2 : i32, i32, i32
  }
  func.func @transform_2(%arg0: i32, %arg1: i32, %arg2: i32, %arg3: i32) -> (i32, i32, i32) {
    %c0_i32 = arith.constant 0 : i32
    %c0_i32_0 = arith.constant 0 : i32
    return %arg1, %c0_i32, %arg2 : i32, i32, i32
  }
  func.func @transform_3(%arg0: i32, %arg1: i32, %arg2: i32, %arg3: i32) -> (i32, i32, i32) {
    %c0_i32 = arith.constant 0 : i32
    %c0_i32_0 = arith.constant 0 : i32
    return %arg1, %c0_i32, %arg2 : i32, i32, i32
  }
  func.func @transform_4(%arg0: i32, %arg1: i32, %arg2: i32, %arg3: i32) -> (i32, i32) {
    %c1_i32 = arith.constant 1 : i32
    %0 = arith.muli %arg1, %c1_i32 : i32
    %1 = arith.addi %0, %arg2 : i32
    %c0_i32 = arith.constant 0 : i32
    return %arg0, %1 : i32, i32
  }
}

module attributes {stable_mosaic.version = 11 : i64} {
  func.func @_se_kernel(%arg0: i32, %arg1: i32, %arg2: memref<1x8x128xbf16, #tpu.memory_space<vmem>>, %arg3: memref<128x32xf32, #tpu.memory_space<vmem>>, %arg4: memref<1x32xf32, #tpu.memory_space<vmem>>, %arg5: memref<32x128xf32, #tpu.memory_space<vmem>>, %arg6: memref<1x128xf32, #tpu.memory_space<vmem>>, %arg7: memref<1x1x128xf32, #tpu.memory_space<vmem>>, %arg8: memref<1x128xf32, #tpu.memory_space<vmem>>) attributes {dimension_semantics = [#tpu.dimension_semantics<parallel>, #tpu.dimension_semantics<arbitrary>], iteration_bounds = array<i64: 4, 1>, scalar_prefetch = 0 : i64, scratch_operands = 1 : i64, tpu.core_type = #tpu.core_type<tc>, window_params = [{transform_indices = @transform_0, window_bounds = array<i64: 1, 8, 128>}, {pipeline_mode = #tpu.pipeline_mode<synchronous>, transform_indices = @transform_1, window_bounds = array<i64: 128, 32>}, {pipeline_mode = #tpu.pipeline_mode<synchronous>, transform_indices = @transform_2, window_bounds = array<i64: 1, 32>}, {pipeline_mode = #tpu.pipeline_mode<synchronous>, transform_indices = @transform_3, window_bounds = array<i64: 32, 128>}, {pipeline_mode = #tpu.pipeline_mode<synchronous>, transform_indices = @transform_4, window_bounds = array<i64: 1, 128>}, {transform_indices = @transform_5, window_bounds = array<i64: 1, 1, 128>}]} {
    %c0_i32 = arith.constant 0 : i32
    %0 = arith.cmpi eq, %arg1, %c0_i32 : i32
    %1 = arith.extui %0 : i1 to i32
    %c0_i32_0 = arith.constant 0 : i32
    %2 = arith.cmpi ne, %1, %c0_i32_0 : i32
    scf.if %2 {
      %cst_9 = arith.constant 0.000000e+00 : f32
      %14 = vector.broadcast %cst_9 : f32 to vector<1x128xf32>
      %c0_10 = arith.constant 0 : index
      %c0_11 = arith.constant 0 : index
      %15 = vector.load %arg8[%c0_10, %c0_11] : memref<1x128xf32, #tpu.memory_space<vmem>>, vector<1x128xf32>
      tpu.vector_store %arg8[%c0_10, %c0_11], %14 {strides = array<i32>} : memref<1x128xf32, #tpu.memory_space<vmem>>, vector<1x128xf32>,
    } else {
    }
    %c0 = arith.constant 0 : index
    %c0_1 = arith.constant 0 : index
    %3 = vector.load %arg8[%c0, %c0_1] : memref<1x128xf32, #tpu.memory_space<vmem>>, vector<1x128xf32>
    %c0_2 = arith.constant 0 : index
    %c0_3 = arith.constant 0 : index
    %c0_4 = arith.constant 0 : index
    %4 = vector.load %arg2[%c0_2, %c0_3, %c0_4] : memref<1x8x128xbf16, #tpu.memory_space<vmem>>, vector<1x8x128xbf16>
    %5 = vector.shape_cast %4 : vector<1x8x128xbf16> to vector<8x128xbf16>
    %6 = arith.extf %5 : vector<8x128xbf16> to vector<8x128xf32>
    %cst = arith.constant dense<0.000000e+00> : vector<128xf32>
    %7 = vector.multi_reduction <add>, %6, %cst [0] : vector<8x128xf32> to vector<128xf32>
    %8 = vector.shape_cast %7 : vector<128xf32> to vector<1x128xf32>
    %9 = arith.addf %3, %8 : vector<1x128xf32>
    %c0_5 = arith.constant 0 : index
    %c0_6 = arith.constant 0 : index
    %10 = vector.load %arg8[%c0_5, %c0_6] : memref<1x128xf32, #tpu.memory_space<vmem>>, vector<1x128xf32>
    tpu.vector_store %arg8[%c0_5, %c0_6], %9 {strides = array<i32>} : memref<1x128xf32, #tpu.memory_space<vmem>>, vector<1x128xf32>,
    %c0_i32_7 = arith.constant 0 : i32
    %11 = arith.cmpi eq, %arg1, %c0_i32_7 : i32
    %12 = arith.extui %11 : i1 to i32
    %c0_i32_8 = arith.constant 0 : i32
    %13 = arith.cmpi ne, %12, %c0_i32_8 : i32
    scf.if %13 {
      %c0_9 = arith.constant 0 : index
      %c0_10 = arith.constant 0 : index
      %14 = vector.load %arg8[%c0_9, %c0_10] : memref<1x128xf32, #tpu.memory_space<vmem>>, vector<1x128xf32>
      %cst_11 = arith.constant 1.000000e+00 : f32
      %15 = vector.broadcast %cst_11 : f32 to vector<1x128xf32>
      %16 = arith.mulf %14, %15 : vector<1x128xf32>
      %c0_12 = arith.constant 0 : index
      %c0_13 = arith.constant 0 : index
      %17 = vector.load %arg3[%c0_12, %c0_13] : memref<128x32xf32, #tpu.memory_space<vmem>>, vector<128x32xf32>
      %cst_14 = arith.constant dense<0.000000e+00> : vector<1x32xf32>
      %18 = tpu.matmul %16, %17, %cst_14 {dimension_numbers = #tpu.dot_dimension_numbers<[1], [0], [0], [1], [0, 0, 1, 1], [], []>} : vector<1x128xf32>, vector<128x32xf32>, vector<1x32xf32> -> vector<1x32xf32>
      %c0_15 = arith.constant 0 : index
      %c0_16 = arith.constant 0 : index
      %19 = vector.load %arg4[%c0_15, %c0_16] : memref<1x32xf32, #tpu.memory_space<vmem>>, vector<1x32xf32>
      %20 = arith.addf %18, %19 : vector<1x32xf32>
      %cst_17 = arith.constant 0.000000e+00 : f32
      %21 = vector.broadcast %cst_17 : f32 to vector<1x32xf32>
      %22 = arith.maximumf %20, %21 : vector<1x32xf32>
      %c0_18 = arith.constant 0 : index
      %c0_19 = arith.constant 0 : index
      %23 = vector.load %arg5[%c0_18, %c0_19] : memref<32x128xf32, #tpu.memory_space<vmem>>, vector<32x128xf32>
      %cst_20 = arith.constant dense<0.000000e+00> : vector<1x128xf32>
      %24 = tpu.matmul %22, %23, %cst_20 {dimension_numbers = #tpu.dot_dimension_numbers<[1], [0], [0], [1], [0, 0, 1, 1], [], []>} : vector<1x32xf32>, vector<32x128xf32>, vector<1x128xf32> -> vector<1x128xf32>
      %c0_21 = arith.constant 0 : index
      %c0_22 = arith.constant 0 : index
      %25 = vector.load %arg6[%c0_21, %c0_22] : memref<1x128xf32, #tpu.memory_space<vmem>>, vector<1x128xf32>
      %26 = arith.addf %24, %25 : vector<1x128xf32>
      %27 = arith.negf %26 : vector<1x128xf32>
      %28 = math.exp %27 : vector<1x128xf32>
      %cst_23 = arith.constant 1.000000e+00 : f32
      %29 = vector.broadcast %cst_23 : f32 to vector<1x128xf32>
      %30 = arith.addf %29, %28 : vector<1x128xf32>
      %31 = arith.divf %29, %30 : vector<1x128xf32>
      %c0_24 = arith.constant 0 : index
      %c0_25 = arith.constant 0 : index
      %c0_26 = arith.constant 0 : index
      %32 = vector.load %arg7[%c0_24, %c0_25, %c0_26] : memref<1x1x128xf32, #tpu.memory_space<vmem>>, vector<1x1x128xf32>
      %33 = vector.shape_cast %32 : vector<1x1x128xf32> to vector<1x128xf32>
      %34 = vector.shape_cast %31 : vector<1x128xf32> to vector<1x1x128xf32>
      tpu.vector_store %arg7[%c0_24, %c0_25, %c0_26], %34 {strides = array<i32>} : memref<1x1x128xf32, #tpu.memory_space<vmem>>, vector<1x1x128xf32>,
    } else {
    }
    return
  }
  func.func @transform_0(%arg0: i32, %arg1: i32) -> (i32, i32, i32) {
    %c0_i32 = arith.constant 0 : i32
    %c0_i32_0 = arith.constant 0 : i32
    return %arg0, %arg1, %c0_i32 : i32, i32, i32
  }
  func.func @transform_1(%arg0: i32, %arg1: i32) -> (i32, i32) {
    %c0_i32 = arith.constant 0 : i32
    %c0_i32_0 = arith.constant 0 : i32
    %c0_i32_1 = arith.constant 0 : i32
    return %c0_i32, %c0_i32_0 : i32, i32
  }
  func.func @transform_2(%arg0: i32, %arg1: i32) -> (i32, i32) {
    %c0_i32 = arith.constant 0 : i32
    %c0_i32_0 = arith.constant 0 : i32
    %c0_i32_1 = arith.constant 0 : i32
    return %c0_i32, %c0_i32_0 : i32, i32
  }
  func.func @transform_3(%arg0: i32, %arg1: i32) -> (i32, i32) {
    %c0_i32 = arith.constant 0 : i32
    %c0_i32_0 = arith.constant 0 : i32
    %c0_i32_1 = arith.constant 0 : i32
    return %c0_i32, %c0_i32_0 : i32, i32
  }
  func.func @transform_4(%arg0: i32, %arg1: i32) -> (i32, i32) {
    %c0_i32 = arith.constant 0 : i32
    %c0_i32_0 = arith.constant 0 : i32
    %c0_i32_1 = arith.constant 0 : i32
    return %c0_i32, %c0_i32_0 : i32, i32
  }
  func.func @transform_5(%arg0: i32, %arg1: i32) -> (i32, i32, i32) {
    %c0_i32 = arith.constant 0 : i32
    %c0_i32_0 = arith.constant 0 : i32
    %c0_i32_1 = arith.constant 0 : i32
    return %arg0, %c0_i32, %c0_i32_0 : i32, i32, i32
  }
}

module attributes {stable_mosaic.version = 11 : i64} {
  func.func @_se_res_relu_kernel(%arg0: i32, %arg1: i32, %arg2: memref<1x8x128xbf16, #tpu.memory_space<vmem>>, %arg3: memref<1x1x128xf32, #tpu.memory_space<vmem>>, %arg4: memref<1x8x128xbf16, #tpu.memory_space<vmem>>, %arg5: memref<1x8x128xbf16, #tpu.memory_space<vmem>>) attributes {dimension_semantics = [#tpu.dimension_semantics<parallel>, #tpu.dimension_semantics<parallel>], iteration_bounds = array<i64: 4, 1>, scalar_prefetch = 0 : i64, scratch_operands = 0 : i64, tpu.core_type = #tpu.core_type<tc>, window_params = [{transform_indices = @transform_0, window_bounds = array<i64: 1, 8, 128>}, {transform_indices = @transform_1, window_bounds = array<i64: 1, 1, 128>}, {transform_indices = @transform_2, window_bounds = array<i64: 1, 8, 128>}, {transform_indices = @transform_3, window_bounds = array<i64: 1, 8, 128>}]} {
    %c0 = arith.constant 0 : index
    %c0_0 = arith.constant 0 : index
    %c0_1 = arith.constant 0 : index
    %0 = vector.load %arg2[%c0, %c0_0, %c0_1] : memref<1x8x128xbf16, #tpu.memory_space<vmem>>, vector<1x8x128xbf16>
    %1 = arith.extf %0 : vector<1x8x128xbf16> to vector<1x8x128xf32>
    %c0_2 = arith.constant 0 : index
    %c0_3 = arith.constant 0 : index
    %c0_4 = arith.constant 0 : index
    %2 = vector.load %arg3[%c0_2, %c0_3, %c0_4] : memref<1x1x128xf32, #tpu.memory_space<vmem>>, vector<1x1x128xf32>
    %3 = vector.broadcast %2 : vector<1x1x128xf32> to vector<1x8x128xf32>
    %4 = arith.mulf %1, %3 : vector<1x8x128xf32>
    %c0_5 = arith.constant 0 : index
    %c0_6 = arith.constant 0 : index
    %c0_7 = arith.constant 0 : index
    %5 = vector.load %arg4[%c0_5, %c0_6, %c0_7] : memref<1x8x128xbf16, #tpu.memory_space<vmem>>, vector<1x8x128xbf16>
    %6 = arith.extf %5 : vector<1x8x128xbf16> to vector<1x8x128xf32>
    %7 = arith.addf %4, %6 : vector<1x8x128xf32>
    %cst = arith.constant 0.000000e+00 : f32
    %8 = vector.broadcast %cst : f32 to vector<1x8x128xf32>
    %9 = arith.maximumf %7, %8 : vector<1x8x128xf32>
    %10 = arith.truncf %9 : vector<1x8x128xf32> to vector<1x8x128xbf16>
    %c0_8 = arith.constant 0 : index
    %c0_9 = arith.constant 0 : index
    %c0_10 = arith.constant 0 : index
    %11 = vector.load %arg5[%c0_8, %c0_9, %c0_10] : memref<1x8x128xbf16, #tpu.memory_space<vmem>>, vector<1x8x128xbf16>
    tpu.vector_store %arg5[%c0_8, %c0_9, %c0_10], %10 {strides = array<i32>} : memref<1x8x128xbf16, #tpu.memory_space<vmem>>, vector<1x8x128xbf16>,
    return
  }
  func.func @transform_0(%arg0: i32, %arg1: i32) -> (i32, i32, i32) {
    %c0_i32 = arith.constant 0 : i32
    %c0_i32_0 = arith.constant 0 : i32
    return %arg0, %arg1, %c0_i32 : i32, i32, i32
  }
  func.func @transform_1(%arg0: i32, %arg1: i32) -> (i32, i32, i32) {
    %c0_i32 = arith.constant 0 : i32
    %c0_i32_0 = arith.constant 0 : i32
    %c0_i32_1 = arith.constant 0 : i32
    return %arg0, %c0_i32, %c0_i32_0 : i32, i32, i32
  }
  func.func @transform_2(%arg0: i32, %arg1: i32) -> (i32, i32, i32) {
    %c0_i32 = arith.constant 0 : i32
    %c0_i32_0 = arith.constant 0 : i32
    return %arg0, %arg1, %c0_i32 : i32, i32, i32
  }
  func.func @transform_3(%arg0: i32, %arg1: i32) -> (i32, i32, i32) {
    %c0_i32 = arith.constant 0 : i32
    %c0_i32_0 = arith.constant 0 : i32
    return %arg0, %arg1, %c0_i32 : i32, i32, i32
  }
}

module attributes {stable_mosaic.version = 11 : i64} {
  func.func @_gap_kernel(%arg0: i32, %arg1: i32, %arg2: memref<1x8x128xbf16, #tpu.memory_space<vmem>>, %arg3: memref<1x1x128xf32, #tpu.memory_space<vmem>>, %arg4: memref<1x128xf32, #tpu.memory_space<vmem>>) attributes {dimension_semantics = [#tpu.dimension_semantics<parallel>, #tpu.dimension_semantics<arbitrary>], iteration_bounds = array<i64: 4, 1>, scalar_prefetch = 0 : i64, scratch_operands = 1 : i64, tpu.core_type = #tpu.core_type<tc>, window_params = [{transform_indices = @transform_0, window_bounds = array<i64: 1, 8, 128>}, {transform_indices = @transform_1, window_bounds = array<i64: 1, 1, 128>}]} {
    %c0_i32 = arith.constant 0 : i32
    %0 = arith.cmpi eq, %arg1, %c0_i32 : i32
    %1 = arith.extui %0 : i1 to i32
    %c0_i32_0 = arith.constant 0 : i32
    %2 = arith.cmpi ne, %1, %c0_i32_0 : i32
    scf.if %2 {
      %cst_9 = arith.constant 0.000000e+00 : f32
      %14 = vector.broadcast %cst_9 : f32 to vector<1x128xf32>
      %c0_10 = arith.constant 0 : index
      %c0_11 = arith.constant 0 : index
      %15 = vector.load %arg4[%c0_10, %c0_11] : memref<1x128xf32, #tpu.memory_space<vmem>>, vector<1x128xf32>
      tpu.vector_store %arg4[%c0_10, %c0_11], %14 {strides = array<i32>} : memref<1x128xf32, #tpu.memory_space<vmem>>, vector<1x128xf32>,
    } else {
    }
    %c0 = arith.constant 0 : index
    %c0_1 = arith.constant 0 : index
    %3 = vector.load %arg4[%c0, %c0_1] : memref<1x128xf32, #tpu.memory_space<vmem>>, vector<1x128xf32>
    %c0_2 = arith.constant 0 : index
    %c0_3 = arith.constant 0 : index
    %c0_4 = arith.constant 0 : index
    %4 = vector.load %arg2[%c0_2, %c0_3, %c0_4] : memref<1x8x128xbf16, #tpu.memory_space<vmem>>, vector<1x8x128xbf16>
    %5 = vector.shape_cast %4 : vector<1x8x128xbf16> to vector<8x128xbf16>
    %6 = arith.extf %5 : vector<8x128xbf16> to vector<8x128xf32>
    %cst = arith.constant dense<0.000000e+00> : vector<128xf32>
    %7 = vector.multi_reduction <add>, %6, %cst [0] : vector<8x128xf32> to vector<128xf32>
    %8 = vector.shape_cast %7 : vector<128xf32> to vector<1x128xf32>
    %9 = arith.addf %3, %8 : vector<1x128xf32>
    %c0_5 = arith.constant 0 : index
    %c0_6 = arith.constant 0 : index
    %10 = vector.load %arg4[%c0_5, %c0_6] : memref<1x128xf32, #tpu.memory_space<vmem>>, vector<1x128xf32>
    tpu.vector_store %arg4[%c0_5, %c0_6], %9 {strides = array<i32>} : memref<1x128xf32, #tpu.memory_space<vmem>>, vector<1x128xf32>,
    %c0_i32_7 = arith.constant 0 : i32
    %11 = arith.cmpi eq, %arg1, %c0_i32_7 : i32
    %12 = arith.extui %11 : i1 to i32
    %c0_i32_8 = arith.constant 0 : i32
    %13 = arith.cmpi ne, %12, %c0_i32_8 : i32
    scf.if %13 {
      %c0_9 = arith.constant 0 : index
      %c0_10 = arith.constant 0 : index
      %14 = vector.load %arg4[%c0_9, %c0_10] : memref<1x128xf32, #tpu.memory_space<vmem>>, vector<1x128xf32>
      %cst_11 = arith.constant 1.000000e+00 : f32
      %15 = vector.broadcast %cst_11 : f32 to vector<1x128xf32>
      %16 = arith.mulf %14, %15 : vector<1x128xf32>
      %c0_12 = arith.constant 0 : index
      %c0_13 = arith.constant 0 : index
      %c0_14 = arith.constant 0 : index
      %17 = vector.load %arg3[%c0_12, %c0_13, %c0_14] : memref<1x1x128xf32, #tpu.memory_space<vmem>>, vector<1x1x128xf32>
      %18 = vector.shape_cast %17 : vector<1x1x128xf32> to vector<1x128xf32>
      %19 = vector.shape_cast %16 : vector<1x128xf32> to vector<1x1x128xf32>
      tpu.vector_store %arg3[%c0_12, %c0_13, %c0_14], %19 {strides = array<i32>} : memref<1x1x128xf32, #tpu.memory_space<vmem>>, vector<1x1x128xf32>,
    } else {
    }
    return
  }
  func.func @transform_0(%arg0: i32, %arg1: i32) -> (i32, i32, i32) {
    %c0_i32 = arith.constant 0 : i32
    %c0_i32_0 = arith.constant 0 : i32
    return %arg0, %arg1, %c0_i32 : i32, i32, i32
  }
  func.func @transform_1(%arg0: i32, %arg1: i32) -> (i32, i32, i32) {
    %c0_i32 = arith.constant 0 : i32
    %c0_i32_0 = arith.constant 0 : i32
    %c0_i32_1 = arith.constant 0 : i32
    return %arg0, %c0_i32, %c0_i32_0 : i32, i32, i32
  }
}

module attributes {stable_mosaic.version = 11 : i64} {
  func.func @_gmm_kernel(%arg0: i32, %arg1: i32, %arg2: i32, %arg3: i32, %arg4: memref<8x128xbf16, #tpu.memory_space<vmem>>, %arg5: memref<1x128x512xbf16, #tpu.memory_space<vmem>>, %arg6: memref<1x1x512xf32, #tpu.memory_space<vmem>>, %arg7: memref<8x512xf32, #tpu.memory_space<vmem>>, %arg8: memref<8x512xf32, #tpu.memory_space<vmem>>) attributes {dimension_semantics = [#tpu.dimension_semantics<parallel>, #tpu.dimension_semantics<parallel>, #tpu.dimension_semantics<parallel>, #tpu.dimension_semantics<arbitrary>], iteration_bounds = array<i64: 1, 1, 1, 1>, scalar_prefetch = 0 : i64, scratch_operands = 1 : i64, tpu.core_type = #tpu.core_type<tc>, window_params = [{transform_indices = @transform_0, window_bounds = array<i64: 8, 128>}, {transform_indices = @transform_1, window_bounds = array<i64: 1, 128, 512>}, {transform_indices = @transform_2, window_bounds = array<i64: 1, 1, 512>}, {transform_indices = @transform_3, window_bounds = array<i64: 8, 512>}]} {
    %c0_i32 = arith.constant 0 : i32
    %0 = arith.cmpi eq, %arg3, %c0_i32 : i32
    %1 = arith.extui %0 : i1 to i32
    %c0_i32_0 = arith.constant 0 : i32
    %2 = arith.cmpi ne, %1, %c0_i32_0 : i32
    scf.if %2 {
      %cst_11 = arith.constant 0.000000e+00 : f32
      %13 = vector.broadcast %cst_11 : f32 to vector<8x512xf32>
      %c0_12 = arith.constant 0 : index
      %c0_13 = arith.constant 0 : index
      %14 = vector.load %arg8[%c0_12, %c0_13] : memref<8x512xf32, #tpu.memory_space<vmem>>, vector<8x512xf32>
      tpu.vector_store %arg8[%c0_12, %c0_13], %13 {strides = array<i32>} : memref<8x512xf32, #tpu.memory_space<vmem>>, vector<8x512xf32>,
    } else {
    }
    %c0 = arith.constant 0 : index
    %c0_1 = arith.constant 0 : index
    %3 = vector.load %arg8[%c0, %c0_1] : memref<8x512xf32, #tpu.memory_space<vmem>>, vector<8x512xf32>
    %c0_2 = arith.constant 0 : index
    %c0_3 = arith.constant 0 : index
    %4 = vector.load %arg4[%c0_2, %c0_3] : memref<8x128xbf16, #tpu.memory_space<vmem>>, vector<8x128xbf16>
    %c0_4 = arith.constant 0 : index
    %c0_5 = arith.constant 0 : index
    %c0_6 = arith.constant 0 : index
    %5 = vector.load %arg5[%c0_4, %c0_5, %c0_6] : memref<1x128x512xbf16, #tpu.memory_space<vmem>>, vector<1x128x512xbf16>
    %6 = vector.shape_cast %5 : vector<1x128x512xbf16> to vector<128x512xbf16>
    %cst = arith.constant dense<0.000000e+00> : vector<8x512xf32>
    %7 = tpu.matmul %4, %6, %cst {dimension_numbers = #tpu.dot_dimension_numbers<[1], [0], [0], [1], [0, 0, 1, 1], [], []>} : vector<8x128xbf16>, vector<128x512xbf16>, vector<8x512xf32> -> vector<8x512xf32>
    %8 = arith.addf %3, %7 : vector<8x512xf32>
    %c0_7 = arith.constant 0 : index
    %c0_8 = arith.constant 0 : index
    %9 = vector.load %arg8[%c0_7, %c0_8] : memref<8x512xf32, #tpu.memory_space<vmem>>, vector<8x512xf32>
    tpu.vector_store %arg8[%c0_7, %c0_8], %8 {strides = array<i32>} : memref<8x512xf32, #tpu.memory_space<vmem>>, vector<8x512xf32>,
    %c0_i32_9 = arith.constant 0 : i32
    %10 = arith.cmpi eq, %arg3, %c0_i32_9 : i32
    %11 = arith.extui %10 : i1 to i32
    %c0_i32_10 = arith.constant 0 : i32
    %12 = arith.cmpi ne, %11, %c0_i32_10 : i32
    scf.if %12 {
      %c0_11 = arith.constant 0 : index
      %c0_12 = arith.constant 0 : index
      %13 = vector.load %arg8[%c0_11, %c0_12] : memref<8x512xf32, #tpu.memory_space<vmem>>, vector<8x512xf32>
      %c0_13 = arith.constant 0 : index
      %c0_14 = arith.constant 0 : index
      %c0_15 = arith.constant 0 : index
      %14 = vector.load %arg6[%c0_13, %c0_14, %c0_15] : memref<1x1x512xf32, #tpu.memory_space<vmem>>, vector<1x1x512xf32>
      %15 = vector.shape_cast %14 : vector<1x1x512xf32> to vector<1x512xf32>
      %16 = vector.broadcast %15 : vector<1x512xf32> to vector<8x512xf32>
      %17 = arith.addf %13, %16 : vector<8x512xf32>
      %c0_16 = arith.constant 0 : index
      %c0_17 = arith.constant 0 : index
      %18 = vector.load %arg7[%c0_16, %c0_17] : memref<8x512xf32, #tpu.memory_space<vmem>>, vector<8x512xf32>
      tpu.vector_store %arg7[%c0_16, %c0_17], %17 {strides = array<i32>} : memref<8x512xf32, #tpu.memory_space<vmem>>, vector<8x512xf32>,
    } else {
    }
    return
  }
  func.func @transform_0(%arg0: i32, %arg1: i32, %arg2: i32, %arg3: i32) -> (i32, i32) {
    %c1_i32 = arith.constant 1 : i32
    %0 = arith.muli %arg1, %c1_i32 : i32
    %1 = arith.addi %0, %arg3 : i32
    %c0_i32 = arith.constant 0 : i32
    return %arg0, %1 : i32, i32
  }
  func.func @transform_1(%arg0: i32, %arg1: i32, %arg2: i32, %arg3: i32) -> (i32, i32, i32) {
    %c0_i32 = arith.constant 0 : i32
    return %arg1, %arg3, %arg2 : i32, i32, i32
  }
  func.func @transform_2(%arg0: i32, %arg1: i32, %arg2: i32, %arg3: i32) -> (i32, i32, i32) {
    %c0_i32 = arith.constant 0 : i32
    %c0_i32_0 = arith.constant 0 : i32
    return %arg1, %c0_i32, %arg2 : i32, i32, i32
  }
  func.func @transform_3(%arg0: i32, %arg1: i32, %arg2: i32, %arg3: i32) -> (i32, i32) {
    %c1_i32 = arith.constant 1 : i32
    %0 = arith.muli %arg1, %c1_i32 : i32
    %1 = arith.addi %0, %arg2 : i32
    %c0_i32 = arith.constant 0 : i32
    return %arg0, %1 : i32, i32
  }
}

module attributes {stable_mosaic.version = 11 : i64} {
  func.func @_lstm_step_kernel(%arg0: i32, %arg1: memref<1x8x512xf32, #tpu.memory_space<vmem>>, %arg2: memref<128x512xbf16, #tpu.memory_space<vmem>>, %arg3: memref<1x8x128xbf16, #tpu.memory_space<vmem>>, %arg4: memref<8x128xf32, #tpu.memory_space<vmem>>, %arg5: memref<8x128xf32, #tpu.memory_space<vmem>>) attributes {dimension_semantics = [#tpu.dimension_semantics<arbitrary>], iteration_bounds = array<i64: 2>, scalar_prefetch = 0 : i64, scratch_operands = 2 : i64, tpu.core_type = #tpu.core_type<tc>, window_params = [{transform_indices = @transform_0, window_bounds = array<i64: 1, 8, 512>}, {pipeline_mode = #tpu.pipeline_mode<synchronous>, transform_indices = @transform_1, window_bounds = array<i64: 128, 512>}, {transform_indices = @transform_2, window_bounds = array<i64: 1, 8, 128>}]} {
    %c0_i32 = arith.constant 0 : i32
    %0 = arith.cmpi eq, %arg0, %c0_i32 : i32
    %1 = arith.extui %0 : i1 to i32
    %c0_i32_0 = arith.constant 0 : i32
    %2 = arith.cmpi ne, %1, %c0_i32_0 : i32
    scf.if %2 {
      %cst_19 = arith.constant 0.000000e+00 : f32
      %42 = vector.broadcast %cst_19 : f32 to vector<8x128xf32>
      %c0_20 = arith.constant 0 : index
      %c0_21 = arith.constant 0 : index
      %43 = vector.load %arg4[%c0_20, %c0_21] : memref<8x128xf32, #tpu.memory_space<vmem>>, vector<8x128xf32>
      tpu.vector_store %arg4[%c0_20, %c0_21], %42 {strides = array<i32>} : memref<8x128xf32, #tpu.memory_space<vmem>>, vector<8x128xf32>,
      %cst_22 = arith.constant 0.000000e+00 : f32
      %44 = vector.broadcast %cst_22 : f32 to vector<8x128xf32>
      %c0_23 = arith.constant 0 : index
      %c0_24 = arith.constant 0 : index
      %45 = vector.load %arg5[%c0_23, %c0_24] : memref<8x128xf32, #tpu.memory_space<vmem>>, vector<8x128xf32>
      tpu.vector_store %arg5[%c0_23, %c0_24], %44 {strides = array<i32>} : memref<8x128xf32, #tpu.memory_space<vmem>>, vector<8x128xf32>,
    } else {
    }
    %c0 = arith.constant 0 : index
    %c0_1 = arith.constant 0 : index
    %c0_2 = arith.constant 0 : index
    %3 = vector.load %arg1[%c0, %c0_1, %c0_2] : memref<1x8x512xf32, #tpu.memory_space<vmem>>, vector<1x8x512xf32>
    %4 = vector.shape_cast %3 : vector<1x8x512xf32> to vector<8x512xf32>
    %c0_3 = arith.constant 0 : index
    %c0_4 = arith.constant 0 : index
    %5 = vector.load %arg4[%c0_3, %c0_4] : memref<8x128xf32, #tpu.memory_space<vmem>>, vector<8x128xf32>
    %6 = arith.truncf %5 : vector<8x128xf32> to vector<8x128xbf16>
    %c0_5 = arith.constant 0 : index
    %c0_6 = arith.constant 0 : index
    %7 = vector.load %arg2[%c0_5, %c0_6] : memref<128x512xbf16, #tpu.memory_space<vmem>>, vector<128x512xbf16>
    %cst = arith.constant dense<0.000000e+00> : vector<8x512xf32>
    %8 = tpu.matmul %6, %7, %cst {dimension_numbers = #tpu.dot_dimension_numbers<[1], [0], [0], [1], [0, 0, 1, 1], [], []>} : vector<8x128xbf16>, vector<128x512xbf16>, vector<8x512xf32> -> vector<8x512xf32>
    %9 = arith.addf %4, %8 : vector<8x512xf32>
    %10 = vector.extract_strided_slice %9 {offsets = [0, 0], sizes = [8, 128], strides = [1, 1]} : vector<8x512xf32> to vector<8x128xf32>
    %11 = arith.negf %10 : vector<8x128xf32>
    %12 = math.exp %11 : vector<8x128xf32>
    %cst_7 = arith.constant 1.000000e+00 : f32
    %13 = vector.broadcast %cst_7 : f32 to vector<8x128xf32>
    %14 = arith.addf %13, %12 : vector<8x128xf32>
    %15 = arith.divf %13, %14 : vector<8x128xf32>
    %16 = vector.extract_strided_slice %9 {offsets = [0, 128], sizes = [8, 128], strides = [1, 1]} : vector<8x512xf32> to vector<8x128xf32>
    %17 = arith.negf %16 : vector<8x128xf32>
    %18 = math.exp %17 : vector<8x128xf32>
    %cst_8 = arith.constant 1.000000e+00 : f32
    %19 = vector.broadcast %cst_8 : f32 to vector<8x128xf32>
    %20 = arith.addf %19, %18 : vector<8x128xf32>
    %21 = arith.divf %19, %20 : vector<8x128xf32>
    %22 = vector.extract_strided_slice %9 {offsets = [0, 256], sizes = [8, 128], strides = [1, 1]} : vector<8x512xf32> to vector<8x128xf32>
    %23 = math.tanh %22 : vector<8x128xf32>
    %24 = vector.extract_strided_slice %9 {offsets = [0, 384], sizes = [8, 128], strides = [1, 1]} : vector<8x512xf32> to vector<8x128xf32>
    %25 = arith.negf %24 : vector<8x128xf32>
    %26 = math.exp %25 : vector<8x128xf32>
    %cst_9 = arith.constant 1.000000e+00 : f32
    %27 = vector.broadcast %cst_9 : f32 to vector<8x128xf32>
    %28 = arith.addf %27, %26 : vector<8x128xf32>
    %29 = arith.divf %27, %28 : vector<8x128xf32>
    %c0_10 = arith.constant 0 : index
    %c0_11 = arith.constant 0 : index
    %30 = vector.load %arg5[%c0_10, %c0_11] : memref<8x128xf32, #tpu.memory_space<vmem>>, vector<8x128xf32>
    %31 = arith.mulf %21, %30 : vector<8x128xf32>
    %32 = arith.mulf %15, %23 : vector<8x128xf32>
    %33 = arith.addf %31, %32 : vector<8x128xf32>
    %34 = math.tanh %33 : vector<8x128xf32>
    %35 = arith.mulf %29, %34 : vector<8x128xf32>
    %c0_12 = arith.constant 0 : index
    %c0_13 = arith.constant 0 : index
    %36 = vector.load %arg5[%c0_12, %c0_13] : memref<8x128xf32, #tpu.memory_space<vmem>>, vector<8x128xf32>
    tpu.vector_store %arg5[%c0_12, %c0_13], %33 {strides = array<i32>} : memref<8x128xf32, #tpu.memory_space<vmem>>, vector<8x128xf32>,
    %c0_14 = arith.constant 0 : index
    %c0_15 = arith.constant 0 : index
    %37 = vector.load %arg4[%c0_14, %c0_15] : memref<8x128xf32, #tpu.memory_space<vmem>>, vector<8x128xf32>
    tpu.vector_store %arg4[%c0_14, %c0_15], %35 {strides = array<i32>} : memref<8x128xf32, #tpu.memory_space<vmem>>, vector<8x128xf32>,
    %38 = arith.truncf %35 : vector<8x128xf32> to vector<8x128xbf16>
    %c0_16 = arith.constant 0 : index
    %c0_17 = arith.constant 0 : index
    %c0_18 = arith.constant 0 : index
    %39 = vector.load %arg3[%c0_16, %c0_17, %c0_18] : memref<1x8x128xbf16, #tpu.memory_space<vmem>>, vector<1x8x128xbf16>
    %40 = vector.shape_cast %39 : vector<1x8x128xbf16> to vector<8x128xbf16>
    %41 = vector.shape_cast %38 : vector<8x128xbf16> to vector<1x8x128xbf16>
    tpu.vector_store %arg3[%c0_16, %c0_17, %c0_18], %41 {strides = array<i32>} : memref<1x8x128xbf16, #tpu.memory_space<vmem>>, vector<1x8x128xbf16>,
    return
  }
  func.func @transform_0(%arg0: i32) -> (i32, i32, i32) {
    %c0_i32 = arith.constant 0 : i32
    %c0_i32_0 = arith.constant 0 : i32
    %c0_i32_1 = arith.constant 0 : i32
    return %arg0, %c0_i32, %c0_i32_0 : i32, i32, i32
  }
  func.func @transform_1(%arg0: i32) -> (i32, i32) {
    %c0_i32 = arith.constant 0 : i32
    %c0_i32_0 = arith.constant 0 : i32
    %c0_i32_1 = arith.constant 0 : i32
    return %c0_i32, %c0_i32_0 : i32, i32
  }
  func.func @transform_2(%arg0: i32) -> (i32, i32, i32) {
    %c0_i32 = arith.constant 0 : i32
    %c0_i32_0 = arith.constant 0 : i32
    %c0_i32_1 = arith.constant 0 : i32
    return %arg0, %c0_i32, %c0_i32_0 : i32, i32, i32
  }
}

module attributes {stable_mosaic.version = 11 : i64} {
  func.func @_gmm_kernel(%arg0: i32, %arg1: i32, %arg2: i32, %arg3: i32, %arg4: memref<8x128xbf16, #tpu.memory_space<vmem>>, %arg5: memref<1x128x128xbf16, #tpu.memory_space<vmem>>, %arg6: memref<1x1x128xf32, #tpu.memory_space<vmem>>, %arg7: memref<8x128xf32, #tpu.memory_space<vmem>>, %arg8: memref<8x128xf32, #tpu.memory_space<vmem>>) attributes {dimension_semantics = [#tpu.dimension_semantics<parallel>, #tpu.dimension_semantics<parallel>, #tpu.dimension_semantics<parallel>, #tpu.dimension_semantics<arbitrary>], iteration_bounds = array<i64: 1, 1, 1, 1>, scalar_prefetch = 0 : i64, scratch_operands = 1 : i64, tpu.core_type = #tpu.core_type<tc>, window_params = [{transform_indices = @transform_0, window_bounds = array<i64: 8, 128>}, {transform_indices = @transform_1, window_bounds = array<i64: 1, 128, 128>}, {transform_indices = @transform_2, window_bounds = array<i64: 1, 1, 128>}, {transform_indices = @transform_3, window_bounds = array<i64: 8, 128>}]} {
    %c0_i32 = arith.constant 0 : i32
    %0 = arith.cmpi eq, %arg3, %c0_i32 : i32
    %1 = arith.extui %0 : i1 to i32
    %c0_i32_0 = arith.constant 0 : i32
    %2 = arith.cmpi ne, %1, %c0_i32_0 : i32
    scf.if %2 {
      %cst_11 = arith.constant 0.000000e+00 : f32
      %13 = vector.broadcast %cst_11 : f32 to vector<8x128xf32>
      %c0_12 = arith.constant 0 : index
      %c0_13 = arith.constant 0 : index
      %14 = vector.load %arg8[%c0_12, %c0_13] : memref<8x128xf32, #tpu.memory_space<vmem>>, vector<8x128xf32>
      tpu.vector_store %arg8[%c0_12, %c0_13], %13 {strides = array<i32>} : memref<8x128xf32, #tpu.memory_space<vmem>>, vector<8x128xf32>,
    } else {
    }
    %c0 = arith.constant 0 : index
    %c0_1 = arith.constant 0 : index
    %3 = vector.load %arg8[%c0, %c0_1] : memref<8x128xf32, #tpu.memory_space<vmem>>, vector<8x128xf32>
    %c0_2 = arith.constant 0 : index
    %c0_3 = arith.constant 0 : index
    %4 = vector.load %arg4[%c0_2, %c0_3] : memref<8x128xbf16, #tpu.memory_space<vmem>>, vector<8x128xbf16>
    %c0_4 = arith.constant 0 : index
    %c0_5 = arith.constant 0 : index
    %c0_6 = arith.constant 0 : index
    %5 = vector.load %arg5[%c0_4, %c0_5, %c0_6] : memref<1x128x128xbf16, #tpu.memory_space<vmem>>, vector<1x128x128xbf16>
    %6 = vector.shape_cast %5 : vector<1x128x128xbf16> to vector<128x128xbf16>
    %cst = arith.constant dense<0.000000e+00> : vector<8x128xf32>
    %7 = tpu.matmul %4, %6, %cst {dimension_numbers = #tpu.dot_dimension_numbers<[1], [0], [0], [1], [0, 0, 1, 1], [], []>} : vector<8x128xbf16>, vector<128x128xbf16>, vector<8x128xf32> -> vector<8x128xf32>
    %8 = arith.addf %3, %7 : vector<8x128xf32>
    %c0_7 = arith.constant 0 : index
    %c0_8 = arith.constant 0 : index
    %9 = vector.load %arg8[%c0_7, %c0_8] : memref<8x128xf32, #tpu.memory_space<vmem>>, vector<8x128xf32>
    tpu.vector_store %arg8[%c0_7, %c0_8], %8 {strides = array<i32>} : memref<8x128xf32, #tpu.memory_space<vmem>>, vector<8x128xf32>,
    %c0_i32_9 = arith.constant 0 : i32
    %10 = arith.cmpi eq, %arg3, %c0_i32_9 : i32
    %11 = arith.extui %10 : i1 to i32
    %c0_i32_10 = arith.constant 0 : i32
    %12 = arith.cmpi ne, %11, %c0_i32_10 : i32
    scf.if %12 {
      %c0_11 = arith.constant 0 : index
      %c0_12 = arith.constant 0 : index
      %13 = vector.load %arg8[%c0_11, %c0_12] : memref<8x128xf32, #tpu.memory_space<vmem>>, vector<8x128xf32>
      %c0_13 = arith.constant 0 : index
      %c0_14 = arith.constant 0 : index
      %c0_15 = arith.constant 0 : index
      %14 = vector.load %arg6[%c0_13, %c0_14, %c0_15] : memref<1x1x128xf32, #tpu.memory_space<vmem>>, vector<1x1x128xf32>
      %15 = vector.shape_cast %14 : vector<1x1x128xf32> to vector<1x128xf32>
      %16 = vector.broadcast %15 : vector<1x128xf32> to vector<8x128xf32>
      %17 = arith.addf %13, %16 : vector<8x128xf32>
      %c0_16 = arith.constant 0 : index
      %c0_17 = arith.constant 0 : index
      %18 = vector.load %arg7[%c0_16, %c0_17] : memref<8x128xf32, #tpu.memory_space<vmem>>, vector<8x128xf32>
      tpu.vector_store %arg7[%c0_16, %c0_17], %17 {strides = array<i32>} : memref<8x128xf32, #tpu.memory_space<vmem>>, vector<8x128xf32>,
    } else {
    }
    return
  }
  func.func @transform_0(%arg0: i32, %arg1: i32, %arg2: i32, %arg3: i32) -> (i32, i32) {
    %c1_i32 = arith.constant 1 : i32
    %0 = arith.muli %arg1, %c1_i32 : i32
    %1 = arith.addi %0, %arg3 : i32
    %c0_i32 = arith.constant 0 : i32
    return %arg0, %1 : i32, i32
  }
  func.func @transform_1(%arg0: i32, %arg1: i32, %arg2: i32, %arg3: i32) -> (i32, i32, i32) {
    %c0_i32 = arith.constant 0 : i32
    return %arg1, %arg3, %arg2 : i32, i32, i32
  }
  func.func @transform_2(%arg0: i32, %arg1: i32, %arg2: i32, %arg3: i32) -> (i32, i32, i32) {
    %c0_i32 = arith.constant 0 : i32
    %c0_i32_0 = arith.constant 0 : i32
    return %arg1, %c0_i32, %arg2 : i32, i32, i32
  }
  func.func @transform_3(%arg0: i32, %arg1: i32, %arg2: i32, %arg3: i32) -> (i32, i32) {
    %c1_i32 = arith.constant 1 : i32
    %0 = arith.muli %arg1, %c1_i32 : i32
    %1 = arith.addi %0, %arg2 : i32
    %c0_i32 = arith.constant 0 : i32
    return %arg0, %1 : i32, i32
  }
}

</mosaic_0001>

<bundles_post_ra>
// kernel: se_resnext_lstm_forward.29
= control target key start
LH: loop header
LB: loop body
LE: loop exit
PB: predicated region body
PF: predicated region fallthrough
CT: control target
= control target key end

     0   :  { %s2798_s15 = smov 0   ;;  %s2800_s16 = smov 0   ;;  %s3153_s0 = inlined_call_operand.vmem [shape: bf16[1024,256], index: 0, kind: input, shape index: {}]   ;;  %s3154_s1 = inlined_call_operand.vmem [shape: bf16[1,256,128], index: 1, kind: input, shape index: {}]   ;;  %s3155_s2 = inlined_call_operand.vmem [shape: f32[1,1,128], index: 2, kind: input, shape index: {}]   ;;  %s3156_s3 = inlined_call_operand.vmem [shape: f32[1,1,128], index: 3, kind: input, shape index: {}]   ;;  %s3157_s4 = inlined_call_operand.vmem [shape: bf16[1024,128], index: 4, kind: output, shape index: {}]  }
   0x1   :  { %s2802_s17 = smov 0  }
   0x2 LB: > { %s40_s18 = sadd.s32 1, %s2766_s16  ;;  %p2169_p0 = scmp.ge.s32.totalorder %s2770_s17, 1  ;;  %s2770_s17 = sphi %s2802_s17, %s14_s17   ;;  %s2766_s16 = sphi %s2800_s16, %s3159_s16   ;;  %s2762_s15 = sphi %s2798_s15, %s3158_s15  }
   0x3   : > { %p42_p1 = scmp.ge.s32.totalorder %s40_s18, 2  ;;  %p253_p2 = scmp.lt.s32.totalorder %s2770_s17, 3 }
   0x5   : > { %s3161_s18 = smov (%p42_p1, %s40_s18), 0  ;;  %p254_p3 = pnand %p2169_p0, %p253_p2 }
   0x6   : > { %v2636_v0 = vld [vmem:[%s3154_s1] sm:$0xff] (!%p254_p3)   ;;  %v2772_v1 = vmov (!%p254_p3), 0   ;;  %s2170_s21 = sshll.u32 (!%p254_p3), %s2762_s15, 6  ;;  %v2637_v2 = vld [vmem:[%s3154_s1 + $0x8] sm:$0xff] (!%p254_p3)   ;;  %v2638_v3 = vld [vmem:[%s3154_s1 + $0x10] sm:$0xff] (!%p254_p3)  }
   0x7   : > { %257 = sbr.rel (%p254_p3) target bundleno = 415 (0x19f), region = 36  ;;  %1008 = vmatprep.subr.bf16.mxu0 (!%p254_p3), %v2772_v1  ;;  %2579 = vmatprep.subr.bf16.mxu1 (!%p254_p3), %v2772_v1  ;;  %p316_p4 = scmp.lt.s32.totalorder (!%p254_p3), %s2170_s21, 127  ;;  %v2639_v4 = vld [vmem:[%s3154_s1 + $0x18] sm:$0xff] (!%p254_p3)   ;;  %v2640_v5 = vld [vmem:[%s3154_s1 + $0x20] sm:$0xff] (!%p254_p3)   ;;  %v2641_v7 = vld [vmem:[%s3154_s1 + $0x28] sm:$0xff] (!%p254_p3)  }
   0x8   : > { %1009 = vmatpush1.bf16.msra.mxu0 (!%p254_p3), %v2636_v0  ;;  %2595 = vmatpush1.bf16.msra.mxu1 (!%p254_p3), %v2636_v0  ;;  %v2642_v9 = vld [vmem:[%s3154_s1 + $0x30] sm:$0xff] (!%p254_p3)   ;;  %v2643_v10 = vld [vmem:[%s3154_s1 + $0x38] sm:$0xff] (!%p254_p3)   ;;  %v2644_v11 = vld [vmem:[%s3154_s1 + $0x40] sm:$0xff] (!%p254_p3)  }
   0x9   : > { %1010 = vmatprep.subr.bf16.mxu0 (!%p254_p3), %v2772_v1  ;;  %2580 = vmatprep.subr.bf16.mxu1 (!%p254_p3), %v2772_v1  ;;  %v2645_v12 = vld [vmem:[%s3154_s1 + $0x48] sm:$0xff] (!%p254_p3)   ;;  %v2646_v13 = vld [vmem:[%s3154_s1 + $0x50] sm:$0xff] (!%p254_p3)   ;;  %v2647_v14 = vld [vmem:[%s3154_s1 + $0x58] sm:$0xff] (!%p254_p3)  }
   0xa   : > { %v2648_v15 = vld [vmem:[%s3154_s1 + $0x60] sm:$0xff] (!%p254_p3)   ;;  %v2649_v16 = vld [vmem:[%s3154_s1 + $0x68] sm:$0xff] (!%p254_p3)   ;;  %v2650_v17 = vld [vmem:[%s3154_s1 + $0x70] sm:$0xff] (!%p254_p3)  }
   0xb   : > { %v2651_v18 = vld [vmem:[%s3154_s1 + $0x78] sm:$0xff] (!%p254_p3)  }
   0xc   : > { %1011 = vmatpush1.bf16.msra.mxu0 (!%p254_p3), %v2637_v2  ;;  %2596 = vmatpush1.bf16.msra.mxu1 (!%p254_p3), %v2637_v2 }
   0xd   : > { %1012 = vmatprep.subr.bf16.mxu0 (!%p254_p3), %v2772_v1  ;;  %2581 = vmatprep.subr.bf16.mxu1 (!%p254_p3), %v2772_v1 }
   0xe   : > { %s3163_s21 = smov (!%p316_p4, %s2170_s21), 127 }
   0xf   : > { %s2323_s28 = sshll.u32 %s3163_s21, 3 }
  0x10   : > { %1013 = vmatpush1.bf16.msra.mxu0 %v2638_v3  ;;  %2597 = vmatpush1.bf16.msra.mxu1 %v2638_v3  ;;  %s2845_s7 = scalar_lea.vmem %s3153_s0, %s2323_s28 }
  0x11   : > { %1014 = vmatprep.subr.bf16.mxu0 %v2772_v1  ;;  %2582 = vmatprep.subr.bf16.mxu1 %v2772_v1  ;;  %v2654_v6 = vld [vmem:[%s2845_s7 + $0x4] ss:$8 sps:$4 sm:$0xff]   ;;  %v2652_v19 = vld [vmem:[%s2845_s7] ss:$8 sps:$4 sm:$0xff]   ;;  %v2658_v21 = vld [vmem:[%s2845_s7 + $0x14] ss:$8 sps:$4 sm:$0xff]  }
  0x12   : > { %v2657_v8 = vld [vmem:[%s2845_s7 + $0x104] ss:$8 sps:$4 sm:$0xff]   ;;  %1040 = vmatprep.mubr.bf16.mxu0 %v2654_v6  ;;  %v2655_v20 = vld [vmem:[%s2845_s7 + $0x100] ss:$8 sps:$4 sm:$0xff]   ;;  %v2660_v22 = vld [vmem:[%s2845_s7 + $0x114] ss:$8 sps:$4 sm:$0xff]  }
  0x13   : > { %1168 = vmatprep.mubr.bf16.mxu1 %v2657_v8  ;;  %v2662_v23 = vld [vmem:[%s2845_s7 + $0x10] ss:$8 sps:$4 sm:$0xff]   ;;  %v2664_v25 = vld [vmem:[%s2845_s7 + $0x24] ss:$8 sps:$4 sm:$0xff]   ;;  %v2668_v27 = vld [vmem:[%s2845_s7 + $0x20] ss:$8 sps:$4 sm:$0xff]  }
  0x14   : > { %1015 = vmatpush1.bf16.msra.mxu0 %v2639_v4  ;;  %2598 = vmatpush1.bf16.msra.mxu1 %v2639_v4  ;;  %v2663_v24 = vld [vmem:[%s2845_s7 + $0x110] ss:$8 sps:$4 sm:$0xff]   ;;  %v2666_v26 = vld [vmem:[%s2845_s7 + $0x124] ss:$8 sps:$4 sm:$0xff]   ;;  %v2669_v28 = vld [vmem:[%s2845_s7 + $0x120] ss:$8 sps:$4 sm:$0xff]  }
  0x15   : > { %1016 = vmatprep.subr.bf16.mxu0 %v2772_v1  ;;  %2583 = vmatprep.subr.bf16.mxu1 %v2772_v1  ;;  %v2670_v29 = vld [vmem:[%s2845_s7 + $0x34] ss:$8 sps:$4 sm:$0xff]   ;;  %v2674_v31 = vld [vmem:[%s2845_s7 + $0x30] ss:$8 sps:$4 sm:$0xff]   ;;  %v2676_v33 = vld [vmem:[%s2845_s7 + $0x44] ss:$8 sps:$4 sm:$0xff]  }
  0x16   : > { %v2672_v30 = vld [vmem:[%s2845_s7 + $0x134] ss:$8 sps:$4 sm:$0xff]   ;;  %v2675_v32 = vld [vmem:[%s2845_s7 + $0x130] ss:$8 sps:$4 sm:$0xff]   ;;  %v2678_v34 = vld [vmem:[%s2845_s7 + $0x144] ss:$8 sps:$4 sm:$0xff]  }
  0x17   : > { %v2680_v35 = vld [vmem:[%s2845_s7 + $0x40] ss:$8 sps:$4 sm:$0xff]   ;;  %v2682_v37 = vld [vmem:[%s2845_s7 + $0x54] ss:$8 sps:$4 sm:$0xff]   ;;  %v2686_v39 = vld [vmem:[%s2845_s7 + $0x50] ss:$8 sps:$4 sm:$0xff]  }
  0x18   : > { %1017 = vmatpush1.bf16.msra.mxu0 %v2640_v5  ;;  %2599 = vmatpush1.bf16.msra.mxu1 %v2640_v5  ;;  %v2681_v36 = vld [vmem:[%s2845_s7 + $0x140] ss:$8 sps:$4 sm:$0xff]   ;;  %v2684_v38 = vld [vmem:[%s2845_s7 + $0x154] ss:$8 sps:$4 sm:$0xff]   ;;  %v2687_v40 = vld [vmem:[%s2845_s7 + $0x150] ss:$8 sps:$4 sm:$0xff]  }
  0x19   : > { %1018 = vmatprep.subr.bf16.mxu0 %v2772_v1  ;;  %2584 = vmatprep.subr.bf16.mxu1 %v2772_v1  ;;  %v2688_v41 = vld [vmem:[%s2845_s7 + $0x64] ss:$8 sps:$4 sm:$0xff]   ;;  %v2692_v43 = vld [vmem:[%s2845_s7 + $0x60] ss:$8 sps:$4 sm:$0xff]   ;;  %v2694_v45 = vld [vmem:[%s2845_s7 + $0x74] ss:$8 sps:$4 sm:$0xff]  }
  0x1a   : > { %v2690_v42 = vld [vmem:[%s2845_s7 + $0x164] ss:$8 sps:$4 sm:$0xff]   ;;  %v2693_v44 = vld [vmem:[%s2845_s7 + $0x160] ss:$8 sps:$4 sm:$0xff]   ;;  %v2696_v46 = vld [vmem:[%s2845_s7 + $0x174] ss:$8 sps:$4 sm:$0xff]  }
  0x1b   : > { %v2698_v47 = vld [vmem:[%s2845_s7 + $0x70] ss:$8 sps:$4 sm:$0xff]   ;;  %v2700_v49 = vld [vmem:[%s2845_s7 + $0x84] ss:$8 sps:$4 sm:$0xff]   ;;  %v2704_v51 = vld [vmem:[%s2845_s7 + $0x80] ss:$8 sps:$4 sm:$0xff]  }
  0x1c   : > { %1019 = vmatpush1.bf16.msra.mxu0 %v2641_v7  ;;  %2600 = vmatpush1.bf16.msra.mxu1 %v2641_v7  ;;  %v2699_v48 = vld [vmem:[%s2845_s7 + $0x170] ss:$8 sps:$4 sm:$0xff]   ;;  %v2702_v50 = vld [vmem:[%s2845_s7 + $0x184] ss:$8 sps:$4 sm:$0xff]   ;;  %v2705_v52 = vld [vmem:[%s2845_s7 + $0x180] ss:$8 sps:$4 sm:$0xff]  }
  0x1d   : > { %1020 = vmatprep.subr.bf16.mxu0 %v2772_v1  ;;  %2585 = vmatprep.subr.bf16.mxu1 %v2772_v1  ;;  %v2706_v53 = vld [vmem:[%s2845_s7 + $0x94] ss:$8 sps:$4 sm:$0xff]   ;;  %v2710_v55 = vld [vmem:[%s2845_s7 + $0x90] ss:$8 sps:$4 sm:$0xff]   ;;  %v2712_v57 = vld [vmem:[%s2845_s7 + $0xa4] ss:$8 sps:$4 sm:$0xff]  }
  0x1e   : > { %v2708_v54 = vld [vmem:[%s2845_s7 + $0x194] ss:$8 sps:$4 sm:$0xff]   ;;  %v2711_v56 = vld [vmem:[%s2845_s7 + $0x190] ss:$8 sps:$4 sm:$0xff]   ;;  %v2714_v58 = vld [vmem:[%s2845_s7 + $0x1a4] ss:$8 sps:$4 sm:$0xff]  }
  0x1f   : > { %v2716_v59 = vld [vmem:[%s2845_s7 + $0xa0] ss:$8 sps:$4 sm:$0xff]   ;;  %v2718_v61 = vld [vmem:[%s2845_s7 + $0xb4] ss:$8 sps:$4 sm:$0xff]   ;;  %v2722_v63 = vld [vmem:[%s2845_s7 + $0xb0] ss:$8 sps:$4 sm:$0xff]  }
  0x20   : > { %1021 = vmatpush1.bf16.msra.mxu0 %v2642_v9  ;;  %2601 = vmatpush1.bf16.msra.mxu1 %v2642_v9  ;;  %v2717_v60 = vld [vmem:[%s2845_s7 + $0x1a0] ss:$8 sps:$4 sm:$0xff]   ;;  %v2720_v62 = vld [vmem:[%s2845_s7 + $0x1b4] ss:$8 sps:$4 sm:$0xff]   ;;  %v2723_v0 = vld [vmem:[%s2845_s7 + $0x1b0] ss:$8 sps:$4 sm:$0xff]  }
  0x21   : > { %1022 = vmatprep.subr.bf16.mxu0 %v2772_v1  ;;  %2586 = vmatprep.subr.bf16.mxu1 %v2772_v1  ;;  %v2726_v2 = vld [vmem:[%s2845_s7 + $0x1c4] ss:$8 sps:$4 sm:$0xff]   ;;  %v2728_v3 = vld [vmem:[%s2845_s7 + $0xc0] ss:$8 sps:$4 sm:$0xff]   ;;  %v2730_v5 = vld [vmem:[%s2845_s7 + $0xd4] ss:$8 sps:$4 sm:$0xff]  }
  0x22   : > { %v2729_v4 = vld [vmem:[%s2845_s7 + $0x1c0] ss:$8 sps:$4 sm:$0xff]   ;;  %v2732_v6 = vld [vmem:[%s2845_s7 + $0x1d4] ss:$8 sps:$4 sm:$0xff]   ;;  %v2734_v7 = vld [vmem:[%s2845_s7 + $0xd0] ss:$8 sps:$4 sm:$0xff]  }
  0x23   : > { %v2735_v8 = vld [vmem:[%s2845_s7 + $0x1d0] ss:$8 sps:$4 sm:$0xff]   ;;  %v2736_v9 = vld [vmem:[%s2845_s7 + $0xe4] ss:$8 sps:$4 sm:$0xff]  }
  0x24   : > { %1023 = vmatpush1.bf16.msra.mxu0 %v2643_v10  ;;  %2602 = vmatpush1.bf16.msra.mxu1 %v2643_v10  ;;  %v2738_v10 = vld [vmem:[%s2845_s7 + $0x1e4] ss:$8 sps:$4 sm:$0xff]  }
  0x25   : > { %1024 = vmatprep.subr.bf16.mxu0 %v2772_v1  ;;  %2587 = vmatprep.subr.bf16.mxu1 %v2772_v1 }
  0x28   : > { %1025 = vmatpush1.bf16.msra.mxu0 %v2644_v11  ;;  %2603 = vmatpush1.bf16.msra.mxu1 %v2644_v11  ;;  %v2740_v11 = vld [vmem:[%s2845_s7 + $0xe0] ss:$8 sps:$4 sm:$0xff]  }
  0x29   : > { %1026 = vmatprep.subr.bf16.mxu0 %v2772_v1  ;;  %2588 = vmatprep.subr.bf16.mxu1 %v2772_v1 }
  0x2c   : > { %1027 = vmatpush1.bf16.msra.mxu0 %v2645_v12  ;;  %2604 = vmatpush1.bf16.msra.mxu1 %v2645_v12  ;;  %v2741_v12 = vld [vmem:[%s2845_s7 + $0x1e0] ss:$8 sps:$4 sm:$0xff]  }
  0x2d   : > { %1028 = vmatprep.subr.bf16.mxu0 %v2772_v1  ;;  %2589 = vmatprep.subr.bf16.mxu1 %v2772_v1 }
  0x30   : > { %1029 = vmatpush1.bf16.msra.mxu0 %v2646_v13  ;;  %2605 = vmatpush1.bf16.msra.mxu1 %v2646_v13  ;;  %v2742_v13 = vld [vmem:[%s2845_s7 + $0xf4] ss:$8 sps:$4 sm:$0xff]  }
  0x31   : > { %1030 = vmatprep.subr.bf16.mxu0 %v2772_v1  ;;  %2590 = vmatprep.subr.bf16.mxu1 %v2772_v1 }
  0x34   : > { %1031 = vmatpush1.bf16.msra.mxu0 %v2647_v14  ;;  %2606 = vmatpush1.bf16.msra.mxu1 %v2647_v14  ;;  %v2744_v14 = vld [vmem:[%s2845_s7 + $0x1f4] ss:$8 sps:$4 sm:$0xff]  }
  0x35   : > { %1032 = vmatprep.subr.bf16.mxu0 %v2772_v1  ;;  %2591 = vmatprep.subr.bf16.mxu1 %v2772_v1 }
  0x38   : > { %1033 = vmatpush1.bf16.msra.mxu0 %v2648_v15  ;;  %2607 = vmatpush1.bf16.msra.mxu1 %v2648_v15  ;;  %v2746_v15 = vld [vmem:[%s2845_s7 + $0xf0] ss:$8 sps:$4 sm:$0xff]  }
  0x39   : > { %1034 = vmatprep.subr.bf16.mxu0 %v2772_v1  ;;  %2592 = vmatprep.subr.bf16.mxu1 %v2772_v1 }
  0x3c   : > { %1035 = vmatpush1.bf16.msra.mxu0 %v2649_v16  ;;  %2608 = vmatpush1.bf16.msra.mxu1 %v2649_v16  ;;  %v2747_v16 = vld [vmem:[%s2845_s7 + $0x1f0] ss:$8 sps:$4 sm:$0xff]  }
  0x3d   : > { %1036 = vmatprep.subr.bf16.mxu0 %v2772_v1  ;;  %2593 = vmatprep.subr.bf16.mxu1 %v2772_v1 }
  0x40   : > { %1037 = vmatpush1.bf16.msra.mxu0 %v2650_v17  ;;  %2609 = vmatpush1.bf16.msra.mxu1 %v2650_v17  ;;  %v2971_v17 = vld [vmem:[%s3155_s2] ss:$0 sm:$0xff] }
  0x41   : > { %1038 = vmatprep.subr.bf16.mxu0 %v2772_v1  ;;  %2594 = vmatprep.subr.bf16.mxu1 %v2772_v1  ;;  %v2724_v1 = vld [vmem:[%s2845_s7 + $0xc4] ss:$8 sps:$4 sm:$0xff]   ;;  %s2174_s7 = sshll.u32 %s3163_s21, 2 }
  0x42   : > { %s2990_s15 = scalar_lea.vmem %s3157_s4, %s2174_s7 }
  0x44   : > { %1039 = vmatpush1.bf16.msra.mxu0 %v2651_v18  ;;  %2610 = vmatpush1.bf16.msra.mxu1 %v2651_v18 }
  0x47   : > { %1041 = vmatmul.mubr.bf16.vlgmr.msra.gmra.mrb[0].mxu0 %v2652_v19  ;;  %1169 = vmatmul.mubr.bf16.vlgmr.msra.gmra.mrb[0].mxu1 %v2655_v20  ;;  %v2976_v19 = vld [vmem:[%s3156_s3] ss:$0 sm:$0xff] }
  0x48   : > { %1048 = vmatprep.mubr.bf16.mxu0 %v2658_v21  ;;  %1176 = vmatprep.mubr.bf16.mxu1 %v2660_v22 }
  0x4f   : > { %1049 = vmatmul.mubr.bf16.gmra.mrb[4].mxu0 %v2662_v23  ;;  %1177 = vmatmul.mubr.bf16.gmra.mrb[4].mxu1 %v2663_v24 }
  0x50   : > { %1056 = vmatprep.mubr.bf16.mxu0 %v2664_v25  ;;  %1184 = vmatprep.mubr.bf16.mxu1 %v2666_v26 }
  0x57   : > { %1057 = vmatmul.mubr.bf16.gmra.mrb[8].mxu0 %v2668_v27  ;;  %1185 = vmatmul.mubr.bf16.gmra.mrb[8].mxu1 %v2669_v28 }
  0x58   : > { %1064 = vmatprep.mubr.bf16.mxu0 %v2670_v29  ;;  %1192 = vmatprep.mubr.bf16.mxu1 %v2672_v30 }
  0x5f   : > { %1065 = vmatmul.mubr.bf16.gmra.mrb[12].mxu0 %v2674_v31  ;;  %1193 = vmatmul.mubr.bf16.gmra.mrb[12].mxu1 %v2675_v32 }
  0x60   : > { %1072 = vmatprep.mubr.bf16.mxu0 %v2676_v33  ;;  %1200 = vmatprep.mubr.bf16.mxu1 %v2678_v34 }
  0x67   : > { %1073 = vmatmul.mubr.bf16.gmra.mrb[16].mxu0 %v2680_v35  ;;  %1201 = vmatmul.mubr.bf16.gmra.mrb[16].mxu1 %v2681_v36 }
  0x68   : > { %1080 = vmatprep.mubr.bf16.mxu0 %v2682_v37  ;;  %1208 = vmatprep.mubr.bf16.mxu1 %v2684_v38 }
  0x6f   : > { %1081 = vmatmul.mubr.bf16.gmra.mrb[20].mxu0 %v2686_v39  ;;  %1209 = vmatmul.mubr.bf16.gmra.mrb[20].mxu1 %v2687_v40 }
  0x70   : > { %1088 = vmatprep.mubr.bf16.mxu0 %v2688_v41  ;;  %1216 = vmatprep.mubr.bf16.mxu1 %v2690_v42 }
  0x77   : > { %1089 = vmatmul.mubr.bf16.gmra.mrb[24].mxu0 %v2692_v43  ;;  %1217 = vmatmul.mubr.bf16.gmra.mrb[24].mxu1 %v2693_v44 }
  0x78   : > { %1096 = vmatprep.mubr.bf16.mxu0 %v2694_v45  ;;  %1224 = vmatprep.mubr.bf16.mxu1 %v2696_v46 }
  0x7f   : > { %1097 = vmatmul.mubr.bf16.gmra.mrb[28].mxu0 %v2698_v47  ;;  %1225 = vmatmul.mubr.bf16.gmra.mrb[28].mxu1 %v2699_v48 }
  0x80   : > { %1104 = vmatprep.mubr.bf16.mxu0 %v2700_v49  ;;  %1232 = vmatprep.mubr.bf16.mxu1 %v2702_v50 }
  0x87   : > { %1105 = vmatmul.mubr.bf16.gmra.mrb[32].mxu0 %v2704_v51  ;;  %1233 = vmatmul.mubr.bf16.gmra.mrb[32].mxu1 %v2705_v52 }
  0x88   : > { %1112 = vmatprep.mubr.bf16.mxu0 %v2706_v53  ;;  %1240 = vmatprep.mubr.bf16.mxu1 %v2708_v54 }
  0x8f   : > { %1113 = vmatmul.mubr.bf16.gmra.mrb[36].mxu0 %v2710_v55  ;;  %1241 = vmatmul.mubr.bf16.gmra.mrb[36].mxu1 %v2711_v56 }
  0x90   : > { %1120 = vmatprep.mubr.bf16.mxu0 %v2712_v57  ;;  %1248 = vmatprep.mubr.bf16.mxu1 %v2714_v58 }
  0x97   : > { %1121 = vmatmul.mubr.bf16.gmra.mrb[40].mxu0 %v2716_v59  ;;  %1249 = vmatmul.mubr.bf16.gmra.mrb[40].mxu1 %v2717_v60 }
  0x98   : > { %1128 = vmatprep.mubr.bf16.mxu0 %v2718_v61  ;;  %1256 = vmatprep.mubr.bf16.mxu1 %v2720_v62 }
  0x9f   : > { %1129 = vmatmul.mubr.bf16.gmra.mrb[44].mxu0 %v2722_v63  ;;  %1257 = vmatmul.mubr.bf16.gmra.mrb[44].mxu1 %v2723_v0 }
  0xa0   : > { %1136 = vmatprep.mubr.bf16.mxu0 %v2724_v1  ;;  %1264 = vmatprep.mubr.bf16.mxu1 %v2726_v2 }
  0xa7   : > { %1137 = vmatmul.mubr.bf16.gmra.mrb[48].mxu0 %v2728_v3  ;;  %1265 = vmatmul.mubr.bf16.gmra.mrb[48].mxu1 %v2729_v4 }
  0xa8   : > { %1144 = vmatprep.mubr.bf16.mxu0 %v2730_v5  ;;  %1272 = vmatprep.mubr.bf16.mxu1 %v2732_v6 }
  0xaf   : > { %1145 = vmatmul.mubr.bf16.gmra.mrb[52].mxu0 %v2734_v7  ;;  %1273 = vmatmul.mubr.bf16.gmra.mrb[52].mxu1 %v2735_v8 }
  0xb0   : > { %1152 = vmatprep.mubr.bf16.mxu0 %v2736_v9  ;;  %1280 = vmatprep.mubr.bf16.mxu1 %v2738_v10 }
  0xb7   : > { %1153 = vmatmul.mubr.bf16.gmra.mrb[56].mxu0 %v2740_v11  ;;  %1281 = vmatmul.mubr.bf16.gmra.mrb[56].mxu1 %v2741_v12 }
  0xb8   : > { %1160 = vmatprep.mubr.bf16.mxu0 %v2742_v13  ;;  %1288 = vmatprep.mubr.bf16.mxu1 %v2744_v14 }
  0xbf   : > { %1161 = vmatmul.mubr.bf16.gmra.mrb[60].mxu0 %v2746_v15  ;;  %1289 = vmatmul.mubr.bf16.gmra.mrb[60].mxu1 %v2747_v16 }
 0x11a   : > { %v1042_v18 = vpop.f32.mrb[0].mxu0  ;;  %v1170_v20 = vpop.f32.mrb[0].mxu1 }
 0x11b   : > { %v1499_v21 = vmul.f32 %v2971_v17, %v1042_v18  ;;  %v1531_v22 = vmul.f32 %v2971_v17, %v1170_v20  ;;  %v1044_v23 = vpop.f32.mrb[1].mxu0  ;;  %v1172_v24 = vpop.f32.mrb[1].mxu1 }
 0x11c   : > { %v1045_v25 = vpop.f32.mrb[2].mxu0  ;;  %v1173_v26 = vpop.f32.mrb[2].mxu1 }
 0x11d   : > { %v1570_v27 = vadd.f32 %v2976_v19, %v1499_v21  ;;  %v1602_v28 = vadd.f32 %v2976_v19, %v1531_v22  ;;  %v1500_v29 = vmul.f32 %v2971_v17, %v1045_v25  ;;  %v1532_v30 = vmul.f32 %v2971_v17, %v1173_v26  ;;  %v1047_v31 = vpop.f32.mrb[3].mxu0  ;;  %v1175_v32 = vpop.f32.mrb[3].mxu1 }
 0x11f   : > { %v1571_v33 = vadd.f32 %v2976_v19, %v1500_v29  ;;  %v1603_v34 = vadd.f32 %v2976_v19, %v1532_v30  ;;  %v1634_v35 = vmax.f32 %v1570_v27, 0.0  ;;  %v1666_v36 = vmax.f32 %v1602_v28, 0.0 }
 0x121   : > { %v1635_v37 = vmax.f32 %v1571_v33, 0.0  ;;  %v1667_v38 = vmax.f32 %v1603_v34, 0.0 }
 0x122   : > { %v1050_v39 = vpop.f32.mrb[4].mxu0  ;;  %v1178_v40 = vpop.f32.mrb[4].mxu1 }
 0x123   : > { %v2391_v41 = vpack.c.bf16 %v1635_v37, %v1634_v35  ;;  %v2471_v42 = vpack.c.bf16 %v1667_v38, %v1666_v36  ;;  %v1501_v43 = vmul.f32 %v2971_v17, %v1050_v39  ;;  %v1533_v44 = vmul.f32 %v2971_v17, %v1178_v40  ;;  %v1052_v45 = vpop.f32.mrb[5].mxu0  ;;  %v1180_v46 = vpop.f32.mrb[5].mxu1 }
 0x124   : > { %v1053_v47 = vpop.f32.mrb[6].mxu0  ;;  %v1181_v48 = vpop.f32.mrb[6].mxu1 }
 0x125   : > { %2392 = vst [vmem:[%s2990_s15] sm:$0xff] %v2391_v41   ;;  %2563 = vst [vmem:[%s2990_s15 + $0x80] sm:$0xff] %v2471_v42   ;;  %v1572_v49 = vadd.f32 %v2976_v19, %v1501_v43  ;;  %v1604_v50 = vadd.f32 %v2976_v19, %v1533_v44  ;;  %v1502_v51 = vmul.f32 %v2971_v17, %v1053_v47  ;;  %v1055_v53 = vpop.f32.mrb[7].mxu0  ;;  %v1183_v54 = vpop.f32.mrb[7].mxu1 }
 0x126   : > { %v1534_v52 = vmul.f32 %v2971_v17, %v1181_v48 }
 0x127   : > { %v1573_v55 = vadd.f32 %v2976_v19, %v1502_v51  ;;  %v1636_v57 = vmax.f32 %v1572_v49, 0.0  ;;  %v1668_v58 = vmax.f32 %v1604_v50, 0.0 }
 0x128   : > { %v1605_v56 = vadd.f32 %v2976_v19, %v1534_v52 }
 0x129   : > { %v1637_v59 = vmax.f32 %v1573_v55, 0.0 }
 0x12a   : > { %v1669_v60 = vmax.f32 %v1605_v56, 0.0  ;;  %v1058_v61 = vpop.f32.mrb[8].mxu0  ;;  %v1186_v62 = vpop.f32.mrb[8].mxu1 }
 0x12b   : > { %v2396_v63 = vpack.c.bf16 %v1637_v59, %v1636_v57  ;;  %v1503_v1 = vmul.f32 %v2971_v17, %v1058_v61  ;;  %v1535_v2 = vmul.f32 %v2971_v17, %v1186_v62  ;;  %v1060_v3 = vpop.f32.mrb[9].mxu0  ;;  %v1188_v4 = vpop.f32.mrb[9].mxu1 }
 0x12c   : > { %v2476_v0 = vpack.c.bf16 %v1669_v60, %v1668_v58  ;;  %v1061_v5 = vpop.f32.mrb[10].mxu0  ;;  %v1189_v6 = vpop.f32.mrb[10].mxu1 }
 0x12d   : > { %2548 = vst [vmem:[%s2990_s15 + $0x8] sm:$0xff] %v2396_v63   ;;  %v1574_v7 = vadd.f32 %v2976_v19, %v1503_v1  ;;  %v1606_v8 = vadd.f32 %v2976_v19, %v1535_v2  ;;  %v1504_v9 = vmul.f32 %v2971_v17, %v1061_v5  ;;  %v1536_v10 = vmul.f32 %v2971_v17, %v1189_v6  ;;  %v1063_v11 = vpop.f32.mrb[11].mxu0  ;;  %v1191_v12 = vpop.f32.mrb[11].mxu1 }
 0x12e   : > { %2564 = vst [vmem:[%s2990_s15 + $0x88] sm:$0xff] %v2476_v0  }
 0x12f   : > { %v1575_v13 = vadd.f32 %v2976_v19, %v1504_v9  ;;  %v1607_v14 = vadd.f32 %v2976_v19, %v1536_v10  ;;  %v1638_v15 = vmax.f32 %v1574_v7, 0.0  ;;  %v1670_v16 = vmax.f32 %v1606_v8, 0.0 }
 0x131   : > { %v1639_v18 = vmax.f32 %v1575_v13, 0.0  ;;  %v1671_v20 = vmax.f32 %v1607_v14, 0.0 }
 0x132   : > { %v1066_v21 = vpop.f32.mrb[12].mxu0  ;;  %v1194_v22 = vpop.f32.mrb[12].mxu1 }
 0x133   : > { %v2401_v23 = vpack.c.bf16 %v1639_v18, %v1638_v15  ;;  %v2481_v24 = vpack.c.bf16 %v1671_v20, %v1670_v16  ;;  %v1505_v25 = vmul.f32 %v2971_v17, %v1066_v21  ;;  %v1537_v26 = vmul.f32 %v2971_v17, %v1194_v22  ;;  %v1068_v27 = vpop.f32.mrb[13].mxu0  ;;  %v1196_v28 = vpop.f32.mrb[13].mxu1 }
 0x134   : > { %v1069_v29 = vpop.f32.mrb[14].mxu0  ;;  %v1197_v30 = vpop.f32.mrb[14].mxu1 }
 0x135   : > { %2549 = vst [vmem:[%s2990_s15 + $0x10] sm:$0xff] %v2401_v23   ;;  %2565 = vst [vmem:[%s2990_s15 + $0x90] sm:$0xff] %v2481_v24   ;;  %v1576_v31 = vadd.f32 %v2976_v19, %v1505_v25  ;;  %v1608_v32 = vadd.f32 %v2976_v19, %v1537_v26  ;;  %v1506_v33 = vmul.f32 %v2971_v17, %v1069_v29  ;;  %v1071_v35 = vpop.f32.mrb[15].mxu0  ;;  %v1199_v36 = vpop.f32.mrb[15].mxu1 }
 0x136   : > { %v1538_v34 = vmul.f32 %v2971_v17, %v1197_v30 }
 0x137   : > { %v1577_v37 = vadd.f32 %v2976_v19, %v1506_v33  ;;  %v1640_v39 = vmax.f32 %v1576_v31, 0.0  ;;  %v1672_v40 = vmax.f32 %v1608_v32, 0.0 }
 0x138   : > { %v1609_v38 = vadd.f32 %v2976_v19, %v1538_v34 }
 0x139   : > { %v1641_v41 = vmax.f32 %v1577_v37, 0.0 }
 0x13a   : > { %v1673_v42 = vmax.f32 %v1609_v38, 0.0  ;;  %v1074_v43 = vpop.f32.mrb[16].mxu0  ;;  %v1202_v44 = vpop.f32.mrb[16].mxu1 }
 0x13b   : > { %v2406_v45 = vpack.c.bf16 %v1641_v41, %v1640_v39  ;;  %v1507_v47 = vmul.f32 %v2971_v17, %v1074_v43  ;;  %v1539_v48 = vmul.f32 %v2971_v17, %v1202_v44  ;;  %v1076_v49 = vpop.f32.mrb[17].mxu0  ;;  %v1204_v50 = vpop.f32.mrb[17].mxu1 }
 0x13c   : > { %v2486_v46 = vpack.c.bf16 %v1673_v42, %v1672_v40  ;;  %v1077_v51 = vpop.f32.mrb[18].mxu0  ;;  %v1205_v52 = vpop.f32.mrb[18].mxu1 }
 0x13d   : > { %2550 = vst [vmem:[%s2990_s15 + $0x18] sm:$0xff] %v2406_v45   ;;  %v1578_v53 = vadd.f32 %v2976_v19, %v1507_v47  ;;  %v1610_v54 = vadd.f32 %v2976_v19, %v1539_v48  ;;  %v1508_v55 = vmul.f32 %v2971_v17, %v1077_v51  ;;  %v1540_v56 = vmul.f32 %v2971_v17, %v1205_v52  ;;  %v1079_v57 = vpop.f32.mrb[19].mxu0  ;;  %v1207_v58 = vpop.f32.mrb[19].mxu1 }
 0x13e   : > { %2566 = vst [vmem:[%s2990_s15 + $0x98] sm:$0xff] %v2486_v46  }
 0x13f   : > { %v1579_v59 = vadd.f32 %v2976_v19, %v1508_v55  ;;  %v1611_v60 = vadd.f32 %v2976_v19, %v1540_v56  ;;  %v1642_v61 = vmax.f32 %v1578_v53, 0.0  ;;  %v1674_v62 = vmax.f32 %v1610_v54, 0.0 }
 0x141   : > { %v1643_v63 = vmax.f32 %v1579_v59, 0.0  ;;  %v1675_v0 = vmax.f32 %v1611_v60, 0.0 }
 0x142   : > { %v1082_v1 = vpop.f32.mrb[20].mxu0  ;;  %v1210_v2 = vpop.f32.mrb[20].mxu1 }
 0x143   : > { %v2411_v3 = vpack.c.bf16 %v1643_v63, %v1642_v61  ;;  %v2491_v4 = vpack.c.bf16 %v1675_v0, %v1674_v62  ;;  %v1509_v5 = vmul.f32 %v2971_v17, %v1082_v1  ;;  %v1541_v6 = vmul.f32 %v2971_v17, %v1210_v2  ;;  %v1084_v7 = vpop.f32.mrb[21].mxu0  ;;  %v1212_v8 = vpop.f32.mrb[21].mxu1 }
 0x144   : > { %v1085_v9 = vpop.f32.mrb[22].mxu0  ;;  %v1213_v10 = vpop.f32.mrb[22].mxu1 }
 0x145   : > { %2551 = vst [vmem:[%s2990_s15 + $0x20] sm:$0xff] %v2411_v3   ;;  %2567 = vst [vmem:[%s2990_s15 + $0xa0] sm:$0xff] %v2491_v4   ;;  %v1580_v11 = vadd.f32 %v2976_v19, %v1509_v5  ;;  %v1612_v12 = vadd.f32 %v2976_v19, %v1541_v6  ;;  %v1510_v13 = vmul.f32 %v2971_v17, %v1085_v9  ;;  %v1087_v15 = vpop.f32.mrb[23].mxu0  ;;  %v1215_v16 = vpop.f32.mrb[23].mxu1 }
 0x146   : > { %v1542_v14 = vmul.f32 %v2971_v17, %v1213_v10 }
 0x147   : > { %v1581_v18 = vadd.f32 %v2976_v19, %v1510_v13  ;;  %v1644_v21 = vmax.f32 %v1580_v11, 0.0  ;;  %v1676_v22 = vmax.f32 %v1612_v12, 0.0 }
 0x148   : > { %v1613_v20 = vadd.f32 %v2976_v19, %v1542_v14 }
 0x149   : > { %v1645_v23 = vmax.f32 %v1581_v18, 0.0 }
 0x14a   : > { %v1677_v24 = vmax.f32 %v1613_v20, 0.0  ;;  %v1090_v25 = vpop.f32.mrb[24].mxu0  ;;  %v1218_v26 = vpop.f32.mrb[24].mxu1 }
 0x14b   : > { %v2416_v27 = vpack.c.bf16 %v1645_v23, %v1644_v21  ;;  %v1511_v29 = vmul.f32 %v2971_v17, %v1090_v25  ;;  %v1543_v30 = vmul.f32 %v2971_v17, %v1218_v26  ;;  %v1092_v31 = vpop.f32.mrb[25].mxu0  ;;  %v1220_v32 = vpop.f32.mrb[25].mxu1 }
 0x14c   : > { %v2496_v28 = vpack.c.bf16 %v1677_v24, %v1676_v22  ;;  %v1093_v33 = vpop.f32.mrb[26].mxu0  ;;  %v1221_v34 = vpop.f32.mrb[26].mxu1 }
 0x14d   : > { %2552 = vst [vmem:[%s2990_s15 + $0x28] sm:$0xff] %v2416_v27   ;;  %v1582_v35 = vadd.f32 %v2976_v19, %v1511_v29  ;;  %v1614_v36 = vadd.f32 %v2976_v19, %v1543_v30  ;;  %v1512_v37 = vmul.f32 %v2971_v17, %v1093_v33  ;;  %v1544_v38 = vmul.f32 %v2971_v17, %v1221_v34  ;;  %v1095_v39 = vpop.f32.mrb[27].mxu0  ;;  %v1223_v40 = vpop.f32.mrb[27].mxu1 }
 0x14e   : > { %2568 = vst [vmem:[%s2990_s15 + $0xa8] sm:$0xff] %v2496_v28  }
 0x14f   : > { %v1583_v41 = vadd.f32 %v2976_v19, %v1512_v37  ;;  %v1615_v42 = vadd.f32 %v2976_v19, %v1544_v38  ;;  %v1646_v43 = vmax.f32 %v1582_v35, 0.0  ;;  %v1678_v44 = vmax.f32 %v1614_v36, 0.0 }
 0x151   : > { %v1647_v45 = vmax.f32 %v1583_v41, 0.0  ;;  %v1679_v46 = vmax.f32 %v1615_v42, 0.0 }
 0x152   : > { %v1098_v47 = vpop.f32.mrb[28].mxu0  ;;  %v1226_v48 = vpop.f32.mrb[28].mxu1 }
 0x153   : > { %v2421_v49 = vpack.c.bf16 %v1647_v45, %v1646_v43  ;;  %v2501_v50 = vpack.c.bf16 %v1679_v46, %v1678_v44  ;;  %v1513_v51 = vmul.f32 %v2971_v17, %v1098_v47  ;;  %v1545_v52 = vmul.f32 %v2971_v17, %v1226_v48  ;;  %v1100_v53 = vpop.f32.mrb[29].mxu0  ;;  %v1228_v54 = vpop.f32.mrb[29].mxu1 }
 0x154   : > { %v1101_v55 = vpop.f32.mrb[30].mxu0  ;;  %v1229_v56 = vpop.f32.mrb[30].mxu1 }
 0x155   : > { %2553 = vst [vmem:[%s2990_s15 + $0x30] sm:$0xff] %v2421_v49   ;;  %2569 = vst [vmem:[%s2990_s15 + $0xb0] sm:$0xff] %v2501_v50   ;;  %v1584_v57 = vadd.f32 %v2976_v19, %v1513_v51  ;;  %v1616_v58 = vadd.f32 %v2976_v19, %v1545_v52  ;;  %v1514_v59 = vmul.f32 %v2971_v17, %v1101_v55  ;;  %v1103_v61 = vpop.f32.mrb[31].mxu0  ;;  %v1231_v62 = vpop.f32.mrb[31].mxu1 }
 0x156   : > { %v1546_v60 = vmul.f32 %v2971_v17, %v1229_v56 }
 0x157   : > { %v1585_v63 = vadd.f32 %v2976_v19, %v1514_v59  ;;  %v1648_v1 = vmax.f32 %v1584_v57, 0.0  ;;  %v1680_v2 = vmax.f32 %v1616_v58, 0.0 }
 0x158   : > { %v1617_v0 = vadd.f32 %v2976_v19, %v1546_v60 }
 0x159   : > { %v1649_v3 = vmax.f32 %v1585_v63, 0.0 }
 0x15a   : > { %v1681_v4 = vmax.f32 %v1617_v0, 0.0  ;;  %v1106_v5 = vpop.f32.mrb[32].mxu0  ;;  %v1234_v6 = vpop.f32.mrb[32].mxu1 }
 0x15b   : > { %v2426_v7 = vpack.c.bf16 %v1649_v3, %v1648_v1  ;;  %v1515_v9 = vmul.f32 %v2971_v17, %v1106_v5  ;;  %v1547_v10 = vmul.f32 %v2971_v17, %v1234_v6  ;;  %v1108_v11 = vpop.f32.mrb[33].mxu0  ;;  %v1236_v12 = vpop.f32.mrb[33].mxu1 }
 0x15c   : > { %v2506_v8 = vpack.c.bf16 %v1681_v4, %v1680_v2  ;;  %v1109_v13 = vpop.f32.mrb[34].mxu0  ;;  %v1237_v14 = vpop.f32.mrb[34].mxu1 }
 0x15d   : > { %2554 = vst [vmem:[%s2990_s15 + $0x38] sm:$0xff] %v2426_v7   ;;  %v1586_v15 = vadd.f32 %v2976_v19, %v1515_v9  ;;  %v1618_v16 = vadd.f32 %v2976_v19, %v1547_v10  ;;  %v1516_v18 = vmul.f32 %v2971_v17, %v1109_v13  ;;  %v1548_v20 = vmul.f32 %v2971_v17, %v1237_v14  ;;  %v1111_v21 = vpop.f32.mrb[35].mxu0  ;;  %v1239_v22 = vpop.f32.mrb[35].mxu1 }
 0x15e   : > { %2570 = vst [vmem:[%s2990_s15 + $0xb8] sm:$0xff] %v2506_v8  }
 0x15f   : > { %v1587_v23 = vadd.f32 %v2976_v19, %v1516_v18  ;;  %v1619_v24 = vadd.f32 %v2976_v19, %v1548_v20  ;;  %v1650_v25 = vmax.f32 %v1586_v15, 0.0  ;;  %v1682_v26 = vmax.f32 %v1618_v16, 0.0 }
 0x161   : > { %v1651_v27 = vmax.f32 %v1587_v23, 0.0  ;;  %v1683_v28 = vmax.f32 %v1619_v24, 0.0 }
 0x162   : > { %v1114_v29 = vpop.f32.mrb[36].mxu0  ;;  %v1242_v30 = vpop.f32.mrb[36].mxu1 }
 0x163   : > { %v2431_v31 = vpack.c.bf16 %v1651_v27, %v1650_v25  ;;  %v2511_v32 = vpack.c.bf16 %v1683_v28, %v1682_v26  ;;  %v1517_v33 = vmul.f32 %v2971_v17, %v1114_v29  ;;  %v1549_v34 = vmul.f32 %v2971_v17, %v1242_v30  ;;  %v1116_v35 = vpop.f32.mrb[37].mxu0  ;;  %v1244_v36 = vpop.f32.mrb[37].mxu1 }
 0x164   : > { %v1117_v37 = vpop.f32.mrb[38].mxu0  ;;  %v1245_v38 = vpop.f32.mrb[38].mxu1 }
 0x165   : > { %2555 = vst [vmem:[%s2990_s15 + $0x40] sm:$0xff] %v2431_v31   ;;  %2571 = vst [vmem:[%s2990_s15 + $0xc0] sm:$0xff] %v2511_v32   ;;  %v1588_v39 = vadd.f32 %v2976_v19, %v1517_v33  ;;  %v1620_v40 = vadd.f32 %v2976_v19, %v1549_v34  ;;  %v1518_v41 = vmul.f32 %v2971_v17, %v1117_v37  ;;  %v1119_v43 = vpop.f32.mrb[39].mxu0  ;;  %v1247_v44 = vpop.f32.mrb[39].mxu1 }
 0x166   : > { %v1550_v42 = vmul.f32 %v2971_v17, %v1245_v38 }
 0x167   : > { %v1589_v45 = vadd.f32 %v2976_v19, %v1518_v41  ;;  %v1652_v47 = vmax.f32 %v1588_v39, 0.0  ;;  %v1684_v48 = vmax.f32 %v1620_v40, 0.0 }
 0x168   : > { %v1621_v46 = vadd.f32 %v2976_v19, %v1550_v42 }
 0x169   : > { %v1653_v49 = vmax.f32 %v1589_v45, 0.0 }
 0x16a   : > { %v1685_v50 = vmax.f32 %v1621_v46, 0.0  ;;  %v1122_v51 = vpop.f32.mrb[40].mxu0  ;;  %v1250_v52 = vpop.f32.mrb[40].mxu1 }
 0x16b   : > { %v2436_v53 = vpack.c.bf16 %v1653_v49, %v1652_v47  ;;  %v1519_v55 = vmul.f32 %v2971_v17, %v1122_v51  ;;  %v1551_v56 = vmul.f32 %v2971_v17, %v1250_v52  ;;  %v1124_v57 = vpop.f32.mrb[41].mxu0  ;;  %v1252_v58 = vpop.f32.mrb[41].mxu1 }
 0x16c   : > { %v2516_v54 = vpack.c.bf16 %v1685_v50, %v1684_v48  ;;  %v1125_v59 = vpop.f32.mrb[42].mxu0  ;;  %v1253_v60 = vpop.f32.mrb[42].mxu1 }
 0x16d   : > { %2556 = vst [vmem:[%s2990_s15 + $0x48] sm:$0xff] %v2436_v53   ;;  %v1590_v61 = vadd.f32 %v2976_v19, %v1519_v55  ;;  %v1622_v62 = vadd.f32 %v2976_v19, %v1551_v56  ;;  %v1520_v63 = vmul.f32 %v2971_v17, %v1125_v59  ;;  %v1552_v0 = vmul.f32 %v2971_v17, %v1253_v60  ;;  %v1127_v1 = vpop.f32.mrb[43].mxu0  ;;  %v1255_v2 = vpop.f32.mrb[43].mxu1 }
 0x16e   : > { %2572 = vst [vmem:[%s2990_s15 + $0xc8] sm:$0xff] %v2516_v54  }
 0x16f   : > { %v1591_v3 = vadd.f32 %v2976_v19, %v1520_v63  ;;  %v1623_v4 = vadd.f32 %v2976_v19, %v1552_v0  ;;  %v1654_v5 = vmax.f32 %v1590_v61, 0.0  ;;  %v1686_v6 = vmax.f32 %v1622_v62, 0.0 }
 0x171   : > { %v1655_v7 = vmax.f32 %v1591_v3, 0.0  ;;  %v1687_v8 = vmax.f32 %v1623_v4, 0.0 }
 0x172   : > { %v1130_v9 = vpop.f32.mrb[44].mxu0  ;;  %v1258_v10 = vpop.f32.mrb[44].mxu1 }
 0x173   : > { %v2441_v11 = vpack.c.bf16 %v1655_v7, %v1654_v5  ;;  %v2521_v12 = vpack.c.bf16 %v1687_v8, %v1686_v6  ;;  %v1521_v13 = vmul.f32 %v2971_v17, %v1130_v9  ;;  %v1553_v14 = vmul.f32 %v2971_v17, %v1258_v10  ;;  %v1132_v15 = vpop.f32.mrb[45].mxu0  ;;  %v1260_v16 = vpop.f32.mrb[45].mxu1 }
 0x174   : > { %v1133_v18 = vpop.f32.mrb[46].mxu0  ;;  %v1261_v20 = vpop.f32.mrb[46].mxu1 }
 0x175   : > { %2557 = vst [vmem:[%s2990_s15 + $0x50] sm:$0xff] %v2441_v11   ;;  %2573 = vst [vmem:[%s2990_s15 + $0xd0] sm:$0xff] %v2521_v12   ;;  %v1592_v21 = vadd.f32 %v2976_v19, %v1521_v13  ;;  %v1624_v22 = vadd.f32 %v2976_v19, %v1553_v14  ;;  %v1522_v23 = vmul.f32 %v2971_v17, %v1133_v18  ;;  %v1135_v25 = vpop.f32.mrb[47].mxu0  ;;  %v1263_v26 = vpop.f32.mrb[47].mxu1 }
 0x176   : > { %v1554_v24 = vmul.f32 %v2971_v17, %v1261_v20 }
 0x177   : > { %v1593_v27 = vadd.f32 %v2976_v19, %v1522_v23  ;;  %v1656_v29 = vmax.f32 %v1592_v21, 0.0  ;;  %v1688_v30 = vmax.f32 %v1624_v22, 0.0 }
 0x178   : > { %v1625_v28 = vadd.f32 %v2976_v19, %v1554_v24 }
 0x179   : > { %v1657_v31 = vmax.f32 %v1593_v27, 0.0 }
 0x17a   : > { %v1689_v32 = vmax.f32 %v1625_v28, 0.0  ;;  %v1138_v33 = vpop.f32.mrb[48].mxu0  ;;  %v1266_v34 = vpop.f32.mrb[48].mxu1 }
 0x17b   : > { %v2446_v35 = vpack.c.bf16 %v1657_v31, %v1656_v29  ;;  %v1523_v37 = vmul.f32 %v2971_v17, %v1138_v33  ;;  %v1555_v38 = vmul.f32 %v2971_v17, %v1266_v34  ;;  %v1140_v39 = vpop.f32.mrb[49].mxu0  ;;  %v1268_v40 = vpop.f32.mrb[49].mxu1 }
 0x17c   : > { %v2526_v36 = vpack.c.bf16 %v1689_v32, %v1688_v30  ;;  %v1141_v41 = vpop.f32.mrb[50].mxu0  ;;  %v1269_v42 = vpop.f32.mrb[50].mxu1 }
 0x17d   : > { %2558 = vst [vmem:[%s2990_s15 + $0x58] sm:$0xff] %v2446_v35   ;;  %v1594_v43 = vadd.f32 %v2976_v19, %v1523_v37  ;;  %v1626_v44 = vadd.f32 %v2976_v19, %v1555_v38  ;;  %v1524_v45 = vmul.f32 %v2971_v17, %v1141_v41  ;;  %v1556_v46 = vmul.f32 %v2971_v17, %v1269_v42  ;;  %v1143_v47 = vpop.f32.mrb[51].mxu0  ;;  %v1271_v48 = vpop.f32.mrb[51].mxu1 }
 0x17e   : > { %2574 = vst [vmem:[%s2990_s15 + $0xd8] sm:$0xff] %v2526_v36  }
 0x17f   : > { %v1595_v49 = vadd.f32 %v2976_v19, %v1524_v45  ;;  %v1627_v50 = vadd.f32 %v2976_v19, %v1556_v46  ;;  %v1658_v51 = vmax.f32 %v1594_v43, 0.0  ;;  %v1690_v52 = vmax.f32 %v1626_v44, 0.0 }
 0x181   : > { %v1659_v53 = vmax.f32 %v1595_v49, 0.0  ;;  %v1691_v54 = vmax.f32 %v1627_v50, 0.0 }
 0x182   : > { %v1146_v55 = vpop.f32.mrb[52].mxu0  ;;  %v1274_v56 = vpop.f32.mrb[52].mxu1 }
 0x183   : > { %v2451_v57 = vpack.c.bf16 %v1659_v53, %v1658_v51  ;;  %v2531_v58 = vpack.c.bf16 %v1691_v54, %v1690_v52  ;;  %v1525_v59 = vmul.f32 %v2971_v17, %v1146_v55  ;;  %v1557_v60 = vmul.f32 %v2971_v17, %v1274_v56  ;;  %v1148_v61 = vpop.f32.mrb[53].mxu0  ;;  %v1276_v62 = vpop.f32.mrb[53].mxu1 }
 0x184   : > { %v1149_v63 = vpop.f32.mrb[54].mxu0  ;;  %v1277_v0 = vpop.f32.mrb[54].mxu1 }
 0x185   : > { %2559 = vst [vmem:[%s2990_s15 + $0x60] sm:$0xff] %v2451_v57   ;;  %2575 = vst [vmem:[%s2990_s15 + $0xe0] sm:$0xff] %v2531_v58   ;;  %v1596_v1 = vadd.f32 %v2976_v19, %v1525_v59  ;;  %v1628_v2 = vadd.f32 %v2976_v19, %v1557_v60  ;;  %v1526_v3 = vmul.f32 %v2971_v17, %v1149_v63  ;;  %v1151_v5 = vpop.f32.mrb[55].mxu0  ;;  %v1279_v6 = vpop.f32.mrb[55].mxu1 }
 0x186   : > { %v1558_v4 = vmul.f32 %v2971_v17, %v1277_v0 }
 0x187   : > { %v1597_v7 = vadd.f32 %v2976_v19, %v1526_v3  ;;  %v1660_v9 = vmax.f32 %v1596_v1, 0.0  ;;  %v1692_v10 = vmax.f32 %v1628_v2, 0.0 }
 0x188   : > { %v1629_v8 = vadd.f32 %v2976_v19, %v1558_v4 }
 0x189   : > { %v1661_v11 = vmax.f32 %v1597_v7, 0.0 }
 0x18a   : > { %v1693_v12 = vmax.f32 %v1629_v8, 0.0  ;;  %v1154_v13 = vpop.f32.mrb[56].mxu0  ;;  %v1282_v14 = vpop.f32.mrb[56].mxu1 }
 0x18b   : > { %v2456_v15 = vpack.c.bf16 %v1661_v11, %v1660_v9  ;;  %v1527_v18 = vmul.f32 %v2971_v17, %v1154_v13  ;;  %v1559_v20 = vmul.f32 %v2971_v17, %v1282_v14  ;;  %v1156_v21 = vpop.f32.mrb[57].mxu0  ;;  %v1284_v22 = vpop.f32.mrb[57].mxu1 }
 0x18c   : > { %v2536_v16 = vpack.c.bf16 %v1693_v12, %v1692_v10  ;;  %v1157_v23 = vpop.f32.mrb[58].mxu0  ;;  %v1285_v24 = vpop.f32.mrb[58].mxu1 }
 0x18d   : > { %2560 = vst [vmem:[%s2990_s15 + $0x68] sm:$0xff] %v2456_v15   ;;  %v1598_v25 = vadd.f32 %v2976_v19, %v1527_v18  ;;  %v1630_v26 = vadd.f32 %v2976_v19, %v1559_v20  ;;  %v1528_v27 = vmul.f32 %v2971_v17, %v1157_v23  ;;  %v1560_v28 = vmul.f32 %v2971_v17, %v1285_v24  ;;  %v1159_v29 = vpop.f32.mrb[59].mxu0  ;;  %v1287_v30 = vpop.f32.mrb[59].mxu1 }
 0x18e   : > { %2576 = vst [vmem:[%s2990_s15 + $0xe8] sm:$0xff] %v2536_v16  }
 0x18f   : > { %v1599_v31 = vadd.f32 %v2976_v19, %v1528_v27  ;;  %v1631_v32 = vadd.f32 %v2976_v19, %v1560_v28  ;;  %v1662_v33 = vmax.f32 %v1598_v25, 0.0  ;;  %v1694_v34 = vmax.f32 %v1630_v26, 0.0 }
 0x191   : > { %v1663_v35 = vmax.f32 %v1599_v31, 0.0  ;;  %v1695_v36 = vmax.f32 %v1631_v32, 0.0 }
 0x192   : > { %v1162_v37 = vpop.f32.mrb[60].mxu0  ;;  %v1290_v38 = vpop.f32.mrb[60].mxu1 }
 0x193   : > { %v2461_v39 = vpack.c.bf16 %v1663_v35, %v1662_v33  ;;  %v2541_v40 = vpack.c.bf16 %v1695_v36, %v1694_v34  ;;  %v1529_v41 = vmul.f32 %v2971_v17, %v1162_v37  ;;  %v1561_v42 = vmul.f32 %v2971_v17, %v1290_v38  ;;  %v1164_v43 = vpop.f32.mrb[61].mxu0  ;;  %v1292_v44 = vpop.f32.mrb[61].mxu1 }
 0x194   : > { %v1165_v45 = vpop.f32.mrb[62].mxu0  ;;  %v1293_v46 = vpop.f32.mrb[62].mxu1 }
 0x195   : > { %2561 = vst [vmem:[%s2990_s15 + $0x70] sm:$0xff] %v2461_v39   ;;  %2577 = vst [vmem:[%s2990_s15 + $0xf0] sm:$0xff] %v2541_v40   ;;  %v1600_v47 = vadd.f32 %v2976_v19, %v1529_v41  ;;  %v1632_v48 = vadd.f32 %v2976_v19, %v1561_v42  ;;  %v1530_v49 = vmul.f32 %v2971_v17, %v1165_v45  ;;  %v1167_v51 = vpop.f32.mrb[63].mxu0  ;;  %v1295_v52 = vpop.f32.mrb[63].mxu1 }
 0x196   : > { %v1562_v50 = vmul.f32 %v2971_v17, %v1293_v46 }
 0x197   : > { %v1601_v53 = vadd.f32 %v2976_v19, %v1530_v49  ;;  %v1664_v55 = vmax.f32 %v1600_v47, 0.0  ;;  %v1696_v56 = vmax.f32 %v1632_v48, 0.0 }
 0x198   : > { %v1633_v54 = vadd.f32 %v2976_v19, %v1562_v50 }
 0x199   : > { %v1665_v57 = vmax.f32 %v1601_v53, 0.0 }
 0x19a   : > { %v1697_v58 = vmax.f32 %v1633_v54, 0.0 }
 0x19b   : > { %v2466_v59 = vpack.c.bf16 %v1665_v57, %v1664_v55 }
 0x19c   : > { %v2546_v60 = vpack.c.bf16 %v1697_v58, %v1696_v56 }
 0x19d   : > { %2562 = vst [vmem:[%s2990_s15 + $0x78] sm:$0xff] %v2466_v59  }
 0x19e   : > { %2578 = vst [vmem:[%s2990_s15 + $0xf8] sm:$0xff] %v2546_v60  }
 0x19f PF: > { %s14_s17 = sadd.s32 1, %s2770_s17   ;;  %s3158_s15 = smov %s2766_s16 }
 0x1a0   : > { %p11_p5 = scmp.ge.s32.totalorder %s14_s17, 4   ;;  %s3159_s16 = smov %s3161_s18 }
 0x1a2   :  { %13 = sbr.rel (!%p11_p5) target bundleno = 2 (0x2), region = 83 }

// kernel: se_resnext_lstm_forward.30
= control target key start
LH: loop header
LB: loop body
LE: loop exit
PB: predicated region body
PF: predicated region fallthrough
CT: control target
= control target key end

     0   :  { %s1381_s1 = inlined_call_operand.vmem [shape: bf16[1,128,128], index: 1, kind: input, shape index: {}]   ;;  %s1382_s0 = inlined_call_operand.vmem [shape: bf16[256,128], index: 0, kind: input, shape index: {}]   ;;  %s1383_s2 = inlined_call_operand.vmem [shape: f32[1,1,128], index: 2, kind: input, shape index: {}]   ;;  %s1384_s3 = inlined_call_operand.vmem [shape: f32[1,1,128], index: 3, kind: input, shape index: {}]   ;;  %s1385_s4 = inlined_call_operand.vmem [shape: bf16[256,128], index: 4, kind: output, shape index: {}]  }
   0x1   :  { %v1138_v0 = vld [vmem:[%s1381_s1] sm:$0xff]   ;;  %v1139_v1 = vld [vmem:[%s1381_s1 + $0x8] sm:$0xff]   ;;  %v1140_v2 = vld [vmem:[%s1381_s1 + $0x10] sm:$0xff]  }
   0x2   :  { %1074 = vmatprep.subr.bf16.mxu0 %v1138_v0  ;;  %1122 = vmatprep.subr.bf16.mxu1 %v1138_v0  ;;  %v1141_v3 = vld [vmem:[%s1381_s1 + $0x18] sm:$0xff]   ;;  %v1146_v4 = vld [vmem:[%s1382_s0] sm:$0xff]   ;;  %v1143_v7 = vld [vmem:[%s1381_s1 + $0x28] sm:$0xff]  }
   0x3   :  { %1075 = vmatpush3.bf16.msra.mxu0 %v1138_v0  ;;  %1130 = vmatpush3.bf16.msra.mxu1 %v1138_v0  ;;  %v1147_v5 = vld [vmem:[%s1382_s0 + $0x40] sm:$0xff]   ;;  %v1144_v8 = vld [vmem:[%s1381_s1 + $0x30] sm:$0xff]   ;;  %v1145_v9 = vld [vmem:[%s1381_s1 + $0x38] sm:$0xff]  }
   0x4   :  { %1076 = vmatprep.subr.bf16.mxu0 %v1139_v1  ;;  %1123 = vmatprep.subr.bf16.mxu1 %v1139_v1  ;;  %v1142_v6 = vld [vmem:[%s1381_s1 + $0x20] sm:$0xff]   ;;  %v1148_v10 = vld [vmem:[%s1382_s0 + $0x8] sm:$0xff]   ;;  %v1150_v12 = vld [vmem:[%s1382_s0 + $0x10] sm:$0xff]  }
   0x5   :  { %1090 = vmatprep.mubr.bf16.mxu0 %v1146_v4  ;;  %1106 = vmatprep.mubr.bf16.mxu1 %v1147_v5  ;;  %v1149_v11 = vld [vmem:[%s1382_s0 + $0x48] sm:$0xff]   ;;  %v1151_v13 = vld [vmem:[%s1382_s0 + $0x50] sm:$0xff]   ;;  %v1152_v14 = vld [vmem:[%s1382_s0 + $0x18] sm:$0xff]  }
   0x6   :  { %v1153_v15 = vld [vmem:[%s1382_s0 + $0x58] sm:$0xff]   ;;  %v1154_v16 = vld [vmem:[%s1382_s0 + $0x20] sm:$0xff]   ;;  %v1156_v18 = vld [vmem:[%s1382_s0 + $0x28] sm:$0xff]  }
   0x7   :  { %1077 = vmatpush3.bf16.msra.mxu0 %v1139_v1  ;;  %1131 = vmatpush3.bf16.msra.mxu1 %v1139_v1  ;;  %v1155_v17 = vld [vmem:[%s1382_s0 + $0x60] sm:$0xff]   ;;  %v1157_v19 = vld [vmem:[%s1382_s0 + $0x68] sm:$0xff]   ;;  %v1158_v20 = vld [vmem:[%s1382_s0 + $0x30] sm:$0xff]  }
   0x8   :  { %1078 = vmatprep.subr.bf16.mxu0 %v1140_v2  ;;  %1124 = vmatprep.subr.bf16.mxu1 %v1140_v2  ;;  %v1159_v21 = vld [vmem:[%s1382_s0 + $0x70] sm:$0xff]   ;;  %v1160_v22 = vld [vmem:[%s1382_s0 + $0x38] sm:$0xff]   ;;  %v1262_v24 = vld [vmem:[%s1383_s2] ss:$0 sm:$0xff] }
   0x9   :  { %v1161_v23 = vld [vmem:[%s1382_s0 + $0x78] sm:$0xff]   ;;  %v1267_v26 = vld [vmem:[%s1384_s3] ss:$0 sm:$0xff] }
   0xb   :  { %1079 = vmatpush3.bf16.msra.mxu0 %v1140_v2  ;;  %1132 = vmatpush3.bf16.msra.mxu1 %v1140_v2 }
   0xc   :  { %1080 = vmatprep.subr.bf16.mxu0 %v1141_v3  ;;  %1125 = vmatprep.subr.bf16.mxu1 %v1141_v3 }
   0xf   :  { %1081 = vmatpush3.bf16.msra.mxu0 %v1141_v3  ;;  %1133 = vmatpush3.bf16.msra.mxu1 %v1141_v3 }
  0x10   :  { %1082 = vmatprep.subr.bf16.mxu0 %v1142_v6  ;;  %1126 = vmatprep.subr.bf16.mxu1 %v1142_v6 }
  0x13   :  { %1083 = vmatpush3.bf16.msra.mxu0 %v1142_v6  ;;  %1134 = vmatpush3.bf16.msra.mxu1 %v1142_v6 }
  0x14   :  { %1084 = vmatprep.subr.bf16.mxu0 %v1143_v7  ;;  %1127 = vmatprep.subr.bf16.mxu1 %v1143_v7 }
  0x17   :  { %1085 = vmatpush3.bf16.msra.mxu0 %v1143_v7  ;;  %1135 = vmatpush3.bf16.msra.mxu1 %v1143_v7 }
  0x18   :  { %1086 = vmatprep.subr.bf16.mxu0 %v1144_v8  ;;  %1128 = vmatprep.subr.bf16.mxu1 %v1144_v8 }
  0x1b   :  { %1087 = vmatpush3.bf16.msra.mxu0 %v1144_v8  ;;  %1136 = vmatpush3.bf16.msra.mxu1 %v1144_v8 }
  0x1c   :  { %1088 = vmatprep.subr.bf16.mxu0 %v1145_v9  ;;  %1129 = vmatprep.subr.bf16.mxu1 %v1145_v9 }
  0x1f   :  { %1089 = vmatpush3.bf16.msra.mxu0 %v1145_v9  ;;  %1137 = vmatpush3.bf16.msra.mxu1 %v1145_v9 }
  0x22   :  { %1091 = vmatmul.mubr.bf16.vlgmr.msra.gmra.mrb[0].mxu0 %v1148_v10  ;;  %1107 = vmatmul.mubr.bf16.vlgmr.msra.gmra.mrb[0].mxu1 %v1149_v11 }
  0x23   :  { %1094 = vmatprep.mubr.bf16.mxu0 %v1150_v12  ;;  %1110 = vmatprep.mubr.bf16.mxu1 %v1151_v13 }
  0x2a   :  { %1095 = vmatmul.mubr.bf16.gmra.mrb[4].mxu0 %v1152_v14  ;;  %1111 = vmatmul.mubr.bf16.gmra.mrb[4].mxu1 %v1153_v15 }
  0x2b   :  { %1098 = vmatprep.mubr.bf16.mxu0 %v1154_v16  ;;  %1114 = vmatprep.mubr.bf16.mxu1 %v1155_v17 }
  0x32   :  { %1099 = vmatmul.mubr.bf16.gmra.mrb[8].mxu0 %v1156_v18  ;;  %1115 = vmatmul.mubr.bf16.gmra.mrb[8].mxu1 %v1157_v19 }
  0x33   :  { %1102 = vmatprep.mubr.bf16.mxu0 %v1158_v20  ;;  %1118 = vmatprep.mubr.bf16.mxu1 %v1159_v21 }
  0x3a   :  { %1103 = vmatmul.mubr.bf16.gmra.mrb[12].mxu0 %v1160_v22  ;;  %1119 = vmatmul.mubr.bf16.gmra.mrb[12].mxu1 %v1161_v23 }
  0xf5   :  { %v1092_v25 = vpop.f32.mrb[0].mxu0  ;;  %v1108_v27 = vpop.f32.mrb[0].mxu1 }
  0xf6   :  { %v575_v28 = vmul.f32 %v1092_v25, %v1262_v24  ;;  %v591_v29 = vmul.f32 %v1108_v27, %v1262_v24  ;;  %v340_v30 = vpop.f32.mrb[1].mxu0  ;;  %v404_v31 = vpop.f32.mrb[1].mxu1 }
  0xf7   :  { %v573_v32 = vmul.f32 %v1262_v24, %v340_v30  ;;  %v589_v33 = vmul.f32 %v1262_v24, %v404_v31  ;;  %v1093_v34 = vpop.f32.mrb[2].mxu0  ;;  %v1109_v35 = vpop.f32.mrb[2].mxu1 }
  0xf8   :  { %v614_v36 = vadd.f32 %v1267_v26, %v575_v28  ;;  %v630_v37 = vadd.f32 %v1267_v26, %v591_v29  ;;  %v576_v38 = vmul.f32 %v1093_v34, %v1262_v24  ;;  %v592_v39 = vmul.f32 %v1109_v35, %v1262_v24  ;;  %v343_v40 = vpop.f32.mrb[3].mxu0  ;;  %v407_v41 = vpop.f32.mrb[3].mxu1 }
  0xf9   :  { %v612_v42 = vadd.f32 %v1267_v26, %v573_v32  ;;  %v628_v43 = vadd.f32 %v1267_v26, %v589_v33  ;;  %v574_v44 = vmul.f32 %v1262_v24, %v343_v40  ;;  %v590_v45 = vmul.f32 %v1262_v24, %v407_v41 }
  0xfa   :  { %v615_v46 = vadd.f32 %v1267_v26, %v576_v38  ;;  %v631_v47 = vadd.f32 %v1267_v26, %v592_v39  ;;  %v646_v50 = vmax.f32 %v614_v36, 0.0  ;;  %v662_v51 = vmax.f32 %v630_v37, 0.0 }
  0xfb   :  { %v613_v48 = vadd.f32 %v1267_v26, %v574_v44  ;;  %v629_v49 = vadd.f32 %v1267_v26, %v590_v45  ;;  %v644_v54 = vmax.f32 %v612_v42, 0.0  ;;  %v660_v55 = vmax.f32 %v628_v43, 0.0 }
  0xfc   :  { %v647_v52 = vmax.f32 %v615_v46, 0.0  ;;  %v663_v53 = vmax.f32 %v631_v47, 0.0 }
  0xfd   :  { %v645_v56 = vmax.f32 %v613_v48, 0.0  ;;  %v661_v57 = vmax.f32 %v629_v49, 0.0  ;;  %v1096_v58 = vpop.f32.mrb[4].mxu0  ;;  %v1112_v59 = vpop.f32.mrb[4].mxu1 }
  0xfe   :  { %v963_v60 = vpack.c.bf16 %v647_v52, %v646_v50  ;;  %v1003_v61 = vpack.c.bf16 %v663_v53, %v662_v51  ;;  %v579_v62 = vmul.f32 %v1096_v58, %v1262_v24  ;;  %v595_v63 = vmul.f32 %v1112_v59, %v1262_v24  ;;  %v356_v0 = vpop.f32.mrb[5].mxu0  ;;  %v420_v1 = vpop.f32.mrb[5].mxu1 }
  0xff   :  { %v958_v2 = vpack.c.bf16 %v645_v56, %v644_v54  ;;  %v998_v3 = vpack.c.bf16 %v661_v57, %v660_v55  ;;  %v577_v4 = vmul.f32 %v1262_v24, %v356_v0  ;;  %v593_v5 = vmul.f32 %v1262_v24, %v420_v1  ;;  %v1097_v6 = vpop.f32.mrb[6].mxu0  ;;  %v1113_v7 = vpop.f32.mrb[6].mxu1 }
 0x100   :  { %1035 = vst [vmem:[%s1385_s4 + $0x8] sm:$0xff] %v963_v60   ;;  %1043 = vst [vmem:[%s1385_s4 + $0x48] sm:$0xff] %v1003_v61   ;;  %v618_v8 = vadd.f32 %v1267_v26, %v579_v62  ;;  %v634_v9 = vadd.f32 %v1267_v26, %v595_v63  ;;  %v580_v10 = vmul.f32 %v1097_v6, %v1262_v24  ;;  %v359_v12 = vpop.f32.mrb[7].mxu0  ;;  %v423_v13 = vpop.f32.mrb[7].mxu1 }
 0x101   :  { %v596_v11 = vmul.f32 %v1113_v7, %v1262_v24  ;;  %959 = vst [vmem:[%s1385_s4] sm:$0xff] %v958_v2   ;;  %1042 = vst [vmem:[%s1385_s4 + $0x40] sm:$0xff] %v998_v3   ;;  %v616_v14 = vadd.f32 %v1267_v26, %v577_v4  ;;  %v632_v15 = vadd.f32 %v1267_v26, %v593_v5 }
 0x102   :  { %v578_v16 = vmul.f32 %v1262_v24, %v359_v12  ;;  %v594_v17 = vmul.f32 %v1262_v24, %v423_v13  ;;  %v619_v18 = vadd.f32 %v1267_v26, %v580_v10  ;;  %v650_v22 = vmax.f32 %v618_v8, 0.0 }
 0x103   :  { %v635_v19 = vadd.f32 %v1267_v26, %v596_v11  ;;  %v666_v23 = vmax.f32 %v634_v9, 0.0  ;;  %v648_v28 = vmax.f32 %v616_v14, 0.0  ;;  %v664_v29 = vmax.f32 %v632_v15, 0.0 }
 0x104   :  { %v617_v20 = vadd.f32 %v1267_v26, %v578_v16  ;;  %v633_v21 = vadd.f32 %v1267_v26, %v594_v17  ;;  %v651_v25 = vmax.f32 %v619_v18, 0.0 }
 0x105   :  { %v667_v27 = vmax.f32 %v635_v19, 0.0  ;;  %v1100_v32 = vpop.f32.mrb[8].mxu0  ;;  %v1116_v33 = vpop.f32.mrb[8].mxu1 }
 0x106   :  { %v649_v30 = vmax.f32 %v617_v20, 0.0  ;;  %v665_v31 = vmax.f32 %v633_v21, 0.0  ;;  %v973_v34 = vpack.c.bf16 %v651_v25, %v650_v22  ;;  %v583_v36 = vmul.f32 %v1100_v32, %v1262_v24  ;;  %v372_v38 = vpop.f32.mrb[9].mxu0  ;;  %v436_v39 = vpop.f32.mrb[9].mxu1 }
 0x107   :  { %v1013_v35 = vpack.c.bf16 %v667_v27, %v666_v23  ;;  %v599_v37 = vmul.f32 %v1116_v33, %v1262_v24  ;;  %v581_v42 = vmul.f32 %v1262_v24, %v372_v38  ;;  %v597_v43 = vmul.f32 %v1262_v24, %v436_v39  ;;  %v1101_v44 = vpop.f32.mrb[10].mxu0  ;;  %v1117_v45 = vpop.f32.mrb[10].mxu1 }
 0x108   :  { %v968_v40 = vpack.c.bf16 %v649_v30, %v648_v28  ;;  %v1008_v41 = vpack.c.bf16 %v665_v31, %v664_v29  ;;  %1037 = vst [vmem:[%s1385_s4 + $0x18] sm:$0xff] %v973_v34   ;;  %v622_v46 = vadd.f32 %v1267_v26, %v583_v36  ;;  %v584_v48 = vmul.f32 %v1101_v44, %v1262_v24  ;;  %v375_v50 = vpop.f32.mrb[11].mxu0  ;;  %v439_v51 = vpop.f32.mrb[11].mxu1 }
 0x109   :  { %1045 = vst [vmem:[%s1385_s4 + $0x58] sm:$0xff] %v1013_v35   ;;  %v638_v47 = vadd.f32 %v1267_v26, %v599_v37  ;;  %v600_v49 = vmul.f32 %v1117_v45, %v1262_v24  ;;  %v620_v52 = vadd.f32 %v1267_v26, %v581_v42  ;;  %v636_v53 = vadd.f32 %v1267_v26, %v597_v43 }
 0x10a   :  { %1036 = vst [vmem:[%s1385_s4 + $0x10] sm:$0xff] %v968_v40   ;;  %1044 = vst [vmem:[%s1385_s4 + $0x50] sm:$0xff] %v1008_v41   ;;  %v582_v54 = vmul.f32 %v1262_v24, %v375_v50  ;;  %v598_v55 = vmul.f32 %v1262_v24, %v439_v51  ;;  %v623_v56 = vadd.f32 %v1267_v26, %v584_v48  ;;  %v654_v60 = vmax.f32 %v622_v46, 0.0 }
 0x10b   :  { %v639_v57 = vadd.f32 %v1267_v26, %v600_v49  ;;  %v670_v61 = vmax.f32 %v638_v47, 0.0  ;;  %v652_v0 = vmax.f32 %v620_v52, 0.0  ;;  %v668_v1 = vmax.f32 %v636_v53, 0.0 }
 0x10c   :  { %v621_v58 = vadd.f32 %v1267_v26, %v582_v54  ;;  %v637_v59 = vadd.f32 %v1267_v26, %v598_v55  ;;  %v655_v62 = vmax.f32 %v623_v56, 0.0 }
 0x10d   :  { %v671_v63 = vmax.f32 %v639_v57, 0.0  ;;  %v1104_v4 = vpop.f32.mrb[12].mxu0  ;;  %v1120_v5 = vpop.f32.mrb[12].mxu1 }
 0x10e   :  { %v653_v2 = vmax.f32 %v621_v58, 0.0  ;;  %v669_v3 = vmax.f32 %v637_v59, 0.0  ;;  %v983_v6 = vpack.c.bf16 %v655_v62, %v654_v60  ;;  %v587_v8 = vmul.f32 %v1104_v4, %v1262_v24  ;;  %v388_v10 = vpop.f32.mrb[13].mxu0  ;;  %v452_v11 = vpop.f32.mrb[13].mxu1 }
 0x10f   :  { %v1023_v7 = vpack.c.bf16 %v671_v63, %v670_v61  ;;  %v603_v9 = vmul.f32 %v1120_v5, %v1262_v24  ;;  %v585_v14 = vmul.f32 %v1262_v24, %v388_v10  ;;  %v601_v15 = vmul.f32 %v1262_v24, %v452_v11  ;;  %v1105_v16 = vpop.f32.mrb[14].mxu0  ;;  %v1121_v17 = vpop.f32.mrb[14].mxu1 }
 0x110   :  { %v978_v12 = vpack.c.bf16 %v653_v2, %v652_v0  ;;  %v1018_v13 = vpack.c.bf16 %v669_v3, %v668_v1  ;;  %1039 = vst [vmem:[%s1385_s4 + $0x28] sm:$0xff] %v983_v6   ;;  %v626_v18 = vadd.f32 %v1267_v26, %v587_v8  ;;  %v588_v20 = vmul.f32 %v1105_v16, %v1262_v24  ;;  %v391_v22 = vpop.f32.mrb[15].mxu0  ;;  %v455_v23 = vpop.f32.mrb[15].mxu1 }
 0x111   :  { %1047 = vst [vmem:[%s1385_s4 + $0x68] sm:$0xff] %v1023_v7   ;;  %v642_v19 = vadd.f32 %v1267_v26, %v603_v9  ;;  %v604_v21 = vmul.f32 %v1121_v17, %v1262_v24  ;;  %v624_v25 = vadd.f32 %v1267_v26, %v585_v14  ;;  %v640_v27 = vadd.f32 %v1267_v26, %v601_v15 }
 0x112   :  { %1038 = vst [vmem:[%s1385_s4 + $0x20] sm:$0xff] %v978_v12   ;;  %1046 = vst [vmem:[%s1385_s4 + $0x60] sm:$0xff] %v1018_v13   ;;  %v586_v28 = vmul.f32 %v1262_v24, %v391_v22  ;;  %v602_v29 = vmul.f32 %v1262_v24, %v455_v23  ;;  %v627_v30 = vadd.f32 %v1267_v26, %v588_v20  ;;  %v658_v34 = vmax.f32 %v626_v18, 0.0 }
 0x113   :  { %v643_v31 = vadd.f32 %v1267_v26, %v604_v21  ;;  %v674_v35 = vmax.f32 %v642_v19, 0.0  ;;  %v656_v38 = vmax.f32 %v624_v25, 0.0  ;;  %v672_v39 = vmax.f32 %v640_v27, 0.0 }
 0x114   :  { %v625_v32 = vadd.f32 %v1267_v26, %v586_v28  ;;  %v641_v33 = vadd.f32 %v1267_v26, %v602_v29  ;;  %v659_v36 = vmax.f32 %v627_v30, 0.0 }
 0x115   :  { %v675_v37 = vmax.f32 %v643_v31, 0.0 }
 0x116   :  { %v657_v40 = vmax.f32 %v625_v32, 0.0  ;;  %v673_v41 = vmax.f32 %v641_v33, 0.0  ;;  %v993_v42 = vpack.c.bf16 %v659_v36, %v658_v34 }
 0x117   :  { %v1033_v43 = vpack.c.bf16 %v675_v37, %v674_v35 }
 0x118   :  { %v988_v44 = vpack.c.bf16 %v657_v40, %v656_v38  ;;  %v1028_v24 = vpack.c.bf16 %v673_v41, %v672_v39  ;;  %1041 = vst [vmem:[%s1385_s4 + $0x38] sm:$0xff] %v993_v42  }
 0x119   :  { %1049 = vst [vmem:[%s1385_s4 + $0x78] sm:$0xff] %v1033_v43  }
 0x11a   :  { %1040 = vst [vmem:[%s1385_s4 + $0x30] sm:$0xff] %v988_v44   ;;  %1048 = vst [vmem:[%s1385_s4 + $0x70] sm:$0xff] %v1028_v24  }

// kernel: se_resnext_lstm_forward.32
= control target key start
LH: loop header
LB: loop body
LE: loop exit
PB: predicated region body
PF: predicated region fallthrough
CT: control target
= control target key end

     0   :  { %s1349_s1 = inlined_call_operand.vmem [shape: bf16[1,128,128], index: 1, kind: input, shape index: {}]   ;;  %s1350_s0 = inlined_call_operand.vmem [shape: bf16[256,128], index: 0, kind: input, shape index: {}]   ;;  %s1351_s2 = inlined_call_operand.vmem [shape: f32[1,1,128], index: 2, kind: input, shape index: {}]   ;;  %s1352_s3 = inlined_call_operand.vmem [shape: f32[1,1,128], index: 3, kind: input, shape index: {}]   ;;  %s1353_s4 = inlined_call_operand.vmem [shape: bf16[256,128], index: 4, kind: output, shape index: {}]  }
   0x1   :  { %v1106_v0 = vld [vmem:[%s1349_s1] sm:$0xff]   ;;  %v1107_v1 = vld [vmem:[%s1349_s1 + $0x8] sm:$0xff]   ;;  %v1108_v2 = vld [vmem:[%s1349_s1 + $0x10] sm:$0xff]  }
   0x2   :  { %1042 = vmatprep.subr.bf16.mxu0 %v1106_v0  ;;  %1090 = vmatprep.subr.bf16.mxu1 %v1106_v0  ;;  %v1109_v3 = vld [vmem:[%s1349_s1 + $0x18] sm:$0xff]   ;;  %v1114_v4 = vld [vmem:[%s1350_s0] sm:$0xff]   ;;  %v1111_v7 = vld [vmem:[%s1349_s1 + $0x28] sm:$0xff]  }
   0x3   :  { %1043 = vmatpush3.bf16.msra.mxu0 %v1106_v0  ;;  %1098 = vmatpush3.bf16.msra.mxu1 %v1106_v0  ;;  %v1115_v5 = vld [vmem:[%s1350_s0 + $0x40] sm:$0xff]   ;;  %v1112_v8 = vld [vmem:[%s1349_s1 + $0x30] sm:$0xff]   ;;  %v1113_v9 = vld [vmem:[%s1349_s1 + $0x38] sm:$0xff]  }
   0x4   :  { %1044 = vmatprep.subr.bf16.mxu0 %v1107_v1  ;;  %1091 = vmatprep.subr.bf16.mxu1 %v1107_v1  ;;  %v1110_v6 = vld [vmem:[%s1349_s1 + $0x20] sm:$0xff]   ;;  %v1116_v10 = vld [vmem:[%s1350_s0 + $0x8] sm:$0xff]   ;;  %v1118_v12 = vld [vmem:[%s1350_s0 + $0x10] sm:$0xff]  }
   0x5   :  { %1058 = vmatprep.mubr.bf16.mxu0 %v1114_v4  ;;  %1074 = vmatprep.mubr.bf16.mxu1 %v1115_v5  ;;  %v1117_v11 = vld [vmem:[%s1350_s0 + $0x48] sm:$0xff]   ;;  %v1119_v13 = vld [vmem:[%s1350_s0 + $0x50] sm:$0xff]   ;;  %v1120_v14 = vld [vmem:[%s1350_s0 + $0x18] sm:$0xff]  }
   0x6   :  { %v1121_v15 = vld [vmem:[%s1350_s0 + $0x58] sm:$0xff]   ;;  %v1122_v16 = vld [vmem:[%s1350_s0 + $0x20] sm:$0xff]   ;;  %v1124_v18 = vld [vmem:[%s1350_s0 + $0x28] sm:$0xff]  }
   0x7   :  { %1045 = vmatpush3.bf16.msra.mxu0 %v1107_v1  ;;  %1099 = vmatpush3.bf16.msra.mxu1 %v1107_v1  ;;  %v1123_v17 = vld [vmem:[%s1350_s0 + $0x60] sm:$0xff]   ;;  %v1125_v19 = vld [vmem:[%s1350_s0 + $0x68] sm:$0xff]   ;;  %v1126_v20 = vld [vmem:[%s1350_s0 + $0x30] sm:$0xff]  }
   0x8   :  { %1046 = vmatprep.subr.bf16.mxu0 %v1108_v2  ;;  %1092 = vmatprep.subr.bf16.mxu1 %v1108_v2  ;;  %v1127_v21 = vld [vmem:[%s1350_s0 + $0x70] sm:$0xff]   ;;  %v1128_v22 = vld [vmem:[%s1350_s0 + $0x38] sm:$0xff]   ;;  %v1230_v24 = vld [vmem:[%s1351_s2] ss:$0 sm:$0xff] }
   0x9   :  { %v1129_v23 = vld [vmem:[%s1350_s0 + $0x78] sm:$0xff]   ;;  %v1237_v31 = vld [vmem:[%s1352_s3] ss:$0 sm:$0xff] }
   0xb   :  { %1047 = vmatpush3.bf16.msra.mxu0 %v1108_v2  ;;  %1100 = vmatpush3.bf16.msra.mxu1 %v1108_v2 }
   0xc   :  { %1048 = vmatprep.subr.bf16.mxu0 %v1109_v3  ;;  %1093 = vmatprep.subr.bf16.mxu1 %v1109_v3 }
   0xf   :  { %1049 = vmatpush3.bf16.msra.mxu0 %v1109_v3  ;;  %1101 = vmatpush3.bf16.msra.mxu1 %v1109_v3 }
  0x10   :  { %1050 = vmatprep.subr.bf16.mxu0 %v1110_v6  ;;  %1094 = vmatprep.subr.bf16.mxu1 %v1110_v6 }
  0x13   :  { %1051 = vmatpush3.bf16.msra.mxu0 %v1110_v6  ;;  %1102 = vmatpush3.bf16.msra.mxu1 %v1110_v6 }
  0x14   :  { %1052 = vmatprep.subr.bf16.mxu0 %v1111_v7  ;;  %1095 = vmatprep.subr.bf16.mxu1 %v1111_v7 }
  0x17   :  { %1053 = vmatpush3.bf16.msra.mxu0 %v1111_v7  ;;  %1103 = vmatpush3.bf16.msra.mxu1 %v1111_v7 }
  0x18   :  { %1054 = vmatprep.subr.bf16.mxu0 %v1112_v8  ;;  %1096 = vmatprep.subr.bf16.mxu1 %v1112_v8 }
  0x1b   :  { %1055 = vmatpush3.bf16.msra.mxu0 %v1112_v8  ;;  %1104 = vmatpush3.bf16.msra.mxu1 %v1112_v8 }
  0x1c   :  { %1056 = vmatprep.subr.bf16.mxu0 %v1113_v9  ;;  %1097 = vmatprep.subr.bf16.mxu1 %v1113_v9 }
  0x1f   :  { %1057 = vmatpush3.bf16.msra.mxu0 %v1113_v9  ;;  %1105 = vmatpush3.bf16.msra.mxu1 %v1113_v9 }
  0x22   :  { %1059 = vmatmul.mubr.bf16.vlgmr.msra.gmra.mrb[0].mxu0 %v1116_v10  ;;  %1075 = vmatmul.mubr.bf16.vlgmr.msra.gmra.mrb[0].mxu1 %v1117_v11 }
  0x23   :  { %1062 = vmatprep.mubr.bf16.mxu0 %v1118_v12  ;;  %1078 = vmatprep.mubr.bf16.mxu1 %v1119_v13 }
  0x2a   :  { %1063 = vmatmul.mubr.bf16.gmra.mrb[4].mxu0 %v1120_v14  ;;  %1079 = vmatmul.mubr.bf16.gmra.mrb[4].mxu1 %v1121_v15 }
  0x2b   :  { %1066 = vmatprep.mubr.bf16.mxu0 %v1122_v16  ;;  %1082 = vmatprep.mubr.bf16.mxu1 %v1123_v17 }
  0x32   :  { %1067 = vmatmul.mubr.bf16.gmra.mrb[8].mxu0 %v1124_v18  ;;  %1083 = vmatmul.mubr.bf16.gmra.mrb[8].mxu1 %v1125_v19 }
  0x33   :  { %1070 = vmatprep.mubr.bf16.mxu0 %v1126_v20  ;;  %1086 = vmatprep.mubr.bf16.mxu1 %v1127_v21 }
  0x3a   :  { %1071 = vmatmul.mubr.bf16.gmra.mrb[12].mxu0 %v1128_v22  ;;  %1087 = vmatmul.mubr.bf16.gmra.mrb[12].mxu1 %v1129_v23 }
  0xf5   :  { %v1060_v25 = vpop.f32.mrb[0].mxu0  ;;  %v1076_v26 = vpop.f32.mrb[0].mxu1 }
  0xf6   :  { %v575_v27 = vmul.f32 %v1060_v25, %v1230_v24  ;;  %v591_v28 = vmul.f32 %v1076_v26, %v1230_v24  ;;  %v340_v29 = vpop.f32.mrb[1].mxu0  ;;  %v404_v30 = vpop.f32.mrb[1].mxu1 }
  0xf7   :  { %v573_v32 = vmul.f32 %v1230_v24, %v340_v29  ;;  %v589_v33 = vmul.f32 %v1230_v24, %v404_v30  ;;  %v1061_v34 = vpop.f32.mrb[2].mxu0  ;;  %v1077_v35 = vpop.f32.mrb[2].mxu1 }
  0xf8   :  { %v576_v36 = vmul.f32 %v1061_v34, %v1230_v24  ;;  %v592_v37 = vmul.f32 %v1077_v35, %v1230_v24  ;;  %v343_v38 = vpop.f32.mrb[3].mxu0  ;;  %v407_v39 = vpop.f32.mrb[3].mxu1  ;;  %v614_v42 = vadd.f32 %v1237_v31, %v575_v27  ;;  %v630_v43 = vadd.f32 %v1237_v31, %v591_v28 }
  0xf9   :  { %v574_v40 = vmul.f32 %v1230_v24, %v343_v38  ;;  %v590_v41 = vmul.f32 %v1230_v24, %v407_v39  ;;  %v612_v46 = vadd.f32 %v1237_v31, %v573_v32  ;;  %v628_v47 = vadd.f32 %v1237_v31, %v589_v33 }
  0xfa   :  { %v615_v44 = vadd.f32 %v1237_v31, %v576_v36  ;;  %v631_v45 = vadd.f32 %v1237_v31, %v592_v37 }
  0xfb   :  { %v613_v48 = vadd.f32 %v1237_v31, %v574_v40  ;;  %v629_v49 = vadd.f32 %v1237_v31, %v590_v41 }
  0xfc   :  { %v931_v50 = vpack.c.bf16 %v615_v44, %v614_v42  ;;  %v971_v51 = vpack.c.bf16 %v631_v45, %v630_v43 }
  0xfd   :  { %v926_v52 = vpack.c.bf16 %v613_v48, %v612_v46  ;;  %v966_v53 = vpack.c.bf16 %v629_v49, %v628_v47  ;;  %v1064_v54 = vpop.f32.mrb[4].mxu0  ;;  %v1080_v55 = vpop.f32.mrb[4].mxu1 }
  0xfe   :  { %1003 = vst [vmem:[%s1353_s4 + $0x8] sm:$0xff] %v931_v50   ;;  %1011 = vst [vmem:[%s1353_s4 + $0x48] sm:$0xff] %v971_v51   ;;  %v579_v56 = vmul.f32 %v1064_v54, %v1230_v24  ;;  %v595_v57 = vmul.f32 %v1080_v55, %v1230_v24  ;;  %v356_v58 = vpop.f32.mrb[5].mxu0  ;;  %v420_v59 = vpop.f32.mrb[5].mxu1 }
  0xff   :  { %927 = vst [vmem:[%s1353_s4] sm:$0xff] %v926_v52   ;;  %1010 = vst [vmem:[%s1353_s4 + $0x40] sm:$0xff] %v966_v53   ;;  %v577_v60 = vmul.f32 %v1230_v24, %v356_v58  ;;  %v593_v61 = vmul.f32 %v1230_v24, %v420_v59  ;;  %v1065_v62 = vpop.f32.mrb[6].mxu0  ;;  %v1081_v63 = vpop.f32.mrb[6].mxu1 }
 0x100   :  { %v580_v0 = vmul.f32 %v1065_v62, %v1230_v24  ;;  %v596_v1 = vmul.f32 %v1081_v63, %v1230_v24  ;;  %v359_v2 = vpop.f32.mrb[7].mxu0  ;;  %v423_v3 = vpop.f32.mrb[7].mxu1  ;;  %v618_v6 = vadd.f32 %v1237_v31, %v579_v56  ;;  %v634_v7 = vadd.f32 %v1237_v31, %v595_v57 }
 0x101   :  { %v578_v4 = vmul.f32 %v1230_v24, %v359_v2  ;;  %v594_v5 = vmul.f32 %v1230_v24, %v423_v3  ;;  %v616_v10 = vadd.f32 %v1237_v31, %v577_v60  ;;  %v632_v11 = vadd.f32 %v1237_v31, %v593_v61 }
 0x102   :  { %v619_v8 = vadd.f32 %v1237_v31, %v580_v0  ;;  %v635_v9 = vadd.f32 %v1237_v31, %v596_v1 }
 0x103   :  { %v617_v12 = vadd.f32 %v1237_v31, %v578_v4  ;;  %v633_v13 = vadd.f32 %v1237_v31, %v594_v5 }
 0x104   :  { %v941_v14 = vpack.c.bf16 %v619_v8, %v618_v6  ;;  %v981_v15 = vpack.c.bf16 %v635_v9, %v634_v7 }
 0x105   :  { %v936_v16 = vpack.c.bf16 %v617_v12, %v616_v10  ;;  %v976_v17 = vpack.c.bf16 %v633_v13, %v632_v11  ;;  %v1068_v18 = vpop.f32.mrb[8].mxu0  ;;  %v1084_v19 = vpop.f32.mrb[8].mxu1 }
 0x106   :  { %1005 = vst [vmem:[%s1353_s4 + $0x18] sm:$0xff] %v941_v14   ;;  %1013 = vst [vmem:[%s1353_s4 + $0x58] sm:$0xff] %v981_v15   ;;  %v583_v20 = vmul.f32 %v1068_v18, %v1230_v24  ;;  %v599_v21 = vmul.f32 %v1084_v19, %v1230_v24  ;;  %v372_v22 = vpop.f32.mrb[9].mxu0  ;;  %v436_v23 = vpop.f32.mrb[9].mxu1 }
 0x107   :  { %1004 = vst [vmem:[%s1353_s4 + $0x10] sm:$0xff] %v936_v16   ;;  %1012 = vst [vmem:[%s1353_s4 + $0x50] sm:$0xff] %v976_v17   ;;  %v581_v25 = vmul.f32 %v1230_v24, %v372_v22  ;;  %v597_v26 = vmul.f32 %v1230_v24, %v436_v23  ;;  %v1069_v27 = vpop.f32.mrb[10].mxu0  ;;  %v1085_v28 = vpop.f32.mrb[10].mxu1 }
 0x108   :  { %v584_v29 = vmul.f32 %v1069_v27, %v1230_v24  ;;  %v600_v30 = vmul.f32 %v1085_v28, %v1230_v24  ;;  %v375_v32 = vpop.f32.mrb[11].mxu0  ;;  %v439_v33 = vpop.f32.mrb[11].mxu1  ;;  %v622_v36 = vadd.f32 %v1237_v31, %v583_v20  ;;  %v638_v37 = vadd.f32 %v1237_v31, %v599_v21 }
 0x109   :  { %v582_v34 = vmul.f32 %v1230_v24, %v375_v32  ;;  %v598_v35 = vmul.f32 %v1230_v24, %v439_v33  ;;  %v620_v40 = vadd.f32 %v1237_v31, %v581_v25  ;;  %v636_v41 = vadd.f32 %v1237_v31, %v597_v26 }
 0x10a   :  { %v623_v38 = vadd.f32 %v1237_v31, %v584_v29  ;;  %v639_v39 = vadd.f32 %v1237_v31, %v600_v30 }
 0x10b   :  { %v621_v42 = vadd.f32 %v1237_v31, %v582_v34  ;;  %v637_v43 = vadd.f32 %v1237_v31, %v598_v35 }
 0x10c   :  { %v951_v44 = vpack.c.bf16 %v623_v38, %v622_v36  ;;  %v991_v45 = vpack.c.bf16 %v639_v39, %v638_v37 }
 0x10d   :  { %v946_v46 = vpack.c.bf16 %v621_v42, %v620_v40  ;;  %v986_v47 = vpack.c.bf16 %v637_v43, %v636_v41  ;;  %v1072_v48 = vpop.f32.mrb[12].mxu0  ;;  %v1088_v49 = vpop.f32.mrb[12].mxu1 }
 0x10e   :  { %1007 = vst [vmem:[%s1353_s4 + $0x28] sm:$0xff] %v951_v44   ;;  %1015 = vst [vmem:[%s1353_s4 + $0x68] sm:$0xff] %v991_v45   ;;  %v587_v50 = vmul.f32 %v1072_v48, %v1230_v24  ;;  %v603_v51 = vmul.f32 %v1088_v49, %v1230_v24  ;;  %v388_v52 = vpop.f32.mrb[13].mxu0  ;;  %v452_v53 = vpop.f32.mrb[13].mxu1 }
 0x10f   :  { %1006 = vst [vmem:[%s1353_s4 + $0x20] sm:$0xff] %v946_v46   ;;  %1014 = vst [vmem:[%s1353_s4 + $0x60] sm:$0xff] %v986_v47   ;;  %v585_v54 = vmul.f32 %v1230_v24, %v388_v52  ;;  %v601_v55 = vmul.f32 %v1230_v24, %v452_v53  ;;  %v1073_v56 = vpop.f32.mrb[14].mxu0  ;;  %v1089_v57 = vpop.f32.mrb[14].mxu1 }
 0x110   :  { %v588_v58 = vmul.f32 %v1073_v56, %v1230_v24  ;;  %v604_v59 = vmul.f32 %v1089_v57, %v1230_v24  ;;  %v391_v60 = vpop.f32.mrb[15].mxu0  ;;  %v455_v61 = vpop.f32.mrb[15].mxu1  ;;  %v626_v0 = vadd.f32 %v1237_v31, %v587_v50  ;;  %v642_v1 = vadd.f32 %v1237_v31, %v603_v51 }
 0x111   :  { %v586_v62 = vmul.f32 %v1230_v24, %v391_v60  ;;  %v602_v63 = vmul.f32 %v1230_v24, %v455_v61  ;;  %v624_v4 = vadd.f32 %v1237_v31, %v585_v54  ;;  %v640_v5 = vadd.f32 %v1237_v31, %v601_v55 }
 0x112   :  { %v627_v2 = vadd.f32 %v1237_v31, %v588_v58  ;;  %v643_v3 = vadd.f32 %v1237_v31, %v604_v59 }
 0x113   :  { %v625_v6 = vadd.f32 %v1237_v31, %v586_v62  ;;  %v641_v7 = vadd.f32 %v1237_v31, %v602_v63 }
 0x114   :  { %v961_v8 = vpack.c.bf16 %v627_v2, %v626_v0  ;;  %v1001_v9 = vpack.c.bf16 %v643_v3, %v642_v1 }
 0x115   :  { %v956_v10 = vpack.c.bf16 %v625_v6, %v624_v4  ;;  %v996_v24 = vpack.c.bf16 %v641_v7, %v640_v5 }
 0x116   :  { %1009 = vst [vmem:[%s1353_s4 + $0x38] sm:$0xff] %v961_v8   ;;  %1017 = vst [vmem:[%s1353_s4 + $0x78] sm:$0xff] %v1001_v9  }
 0x117   :  { %1008 = vst [vmem:[%s1353_s4 + $0x30] sm:$0xff] %v956_v10   ;;  %1016 = vst [vmem:[%s1353_s4 + $0x70] sm:$0xff] %v996_v24  }

// kernel: se_resnext_lstm_forward.34
= control target key start
LH: loop header
LB: loop body
LE: loop exit
PB: predicated region body
PF: predicated region fallthrough
CT: control target
= control target key end

     0   :  { %s668_s18 = smov 0   ;;  %s670_s19 = smov 0   ;;  %s732_s0 = inlined_call_operand.vmem [shape: bf16[4,64,16], index: 0, kind: input, shape index: {}]   ;;  %s733_s1 = inlined_call_operand.vmem [shape: f32[16,4], index: 1, kind: input, shape index: {}]   ;;  %s734_s2 = inlined_call_operand.vmem [shape: f32[1,4], index: 2, kind: input, shape index: {}]   ;;  %s735_s3 = inlined_call_operand.vmem [shape: f32[4,16], index: 3, kind: input, shape index: {}]   ;;  %s736_s4 = inlined_call_operand.vmem [shape: f32[1,16], index: 4, kind: input, shape index: {}]   ;;  %s737_s5 = inlined_call_operand.vmem [shape: f32[4,1,16], index: 5, kind: output, shape index: {}]  }
   0x1   :  { %s672_s20 = smov 0  }
   0x2 LB: > { %s27_s21 = sadd.s32 1, %s629_s19  ;;  %p531_p0 = scmp.ge.s32.totalorder %s633_s20, 1  ;;  %s633_s20 = sphi %s672_s20, %s15_s20   ;;  %s629_s19 = sphi %s670_s19, %s739_s19   ;;  %s625_s18 = sphi %s668_s18, %s738_s18  }
   0x3   : > { %p29_p1 = scmp.ge.s32.totalorder %s27_s21, 4  ;;  %p206_p2 = scmp.lt.s32.totalorder %s633_s20, 5 }
   0x5   : > { %s741_s21 = smov (%p29_p1, %s27_s21), 0  ;;  %p207_p3 = pnand %p531_p0, %p206_p2 }
   0x6   : > { %v302_v0 = vld [vmem:[%s733_s1] sm:$0xff] (!%p207_p3)  ;;  %v303_v1 = vld [vmem:[%s733_s1 + $0x8] sm:$0xff] (!%p207_p3)  ;;  %p237_p4 = scmp.lt.s32.totalorder (!%p207_p3), %s625_s18, 3  ;;  %vm253_vm0 = vcmask (!%p207_p3), 122880   ;;  %v635_v2 = vmov (!%p207_p3), 0.0|0.0   ;;  %v636_v4 = vmov (!%p207_p3), 0.0  }
   0x7   : > { %210 = sbr.rel (%p207_p3) target bundleno = 516 (0x204), region = 40  ;;  %577 = vmatprep.subr.bf16.mxu0 (!%p207_p3), %v635_v2  ;;  %v578_v3 = vpack.c.bf16 (!%p207_p3), %v303_v1, %v302_v0  ;;  %254 = vst.msk [vmem:[#allocation2] sm:$0x1] (!%p207_p3), %vm253_vm0, %v636_v4  ;;  %572 = vmatprep.subr.mxu1 (!%p207_p3), %v636_v4  ;;  %vm637_vm1 = vmmov (!%p207_p3), 0   ;;  %vm272_vm2 = vcmask (!%p207_p3), 130048   ;;  %vm385_vm3 = vcmask (!%p207_p3), 1043456  }
   0x8   : > { %569 = vmatprep.mubr.msk.f32.mxu0 (!%p207_p3), %vm637_vm1, %v636_v4  ;;  %574 = vmatprep.mubr.msk.f32.mxu1 (!%p207_p3), %vm637_vm1, %v636_v4  ;;  %v379_v42 = vld [vmem:[%s735_s3] sm:$0xf] (!%p207_p3)  ;;  %vm381_vm4 = vcmask (!%p207_p3), 31744  }
   0x9   : > { %579 = vmatpush3.bf16.msra.mxu0 (!%p207_p3), %v578_v3  ;;  %573 = vmatpush3.msk.msra.mxu1 (!%p207_p3), %vm385_vm3, %v379_v42  ;;  %v304_v43 = vld [vmem:[%s734_s2] sm:$0x1] (!%p207_p3) }
   0xa   : > { %v380_v48 = vld [vmem:[%s736_s4] sm:$0x1] (!%p207_p3) }
   0xe   : > { %s743_s18 = smov (!%p237_p4, %s625_s18), 3  ;;  %v255_v37 = vld [vmem:[#allocation2] sm:$0x1] }
   0xf   : > { %s540_s26 = sshll.u32 %s743_s18, 5  ;;  %s248_s13 = scalar_lea.vmem %s737_s5, %s743_s18 }
  0x10   : > { %s244_s29 = scalar_lea.vmem %s732_s0, %s540_s26 }
  0x11   : > { %v542_v5 = vld [vmem:[%s244_s29] sm:$0xff]   ;;  %v557_v6 = vld [vmem:[%s244_s29 + $0x8] sm:$0xff]   ;;  %v558_v7 = vld [vmem:[%s244_s29 + $0x10] sm:$0xff]  }
  0x12   : > { %v543_v8 = vunpack.c.l.bf16 %v542_v5  ;;  %v544_v9 = vunpack.c.h.bf16 %v542_v5  ;;  %v547_v10 = vunpack.c.l.bf16 %v557_v6  ;;  %v548_v11 = vunpack.c.h.bf16 %v557_v6  ;;  %v559_v16 = vld [vmem:[%s244_s29 + $0x18] sm:$0xff]  }
  0x13   : > { %v551_v12 = vunpack.c.l.bf16 %v558_v7  ;;  %v552_v18 = vunpack.c.h.bf16 %v558_v7  ;;  %v555_v21 = vunpack.c.l.bf16 %v559_v16  ;;  %v556_v24 = vunpack.c.h.bf16 %v559_v16 }
  0x14   : > { %v273_v13 = vsel %vm272_vm2, %v543_v8, 0.0  ;;  %v274_v14 = vsel %vm272_vm2, %v544_v9, 0.0  ;;  %v276_v15 = vsel %vm272_vm2, %v547_v10, 0.0  ;;  %v278_v19 = vsel %vm272_vm2, %v548_v11, 0.0 }
  0x15   : > { %v275_v17 = vadd.f32 %v274_v14, %v273_v13  ;;  %v280_v22 = vsel %vm272_vm2, %v551_v12, 0.0  ;;  %v282_v25 = vsel %vm272_vm2, %v552_v18, 0.0  ;;  %v284_v27 = vsel %vm272_vm2, %v555_v21, 0.0 }
  0x16   : > { %v286_v29 = vsel %vm272_vm2, %v556_v24, 0.0 }
  0x17   : > { %v277_v20 = vadd.f32 %v276_v15, %v275_v17 }
  0x19   : > { %v279_v23 = vadd.f32 %v278_v19, %v277_v20 }
  0x1b   : > { %v281_v26 = vadd.f32 %v280_v22, %v279_v23 }
  0x1d   : > { %v283_v28 = vadd.f32 %v282_v25, %v281_v26 }
  0x1f   : > { %v285_v30 = vadd.f32 %v284_v27, %v283_v28 }
  0x21   : > { %v287_v31 = vadd.f32 %v286_v29, %v285_v30 }
  0x23   : > { %v288_v32 = vrot.slane %v287_v31, 4 }
  0x25   : > { %v289_v33 = vadd.f32 %v288_v32, %v287_v31 }
  0x27   : > { %v290_v34 = vrot.slane %v289_v33, 2 }
  0x29   : > { %v291_v35 = vadd.f32 %v290_v34, %v289_v33 }
  0x2b   : > { %v292_v36 = vrot.slane %v291_v35, 1 }
  0x2d   : > { %v293_v38 = vadd.f32 %v292_v36, %v291_v35 }
  0x2f   : > { %v294_v39 = vadd.f32 %v293_v38, %v255_v37 }
  0x31   : > { %296 = vst.msk [vmem:[#allocation2] sm:$0x1] %vm253_vm0, %v294_v39 }
  0x38   : > { %v300_v40 = vld [vmem:[#allocation2] sm:$0x1] }
  0x39   : > { %v301_v41 = vmul.f32 0.015625, %v300_v40 }
  0x3b   : > { %570 = vmatmul.mubr.msk.f32.vlgmr.msra.gmra.mrb[0].mxu0 %vm272_vm2, %v301_v41 }
 0x10e   : > { %v374_v44 = vpop.f32.mrb[0].mxu0 }
 0x10f   : > { %v375_v45 = vadd.f32 %v374_v44, %v304_v43  ;;  %v571_v46 = vpop.f32.mrb[1].mxu0 }
 0x111   : > { %v378_v47 = vmax.f32 %v375_v45, 0.0 }
 0x113   : > { %575 = vmatmul.mubr.msk.f32.vlgmr.msra.gmra.mrb[0].mxu1 %vm381_vm4, %v378_v47 }
 0x1e6   : > { %v455_v49 = vpop.f32.mrb[0].mxu1 }
 0x1e7   : > { %v456_v50 = vadd.f32 %v455_v49, %v380_v48  ;;  %v576_v51 = vpop.f32.mrb[1].mxu1 }
 0x1e9   : > { %v537_v52 = vmul.f32 -1.442695, %v456_v50 }
 0x1eb   : > { %607 = vpow2.f32 %v537_v52 }
 0x1f5   : > { %v608_v53 = vpop.eup %607 }
 0x1f6   : > { %v462_v54 = vadd.f32 1.0, %v608_v53 }
 0x1f8   : > { %609 = vrcp.f32 %v462_v54 }
 0x202   : > { %v610_v55 = vpop.eup %609 }
 0x203   : > { %465 = vst.msk [vmem:[%s248_s13] sm:$0x1] %vm253_vm0, %v610_v55 }
 0x204 PF: > { %s15_s20 = sadd.s32 1, %s633_s20   ;;  %s738_s18 = smov %s629_s19 }
 0x205   : > { %p12_p5 = scmp.ge.s32.totalorder %s15_s20, 6   ;;  %s739_s19 = smov %s741_s21 }
 0x207   :  { %14 = sbr.rel (!%p12_p5) target bundleno = 2 (0x2), region = 78 }

// kernel: se_resnext_lstm_forward.35
= control target key start
LH: loop header
LB: loop body
LE: loop exit
PB: predicated region body
PF: predicated region fallthrough
CT: control target
= control target key end

     0   :  { %s617_s12 = smov 0   ;;  %s619_s13 = smov 0   ;;  %s669_s0 = inlined_call_operand.vmem [shape: bf16[4,64,16], index: 0, kind: input, shape index: {}]   ;;  %s670_s1 = inlined_call_operand.vmem [shape: f32[4,1,16], index: 1, kind: input, shape index: {}]   ;;  %s671_s2 = inlined_call_operand.vmem [shape: bf16[4,64,16], index: 2, kind: input, shape index: {}]   ;;  %s672_s3 = inlined_call_operand.vmem [shape: bf16[4,64,16], index: 3, kind: output, shape index: {}]  }
   0x1   :  { %s621_s14 = smov 0  }
   0x2 LB: > { %s25_s15 = sadd.s32 1, %s591_s13  ;;  %p482_p0 = scmp.ge.s32.totalorder %s595_s14, 1  ;;  %s595_s14 = sphi %s621_s14, %s13_s14   ;;  %s591_s13 = sphi %s619_s13, %s674_s13   ;;  %s587_s12 = sphi %s617_s12, %s673_s12  }
   0x3   : > { %p27_p1 = scmp.ge.s32.totalorder %s25_s15, 4  ;;  %p183_p2 = scmp.lt.s32.totalorder %s595_s14, 5 }
   0x5   : > { %s676_s15 = smov (%p27_p1, %s25_s15), 0  ;;  %p184_p3 = pnand %p482_p0, %p183_p2 }
   0x6   : > { %p228_p4 = scmp.lt.s32.totalorder (!%p184_p3), %s587_s12, 3  ;;  %vm355_vm0 = vcmask (!%p184_p3), 125952  }
   0x7   : > { %187 = sbr.rel (%p184_p3) target bundleno = 37 (0x25), region = 32 }
   0xe   : > { %s678_s12 = smov (!%p228_p4, %s587_s12), 3 }
   0xf   : > { %s635_s16 = sshll.u32 %s678_s12, 5  ;;  %s239_s19 = scalar_lea.vmem %s670_s1, %s678_s12 }
  0x10   : > { %s235_s22 = scalar_lea.vmem %s669_s0, %s635_s16  ;;  %s248_s25 = scalar_lea.vmem %s671_s2, %s635_s16  ;;  %v489_v0 = vld [vmem:[%s239_s19] ss:$0 sm:$0xff] }
  0x11   : > { %v512_v1 = vld [vmem:[%s235_s22] sm:$0xff]   ;;  %v543_v3 = vld [vmem:[%s235_s22 + $0x8] sm:$0xff]   ;;  %v544_v9 = vld [vmem:[%s235_s22 + $0x10] sm:$0xff]   ;;  %s258_s28 = scalar_lea.vmem %s672_s3, %s635_s16 }
  0x12   : > { %v528_v2 = vld [vmem:[%s248_s25] sm:$0xff]   ;;  %v513_v4 = vunpack.c.l.bf16 %v512_v1  ;;  %v514_v6 = vunpack.c.h.bf16 %v512_v1  ;;  %v546_v8 = vld [vmem:[%s248_s25 + $0x8] sm:$0xff]   ;;  %v547_v10 = vld [vmem:[%s248_s25 + $0x10] sm:$0xff]   ;;  %v517_v11 = vunpack.c.l.bf16 %v543_v3  ;;  %v518_v13 = vunpack.c.h.bf16 %v543_v3 }
  0x13   : > { %v529_v5 = vunpack.c.l.bf16 %v528_v2  ;;  %v530_v7 = vunpack.c.h.bf16 %v528_v2  ;;  %v533_v12 = vunpack.c.l.bf16 %v546_v8  ;;  %v534_v14 = vunpack.c.h.bf16 %v546_v8  ;;  %v545_v15 = vld [vmem:[%s235_s22 + $0x18] sm:$0xff]  }
  0x14   : > { %v283_v16 = vmul.f32 %v513_v4, %v489_v0  ;;  %v284_v17 = vmul.f32 %v514_v6, %v489_v0  ;;  %v521_v18 = vunpack.c.l.bf16 %v544_v9  ;;  %v537_v19 = vunpack.c.l.bf16 %v547_v10  ;;  %v548_v20 = vld [vmem:[%s248_s25 + $0x18] sm:$0xff]  }
  0x15   : > { %v285_v21 = vmul.f32 %v517_v11, %v489_v0  ;;  %v286_v22 = vmul.f32 %v518_v13, %v489_v0  ;;  %v522_v23 = vunpack.c.h.bf16 %v544_v9  ;;  %v538_v24 = vunpack.c.h.bf16 %v547_v10 }
  0x16   : > { %v307_v25 = vadd.f32 %v529_v5, %v283_v16  ;;  %v308_v26 = vadd.f32 %v530_v7, %v284_v17  ;;  %v287_v27 = vmul.f32 %v521_v18, %v489_v0  ;;  %v525_v28 = vunpack.c.l.bf16 %v545_v15 }
  0x17   : > { %v309_v29 = vadd.f32 %v533_v12, %v285_v21  ;;  %v310_v30 = vadd.f32 %v534_v14, %v286_v22  ;;  %v288_v31 = vmul.f32 %v522_v23, %v489_v0  ;;  %v541_v32 = vunpack.c.l.bf16 %v548_v20 }
  0x18   : > { %v315_v33 = vmax.f32 %v307_v25, 0.0  ;;  %v316_v34 = vmax.f32 %v308_v26, 0.0  ;;  %v311_v35 = vadd.f32 %v537_v19, %v287_v27  ;;  %v289_v36 = vmul.f32 %v525_v28, %v489_v0 }
  0x19   : > { %v317_v37 = vmax.f32 %v309_v29, 0.0  ;;  %v318_v38 = vmax.f32 %v310_v30, 0.0  ;;  %v312_v39 = vadd.f32 %v538_v24, %v288_v31  ;;  %v526_v40 = vunpack.c.h.bf16 %v545_v15 }
  0x1a   : > { %v503_v41 = vpack.c.bf16 %v315_v33, %v315_v33  ;;  %v504_v42 = vpack.c.bf16 %v316_v34, %v316_v34  ;;  %v319_v43 = vmax.f32 %v311_v35, 0.0  ;;  %v313_v44 = vadd.f32 %v541_v32, %v289_v36 }
  0x1b   : > { %v505_v45 = vpack.c.bf16 %v317_v37, %v317_v37  ;;  %v506_v46 = vpack.c.bf16 %v318_v38, %v318_v38  ;;  %v320_v47 = vmax.f32 %v312_v39, 0.0  ;;  %v290_v48 = vmul.f32 %v526_v40, %v489_v0 }
  0x1c   : > { %356 = vst.msk [vmem:[%s258_s28] sm:$0xf] %vm355_vm0, %v503_v41  ;;  %357 = vst.msk [vmem:[%s258_s28 + $0x4] sm:$0xf] %vm355_vm0, %v504_v42  ;;  %v507_v49 = vpack.c.bf16 %v319_v43, %v319_v43  ;;  %v321_v50 = vmax.f32 %v313_v44, 0.0  ;;  %v542_v51 = vunpack.c.h.bf16 %v548_v20 }
  0x1d   : > { %358 = vst.msk [vmem:[%s258_s28 + $0x8] sm:$0xf] %vm355_vm0, %v505_v45  ;;  %359 = vst.msk [vmem:[%s258_s28 + $0xc] sm:$0xf] %vm355_vm0, %v506_v46  ;;  %v508_v52 = vpack.c.bf16 %v320_v47, %v320_v47 }
  0x1e   : > { %360 = vst.msk [vmem:[%s258_s28 + $0x10] sm:$0xf] %vm355_vm0, %v507_v49  ;;  %v509_v53 = vpack.c.bf16 %v321_v50, %v321_v50  ;;  %v314_v54 = vadd.f32 %v542_v51, %v290_v48 }
  0x1f   : > { %361 = vst.msk [vmem:[%s258_s28 + $0x14] sm:$0xf] %vm355_vm0, %v508_v52 }
  0x20   : > { %362 = vst.msk [vmem:[%s258_s28 + $0x18] sm:$0xf] %vm355_vm0, %v509_v53  ;;  %v322_v55 = vmax.f32 %v314_v54, 0.0 }
  0x22   : > { %v510_v56 = vpack.c.bf16 %v322_v55, %v322_v55 }
  0x24   : > { %363 = vst.msk [vmem:[%s258_s28 + $0x1c] sm:$0xf] %vm355_vm0, %v510_v56 }
  0x25 PF: > { %s13_s14 = sadd.s32 1, %s595_s14   ;;  %s673_s12 = smov %s591_s13 }
  0x26   : > { %p10_p5 = scmp.ge.s32.totalorder %s13_s14, 6   ;;  %s674_s13 = smov %s676_s15 }
  0x28   :  { %12 = sbr.rel (!%p10_p5) target bundleno = 2 (0x2), region = 68 }

// kernel: se_resnext_lstm_forward.38
= control target key start
LH: loop header
LB: loop body
LE: loop exit
PB: predicated region body
PF: predicated region fallthrough
CT: control target
= control target key end

     0   :  { %s549_s1 = inlined_call_operand.vmem [shape: bf16[1,128,128], index: 1, kind: input, shape index: {}]   ;;  %s550_s0 = inlined_call_operand.vmem [shape: bf16[64,128], index: 0, kind: input, shape index: {}]   ;;  %s551_s2 = inlined_call_operand.vmem [shape: f32[1,1,128], index: 2, kind: input, shape index: {}]   ;;  %s552_s3 = inlined_call_operand.vmem [shape: f32[1,1,128], index: 3, kind: input, shape index: {}]   ;;  %s553_s4 = inlined_call_operand.vmem [shape: bf16[64,128], index: 4, kind: output, shape index: {}]  }
   0x1   :  { %v458_v0 = vld [vmem:[%s549_s1] sm:$0xff]   ;;  %v459_v1 = vld [vmem:[%s549_s1 + $0x8] sm:$0xff]   ;;  %v460_v2 = vld [vmem:[%s549_s1 + $0x10] sm:$0xff]  }
   0x2   :  { %418 = vmatprep.subr.bf16.mxu0 %v458_v0  ;;  %442 = vmatprep.subr.bf16.mxu1 %v458_v0  ;;  %v461_v3 = vld [vmem:[%s549_s1 + $0x18] sm:$0xff]   ;;  %v466_v4 = vld [vmem:[%s550_s0] sm:$0xff]   ;;  %v467_v5 = vld [vmem:[%s550_s0 + $0x10] sm:$0xff]  }
   0x3   :  { %419 = vmatpush3.bf16.msra.mxu0 %v458_v0  ;;  %450 = vmatpush3.bf16.msra.mxu1 %v458_v0  ;;  %v462_v6 = vld [vmem:[%s549_s1 + $0x20] sm:$0xff]   ;;  %v463_v7 = vld [vmem:[%s549_s1 + $0x28] sm:$0xff]   ;;  %v464_v8 = vld [vmem:[%s549_s1 + $0x30] sm:$0xff]  }
   0x4   :  { %420 = vmatprep.subr.bf16.mxu0 %v459_v1  ;;  %443 = vmatprep.subr.bf16.mxu1 %v459_v1  ;;  %v465_v9 = vld [vmem:[%s549_s1 + $0x38] sm:$0xff]   ;;  %v468_v10 = vld [vmem:[%s550_s0 + $0x8] sm:$0xff]   ;;  %v365_v12 = vld [vmem:[%s551_s2] ss:$0 sm:$0xff] }
   0x5   :  { %434 = vmatprep.mubr.bf16.mxu0 %v466_v4  ;;  %438 = vmatprep.mubr.bf16.mxu1 %v467_v5  ;;  %v469_v11 = vld [vmem:[%s550_s0 + $0x18] sm:$0xff]   ;;  %v366_v19 = vld [vmem:[%s552_s3] ss:$0 sm:$0xff] }
   0x7   :  { %421 = vmatpush3.bf16.msra.mxu0 %v459_v1  ;;  %451 = vmatpush3.bf16.msra.mxu1 %v459_v1 }
   0x8   :  { %422 = vmatprep.subr.bf16.mxu0 %v460_v2  ;;  %444 = vmatprep.subr.bf16.mxu1 %v460_v2 }
   0xb   :  { %423 = vmatpush3.bf16.msra.mxu0 %v460_v2  ;;  %452 = vmatpush3.bf16.msra.mxu1 %v460_v2 }
   0xc   :  { %424 = vmatprep.subr.bf16.mxu0 %v461_v3  ;;  %445 = vmatprep.subr.bf16.mxu1 %v461_v3 }
   0xf   :  { %425 = vmatpush3.bf16.msra.mxu0 %v461_v3  ;;  %453 = vmatpush3.bf16.msra.mxu1 %v461_v3 }
  0x10   :  { %426 = vmatprep.subr.bf16.mxu0 %v462_v6  ;;  %446 = vmatprep.subr.bf16.mxu1 %v462_v6 }
  0x13   :  { %427 = vmatpush3.bf16.msra.mxu0 %v462_v6  ;;  %454 = vmatpush3.bf16.msra.mxu1 %v462_v6 }
  0x14   :  { %428 = vmatprep.subr.bf16.mxu0 %v463_v7  ;;  %447 = vmatprep.subr.bf16.mxu1 %v463_v7 }
  0x17   :  { %429 = vmatpush3.bf16.msra.mxu0 %v463_v7  ;;  %455 = vmatpush3.bf16.msra.mxu1 %v463_v7 }
  0x18   :  { %430 = vmatprep.subr.bf16.mxu0 %v464_v8  ;;  %448 = vmatprep.subr.bf16.mxu1 %v464_v8 }
  0x1b   :  { %431 = vmatpush3.bf16.msra.mxu0 %v464_v8  ;;  %456 = vmatpush3.bf16.msra.mxu1 %v464_v8 }
  0x1c   :  { %432 = vmatprep.subr.bf16.mxu0 %v465_v9  ;;  %449 = vmatprep.subr.bf16.mxu1 %v465_v9 }
  0x1f   :  { %433 = vmatpush3.bf16.msra.mxu0 %v465_v9  ;;  %457 = vmatpush3.bf16.msra.mxu1 %v465_v9 }
  0x22   :  { %435 = vmatmul.mubr.bf16.vlgmr.msra.gmra.mrb[0].mxu0 %v468_v10  ;;  %439 = vmatmul.mubr.bf16.vlgmr.msra.gmra.mrb[0].mxu1 %v469_v11 }
  0xf5   :  { %v436_v13 = vpop.f32.mrb[0].mxu0  ;;  %v440_v14 = vpop.f32.mrb[0].mxu1 }
  0xf6   :  { %v263_v15 = vmul.f32 %v436_v13, %v365_v12  ;;  %v267_v16 = vmul.f32 %v440_v14, %v365_v12  ;;  %v196_v17 = vpop.f32.mrb[1].mxu0  ;;  %v212_v18 = vpop.f32.mrb[1].mxu1 }
  0xf7   :  { %v261_v20 = vmul.f32 %v365_v12, %v196_v17  ;;  %v265_v21 = vmul.f32 %v365_v12, %v212_v18  ;;  %v437_v22 = vpop.f32.mrb[2].mxu0  ;;  %v441_v23 = vpop.f32.mrb[2].mxu1 }
  0xf8   :  { %v264_v24 = vmul.f32 %v437_v22, %v365_v12  ;;  %v268_v25 = vmul.f32 %v441_v23, %v365_v12  ;;  %v199_v26 = vpop.f32.mrb[3].mxu0  ;;  %v215_v27 = vpop.f32.mrb[3].mxu1  ;;  %v278_v30 = vadd.f32 %v366_v19, %v263_v15  ;;  %v282_v31 = vadd.f32 %v366_v19, %v267_v16 }
  0xf9   :  { %v262_v28 = vmul.f32 %v365_v12, %v199_v26  ;;  %v266_v29 = vmul.f32 %v365_v12, %v215_v27  ;;  %v276_v34 = vadd.f32 %v366_v19, %v261_v20  ;;  %v280_v35 = vadd.f32 %v366_v19, %v265_v21 }
  0xfa   :  { %v279_v32 = vadd.f32 %v366_v19, %v264_v24  ;;  %v283_v33 = vadd.f32 %v366_v19, %v268_v25 }
  0xfb   :  { %v277_v36 = vadd.f32 %v366_v19, %v262_v28  ;;  %v281_v37 = vadd.f32 %v366_v19, %v266_v29 }
  0xfc   :  { %v391_v38 = vpack.c.bf16 %v279_v32, %v278_v30  ;;  %v401_v39 = vpack.c.bf16 %v283_v33, %v282_v31 }
  0xfd   :  { %v386_v40 = vpack.c.bf16 %v277_v36, %v276_v34  ;;  %v396_v41 = vpack.c.bf16 %v281_v37, %v280_v35 }
  0xfe   :  { %403 = vst [vmem:[%s553_s4 + $0x8] sm:$0xff] %v391_v38   ;;  %405 = vst [vmem:[%s553_s4 + $0x18] sm:$0xff] %v401_v39  }
  0xff   :  { %387 = vst [vmem:[%s553_s4] sm:$0xff] %v386_v40   ;;  %404 = vst [vmem:[%s553_s4 + $0x10] sm:$0xff] %v396_v41  }

// kernel: se_resnext_lstm_forward.40
= control target key start
LH: loop header
LB: loop body
LE: loop exit
PB: predicated region body
PF: predicated region fallthrough
CT: control target
= control target key end

     0   :  { %s635_s18 = smov 0   ;;  %s637_s19 = smov 0   ;;  %s699_s0 = inlined_call_operand.vmem [shape: bf16[4,16,32], index: 0, kind: input, shape index: {}]   ;;  %s700_s1 = inlined_call_operand.vmem [shape: f32[32,8], index: 1, kind: input, shape index: {}]   ;;  %s701_s2 = inlined_call_operand.vmem [shape: f32[1,8], index: 2, kind: input, shape index: {}]   ;;  %s702_s3 = inlined_call_operand.vmem [shape: f32[8,32], index: 3, kind: input, shape index: {}]   ;;  %s703_s4 = inlined_call_operand.vmem [shape: f32[1,32], index: 4, kind: input, shape index: {}]   ;;  %s704_s5 = inlined_call_operand.vmem [shape: f32[4,1,32], index: 5, kind: output, shape index: {}]  }
   0x1   :  { %s639_s20 = smov 0  }
   0x2 LB: > { %s27_s21 = sadd.s32 1, %s596_s19  ;;  %p505_p0 = scmp.ge.s32.totalorder %s600_s20, 1  ;;  %s600_s20 = sphi %s639_s20, %s15_s20   ;;  %s596_s19 = sphi %s637_s19, %s706_s19   ;;  %s592_s18 = sphi %s635_s18, %s705_s18  }
   0x3   : > { %p29_p1 = scmp.ge.s32.totalorder %s27_s21, 4  ;;  %p206_p2 = scmp.lt.s32.totalorder %s600_s20, 5 }
   0x5   : > { %s708_s21 = smov (%p29_p1, %s27_s21), 0  ;;  %p207_p3 = pnand %p505_p0, %p206_p2 }
   0x6   : > { %v278_v0 = vld [vmem:[%s700_s1] sm:$0xff] (!%p207_p3)  ;;  %v279_v1 = vld [vmem:[%s700_s1 + $0x8] sm:$0xff] (!%p207_p3)  ;;  %v280_v2 = vld [vmem:[%s700_s1 + $0x10] sm:$0xff] (!%p207_p3)  ;;  %vm253_vm0 = vcmask (!%p207_p3), 253952   ;;  %v602_v3 = vmov (!%p207_p3), 0.0|0.0   ;;  %v603_v6 = vmov (!%p207_p3), 0.0  }
   0x7   : > { %210 = sbr.rel (%p207_p3) target bundleno = 504 (0x1f8), region = 40  ;;  %541 = vmatprep.subr.bf16.mxu0 (!%p207_p3), %v602_v3  ;;  %v542_v4 = vpack.c.bf16 (!%p207_p3), %v279_v1, %v278_v0  ;;  %v281_v5 = vld [vmem:[%s700_s1 + $0x18] sm:$0xff] (!%p207_p3)  ;;  %254 = vst.msk [vmem:[#allocation2] sm:$0x1] (!%p207_p3), %vm253_vm0, %v603_v6  ;;  %p237_p4 = scmp.lt.s32.totalorder (!%p207_p3), %s592_s18, 3  ;;  %536 = vmatprep.subr.mxu1 (!%p207_p3), %v603_v6  ;;  %vm604_vm1 = vmmov (!%p207_p3), 0  }
   0x8   : > { %533 = vmatprep.mubr.msk.f32.mxu0 (!%p207_p3), %vm604_vm1, %v603_v6  ;;  %538 = vmatprep.mubr.msk.f32.mxu1 (!%p207_p3), %vm604_vm1, %v603_v6  ;;  %v545_v7 = vpack.c.bf16 (!%p207_p3), %v281_v5, %v280_v2  ;;  %vm260_vm2 = vcmask (!%p207_p3), 261120   ;;  %v357_v24 = vld [vmem:[%s702_s3] sm:$0xff] (!%p207_p3)  ;;  %vm359_vm3 = vcmask (!%p207_p3), 64512  }
   0x9   : > { %543 = vmatpush3.bf16.msra.mxu0 (!%p207_p3), %v542_v4  ;;  %537 = vmatpush3.msra.mxu1 (!%p207_p3), %v357_v24  ;;  %v282_v25 = vld [vmem:[%s701_s2] sm:$0x1] (!%p207_p3) }
   0xa   : > { %544 = vmatprep.subr.bf16.mxu0 (!%p207_p3), %v602_v3  ;;  %v358_v30 = vld [vmem:[%s703_s4] sm:$0x1] (!%p207_p3) }
   0xd   : > { %546 = vmatpush3.bf16.msra.mxu0 (!%p207_p3), %v545_v7 }
   0xe   : > { %s710_s18 = smov (!%p237_p4, %s592_s18), 3  ;;  %v255_v19 = vld [vmem:[#allocation2] sm:$0x1] }
   0xf   : > { %s513_s30 = sshll.u32 %s710_s18, 3  ;;  %s248_s17 = scalar_lea.vmem %s704_s5, %s710_s18 }
  0x10   : > { %s244_s8 = scalar_lea.vmem %s699_s0, %s513_s30 }
  0x11   : > { %v515_v8 = vld [vmem:[%s244_s8] sm:$0xff]  }
  0x12   : > { %v516_v9 = vunpack.c.l.bf16 %v515_v8  ;;  %v517_v10 = vunpack.c.h.bf16 %v515_v8 }
  0x14   : > { %v261_v11 = vsel %vm260_vm2, %v516_v9, 0.0  ;;  %v262_v12 = vsel %vm260_vm2, %v517_v10, 0.0 }
  0x15   : > { %v263_v13 = vadd.f32 %v262_v12, %v261_v11 }
  0x17   : > { %v264_v14 = vrot.slane %v263_v13, 4 }
  0x19   : > { %v265_v15 = vadd.f32 %v264_v14, %v263_v13 }
  0x1b   : > { %v266_v16 = vrot.slane %v265_v15, 2 }
  0x1d   : > { %v267_v17 = vadd.f32 %v266_v16, %v265_v15 }
  0x1f   : > { %v268_v18 = vrot.slane %v267_v17, 1 }
  0x21   : > { %v269_v20 = vadd.f32 %v268_v18, %v267_v17 }
  0x23   : > { %v270_v21 = vadd.f32 %v269_v20, %v255_v19 }
  0x25   : > { %272 = vst.msk [vmem:[#allocation2] sm:$0x1] %vm253_vm0, %v270_v21 }
  0x2c   : > { %v276_v22 = vld [vmem:[#allocation2] sm:$0x1] }
  0x2d   : > { %v277_v23 = vmul.f32 0.0625, %v276_v22 }
  0x2f   : > { %534 = vmatmul.mubr.msk.f32.vlgmr.msra.gmra.mrb[0].mxu0 %vm260_vm2, %v277_v23 }
 0x102   : > { %v352_v26 = vpop.f32.mrb[0].mxu0 }
 0x103   : > { %v353_v27 = vadd.f32 %v352_v26, %v282_v25  ;;  %v535_v28 = vpop.f32.mrb[1].mxu0 }
 0x105   : > { %v356_v29 = vmax.f32 %v353_v27, 0.0 }
 0x107   : > { %539 = vmatmul.mubr.msk.f32.vlgmr.msra.gmra.mrb[0].mxu1 %vm359_vm3, %v356_v29 }
 0x1da   : > { %v429_v31 = vpop.f32.mrb[0].mxu1 }
 0x1db   : > { %v430_v32 = vadd.f32 %v429_v31, %v358_v30  ;;  %v540_v33 = vpop.f32.mrb[1].mxu1 }
 0x1dd   : > { %v510_v34 = vmul.f32 -1.442695, %v430_v32 }
 0x1df   : > { %574 = vpow2.f32 %v510_v34 }
 0x1e9   : > { %v575_v35 = vpop.eup %574 }
 0x1ea   : > { %v436_v36 = vadd.f32 1.0, %v575_v35 }
 0x1ec   : > { %576 = vrcp.f32 %v436_v36 }
 0x1f6   : > { %v577_v37 = vpop.eup %576 }
 0x1f7   : > { %439 = vst.msk [vmem:[%s248_s17] sm:$0x1] %vm253_vm0, %v577_v37 }
 0x1f8 PF: > { %s15_s20 = sadd.s32 1, %s600_s20   ;;  %s705_s18 = smov %s596_s19 }
 0x1f9   : > { %p12_p5 = scmp.ge.s32.totalorder %s15_s20, 6   ;;  %s706_s19 = smov %s708_s21 }
 0x1fb   :  { %14 = sbr.rel (!%p12_p5) target bundleno = 2 (0x2), region = 78 }

// kernel: se_resnext_lstm_forward.37
= control target key start
LH: loop header
LB: loop body
LE: loop exit
PB: predicated region body
PF: predicated region fallthrough
CT: control target
= control target key end

     0   :  { %s557_s1 = inlined_call_operand.vmem [shape: bf16[1,128,128], index: 1, kind: input, shape index: {}]   ;;  %s558_s0 = inlined_call_operand.vmem [shape: bf16[64,128], index: 0, kind: input, shape index: {}]   ;;  %s559_s2 = inlined_call_operand.vmem [shape: f32[1,1,128], index: 2, kind: input, shape index: {}]   ;;  %s560_s3 = inlined_call_operand.vmem [shape: f32[1,1,128], index: 3, kind: input, shape index: {}]   ;;  %s561_s4 = inlined_call_operand.vmem [shape: bf16[64,128], index: 4, kind: output, shape index: {}]  }
   0x1   :  { %v466_v0 = vld [vmem:[%s557_s1] sm:$0xff]   ;;  %v467_v1 = vld [vmem:[%s557_s1 + $0x8] sm:$0xff]   ;;  %v468_v2 = vld [vmem:[%s557_s1 + $0x10] sm:$0xff]  }
   0x2   :  { %426 = vmatprep.subr.bf16.mxu0 %v466_v0  ;;  %450 = vmatprep.subr.bf16.mxu1 %v466_v0  ;;  %v469_v3 = vld [vmem:[%s557_s1 + $0x18] sm:$0xff]   ;;  %v474_v4 = vld [vmem:[%s558_s0] sm:$0xff]   ;;  %v475_v5 = vld [vmem:[%s558_s0 + $0x10] sm:$0xff]  }
   0x3   :  { %427 = vmatpush3.bf16.msra.mxu0 %v466_v0  ;;  %458 = vmatpush3.bf16.msra.mxu1 %v466_v0  ;;  %v470_v6 = vld [vmem:[%s557_s1 + $0x20] sm:$0xff]   ;;  %v471_v7 = vld [vmem:[%s557_s1 + $0x28] sm:$0xff]   ;;  %v472_v8 = vld [vmem:[%s557_s1 + $0x30] sm:$0xff]  }
   0x4   :  { %428 = vmatprep.subr.bf16.mxu0 %v467_v1  ;;  %451 = vmatprep.subr.bf16.mxu1 %v467_v1  ;;  %v473_v9 = vld [vmem:[%s557_s1 + $0x38] sm:$0xff]   ;;  %v476_v10 = vld [vmem:[%s558_s0 + $0x8] sm:$0xff]   ;;  %v373_v12 = vld [vmem:[%s559_s2] ss:$0 sm:$0xff] }
   0x5   :  { %442 = vmatprep.mubr.bf16.mxu0 %v474_v4  ;;  %446 = vmatprep.mubr.bf16.mxu1 %v475_v5  ;;  %v477_v11 = vld [vmem:[%s558_s0 + $0x18] sm:$0xff]   ;;  %v374_v14 = vld [vmem:[%s560_s3] ss:$0 sm:$0xff] }
   0x7   :  { %429 = vmatpush3.bf16.msra.mxu0 %v467_v1  ;;  %459 = vmatpush3.bf16.msra.mxu1 %v467_v1 }
   0x8   :  { %430 = vmatprep.subr.bf16.mxu0 %v468_v2  ;;  %452 = vmatprep.subr.bf16.mxu1 %v468_v2 }
   0xb   :  { %431 = vmatpush3.bf16.msra.mxu0 %v468_v2  ;;  %460 = vmatpush3.bf16.msra.mxu1 %v468_v2 }
   0xc   :  { %432 = vmatprep.subr.bf16.mxu0 %v469_v3  ;;  %453 = vmatprep.subr.bf16.mxu1 %v469_v3 }
   0xf   :  { %433 = vmatpush3.bf16.msra.mxu0 %v469_v3  ;;  %461 = vmatpush3.bf16.msra.mxu1 %v469_v3 }
  0x10   :  { %434 = vmatprep.subr.bf16.mxu0 %v470_v6  ;;  %454 = vmatprep.subr.bf16.mxu1 %v470_v6 }
  0x13   :  { %435 = vmatpush3.bf16.msra.mxu0 %v470_v6  ;;  %462 = vmatpush3.bf16.msra.mxu1 %v470_v6 }
  0x14   :  { %436 = vmatprep.subr.bf16.mxu0 %v471_v7  ;;  %455 = vmatprep.subr.bf16.mxu1 %v471_v7 }
  0x17   :  { %437 = vmatpush3.bf16.msra.mxu0 %v471_v7  ;;  %463 = vmatpush3.bf16.msra.mxu1 %v471_v7 }
  0x18   :  { %438 = vmatprep.subr.bf16.mxu0 %v472_v8  ;;  %456 = vmatprep.subr.bf16.mxu1 %v472_v8 }
  0x1b   :  { %439 = vmatpush3.bf16.msra.mxu0 %v472_v8  ;;  %464 = vmatpush3.bf16.msra.mxu1 %v472_v8 }
  0x1c   :  { %440 = vmatprep.subr.bf16.mxu0 %v473_v9  ;;  %457 = vmatprep.subr.bf16.mxu1 %v473_v9 }
  0x1f   :  { %441 = vmatpush3.bf16.msra.mxu0 %v473_v9  ;;  %465 = vmatpush3.bf16.msra.mxu1 %v473_v9 }
  0x22   :  { %443 = vmatmul.mubr.bf16.vlgmr.msra.gmra.mrb[0].mxu0 %v476_v10  ;;  %447 = vmatmul.mubr.bf16.vlgmr.msra.gmra.mrb[0].mxu1 %v477_v11 }
  0xf5   :  { %v444_v13 = vpop.f32.mrb[0].mxu0  ;;  %v448_v15 = vpop.f32.mrb[0].mxu1 }
  0xf6   :  { %v263_v16 = vmul.f32 %v444_v13, %v373_v12  ;;  %v267_v17 = vmul.f32 %v448_v15, %v373_v12  ;;  %v196_v18 = vpop.f32.mrb[1].mxu0  ;;  %v212_v19 = vpop.f32.mrb[1].mxu1 }
  0xf7   :  { %v261_v20 = vmul.f32 %v373_v12, %v196_v18  ;;  %v265_v21 = vmul.f32 %v373_v12, %v212_v19  ;;  %v445_v22 = vpop.f32.mrb[2].mxu0  ;;  %v449_v23 = vpop.f32.mrb[2].mxu1 }
  0xf8   :  { %v278_v24 = vadd.f32 %v374_v14, %v263_v16  ;;  %v282_v25 = vadd.f32 %v374_v14, %v267_v17  ;;  %v264_v26 = vmul.f32 %v445_v22, %v373_v12  ;;  %v268_v27 = vmul.f32 %v449_v23, %v373_v12  ;;  %v199_v28 = vpop.f32.mrb[3].mxu0  ;;  %v215_v29 = vpop.f32.mrb[3].mxu1 }
  0xf9   :  { %v276_v30 = vadd.f32 %v374_v14, %v261_v20  ;;  %v280_v31 = vadd.f32 %v374_v14, %v265_v21  ;;  %v262_v32 = vmul.f32 %v373_v12, %v199_v28  ;;  %v266_v33 = vmul.f32 %v373_v12, %v215_v29 }
  0xfa   :  { %v279_v34 = vadd.f32 %v374_v14, %v264_v26  ;;  %v283_v35 = vadd.f32 %v374_v14, %v268_v27  ;;  %v286_v38 = vmax.f32 %v278_v24, 0.0  ;;  %v290_v39 = vmax.f32 %v282_v25, 0.0 }
  0xfb   :  { %v277_v36 = vadd.f32 %v374_v14, %v262_v32  ;;  %v281_v37 = vadd.f32 %v374_v14, %v266_v33  ;;  %v284_v42 = vmax.f32 %v276_v30, 0.0  ;;  %v288_v43 = vmax.f32 %v280_v31, 0.0 }
  0xfc   :  { %v287_v40 = vmax.f32 %v279_v34, 0.0  ;;  %v291_v41 = vmax.f32 %v283_v35, 0.0 }
  0xfd   :  { %v285_v44 = vmax.f32 %v277_v36, 0.0  ;;  %v289_v45 = vmax.f32 %v281_v37, 0.0 }
  0xfe   :  { %v399_v46 = vpack.c.bf16 %v287_v40, %v286_v38  ;;  %v409_v47 = vpack.c.bf16 %v291_v41, %v290_v39 }
  0xff   :  { %v394_v48 = vpack.c.bf16 %v285_v44, %v284_v42  ;;  %v404_v49 = vpack.c.bf16 %v289_v45, %v288_v43 }
 0x100   :  { %411 = vst [vmem:[%s561_s4 + $0x8] sm:$0xff] %v399_v46   ;;  %413 = vst [vmem:[%s561_s4 + $0x18] sm:$0xff] %v409_v47  }
 0x101   :  { %395 = vst [vmem:[%s561_s4] sm:$0xff] %v394_v48   ;;  %412 = vst [vmem:[%s561_s4 + $0x10] sm:$0xff] %v404_v49  }

// kernel: se_resnext_lstm_forward.41
= control target key start
LH: loop header
LB: loop body
LE: loop exit
PB: predicated region body
PF: predicated region fallthrough
CT: control target
= control target key end

     0   :  { %s503_s12 = smov 0   ;;  %s505_s13 = smov 0   ;;  %s542_s0 = inlined_call_operand.vmem [shape: bf16[4,16,32], index: 0, kind: input, shape index: {}]   ;;  %s543_s1 = inlined_call_operand.vmem [shape: f32[4,1,32], index: 1, kind: input, shape index: {}]   ;;  %s544_s2 = inlined_call_operand.vmem [shape: bf16[4,16,32], index: 2, kind: input, shape index: {}]   ;;  %s545_s3 = inlined_call_operand.vmem [shape: bf16[4,16,32], index: 3, kind: output, shape index: {}]  }
   0x1   :  { %s507_s14 = smov 0  }
   0x2 LB: > { %s25_s15 = sadd.s32 1, %s477_s13  ;;  %p410_p0 = scmp.ge.s32.totalorder %s481_s14, 1  ;;  %s481_s14 = sphi %s507_s14, %s13_s14   ;;  %s477_s13 = sphi %s505_s13, %s547_s13   ;;  %s473_s12 = sphi %s503_s12, %s546_s12  }
   0x3   : > { %p27_p1 = scmp.ge.s32.totalorder %s25_s15, 4  ;;  %p183_p2 = scmp.lt.s32.totalorder %s481_s14, 5 }
   0x5   : > { %s549_s15 = smov (%p27_p1, %s25_s15), 0  ;;  %p184_p3 = pnand %p410_p0, %p183_p2 }
   0x6   : > { %p228_p4 = scmp.lt.s32.totalorder (!%p184_p3), %s473_s12, 3  ;;  %vm289_vm0 = vcmask (!%p184_p3), 257024  }
   0x7   : > { %187 = sbr.rel (%p184_p3) target bundleno = 29 (0x1d), region = 32 }
   0xe   : > { %s551_s12 = smov (!%p228_p4, %s473_s12), 3 }
   0xf   : > { %s422_s16 = sshll.u32 %s551_s12, 3  ;;  %s239_s19 = scalar_lea.vmem %s543_s1, %s551_s12 }
  0x10   : > { %s235_s22 = scalar_lea.vmem %s542_s0, %s422_s16  ;;  %s248_s25 = scalar_lea.vmem %s544_s2, %s422_s16  ;;  %v417_v1 = vld [vmem:[%s239_s19] ss:$0 sm:$0xff] }
  0x11   : > { %v428_v0 = vld [vmem:[%s235_s22] sm:$0xff]   ;;  %s258_s28 = scalar_lea.vmem %s545_s3, %s422_s16 }
  0x12   : > { %v432_v2 = vld [vmem:[%s248_s25] sm:$0xff]   ;;  %v429_v3 = vunpack.c.l.bf16 %v428_v0  ;;  %v430_v4 = vunpack.c.h.bf16 %v428_v0 }
  0x13   : > { %v433_v5 = vunpack.c.l.bf16 %v432_v2  ;;  %v434_v6 = vunpack.c.h.bf16 %v432_v2 }
  0x14   : > { %v271_v7 = vmul.f32 %v429_v3, %v417_v1  ;;  %v272_v8 = vmul.f32 %v430_v4, %v417_v1 }
  0x16   : > { %v277_v9 = vadd.f32 %v433_v5, %v271_v7  ;;  %v278_v10 = vadd.f32 %v434_v6, %v272_v8 }
  0x18   : > { %v279_v11 = vmax.f32 %v277_v9, 0.0  ;;  %v280_v12 = vmax.f32 %v278_v10, 0.0 }
  0x1a   : > { %v425_v13 = vpack.c.bf16 %v279_v11, %v279_v11  ;;  %v426_v14 = vpack.c.bf16 %v280_v12, %v280_v12 }
  0x1c   : > { %290 = vst.msk [vmem:[%s258_s28] sm:$0xf] %vm289_vm0, %v425_v13  ;;  %291 = vst.msk [vmem:[%s258_s28 + $0x4] sm:$0xf] %vm289_vm0, %v426_v14 }
  0x1d PF: > { %s13_s14 = sadd.s32 1, %s481_s14   ;;  %s546_s12 = smov %s477_s13 }
  0x1e   : > { %p10_p5 = scmp.ge.s32.totalorder %s13_s14, 6   ;;  %s547_s13 = smov %s549_s15 }
  0x20   :  { %12 = sbr.rel (!%p10_p5) target bundleno = 2 (0x2), region = 68 }

// kernel: se_resnext_lstm_forward.43
= control target key start
LH: loop header
LB: loop body
LE: loop exit
PB: predicated region body
PF: predicated region fallthrough
CT: control target
= control target key end

     0   :  { %s466_s1 = inlined_call_operand.vmem [shape: bf16[1,256,128], index: 1, kind: input, shape index: {}]   ;;  %s467_s0 = inlined_call_operand.vmem [shape: bf16[16,256], index: 0, kind: input, shape index: {}]   ;;  %s468_s2 = inlined_call_operand.vmem [shape: f32[1,1,128], index: 2, kind: input, shape index: {}]   ;;  %s469_s3 = inlined_call_operand.vmem [shape: f32[1,1,128], index: 3, kind: input, shape index: {}]   ;;  %s470_s4 = inlined_call_operand.vmem [shape: bf16[16,128], index: 4, kind: output, shape index: {}]  }
   0x1   :  { %v359_v0 = vld [vmem:[%s466_s1 + $0x40] sm:$0xff]   ;;  %v361_v2 = vld [vmem:[%s466_s1 + $0x48] sm:$0xff]   ;;  %v363_v4 = vld [vmem:[%s466_s1 + $0x50] sm:$0xff]  }
   0x2   :  { %v360_v1 = vld [vmem:[%s466_s1] sm:$0xff]   ;;  %337 = vmatprep.subr.bf16.mxu0 %v359_v0  ;;  %v362_v3 = vld [vmem:[%s466_s1 + $0x8] sm:$0xff]   ;;  %v364_v5 = vld [vmem:[%s466_s1 + $0x10] sm:$0xff]  }
   0x3   :  { %338 = vmatpush3.bf16.msra.mxu0 %v360_v1  ;;  %v365_v6 = vld [vmem:[%s466_s1 + $0x58] sm:$0xff]   ;;  %v367_v8 = vld [vmem:[%s466_s1 + $0x60] sm:$0xff]   ;;  %v369_v10 = vld [vmem:[%s466_s1 + $0x68] sm:$0xff]  }
   0x4   :  { %339 = vmatprep.subr.bf16.mxu0 %v361_v2  ;;  %v366_v7 = vld [vmem:[%s466_s1 + $0x18] sm:$0xff]   ;;  %v368_v9 = vld [vmem:[%s466_s1 + $0x20] sm:$0xff]   ;;  %v370_v12 = vld [vmem:[%s466_s1 + $0x28] sm:$0xff]  }
   0x5   :  { %v377_v11 = vld [vmem:[%s467_s0 + $0x4] ss:$8 sps:$4 sm:$0xff]   ;;  %v371_v13 = vld [vmem:[%s466_s1 + $0x70] sm:$0xff]   ;;  %v373_v15 = vld [vmem:[%s466_s1 + $0x78] sm:$0xff]  }
   0x6   :  { %231 = vmatprep.mubr.bf16.mxu0 %v377_v11  ;;  %v372_v14 = vld [vmem:[%s466_s1 + $0x30] sm:$0xff]   ;;  %v374_v16 = vld [vmem:[%s466_s1 + $0x38] sm:$0xff]   ;;  %v375_v17 = vld [vmem:[%s467_s0] ss:$8 sps:$4 sm:$0xff]  }
   0x7   :  { %340 = vmatpush3.bf16.msra.mxu0 %v362_v3  ;;  %v326_v20 = vld [vmem:[%s468_s2] ss:$0 sm:$0xff] }
   0x8   :  { %341 = vmatprep.subr.bf16.mxu0 %v363_v4  ;;  %v327_v23 = vld [vmem:[%s469_s3] ss:$0 sm:$0xff] }
   0xb   :  { %342 = vmatpush3.bf16.msra.mxu0 %v364_v5 }
   0xc   :  { %343 = vmatprep.subr.bf16.mxu0 %v365_v6 }
   0xf   :  { %344 = vmatpush3.bf16.msra.mxu0 %v366_v7 }
  0x10   :  { %345 = vmatprep.subr.bf16.mxu0 %v367_v8 }
  0x13   :  { %346 = vmatpush3.bf16.msra.mxu0 %v368_v9 }
  0x14   :  { %347 = vmatprep.subr.bf16.mxu0 %v369_v10 }
  0x17   :  { %348 = vmatpush3.bf16.msra.mxu0 %v370_v12 }
  0x18   :  { %349 = vmatprep.subr.bf16.mxu0 %v371_v13 }
  0x1b   :  { %350 = vmatpush3.bf16.msra.mxu0 %v372_v14 }
  0x1c   :  { %351 = vmatprep.subr.bf16.mxu0 %v373_v15 }
  0x1f   :  { %352 = vmatpush3.bf16.msra.mxu0 %v374_v16 }
  0x22   :  { %232 = vmatmul.mubr.bf16.vlgmr.msra.gmra.mrb[0].mxu0 %v375_v17 }
  0xf5   :  { %v353_v18 = vpop.f32.mrb[0].mxu0 }
  0xf6   :  { %v354_v19 = vpop.f32.mrb[1].mxu0 }
  0xf7   :  { %v355_v21 = vadd.f32 %v354_v19, %v353_v18  ;;  %v356_v22 = vpop.f32.mrb[2].mxu0 }
  0xf8   :  { %v357_v24 = vpop.f32.mrb[3].mxu0 }
  0xf9   :  { %v256_v25 = vmul.f32 %v355_v21, %v326_v20  ;;  %v358_v26 = vadd.f32 %v357_v24, %v356_v22 }
  0xfb   :  { %v265_v27 = vadd.f32 %v327_v23, %v256_v25  ;;  %v257_v28 = vmul.f32 %v358_v26, %v326_v20 }
  0xfd   :  { %v266_v29 = vadd.f32 %v327_v23, %v257_v28  ;;  %v267_v30 = vmax.f32 %v265_v27, 0.0 }
  0xff   :  { %v268_v31 = vmax.f32 %v266_v29, 0.0 }
 0x101   :  { %v335_v32 = vpack.c.bf16 %v268_v31, %v267_v30 }
 0x103   :  { %336 = vst [vmem:[%s470_s4] sm:$0xff] %v335_v32  }

// kernel: se_resnext_lstm_forward.44
= control target key start
LH: loop header
LB: loop body
LE: loop exit
PB: predicated region body
PF: predicated region fallthrough
CT: control target
= control target key end

     0   :  { %v293_v0 = vmov 0.0   ;;  %vm294_vm0 = vmmov 0   ;;  %s356_s1 = inlined_call_operand.vmem [shape: bf16[1,128,128], index: 1, kind: input, shape index: {}]   ;;  %s357_s0 = inlined_call_operand.vmem [shape: bf16[16,128], index: 0, kind: input, shape index: {}]   ;;  %s358_s2 = inlined_call_operand.vmem [shape: f32[1,1,128], index: 2, kind: input, shape index: {}]   ;;  %s359_s3 = inlined_call_operand.vmem [shape: f32[1,1,128], index: 3, kind: input, shape index: {}]   ;;  %s360_s4 = inlined_call_operand.vmem [shape: bf16[16,128], index: 4, kind: output, shape index: {}]  }
   0x1   :  { %262 = vmatprep.subr.bf16.mxu0 %v293_v0  ;;  %v284_v1 = vld [vmem:[%s356_s1] sm:$0xff]   ;;  %278 = vmatprep.mubr.msk.bf16.mxu0 %vm294_vm0, %v293_v0  ;;  %v285_v2 = vld [vmem:[%s356_s1 + $0x8] sm:$0xff]   ;;  %v286_v3 = vld [vmem:[%s356_s1 + $0x10] sm:$0xff]  }
   0x2   :  { %263 = vmatpush3.bf16.msra.mxu0 %v284_v1  ;;  %v287_v4 = vld [vmem:[%s356_s1 + $0x18] sm:$0xff]   ;;  %v288_v5 = vld [vmem:[%s356_s1 + $0x20] sm:$0xff]   ;;  %v289_v6 = vld [vmem:[%s356_s1 + $0x28] sm:$0xff]  }
   0x3   :  { %264 = vmatprep.subr.bf16.mxu0 %v293_v0  ;;  %v290_v7 = vld [vmem:[%s356_s1 + $0x30] sm:$0xff]   ;;  %v291_v8 = vld [vmem:[%s356_s1 + $0x38] sm:$0xff]   ;;  %v292_v9 = vld [vmem:[%s357_s0] sm:$0xff]  }
   0x4   :  { %v242_v10 = vld [vmem:[%s358_s2] ss:$0 sm:$0xff] }
   0x5   :  { %v243_v14 = vld [vmem:[%s359_s3] ss:$0 sm:$0xff] }
   0x6   :  { %265 = vmatpush3.bf16.msra.mxu0 %v285_v2 }
   0x7   :  { %266 = vmatprep.subr.bf16.mxu0 %v293_v0 }
   0xa   :  { %267 = vmatpush3.bf16.msra.mxu0 %v286_v3 }
   0xb   :  { %268 = vmatprep.subr.bf16.mxu0 %v293_v0 }
   0xe   :  { %269 = vmatpush3.bf16.msra.mxu0 %v287_v4 }
   0xf   :  { %270 = vmatprep.subr.bf16.mxu0 %v293_v0 }
  0x12   :  { %271 = vmatpush3.bf16.msra.mxu0 %v288_v5 }
  0x13   :  { %272 = vmatprep.subr.bf16.mxu0 %v293_v0 }
  0x16   :  { %273 = vmatpush3.bf16.msra.mxu0 %v289_v6 }
  0x17   :  { %274 = vmatprep.subr.bf16.mxu0 %v293_v0 }
  0x1a   :  { %275 = vmatpush3.bf16.msra.mxu0 %v290_v7 }
  0x1b   :  { %276 = vmatprep.subr.bf16.mxu0 %v293_v0 }
  0x1e   :  { %277 = vmatpush3.bf16.msra.mxu0 %v291_v8 }
  0x21   :  { %279 = vmatmul.mubr.bf16.vlgmr.msra.gmra.mrb[0].mxu0 %v292_v9 }
  0xf4   :  { %v160_v11 = vpop.f32.mrb[0].mxu0 }
  0xf5   :  { %v183_v12 = vmul.f32 %v242_v10, %v160_v11  ;;  %v280_v13 = vpop.f32.mrb[1].mxu0 }
  0xf6   :  { %v163_v15 = vpop.f32.mrb[2].mxu0 }
  0xf7   :  { %v184_v16 = vmul.f32 %v242_v10, %v163_v15  ;;  %v281_v17 = vpop.f32.mrb[3].mxu0  ;;  %v192_v18 = vadd.f32 %v243_v14, %v183_v12 }
  0xf9   :  { %v193_v19 = vadd.f32 %v243_v14, %v184_v16 }
  0xfb   :  { %v251_v20 = vpack.c.bf16 %v193_v19, %v192_v18 }
  0xfd   :  { %252 = vst [vmem:[%s360_s4] sm:$0xff] %v251_v20  }

// kernel: se_resnext_lstm_forward.46
= control target key start
LH: loop header
LB: loop body
LE: loop exit
PB: predicated region body
PF: predicated region fallthrough
CT: control target
= control target key end

     0   :  { %s643_s18 = smov 0   ;;  %s645_s19 = smov 0   ;;  %s721_s0 = inlined_call_operand.vmem [shape: bf16[4,8,64], index: 0, kind: input, shape index: {}]   ;;  %s722_s1 = inlined_call_operand.vmem [shape: f32[64,16], index: 1, kind: input, shape index: {}]   ;;  %s723_s2 = inlined_call_operand.vmem [shape: f32[1,16], index: 2, kind: input, shape index: {}]   ;;  %s724_s3 = inlined_call_operand.vmem [shape: f32[16,64], index: 3, kind: input, shape index: {}]   ;;  %s725_s4 = inlined_call_operand.vmem [shape: f32[1,64], index: 4, kind: input, shape index: {}]   ;;  %s726_s5 = inlined_call_operand.vmem [shape: f32[4,1,64], index: 5, kind: output, shape index: {}]  }
   0x1   :  { %s647_s20 = smov 0  }
   0x2 LB: > { %s27_s21 = sadd.s32 1, %s604_s19  ;;  %p495_p0 = scmp.ge.s32.totalorder %s608_s20, 1  ;;  %s608_s20 = sphi %s647_s20, %s15_s20   ;;  %s604_s19 = sphi %s645_s19, %s728_s19   ;;  %s600_s18 = sphi %s643_s18, %s727_s18  }
   0x3   : > { %p29_p1 = scmp.ge.s32.totalorder %s27_s21, 4  ;;  %p203_p2 = scmp.lt.s32.totalorder %s608_s20, 5 }
   0x5   : > { %s730_s21 = smov (%p29_p1, %s27_s21), 0  ;;  %p204_p3 = pnand %p495_p0, %p203_p2 }
   0x6   : > { %v266_v0 = vld [vmem:[%s722_s1] sm:$0xff] (!%p204_p3)  ;;  %v267_v1 = vld [vmem:[%s722_s1 + $0x8] sm:$0xff] (!%p204_p3)  ;;  %v268_v2 = vld [vmem:[%s722_s1 + $0x10] sm:$0xff] (!%p204_p3)  ;;  %vm245_vm0 = vcmask (!%p204_p3), 516096   ;;  %v610_v3 = vmov (!%p204_p3), 0.0|0.0   ;;  %v611_v6 = vmov (!%p204_p3), 0.0  }
   0x7   : > { %207 = sbr.rel (%p204_p3) target bundleno = 502 (0x1f6), region = 40  ;;  %540 = vmatprep.subr.bf16.mxu0 (!%p204_p3), %v610_v3  ;;  %v541_v4 = vpack.c.bf16 (!%p204_p3), %v267_v1, %v266_v0  ;;  %v269_v5 = vld [vmem:[%s722_s1 + $0x18] sm:$0xff] (!%p204_p3)  ;;  %246 = vst.msk [vmem:[#allocation2] sm:$0x1] (!%p204_p3), %vm245_vm0, %v611_v6  ;;  %p231_p4 = scmp.lt.s32.totalorder (!%p204_p3), %s600_s18, 3  ;;  %552 = vmatprep.subr.bf16.mxu1 (!%p204_p3), %v610_v3  ;;  %vm612_vm1 = vmmov (!%p204_p3), 0  }
   0x8   : > { %530 = vmatprep.mubr.msk.f32.mxu0 (!%p204_p3), %vm612_vm1, %v611_v6  ;;  %537 = vmatprep.mubr.msk.f32.mxu1 (!%p204_p3), %vm612_vm1, %v611_v6  ;;  %v544_v7 = vpack.c.bf16 (!%p204_p3), %v269_v5, %v268_v2  ;;  %v270_v8 = vld [vmem:[%s722_s1 + $0x20] sm:$0xff] (!%p204_p3)  ;;  %v271_v9 = vld [vmem:[%s722_s1 + $0x28] sm:$0xff] (!%p204_p3)  ;;  %vm250_vm2 = vcmask (!%p204_p3), 523264   ;;  %v272_v12 = vld [vmem:[%s722_s1 + $0x30] sm:$0xff] (!%p204_p3)  ;;  %vm352_vm3 = vcmask (!%p204_p3), 130048  }
   0x9   : > { %542 = vmatpush3.bf16.msra.mxu0 (!%p204_p3), %v541_v4  ;;  %v547_v10 = vpack.c.bf16 (!%p204_p3), %v271_v9, %v270_v8  ;;  %v273_v13 = vld [vmem:[%s722_s1 + $0x38] sm:$0xff] (!%p204_p3)  ;;  %v349_v27 = vld [vmem:[%s724_s3] sm:$0xff] (!%p204_p3)  ;;  %v350_v28 = vld [vmem:[%s724_s3 + $0x8] sm:$0xff] (!%p204_p3) }
   0xa   : > { %543 = vmatprep.subr.bf16.mxu0 (!%p204_p3), %v610_v3  ;;  %v550_v16 = vpack.c.bf16 (!%p204_p3), %v273_v13, %v272_v12  ;;  %v553_v29 = vpack.c.bf16 (!%p204_p3), %v350_v28, %v349_v27  ;;  %v274_v30 = vld [vmem:[%s723_s2] sm:$0x1] (!%p204_p3) }
   0xb   : > { %v351_v35 = vld [vmem:[%s725_s4] sm:$0x1] (!%p204_p3) }
   0xc   : > { %554 = vmatpush3.bf16.msra.mxu1 (!%p204_p3), %v553_v29 }
   0xd   : > { %545 = vmatpush3.bf16.msra.mxu0 (!%p204_p3), %v544_v7 }
   0xe   : > { %s732_s18 = smov (!%p231_p4, %s600_s18), 3  ;;  %546 = vmatprep.subr.bf16.mxu0 %v610_v3  ;;  %v247_v22 = vld [vmem:[#allocation2] sm:$0x1] }
   0xf   : > { %s496_s9 = sshll.u32 %s732_s18, 2  ;;  %s240_s6 = scalar_lea.vmem %s726_s5, %s732_s18 }
  0x10   : > { %s237_s12 = scalar_lea.vmem %s721_s0, %s496_s9 }
  0x11   : > { %v248_v11 = vld [vmem:[%s237_s12] sm:$0xf]  ;;  %548 = vmatpush3.bf16.msra.mxu0 %v547_v10 }
  0x12   : > { %v249_v14 = vunpack.c.l.bf16 %v248_v11  ;;  %549 = vmatprep.subr.bf16.mxu0 %v610_v3 }
  0x14   : > { %v251_v15 = vsel %vm250_vm2, %v249_v14, 0.0 }
  0x15   : > { %v252_v17 = vrot.slane %v251_v15, 4  ;;  %551 = vmatpush3.bf16.msra.mxu0 %v550_v16 }
  0x17   : > { %v253_v18 = vadd.f32 %v252_v17, %v251_v15 }
  0x19   : > { %v254_v19 = vrot.slane %v253_v18, 2 }
  0x1b   : > { %v255_v20 = vadd.f32 %v254_v19, %v253_v18 }
  0x1d   : > { %v256_v21 = vrot.slane %v255_v20, 1 }
  0x1f   : > { %v257_v23 = vadd.f32 %v256_v21, %v255_v20 }
  0x21   : > { %v258_v24 = vadd.f32 %v257_v23, %v247_v22 }
  0x23   : > { %260 = vst.msk [vmem:[#allocation2] sm:$0x1] %vm245_vm0, %v258_v24 }
  0x2a   : > { %v264_v25 = vld [vmem:[#allocation2] sm:$0x1] }
  0x2b   : > { %v265_v26 = vmul.f32 0.25, %v264_v25 }
  0x2d   : > { %531 = vmatmul.mubr.msk.f32.vlgmr.msra.gmra.mrb[0].mxu0 %vm250_vm2, %v265_v26 }
 0x100   : > { %v344_v31 = vpop.f32.mrb[0].mxu0 }
 0x101   : > { %v345_v32 = vadd.f32 %v344_v31, %v274_v30  ;;  %v532_v33 = vpop.f32.mrb[1].mxu0 }
 0x103   : > { %v348_v34 = vmax.f32 %v345_v32, 0.0 }
 0x105   : > { %538 = vmatmul.mubr.msk.f32.vlgmr.msra.gmra.mrb[0].mxu1 %vm352_vm3, %v348_v34 }
 0x1d8   : > { %v422_v36 = vpop.f32.mrb[0].mxu1 }
 0x1d9   : > { %v423_v37 = vadd.f32 %v422_v36, %v351_v35  ;;  %v539_v38 = vpop.f32.mrb[1].mxu1 }
 0x1db   : > { %v499_v39 = vmul.f32 -1.442695, %v423_v37 }
 0x1dd   : > { %582 = vpow2.f32 %v499_v39 }
 0x1e7   : > { %v583_v40 = vpop.eup %582 }
 0x1e8   : > { %v429_v41 = vadd.f32 1.0, %v583_v40 }
 0x1ea   : > { %584 = vrcp.f32 %v429_v41 }
 0x1f4   : > { %v585_v42 = vpop.eup %584 }
 0x1f5   : > { %432 = vst.msk [vmem:[%s240_s6] sm:$0x1] %vm245_vm0, %v585_v42 }
 0x1f6 PF: > { %s15_s20 = sadd.s32 1, %s608_s20   ;;  %s727_s18 = smov %s604_s19 }
 0x1f7   : > { %p12_p5 = scmp.ge.s32.totalorder %s15_s20, 6   ;;  %s728_s19 = smov %s730_s21 }
 0x1f9   :  { %14 = sbr.rel (!%p12_p5) target bundleno = 2 (0x2), region = 78 }

// kernel: se_resnext_lstm_forward.47
= control target key start
LH: loop header
LB: loop body
LE: loop exit
PB: predicated region body
PF: predicated region fallthrough
CT: control target
= control target key end

     0   :  { %s433_s12 = smov 0   ;;  %s435_s13 = smov 0   ;;  %s469_s0 = inlined_call_operand.vmem [shape: bf16[4,8,64], index: 0, kind: input, shape index: {}]   ;;  %s470_s1 = inlined_call_operand.vmem [shape: f32[4,1,64], index: 1, kind: input, shape index: {}]   ;;  %s471_s2 = inlined_call_operand.vmem [shape: bf16[4,8,64], index: 2, kind: input, shape index: {}]   ;;  %s472_s3 = inlined_call_operand.vmem [shape: bf16[4,8,64], index: 3, kind: output, shape index: {}]  }
   0x1   :  { %s437_s14 = smov 0  }
   0x2 LB: > { %s25_s15 = sadd.s32 1, %s407_s13  ;;  %p358_p0 = scmp.ge.s32.totalorder %s411_s14, 1  ;;  %s411_s14 = sphi %s437_s14, %s13_s14   ;;  %s407_s13 = sphi %s435_s13, %s474_s13   ;;  %s403_s12 = sphi %s433_s12, %s473_s12  }
   0x3   : > { %p27_p1 = scmp.ge.s32.totalorder %s25_s15, 4  ;;  %p177_p2 = scmp.lt.s32.totalorder %s411_s14, 5 }
   0x5   : > { %s476_s15 = smov (%p27_p1, %s25_s15), 0  ;;  %p178_p3 = pnand %p358_p0, %p177_p2 }
   0x6   : > { %p215_p4 = scmp.lt.s32.totalorder (!%p178_p3), %s403_s12, 3  ;;  %vm254_vm0 = vcmask (!%p178_p3), 519168  }
   0x7   : > { %181 = sbr.rel (%p178_p3) target bundleno = 29 (0x1d), region = 32 }
   0xe   : > { %s478_s12 = smov (!%p215_p4, %s403_s12), 3 }
   0xf   : > { %s359_s16 = sshll.u32 %s478_s12, 2  ;;  %s224_s19 = scalar_lea.vmem %s470_s1, %s478_s12 }
  0x10   : > { %s221_s22 = scalar_lea.vmem %s469_s0, %s359_s16  ;;  %s231_s25 = scalar_lea.vmem %s471_s2, %s359_s16  ;;  %v362_v1 = vld [vmem:[%s224_s19] ss:$0 sm:$0xff] }
  0x11   : > { %v239_v0 = vld [vmem:[%s221_s22] sm:$0xf]  ;;  %s238_s28 = scalar_lea.vmem %s472_s3, %s359_s16 }
  0x12   : > { %v249_v2 = vld [vmem:[%s231_s25] sm:$0xf]  ;;  %v240_v3 = vunpack.c.l.bf16 %v239_v0 }
  0x13   : > { %v250_v4 = vunpack.c.l.bf16 %v249_v2 }
  0x14   : > { %v248_v5 = vmul.f32 %v362_v1, %v240_v3 }
  0x16   : > { %v251_v6 = vadd.f32 %v250_v4, %v248_v5 }
  0x18   : > { %v252_v7 = vmax.f32 %v251_v6, 0.0 }
  0x1a   : > { %v253_v8 = vpack.c.bf16 %v252_v7, %v252_v7 }
  0x1c   : > { %255 = vst.msk [vmem:[%s238_s28] sm:$0xf] %vm254_vm0, %v253_v8 }
  0x1d PF: > { %s13_s14 = sadd.s32 1, %s411_s14   ;;  %s473_s12 = smov %s407_s13 }
  0x1e   : > { %p10_p5 = scmp.ge.s32.totalorder %s13_s14, 6   ;;  %s474_s13 = smov %s476_s15 }
  0x20   :  { %12 = sbr.rel (!%p10_p5) target bundleno = 2 (0x2), region = 68 }

// kernel: se_resnext_lstm_forward.48
= control target key start
LH: loop header
LB: loop body
LE: loop exit
PB: predicated region body
PF: predicated region fallthrough
CT: control target
= control target key end

     0   :  { %v295_v0 = vmov 0.0   ;;  %vm296_vm0 = vmmov 0   ;;  %s358_s1 = inlined_call_operand.vmem [shape: bf16[1,128,128], index: 1, kind: input, shape index: {}]   ;;  %s359_s0 = inlined_call_operand.vmem [shape: bf16[16,128], index: 0, kind: input, shape index: {}]   ;;  %s360_s2 = inlined_call_operand.vmem [shape: f32[1,1,128], index: 2, kind: input, shape index: {}]   ;;  %s361_s3 = inlined_call_operand.vmem [shape: f32[1,1,128], index: 3, kind: input, shape index: {}]   ;;  %s362_s4 = inlined_call_operand.vmem [shape: bf16[16,128], index: 4, kind: output, shape index: {}]  }
   0x1   :  { %264 = vmatprep.subr.bf16.mxu0 %v295_v0  ;;  %v286_v1 = vld [vmem:[%s358_s1] sm:$0xff]   ;;  %280 = vmatprep.mubr.msk.bf16.mxu0 %vm296_vm0, %v295_v0  ;;  %v287_v2 = vld [vmem:[%s358_s1 + $0x8] sm:$0xff]   ;;  %v288_v3 = vld [vmem:[%s358_s1 + $0x10] sm:$0xff]  }
   0x2   :  { %265 = vmatpush3.bf16.msra.mxu0 %v286_v1  ;;  %v289_v4 = vld [vmem:[%s358_s1 + $0x18] sm:$0xff]   ;;  %v290_v5 = vld [vmem:[%s358_s1 + $0x20] sm:$0xff]   ;;  %v291_v6 = vld [vmem:[%s358_s1 + $0x28] sm:$0xff]  }
   0x3   :  { %266 = vmatprep.subr.bf16.mxu0 %v295_v0  ;;  %v292_v7 = vld [vmem:[%s358_s1 + $0x30] sm:$0xff]   ;;  %v293_v8 = vld [vmem:[%s358_s1 + $0x38] sm:$0xff]   ;;  %v294_v9 = vld [vmem:[%s359_s0] sm:$0xff]  }
   0x4   :  { %v244_v10 = vld [vmem:[%s360_s2] ss:$0 sm:$0xff] }
   0x5   :  { %v245_v12 = vld [vmem:[%s361_s3] ss:$0 sm:$0xff] }
   0x6   :  { %267 = vmatpush3.bf16.msra.mxu0 %v287_v2 }
   0x7   :  { %268 = vmatprep.subr.bf16.mxu0 %v295_v0 }
   0xa   :  { %269 = vmatpush3.bf16.msra.mxu0 %v288_v3 }
   0xb   :  { %270 = vmatprep.subr.bf16.mxu0 %v295_v0 }
   0xe   :  { %271 = vmatpush3.bf16.msra.mxu0 %v289_v4 }
   0xf   :  { %272 = vmatprep.subr.bf16.mxu0 %v295_v0 }
  0x12   :  { %273 = vmatpush3.bf16.msra.mxu0 %v290_v5 }
  0x13   :  { %274 = vmatprep.subr.bf16.mxu0 %v295_v0 }
  0x16   :  { %275 = vmatpush3.bf16.msra.mxu0 %v291_v6 }
  0x17   :  { %276 = vmatprep.subr.bf16.mxu0 %v295_v0 }
  0x1a   :  { %277 = vmatpush3.bf16.msra.mxu0 %v292_v7 }
  0x1b   :  { %278 = vmatprep.subr.bf16.mxu0 %v295_v0 }
  0x1e   :  { %279 = vmatpush3.bf16.msra.mxu0 %v293_v8 }
  0x21   :  { %281 = vmatmul.mubr.bf16.vlgmr.msra.gmra.mrb[0].mxu0 %v294_v9 }
  0xf4   :  { %v160_v11 = vpop.f32.mrb[0].mxu0 }
  0xf5   :  { %v183_v13 = vmul.f32 %v244_v10, %v160_v11  ;;  %v282_v14 = vpop.f32.mrb[1].mxu0 }
  0xf6   :  { %v163_v15 = vpop.f32.mrb[2].mxu0 }
  0xf7   :  { %v192_v16 = vadd.f32 %v245_v12, %v183_v13  ;;  %v184_v17 = vmul.f32 %v244_v10, %v163_v15  ;;  %v283_v18 = vpop.f32.mrb[3].mxu0 }
  0xf9   :  { %v193_v19 = vadd.f32 %v245_v12, %v184_v17  ;;  %v194_v20 = vmax.f32 %v192_v16, 0.0 }
  0xfb   :  { %v195_v21 = vmax.f32 %v193_v19, 0.0 }
  0xfd   :  { %v253_v22 = vpack.c.bf16 %v195_v21, %v194_v20 }
  0xff   :  { %254 = vst [vmem:[%s362_s4] sm:$0xff] %v253_v22  }

// kernel: se_resnext_lstm_forward.50
= control target key start
LH: loop header
LB: loop body
LE: loop exit
PB: predicated region body
PF: predicated region fallthrough
CT: control target
= control target key end

     0   :  { %v259_v0 = vmov 0.0   ;;  %vm260_vm0 = vmmov 0   ;;  %s322_s1 = inlined_call_operand.vmem [shape: bf16[1,128,128], index: 1, kind: input, shape index: {}]   ;;  %s323_s0 = inlined_call_operand.vmem [shape: bf16[8,128], index: 0, kind: input, shape index: {}]   ;;  %s324_s2 = inlined_call_operand.vmem [shape: f32[1,1,128], index: 2, kind: input, shape index: {}]   ;;  %s325_s3 = inlined_call_operand.vmem [shape: f32[1,1,128], index: 3, kind: input, shape index: {}]   ;;  %s326_s4 = inlined_call_operand.vmem [shape: bf16[8,128], index: 4, kind: output, shape index: {}]  }
   0x1   :  { %229 = vmatprep.subr.bf16.mxu0 %v259_v0  ;;  %v251_v1 = vld [vmem:[%s322_s1] sm:$0xff]   ;;  %245 = vmatprep.mubr.msk.bf16.mxu0 %vm260_vm0, %v259_v0  ;;  %v252_v2 = vld [vmem:[%s322_s1 + $0x8] sm:$0xff]   ;;  %v253_v3 = vld [vmem:[%s322_s1 + $0x10] sm:$0xff]  }
   0x2   :  { %230 = vmatpush3.bf16.msra.mxu0 %v251_v1  ;;  %v254_v4 = vld [vmem:[%s322_s1 + $0x18] sm:$0xff]   ;;  %v255_v5 = vld [vmem:[%s322_s1 + $0x20] sm:$0xff]   ;;  %v256_v6 = vld [vmem:[%s322_s1 + $0x28] sm:$0xff]  }
   0x3   :  { %231 = vmatprep.subr.bf16.mxu0 %v259_v0  ;;  %v257_v7 = vld [vmem:[%s322_s1 + $0x30] sm:$0xff]   ;;  %v258_v8 = vld [vmem:[%s322_s1 + $0x38] sm:$0xff]   ;;  %v52_v9 = vld [vmem:[%s323_s0] sm:$0xf] }
   0x4   :  { %v218_v10 = vld [vmem:[%s324_s2] ss:$0 sm:$0xff] }
   0x5   :  { %v219_v12 = vld [vmem:[%s325_s3] ss:$0 sm:$0xff] }
   0x6   :  { %232 = vmatpush3.bf16.msra.mxu0 %v252_v2 }
   0x7   :  { %233 = vmatprep.subr.bf16.mxu0 %v259_v0 }
   0xa   :  { %234 = vmatpush3.bf16.msra.mxu0 %v253_v3 }
   0xb   :  { %235 = vmatprep.subr.bf16.mxu0 %v259_v0 }
   0xe   :  { %236 = vmatpush3.bf16.msra.mxu0 %v254_v4 }
   0xf   :  { %237 = vmatprep.subr.bf16.mxu0 %v259_v0 }
  0x12   :  { %238 = vmatpush3.bf16.msra.mxu0 %v255_v5 }
  0x13   :  { %239 = vmatprep.subr.bf16.mxu0 %v259_v0 }
  0x16   :  { %240 = vmatpush3.bf16.msra.mxu0 %v256_v6 }
  0x17   :  { %241 = vmatprep.subr.bf16.mxu0 %v259_v0 }
  0x1a   :  { %242 = vmatpush3.bf16.msra.mxu0 %v257_v7 }
  0x1b   :  { %243 = vmatprep.subr.bf16.mxu0 %v259_v0 }
  0x1e   :  { %244 = vmatpush3.bf16.msra.mxu0 %v258_v8 }
  0x21   :  { %246 = vmatmul.mubr.bf16.vlgmr.msra.gmra.mrb[0].mxu0 %v52_v9 }
  0xf4   :  { %v151_v11 = vpop.f32.mrb[0].mxu0 }
  0xf5   :  { %v170_v13 = vmul.f32 %v218_v10, %v151_v11  ;;  %v247_v14 = vpop.f32.mrb[1].mxu0 }
  0xf6   :  { %v154_v15 = vpop.f32.mrb[2].mxu0 }
  0xf7   :  { %v178_v16 = vadd.f32 %v219_v12, %v170_v13  ;;  %v248_v17 = vpop.f32.mrb[3].mxu0 }
  0xf9   :  { %v179_v18 = vpack.c.bf16 %v178_v16, %v178_v16 }
  0xfb   :  { %180 = vst [vmem:[%s326_s4] sm:$0xf] %v179_v18 }

// kernel: se_resnext_lstm_forward.49
= control target key start
LH: loop header
LB: loop body
LE: loop exit
PB: predicated region body
PF: predicated region fallthrough
CT: control target
= control target key end

     0   :  { %v505_v1 = vmov 0.0   ;;  %vm506_vm0 = vmmov 0   ;;  %s619_s1 = inlined_call_operand.vmem [shape: bf16[1,384,128], index: 1, kind: input, shape index: {}]   ;;  %s620_s0 = inlined_call_operand.vmem [shape: bf16[8,384], index: 0, kind: input, shape index: {}]   ;;  %s621_s2 = inlined_call_operand.vmem [shape: f32[1,1,128], index: 2, kind: input, shape index: {}]   ;;  %s622_s3 = inlined_call_operand.vmem [shape: f32[1,1,128], index: 3, kind: input, shape index: {}]   ;;  %s623_s4 = inlined_call_operand.vmem [shape: bf16[8,128], index: 4, kind: output, shape index: {}]  }
   0x1   :  { %v478_v0 = vld [vmem:[%s619_s1 + $0x40] sm:$0xff]   ;;  %456 = vmatprep.subr.bf16.mxu1 %v505_v1  ;;  %472 = vmatprep.mubr.msk.bf16.mxu1 %vm506_vm0, %v505_v1  ;;  %v481_v4 = vld [vmem:[%s619_s1 + $0x48] sm:$0xff]   ;;  %v484_v7 = vld [vmem:[%s619_s1 + $0x50] sm:$0xff]  }
   0x2   :  { %v479_v2 = vld [vmem:[%s619_s1] sm:$0xff]   ;;  %425 = vmatprep.subr.bf16.mxu0 %v478_v0  ;;  %v482_v5 = vld [vmem:[%s619_s1 + $0x8] sm:$0xff]   ;;  %v485_v8 = vld [vmem:[%s619_s1 + $0x10] sm:$0xff]  }
   0x3   :  { %v480_v3 = vld [vmem:[%s619_s1 + $0x80] sm:$0xff]   ;;  %426 = vmatpush3.bf16.msra.mxu0 %v479_v2  ;;  %v483_v6 = vld [vmem:[%s619_s1 + $0x88] sm:$0xff]   ;;  %v486_v9 = vld [vmem:[%s619_s1 + $0x90] sm:$0xff]  }
   0x4   :  { %457 = vmatpush3.bf16.msra.mxu1 %v480_v3  ;;  %427 = vmatprep.subr.bf16.mxu0 %v481_v4  ;;  %v487_v10 = vld [vmem:[%s619_s1 + $0x58] sm:$0xff]   ;;  %v490_v13 = vld [vmem:[%s619_s1 + $0x60] sm:$0xff]   ;;  %v493_v16 = vld [vmem:[%s619_s1 + $0x68] sm:$0xff]  }
   0x5   :  { %458 = vmatprep.subr.bf16.mxu1 %v505_v1  ;;  %v488_v11 = vld [vmem:[%s619_s1 + $0x18] sm:$0xff]   ;;  %v491_v14 = vld [vmem:[%s619_s1 + $0x20] sm:$0xff]   ;;  %v494_v17 = vld [vmem:[%s619_s1 + $0x28] sm:$0xff]  }
   0x6   :  { %v489_v12 = vld [vmem:[%s619_s1 + $0x98] sm:$0xff]   ;;  %v492_v15 = vld [vmem:[%s619_s1 + $0xa0] sm:$0xff]   ;;  %v495_v18 = vld [vmem:[%s619_s1 + $0xa8] sm:$0xff]  }
   0x7   :  { %428 = vmatpush3.bf16.msra.mxu0 %v482_v5  ;;  %v496_v19 = vld [vmem:[%s619_s1 + $0x70] sm:$0xff]   ;;  %v499_v22 = vld [vmem:[%s619_s1 + $0x78] sm:$0xff]   ;;  %v57_v23 = vld [vmem:[%s620_s0] sm:$0xff] }
   0x8   :  { %459 = vmatpush3.bf16.msra.mxu1 %v483_v6  ;;  %429 = vmatprep.subr.bf16.mxu0 %v484_v7  ;;  %v497_v20 = vld [vmem:[%s619_s1 + $0x30] sm:$0xff]   ;;  %v397_v24 = vcombine.high %v57_v23, %v57_v23  ;;  %v500_v25 = vld [vmem:[%s619_s1 + $0x38] sm:$0xff]   ;;  %v396_v27 = vcombine.low %v57_v23, %v57_v23  ;;  %v504_v28 = vld [vmem:[%s620_s0 + $0x8] ss:$0 sps:$4 sm:$0xff]  }
   0x9   :  { %460 = vmatprep.subr.bf16.mxu1 %v505_v1  ;;  %v498_v21 = vld [vmem:[%s619_s1 + $0xb0] sm:$0xff]   ;;  %v501_v26 = vld [vmem:[%s619_s1 + $0xb8] sm:$0xff]   ;;  %v423_v35 = vld [vmem:[%s621_s2] ss:$0 sm:$0xff] }
   0xa   :  { %294 = vmatprep.mubr.bf16.mxu0 %v397_v24  ;;  %v424_v40 = vld [vmem:[%s622_s3] ss:$0 sm:$0xff] }
   0xb   :  { %430 = vmatpush3.bf16.msra.mxu0 %v485_v8 }
   0xc   :  { %461 = vmatpush3.bf16.msra.mxu1 %v486_v9  ;;  %431 = vmatprep.subr.bf16.mxu0 %v487_v10 }
   0xd   :  { %462 = vmatprep.subr.bf16.mxu1 %v505_v1 }
   0xf   :  { %432 = vmatpush3.bf16.msra.mxu0 %v488_v11 }
  0x10   :  { %463 = vmatpush3.bf16.msra.mxu1 %v489_v12  ;;  %433 = vmatprep.subr.bf16.mxu0 %v490_v13 }
  0x11   :  { %464 = vmatprep.subr.bf16.mxu1 %v505_v1 }
  0x13   :  { %434 = vmatpush3.bf16.msra.mxu0 %v491_v14 }
  0x14   :  { %465 = vmatpush3.bf16.msra.mxu1 %v492_v15  ;;  %435 = vmatprep.subr.bf16.mxu0 %v493_v16 }
  0x15   :  { %466 = vmatprep.subr.bf16.mxu1 %v505_v1 }
  0x17   :  { %436 = vmatpush3.bf16.msra.mxu0 %v494_v17 }
  0x18   :  { %467 = vmatpush3.bf16.msra.mxu1 %v495_v18  ;;  %437 = vmatprep.subr.bf16.mxu0 %v496_v19 }
  0x19   :  { %468 = vmatprep.subr.bf16.mxu1 %v505_v1 }
  0x1b   :  { %438 = vmatpush3.bf16.msra.mxu0 %v497_v20 }
  0x1c   :  { %469 = vmatpush3.bf16.msra.mxu1 %v498_v21  ;;  %439 = vmatprep.subr.bf16.mxu0 %v499_v22 }
  0x1d   :  { %470 = vmatprep.subr.bf16.mxu1 %v505_v1 }
  0x1f   :  { %440 = vmatpush3.bf16.msra.mxu0 %v500_v25 }
  0x20   :  { %471 = vmatpush3.bf16.msra.mxu1 %v501_v26 }
  0x22   :  { %295 = vmatmul.mubr.bf16.vlgmr.msra.gmra.mrb[0].mxu0 %v396_v27 }
  0x23   :  { %473 = vmatmul.mubr.bf16.vlgmr.msra.gmra.mrb[0].mxu1 %v504_v28 }
  0xf5   :  { %v441_v29 = vpop.f32.mrb[0].mxu0 }
  0xf6   :  { %v336_v30 = vpop.f32.mrb[0].mxu1  ;;  %v442_v31 = vpop.f32.mrb[1].mxu0 }
  0xf7   :  { %v443_v32 = vadd.f32 %v442_v31, %v441_v29  ;;  %v474_v33 = vpop.f32.mrb[1].mxu1  ;;  %v444_v34 = vpop.f32.mrb[2].mxu0 }
  0xf8   :  { %v339_v36 = vpop.f32.mrb[2].mxu1  ;;  %v445_v37 = vpop.f32.mrb[3].mxu0 }
  0xf9   :  { %v337_v38 = vadd.f32 %v443_v32, %v336_v30  ;;  %v475_v39 = vpop.f32.mrb[3].mxu1 }
  0xfb   :  { %v355_v41 = vmul.f32 %v423_v35, %v337_v38 }
  0xfd   :  { %v363_v42 = vadd.f32 %v424_v40, %v355_v41 }
  0xff   :  { %v364_v43 = vmax.f32 %v363_v42, 0.0 }
 0x101   :  { %v365_v44 = vpack.c.bf16 %v364_v43, %v364_v43 }
 0x103   :  { %366 = vst [vmem:[%s623_s4] sm:$0xf] %v365_v44 }

// kernel: se_resnext_lstm_forward.53
= control target key start
LH: loop header
LB: loop body
LE: loop exit
PB: predicated region body
PF: predicated region fallthrough
CT: control target
= control target key end

     0   :  { %s432_s12 = smov 0   ;;  %s434_s13 = smov 0   ;;  %s464_s0 = inlined_call_operand.vmem [shape: bf16[4,8,128], index: 0, kind: input, shape index: {}]   ;;  %s465_s1 = inlined_call_operand.vmem [shape: f32[4,1,128], index: 1, kind: input, shape index: {}]   ;;  %s466_s2 = inlined_call_operand.vmem [shape: bf16[4,8,128], index: 2, kind: input, shape index: {}]   ;;  %s467_s3 = inlined_call_operand.vmem [shape: bf16[4,8,128], index: 3, kind: output, shape index: {}]  }
   0x1   :  { %s436_s14 = smov 0  }
   0x2 LB: > { %s25_s15 = sadd.s32 1, %s406_s13  ;;  %p357_p0 = scmp.ge.s32.totalorder %s410_s14, 1  ;;  %s410_s14 = sphi %s436_s14, %s13_s14   ;;  %s406_s13 = sphi %s434_s13, %s469_s13   ;;  %s402_s12 = sphi %s432_s12, %s468_s12  }
   0x3   : > { %p27_p1 = scmp.ge.s32.totalorder %s25_s15, 4  ;;  %p177_p2 = scmp.lt.s32.totalorder %s410_s14, 5 }
   0x5   : > { %s471_s15 = smov (%p27_p1, %s25_s15), 0  ;;  %p178_p3 = pnand %p357_p0, %p177_p2 }
   0x6   : > { %p215_p4 = scmp.lt.s32.totalorder (!%p178_p3), %s402_s12, 3 }
   0x7   : > { %181 = sbr.rel (%p178_p3) target bundleno = 29 (0x1d), region = 32 }
   0xe   : > { %s473_s12 = smov (!%p215_p4, %s402_s12), 3 }
   0xf   : > { %s358_s16 = sshll.u32 %s473_s12, 2  ;;  %s224_s19 = scalar_lea.vmem %s465_s1, %s473_s12 }
  0x10   : > { %s221_s22 = scalar_lea.vmem %s464_s0, %s358_s16  ;;  %s231_s25 = scalar_lea.vmem %s466_s2, %s358_s16  ;;  %v361_v1 = vld [vmem:[%s224_s19] ss:$0 sm:$0xff] }
  0x11   : > { %v239_v0 = vld [vmem:[%s221_s22] sm:$0xf]  ;;  %s238_s28 = scalar_lea.vmem %s467_s3, %s358_s16 }
  0x12   : > { %v249_v2 = vld [vmem:[%s231_s25] sm:$0xf]  ;;  %v240_v3 = vunpack.c.l.bf16 %v239_v0 }
  0x13   : > { %v250_v4 = vunpack.c.l.bf16 %v249_v2 }
  0x14   : > { %v248_v5 = vmul.f32 %v361_v1, %v240_v3 }
  0x16   : > { %v251_v6 = vadd.f32 %v250_v4, %v248_v5 }
  0x18   : > { %v252_v7 = vmax.f32 %v251_v6, 0.0 }
  0x1a   : > { %v253_v8 = vpack.c.bf16 %v252_v7, %v252_v7 }
  0x1c   : > { %254 = vst [vmem:[%s238_s28] sm:$0xf] %v253_v8 }
  0x1d PF: > { %s13_s14 = sadd.s32 1, %s410_s14   ;;  %s468_s12 = smov %s406_s13 }
  0x1e   : > { %p10_p5 = scmp.ge.s32.totalorder %s13_s14, 6   ;;  %s469_s13 = smov %s471_s15 }
  0x20   :  { %12 = sbr.rel (!%p10_p5) target bundleno = 2 (0x2), region = 68 }

// kernel: se_resnext_lstm_forward.52
= control target key start
LH: loop header
LB: loop body
LE: loop exit
PB: predicated region body
PF: predicated region fallthrough
CT: control target
= control target key end

     0   :  { %s689_s18 = smov 0   ;;  %s691_s19 = smov 0   ;;  %s792_s0 = inlined_call_operand.vmem [shape: bf16[4,8,128], index: 0, kind: input, shape index: {}]   ;;  %s793_s1 = inlined_call_operand.vmem [shape: f32[128,32], index: 1, kind: input, shape index: {}]   ;;  %s794_s2 = inlined_call_operand.vmem [shape: f32[1,32], index: 2, kind: input, shape index: {}]   ;;  %s795_s3 = inlined_call_operand.vmem [shape: f32[32,128], index: 3, kind: input, shape index: {}]   ;;  %s796_s4 = inlined_call_operand.vmem [shape: f32[1,128], index: 4, kind: input, shape index: {}]   ;;  %s797_s5 = inlined_call_operand.vmem [shape: f32[4,1,128], index: 5, kind: output, shape index: {}]  }
   0x1   :  { %s693_s20 = smov 0  }
   0x2 LB: > { %s27_s21 = sadd.s32 1, %s650_s19  ;;  %p497_p0 = scmp.ge.s32.totalorder %s654_s20, 1  ;;  %s654_s20 = sphi %s693_s20, %s15_s20   ;;  %s650_s19 = sphi %s691_s19, %s799_s19   ;;  %s646_s18 = sphi %s689_s18, %s798_s18  }
   0x3   : > { %p29_p1 = scmp.ge.s32.totalorder %s27_s21, 4  ;;  %p203_p2 = scmp.lt.s32.totalorder %s654_s20, 5 }
   0x5   : > { %s801_s21 = smov (%p29_p1, %s27_s21), 0  ;;  %p204_p3 = pnand %p497_p0, %p203_p2 }
   0x6   : > { %v261_v0 = vld [vmem:[%s793_s1] sm:$0xff] (!%p204_p3)  ;;  %v262_v1 = vld [vmem:[%s793_s1 + $0x8] sm:$0xff] (!%p204_p3)  ;;  %v263_v2 = vld [vmem:[%s793_s1 + $0x10] sm:$0xff] (!%p204_p3)  ;;  %p231_p4 = scmp.lt.s32.totalorder (!%p204_p3), %s646_s18, 3  ;;  %v656_v3 = vmov (!%p204_p3), 0.0|0.0   ;;  %v657_v6 = vmov (!%p204_p3), 0.0  }
   0x7   : > { %207 = sbr.rel (%p204_p3) target bundleno = 499 (0x1f3), region = 40  ;;  %571 = vmatprep.subr.bf16.mxu0 (!%p204_p3), %v656_v3  ;;  %v572_v4 = vpack.c.bf16 (!%p204_p3), %v262_v1, %v261_v0  ;;  %v264_v5 = vld [vmem:[%s793_s1 + $0x18] sm:$0xff] (!%p204_p3)  ;;  %245 = vst [vmem:[#allocation2] sm:$0x1] (!%p204_p3), %v657_v6  ;;  %595 = vmatprep.subr.bf16.mxu1 (!%p204_p3), %v656_v3  ;;  %vm658_vm0 = vmmov (!%p204_p3), 0   ;;  %v265_v8 = vld [vmem:[%s793_s1 + $0x20] sm:$0xff] (!%p204_p3) }
   0x8   : > { %557 = vmatprep.mubr.msk.f32.mxu0 (!%p204_p3), %vm658_vm0, %v657_v6  ;;  %568 = vmatprep.mubr.msk.f32.mxu1 (!%p204_p3), %vm658_vm0, %v657_v6  ;;  %v575_v7 = vpack.c.bf16 (!%p204_p3), %v264_v5, %v263_v2  ;;  %v266_v9 = vld [vmem:[%s793_s1 + $0x28] sm:$0xff] (!%p204_p3)  ;;  %v349_v10 = vld [vmem:[%s795_s3] sm:$0xff] (!%p204_p3)  ;;  %v267_v16 = vld [vmem:[%s793_s1 + $0x30] sm:$0xff] (!%p204_p3)  ;;  %vm354_vm1 = vcmask (!%p204_p3), 261120  }
   0x9   : > { %573 = vmatpush3.bf16.msra.mxu0 (!%p204_p3), %v572_v4  ;;  %v350_v11 = vld [vmem:[%s795_s3 + $0x8] sm:$0xff] (!%p204_p3)  ;;  %v578_v14 = vpack.c.bf16 (!%p204_p3), %v266_v9, %v265_v8  ;;  %v268_v17 = vld [vmem:[%s793_s1 + $0x38] sm:$0xff] (!%p204_p3)  ;;  %v269_v21 = vld [vmem:[%s793_s1 + $0x40] sm:$0xff] (!%p204_p3) }
   0xa   : > { %574 = vmatprep.subr.bf16.mxu0 (!%p204_p3), %v656_v3  ;;  %v596_v13 = vpack.c.bf16 (!%p204_p3), %v350_v11, %v349_v10  ;;  %v581_v19 = vpack.c.bf16 (!%p204_p3), %v268_v17, %v267_v16  ;;  %v270_v22 = vld [vmem:[%s793_s1 + $0x48] sm:$0xff] (!%p204_p3)  ;;  %v271_v26 = vld [vmem:[%s793_s1 + $0x50] sm:$0xff] (!%p204_p3)  ;;  %v272_v27 = vld [vmem:[%s793_s1 + $0x58] sm:$0xff] (!%p204_p3) }
   0xb   : > { %v584_v24 = vpack.c.bf16 (!%p204_p3), %v270_v22, %v269_v21  ;;  %v587_v30 = vpack.c.bf16 (!%p204_p3), %v272_v27, %v271_v26  ;;  %v273_v32 = vld [vmem:[%s793_s1 + $0x60] sm:$0xff] (!%p204_p3)  ;;  %v274_v33 = vld [vmem:[%s793_s1 + $0x68] sm:$0xff] (!%p204_p3)  ;;  %v275_v36 = vld [vmem:[%s793_s1 + $0x70] sm:$0xff] (!%p204_p3) }
   0xc   : > { %597 = vmatpush3.bf16.msra.mxu1 (!%p204_p3), %v596_v13  ;;  %v590_v35 = vpack.c.bf16 (!%p204_p3), %v274_v33, %v273_v32  ;;  %v276_v37 = vld [vmem:[%s793_s1 + $0x78] sm:$0xff] (!%p204_p3)  ;;  %v351_v40 = vld [vmem:[%s795_s3 + $0x10] sm:$0xff] (!%p204_p3)  ;;  %v277_v43 = vld [vmem:[%s794_s2] sm:$0x1] (!%p204_p3) }
   0xd   : > { %576 = vmatpush3.bf16.msra.mxu0 (!%p204_p3), %v575_v7  ;;  %598 = vmatprep.subr.bf16.mxu1 (!%p204_p3), %v656_v3  ;;  %v593_v38 = vpack.c.bf16 (!%p204_p3), %v276_v37, %v275_v36  ;;  %v352_v41 = vld [vmem:[%s795_s3 + $0x18] sm:$0xff] (!%p204_p3)  ;;  %v353_v48 = vld [vmem:[%s796_s4] sm:$0x1] (!%p204_p3) }
   0xe   : > { %s803_s18 = smov (!%p231_p4, %s646_s18), 3  ;;  %577 = vmatprep.subr.bf16.mxu0 %v656_v3  ;;  %v246_v29 = vld [vmem:[#allocation2] sm:$0x1]  ;;  %v599_v42 = vpack.c.bf16 %v352_v41, %v351_v40 }
   0xf   : > { %s498_s9 = sshll.u32 %s803_s18, 2  ;;  %s240_s30 = scalar_lea.vmem %s797_s5, %s803_s18 }
  0x10   : > { %s237_s12 = scalar_lea.vmem %s792_s0, %s498_s9  ;;  %600 = vmatpush3.bf16.msra.mxu1 %v599_v42 }
  0x11   : > { %v247_v12 = vld [vmem:[%s237_s12] sm:$0xf]  ;;  %579 = vmatpush3.bf16.msra.mxu0 %v578_v14 }
  0x12   : > { %v248_v15 = vunpack.c.l.bf16 %v247_v12  ;;  %580 = vmatprep.subr.bf16.mxu0 %v656_v3 }
  0x14   : > { %v249_v18 = vrot.slane %v248_v15, 4 }
  0x15   : > { %582 = vmatpush3.bf16.msra.mxu0 %v581_v19 }
  0x16   : > { %v250_v20 = vadd.f32 %v249_v18, %v248_v15  ;;  %583 = vmatprep.subr.bf16.mxu0 %v656_v3 }
  0x18   : > { %v251_v23 = vrot.slane %v250_v20, 2 }
  0x19   : > { %585 = vmatpush3.bf16.msra.mxu0 %v584_v24 }
  0x1a   : > { %v252_v25 = vadd.f32 %v251_v23, %v250_v20  ;;  %586 = vmatprep.subr.bf16.mxu0 %v656_v3 }
  0x1c   : > { %v253_v28 = vrot.slane %v252_v25, 1 }
  0x1d   : > { %588 = vmatpush3.bf16.msra.mxu0 %v587_v30 }
  0x1e   : > { %v254_v31 = vadd.f32 %v253_v28, %v252_v25  ;;  %589 = vmatprep.subr.bf16.mxu0 %v656_v3 }
  0x20   : > { %v255_v34 = vadd.f32 %v254_v31, %v246_v29 }
  0x21   : > { %591 = vmatpush3.bf16.msra.mxu0 %v590_v35 }
  0x22   : > { %256 = vst [vmem:[#allocation2] sm:$0x1] %v255_v34  ;;  %592 = vmatprep.subr.bf16.mxu0 %v656_v3 }
  0x25   : > { %594 = vmatpush3.bf16.msra.mxu0 %v593_v38 }
  0x29   : > { %v260_v39 = vld [vmem:[#allocation2] sm:$0x1] }
  0x2a   : > { %558 = vmatmul.mubr.f32.vlgmr.msra.gmra.mrb[0].mxu0 %v260_v39 }
  0xfd   : > { %v344_v44 = vpop.f32.mrb[0].mxu0 }
  0xfe   : > { %v345_v45 = vadd.f32 %v344_v44, %v277_v43  ;;  %v559_v46 = vpop.f32.mrb[1].mxu0 }
 0x100   : > { %v348_v47 = vmax.f32 %v345_v45, 0.0 }
 0x102   : > { %569 = vmatmul.mubr.msk.f32.vlgmr.msra.gmra.mrb[0].mxu1 %vm354_vm1, %v348_v47 }
 0x1d5   : > { %v424_v49 = vpop.f32.mrb[0].mxu1 }
 0x1d6   : > { %v425_v50 = vadd.f32 %v424_v49, %v353_v48  ;;  %v570_v51 = vpop.f32.mrb[1].mxu1 }
 0x1d8   : > { %v500_v52 = vmul.f32 -1.442695, %v425_v50 }
 0x1da   : > { %628 = vpow2.f32 %v500_v52 }
 0x1e4   : > { %v629_v53 = vpop.eup %628 }
 0x1e5   : > { %v431_v54 = vadd.f32 1.0, %v629_v53 }
 0x1e7   : > { %630 = vrcp.f32 %v431_v54 }
 0x1f1   : > { %v631_v55 = vpop.eup %630 }
 0x1f2   : > { %434 = vst [vmem:[%s240_s30] sm:$0x1] %v631_v55 }
 0x1f3 PF: > { %s15_s20 = sadd.s32 1, %s654_s20   ;;  %s798_s18 = smov %s650_s19 }
 0x1f4   : > { %p12_p5 = scmp.ge.s32.totalorder %s15_s20, 6   ;;  %s799_s19 = smov %s801_s21 }
 0x1f6   :  { %14 = sbr.rel (!%p12_p5) target bundleno = 2 (0x2), region = 78 }

// kernel: se_resnext_lstm_forward.54
= control target key start
LH: loop header
LB: loop body
LE: loop exit
PB: predicated region body
PF: predicated region fallthrough
CT: control target
= control target key end

     0   :  { %s280_s6 = smov 0   ;;  %s282_s7 = smov 0   ;;  %s310_s0 = inlined_call_operand.vmem [shape: bf16[4,8,128], index: 0, kind: input, shape index: {}]   ;;  %s311_s1 = inlined_call_operand.vmem [shape: f32[4,1,128], index: 1, kind: output, shape index: {}]  }
   0x1   :  { %s284_s8 = smov 0  }
   0x2 LB: > { %s23_s9 = sadd.s32 1, %s263_s7  ;;  %p216_p0 = scmp.ge.s32.totalorder %s267_s8, 1  ;;  %s267_s8 = sphi %s284_s8, %s11_s8   ;;  %s263_s7 = sphi %s282_s7, %s313_s7   ;;  %s259_s6 = sphi %s280_s6, %s312_s6  }
   0x3   : > { %p25_p1 = scmp.ge.s32.totalorder %s23_s9, 4  ;;  %p103_p2 = scmp.lt.s32.totalorder %s267_s8, 5 }
   0x5   : > { %s315_s9 = smov (%p25_p1, %s23_s9), 0  ;;  %p104_p3 = pnand %p216_p0, %p103_p2 }
   0x6   : > { %p123_p4 = scmp.lt.s32.totalorder (!%p104_p3), %s259_s6, 3  ;;  %v269_v0 = vmov (!%p104_p3), 0.0  }
   0x7   : > { %107 = sbr.rel (%p104_p3) target bundleno = 43 (0x2b), region = 24  ;;  %137 = vst [vmem:[#allocation2] sm:$0x1] (!%p104_p3), %v269_v0 }
   0xe   : > { %s317_s6 = smov (!%p123_p4, %s259_s6), 3  ;;  %v138_v8 = vld [vmem:[#allocation2] sm:$0x1] }
   0xf   : > { %s217_s10 = sshll.u32 %s317_s6, 2  ;;  %s132_s16 = scalar_lea.vmem %s311_s1, %s317_s6 }
  0x10   : > { %s129_s13 = scalar_lea.vmem %s310_s0, %s217_s10 }
  0x11   : > { %v139_v1 = vld [vmem:[%s129_s13] sm:$0xf] }
  0x12   : > { %v140_v2 = vunpack.c.l.bf16 %v139_v1 }
  0x14   : > { %v141_v3 = vrot.slane %v140_v2, 4 }
  0x16   : > { %v142_v4 = vadd.f32 %v141_v3, %v140_v2 }
  0x18   : > { %v143_v5 = vrot.slane %v142_v4, 2 }
  0x1a   : > { %v144_v6 = vadd.f32 %v143_v5, %v142_v4 }
  0x1c   : > { %v145_v7 = vrot.slane %v144_v6, 1 }
  0x1e   : > { %v146_v9 = vadd.f32 %v145_v7, %v144_v6 }
  0x20   : > { %v147_v10 = vadd.f32 %v146_v9, %v138_v8 }
  0x22   : > { %148 = vst [vmem:[#allocation2] sm:$0x1] %v147_v10 }
  0x29   : > { %v152_v11 = vld [vmem:[#allocation2] sm:$0x1] }
  0x2a   : > { %153 = vst [vmem:[%s132_s16] sm:$0x1] %v152_v11 }
  0x2b PF: > { %s11_s8 = sadd.s32 1, %s267_s8   ;;  %s312_s6 = smov %s263_s7 }
  0x2c   : > { %p8_p5 = scmp.ge.s32.totalorder %s11_s8, 6   ;;  %s313_s7 = smov %s315_s9 }
  0x2e   :  { %10 = sbr.rel (!%p8_p5) target bundleno = 2 (0x2), region = 62 }

// kernel: se_resnext_lstm_forward.55
= control target key start
LH: loop header
LB: loop body
LE: loop exit
PB: predicated region body
PF: predicated region fallthrough
CT: control target
= control target key end

     0   :  { %v491_v1 = vmov 0   ;;  %v350_v34 = vlaneseq  ;;  %s626_s1 = inlined_call_operand.vmem [shape: bf16[1,128,512], index: 1, kind: input, shape index: {}]   ;;  %s627_s0 = inlined_call_operand.vmem [shape: bf16[8,128], index: 0, kind: input, shape index: {}]   ;;  %s628_s2 = inlined_call_operand.vmem [shape: f32[1,1,512], index: 2, kind: input, shape index: {}]   ;;  %s629_s3 = inlined_call_operand.vmem [shape: f32[8,512], index: 3, kind: output, shape index: {}]  }
   0x1   :  { %v443_v0 = vld [vmem:[%s626_s1 + $0x4] ss:$16 sps:$4 sm:$0xff]   ;;  %283 = vmatprep.mubr.bf16.mxu0 %v491_v1  ;;  %324 = vmatprep.mubr.bf16.mxu1 %v491_v1  ;;  %v445_v2 = vld [vmem:[%s626_s1 + $0xc] ss:$16 sps:$4 sm:$0xff]   ;;  %v447_v3 = vld [vmem:[%s626_s1] ss:$16 sps:$4 sm:$0xff]  }
   0x2   :  { %251 = vmatprep.subr.bf16.mxu0 %v443_v0  ;;  %v448_v4 = vld [vmem:[%s626_s1 + $0x8] ss:$16 sps:$4 sm:$0xff]   ;;  %292 = vmatprep.subr.bf16.mxu1 %v445_v2  ;;  %v449_v5 = vld [vmem:[%s626_s1 + $0x24] ss:$16 sps:$4 sm:$0xff]   ;;  %v451_v6 = vld [vmem:[%s626_s1 + $0x2c] ss:$16 sps:$4 sm:$0xff]  }
   0x3   :  { %252 = vmatpush1.bf16.msra.mxu0 %v447_v3  ;;  %293 = vmatpush1.bf16.msra.mxu1 %v448_v4  ;;  %v453_v7 = vld [vmem:[%s626_s1 + $0x20] ss:$16 sps:$4 sm:$0xff]   ;;  %v454_v8 = vld [vmem:[%s626_s1 + $0x28] ss:$16 sps:$4 sm:$0xff]   ;;  %v455_v9 = vld [vmem:[%s626_s1 + $0x44] ss:$16 sps:$4 sm:$0xff]  }
   0x4   :  { %253 = vmatprep.subr.bf16.mxu0 %v449_v5  ;;  %294 = vmatprep.subr.bf16.mxu1 %v451_v6  ;;  %v457_v10 = vld [vmem:[%s626_s1 + $0x4c] ss:$16 sps:$4 sm:$0xff]   ;;  %v459_v11 = vld [vmem:[%s626_s1 + $0x40] ss:$16 sps:$4 sm:$0xff]   ;;  %v460_v12 = vld [vmem:[%s626_s1 + $0x48] ss:$16 sps:$4 sm:$0xff]  }
   0x5   :  { %v461_v13 = vld [vmem:[%s626_s1 + $0x64] ss:$16 sps:$4 sm:$0xff]   ;;  %v463_v14 = vld [vmem:[%s626_s1 + $0x6c] ss:$16 sps:$4 sm:$0xff]   ;;  %v465_v15 = vld [vmem:[%s626_s1 + $0x60] ss:$16 sps:$4 sm:$0xff]  }
   0x6   :  { %v466_v16 = vld [vmem:[%s626_s1 + $0x68] ss:$16 sps:$4 sm:$0xff]   ;;  %v467_v17 = vld [vmem:[%s626_s1 + $0x84] ss:$16 sps:$4 sm:$0xff]   ;;  %v469_v18 = vld [vmem:[%s626_s1 + $0x8c] ss:$16 sps:$4 sm:$0xff]  }
   0x7   :  { %254 = vmatpush1.bf16.msra.mxu0 %v453_v7  ;;  %295 = vmatpush1.bf16.msra.mxu1 %v454_v8  ;;  %v471_v19 = vld [vmem:[%s626_s1 + $0x80] ss:$16 sps:$4 sm:$0xff]   ;;  %v472_v20 = vld [vmem:[%s626_s1 + $0x88] ss:$16 sps:$4 sm:$0xff]   ;;  %v473_v21 = vld [vmem:[%s626_s1 + $0xa4] ss:$16 sps:$4 sm:$0xff]  }
   0x8   :  { %255 = vmatprep.subr.bf16.mxu0 %v455_v9  ;;  %296 = vmatprep.subr.bf16.mxu1 %v457_v10  ;;  %v475_v22 = vld [vmem:[%s626_s1 + $0xac] ss:$16 sps:$4 sm:$0xff]   ;;  %v477_v23 = vld [vmem:[%s626_s1 + $0xa0] ss:$16 sps:$4 sm:$0xff]   ;;  %v478_v24 = vld [vmem:[%s626_s1 + $0xa8] ss:$16 sps:$4 sm:$0xff]  }
   0x9   :  { %v479_v25 = vld [vmem:[%s626_s1 + $0xc4] ss:$16 sps:$4 sm:$0xff]   ;;  %v481_v26 = vld [vmem:[%s626_s1 + $0xcc] ss:$16 sps:$4 sm:$0xff]   ;;  %v483_v27 = vld [vmem:[%s626_s1 + $0xc0] ss:$16 sps:$4 sm:$0xff]  }
   0xa   :  { %v484_v28 = vld [vmem:[%s626_s1 + $0xc8] ss:$16 sps:$4 sm:$0xff]   ;;  %v485_v29 = vld [vmem:[%s626_s1 + $0xe4] ss:$16 sps:$4 sm:$0xff]   ;;  %v487_v30 = vld [vmem:[%s626_s1 + $0xec] ss:$16 sps:$4 sm:$0xff]  }
   0xb   :  { %256 = vmatpush1.bf16.msra.mxu0 %v459_v11  ;;  %297 = vmatpush1.bf16.msra.mxu1 %v460_v12  ;;  %v489_v31 = vld [vmem:[%s626_s1 + $0xe0] ss:$16 sps:$4 sm:$0xff]   ;;  %v490_v32 = vld [vmem:[%s626_s1 + $0xe8] ss:$16 sps:$4 sm:$0xff]   ;;  %v351_v35 = vshrl.u32 %v350_v34, 7 }
   0xc   :  { %257 = vmatprep.subr.bf16.mxu0 %v461_v13  ;;  %298 = vmatprep.subr.bf16.mxu1 %v463_v14  ;;  %v58_v33 = vld [vmem:[%s627_s0] sm:$0xf] }
   0xd   :  { %v352_v36 = vsub.s32 0, %v351_v35  ;;  %v360_v37 = vsub.s32 2, %v351_v35  ;;  %v348_v38 = vld [vmem:[%s628_s2] sm:$0xf]  ;;  %v356_v39 = vsub.s32 1, %v351_v35  ;;  %v364_v40 = vsub.s32 3, %v351_v35 }
   0xf   :  { %258 = vmatpush1.bf16.msra.mxu0 %v465_v15  ;;  %299 = vmatpush1.bf16.msra.mxu1 %v466_v16  ;;  %v353_v41 = vrot.slane %v348_v38, %v352_v36  ;;  %v361_v42 = vrot.slane %v348_v38, %v360_v37  ;;  %v357_v43 = vrot.slane %v348_v38, %v356_v39 }
  0x10   :  { %259 = vmatprep.subr.bf16.mxu0 %v467_v17  ;;  %300 = vmatprep.subr.bf16.mxu1 %v469_v18  ;;  %v365_v44 = vrot.slane %v348_v38, %v364_v40 }
  0x13   :  { %260 = vmatpush1.bf16.msra.mxu0 %v471_v19  ;;  %301 = vmatpush1.bf16.msra.mxu1 %v472_v20 }
  0x14   :  { %261 = vmatprep.subr.bf16.mxu0 %v473_v21  ;;  %302 = vmatprep.subr.bf16.mxu1 %v475_v22 }
  0x17   :  { %262 = vmatpush1.bf16.msra.mxu0 %v477_v23  ;;  %303 = vmatpush1.bf16.msra.mxu1 %v478_v24 }
  0x18   :  { %263 = vmatprep.subr.bf16.mxu0 %v479_v25  ;;  %304 = vmatprep.subr.bf16.mxu1 %v481_v26 }
  0x1b   :  { %264 = vmatpush1.bf16.msra.mxu0 %v483_v27  ;;  %305 = vmatpush1.bf16.msra.mxu1 %v484_v28 }
  0x1c   :  { %265 = vmatprep.subr.bf16.mxu0 %v485_v29  ;;  %306 = vmatprep.subr.bf16.mxu1 %v487_v30 }
  0x1f   :  { %266 = vmatpush1.bf16.msra.mxu0 %v489_v31  ;;  %307 = vmatpush1.bf16.msra.mxu1 %v490_v32 }
  0x22   :  { %284 = vmatmul.mubr.bf16.vlgmr.msra.gmra.mrb[0].mxu0 %v58_v33  ;;  %325 = vmatmul.mubr.bf16.vlgmr.msra.gmra.mrb[0].mxu1 %v58_v33 }
  0xf5   :  { %v285_v45 = vpop.f32.mrb[0].mxu0  ;;  %v326_v46 = vpop.f32.mrb[0].mxu1 }
  0xf6   :  { %v370_v47 = vadd.f32 %v353_v41, %v285_v45  ;;  %v372_v48 = vadd.f32 %v361_v42, %v326_v46  ;;  %v287_v49 = vpop.f32.mrb[1].mxu0  ;;  %v328_v50 = vpop.f32.mrb[1].mxu1 }
  0xf7   :  { %v371_v51 = vadd.f32 %v357_v43, %v287_v49  ;;  %v373_v52 = vadd.f32 %v365_v44, %v328_v50  ;;  %v289_v53 = vpop.f32.mrb[2].mxu0  ;;  %v330_v54 = vpop.f32.mrb[2].mxu1 }
  0xf8   :  { %374 = vst [vmem:[%s629_s3] sm:$0xff] %v370_v47  ;;  %376 = vst [vmem:[%s629_s3 + $0x10] sm:$0xff] %v372_v48  ;;  %v290_v55 = vpop.f32.mrb[3].mxu0  ;;  %v331_v56 = vpop.f32.mrb[3].mxu1 }
  0xf9   :  { %375 = vst [vmem:[%s629_s3 + $0x8] sm:$0xff] %v371_v51  ;;  %377 = vst [vmem:[%s629_s3 + $0x18] sm:$0xff] %v373_v52 }

// kernel: se_resnext_lstm_forward.57
= control target key start
LH: loop header
LB: loop body
LE: loop exit
PB: predicated region body
PF: predicated region fallthrough
CT: control target
= control target key end

     0   :  { %v246_v0 = vmov 0.0   ;;  %vm247_vm0 = vmmov 0   ;;  %s301_s1 = inlined_call_operand.vmem [shape: bf16[1,128,128], index: 1, kind: input, shape index: {}]   ;;  %s302_s0 = inlined_call_operand.vmem [shape: bf16[8,128], index: 0, kind: input, shape index: {}]   ;;  %s303_s2 = inlined_call_operand.vmem [shape: f32[1,1,128], index: 2, kind: input, shape index: {}]   ;;  %s304_s3 = inlined_call_operand.vmem [shape: f32[8,128], index: 3, kind: output, shape index: {}]  }
   0x1   :  { %216 = vmatprep.subr.bf16.mxu0 %v246_v0  ;;  %v238_v1 = vld [vmem:[%s301_s1] sm:$0xff]   ;;  %232 = vmatprep.mubr.msk.bf16.mxu0 %vm247_vm0, %v246_v0  ;;  %v239_v2 = vld [vmem:[%s301_s1 + $0x8] sm:$0xff]   ;;  %v240_v3 = vld [vmem:[%s301_s1 + $0x10] sm:$0xff]  }
   0x2   :  { %217 = vmatpush3.bf16.msra.mxu0 %v238_v1  ;;  %v241_v4 = vld [vmem:[%s301_s1 + $0x18] sm:$0xff]   ;;  %v242_v5 = vld [vmem:[%s301_s1 + $0x20] sm:$0xff]   ;;  %v243_v6 = vld [vmem:[%s301_s1 + $0x28] sm:$0xff]  }
   0x3   :  { %218 = vmatprep.subr.bf16.mxu0 %v246_v0  ;;  %v244_v7 = vld [vmem:[%s301_s1 + $0x30] sm:$0xff]   ;;  %v245_v8 = vld [vmem:[%s301_s1 + $0x38] sm:$0xff]   ;;  %v49_v9 = vld [vmem:[%s302_s0] sm:$0xf] }
   0x4   :  { %v206_v10 = vld [vmem:[%s303_s2] ss:$0 sm:$0xff] }
   0x6   :  { %219 = vmatpush3.bf16.msra.mxu0 %v239_v2 }
   0x7   :  { %220 = vmatprep.subr.bf16.mxu0 %v246_v0 }
   0xa   :  { %221 = vmatpush3.bf16.msra.mxu0 %v240_v3 }
   0xb   :  { %222 = vmatprep.subr.bf16.mxu0 %v246_v0 }
   0xe   :  { %223 = vmatpush3.bf16.msra.mxu0 %v241_v4 }
   0xf   :  { %224 = vmatprep.subr.bf16.mxu0 %v246_v0 }
  0x12   :  { %225 = vmatpush3.bf16.msra.mxu0 %v242_v5 }
  0x13   :  { %226 = vmatprep.subr.bf16.mxu0 %v246_v0 }
  0x16   :  { %227 = vmatpush3.bf16.msra.mxu0 %v243_v6 }
  0x17   :  { %228 = vmatprep.subr.bf16.mxu0 %v246_v0 }
  0x1a   :  { %229 = vmatpush3.bf16.msra.mxu0 %v244_v7 }
  0x1b   :  { %230 = vmatprep.subr.bf16.mxu0 %v246_v0 }
  0x1e   :  { %231 = vmatpush3.bf16.msra.mxu0 %v245_v8 }
  0x21   :  { %233 = vmatmul.mubr.bf16.vlgmr.msra.gmra.mrb[0].mxu0 %v49_v9 }
  0xf4   :  { %v148_v11 = vpop.f32.mrb[0].mxu0 }
  0xf5   :  { %v167_v12 = vadd.f32 %v206_v10, %v148_v11  ;;  %v234_v13 = vpop.f32.mrb[1].mxu0 }
  0xf6   :  { %v151_v14 = vpop.f32.mrb[2].mxu0 }
  0xf7   :  { %168 = vst [vmem:[%s304_s3] sm:$0xff] %v167_v12  ;;  %v235_v15 = vpop.f32.mrb[3].mxu0 }

// kernel: se_resnext_lstm_forward.56
= control target key start
LH: loop header
LB: loop body
LE: loop exit
PB: predicated region body
PF: predicated region fallthrough
CT: control target
= control target key end

     0   :  { %s661_s9 = smov 0   ;;  %s783_s0 = inlined_call_operand.vmem [shape: f32[2,8,512], index: 0, kind: input, shape index: {}]   ;;  %s784_s1 = inlined_call_operand.vmem [shape: bf16[128,512], index: 1, kind: input, shape index: {}]   ;;  %s785_s2 = inlined_call_operand.vmem [shape: bf16[2,8,128], index: 2, kind: output, shape index: {}]  }
   0x1 LB: > { %s515_s10 = sadd.s32 4294967295, %s642_s9   ;;  %p519_p0 = scmp.ge.s32.totalorder %s642_s9, 1  ;;  %s642_s9 = sphi %s661_s9, %s12_s9  }
   0x2   : > { %p112_p1 = scmp.lt.s32.totalorder %s642_s9, 3 }
   0x4   : > { %p113_p2 = pnand %p519_p0, %p112_p1 }
   0x5   : > { %p133_p3 = scmp.lt.s32.totalorder (!%p113_p2), %s515_s10, 1  ;;  %p523_p4 = scmp.ne.s32.totalorder (!%p113_p2), %s515_s10, 0 }
   0x6   : > { %116 = sbr.rel (%p113_p2) target bundleno = 316 (0x13c), region = 28 }
   0xd   : > { %s134_s11 = scalar_select %p133_p3, %s515_s10, 1 }
   0xe   : > { %146 = sbr.rel (%p523_p4) target bundleno = 21 (0x15), region = 32  ;;  %v644_v0 = vmov (!%p523_p4), 0.0  }
   0xf   : > { %s561_s12 = sshll.u32 %s134_s11, 5  ;;  %s522_s13 = sshll.u32 %s134_s11, 2  ;;  %147 = vst [vmem:[#allocation2] sm:$0xff] (!%p523_p4), %v644_v0  ;;  %148 = vst [vmem:[#allocation3] sm:$0xff] (!%p523_p4), %v644_v0 }
  0x10   : > { %s672_s16 = scalar_lea.vmem %s783_s0, %s561_s12  ;;  %s677_s19 = scalar_lea.vmem %s785_s2, %s522_s13 }
  0x15 PF: > { %v572_v1 = vld [vmem:[%s784_s1 + $0x4] ss:$16 sps:$4 sm:$0xff]   ;;  %v574_v2 = vld [vmem:[%s784_s1] ss:$16 sps:$4 sm:$0xff]   ;;  %v645_v3 = vmov 0   ;;  %v150_v37 = vld [vmem:[%s672_s16 + $0x8] sm:$0xff] }
  0x16   : > { %379 = vmatprep.mubr.bf16.mxu0 %v645_v3  ;;  %420 = vmatprep.mubr.bf16.mxu1 %v645_v3  ;;  %v575_v4 = vld [vmem:[%s784_s1 + $0x24] ss:$16 sps:$4 sm:$0xff]   ;;  %v577_v5 = vld [vmem:[%s784_s1 + $0x20] ss:$16 sps:$4 sm:$0xff]   ;;  %v583_v7 = vld [vmem:[%s784_s1 + $0xc] ss:$16 sps:$4 sm:$0xff]  }
  0x17   : > { %347 = vmatprep.subr.bf16.mxu0 %v572_v1  ;;  %v578_v6 = vld [vmem:[%s784_s1 + $0x44] ss:$16 sps:$4 sm:$0xff]   ;;  %v586_v8 = vld [vmem:[%s784_s1 + $0x8] ss:$16 sps:$4 sm:$0xff]   ;;  %v580_v9 = vld [vmem:[%s784_s1 + $0x40] ss:$16 sps:$4 sm:$0xff]   ;;  %388 = vmatprep.subr.bf16.mxu1 %v583_v7 }
  0x18   : > { %348 = vmatpush1.bf16.msra.mxu0 %v574_v2  ;;  %v581_v10 = vld [vmem:[%s784_s1 + $0x64] ss:$16 sps:$4 sm:$0xff]   ;;  %389 = vmatpush1.bf16.msra.mxu1 %v586_v8  ;;  %v589_v11 = vld [vmem:[%s784_s1 + $0x2c] ss:$16 sps:$4 sm:$0xff]   ;;  %v592_v12 = vld [vmem:[%s784_s1 + $0x28] ss:$16 sps:$4 sm:$0xff]  }
  0x19   : > { %349 = vmatprep.subr.bf16.mxu0 %v575_v4  ;;  %390 = vmatprep.subr.bf16.mxu1 %v589_v11  ;;  %v585_v13 = vld [vmem:[%s784_s1 + $0x60] ss:$16 sps:$4 sm:$0xff]   ;;  %v587_v14 = vld [vmem:[%s784_s1 + $0x84] ss:$16 sps:$4 sm:$0xff]   ;;  %v595_v15 = vld [vmem:[%s784_s1 + $0x4c] ss:$16 sps:$4 sm:$0xff]  }
  0x1a   : > { %v598_v16 = vld [vmem:[%s784_s1 + $0x48] ss:$16 sps:$4 sm:$0xff]   ;;  %v601_v17 = vld [vmem:[%s784_s1 + $0x6c] ss:$16 sps:$4 sm:$0xff]   ;;  %v591_v18 = vld [vmem:[%s784_s1 + $0x80] ss:$16 sps:$4 sm:$0xff]  }
  0x1b   : > { %v593_v19 = vld [vmem:[%s784_s1 + $0xa4] ss:$16 sps:$4 sm:$0xff]   ;;  %v604_v20 = vld [vmem:[%s784_s1 + $0x68] ss:$16 sps:$4 sm:$0xff]   ;;  %v607_v21 = vld [vmem:[%s784_s1 + $0x8c] ss:$16 sps:$4 sm:$0xff]  }
  0x1c   : > { %350 = vmatpush1.bf16.msra.mxu0 %v577_v5  ;;  %391 = vmatpush1.bf16.msra.mxu1 %v592_v12  ;;  %v597_v22 = vld [vmem:[%s784_s1 + $0xa0] ss:$16 sps:$4 sm:$0xff]   ;;  %v599_v23 = vld [vmem:[%s784_s1 + $0xc4] ss:$16 sps:$4 sm:$0xff]   ;;  %v610_v24 = vld [vmem:[%s784_s1 + $0x88] ss:$16 sps:$4 sm:$0xff]  }
  0x1d   : > { %351 = vmatprep.subr.bf16.mxu0 %v578_v6  ;;  %392 = vmatprep.subr.bf16.mxu1 %v595_v15  ;;  %v611_v25 = vld [vmem:[%s784_s1 + $0xac] ss:$16 sps:$4 sm:$0xff]   ;;  %v603_v26 = vld [vmem:[%s784_s1 + $0xc0] ss:$16 sps:$4 sm:$0xff]   ;;  %v605_v27 = vld [vmem:[%s784_s1 + $0xe4] ss:$16 sps:$4 sm:$0xff]  }
  0x1e   : > { %v613_v28 = vld [vmem:[%s784_s1 + $0xa8] ss:$16 sps:$4 sm:$0xff]   ;;  %v614_v29 = vld [vmem:[%s784_s1 + $0xcc] ss:$16 sps:$4 sm:$0xff]   ;;  %v609_v30 = vld [vmem:[%s784_s1 + $0xe0] ss:$16 sps:$4 sm:$0xff]  }
  0x1f   : > { %v153_v31 = vld [vmem:[#allocation2] sm:$0xff]  ;;  %v616_v32 = vld [vmem:[%s784_s1 + $0xc8] ss:$16 sps:$4 sm:$0xff]   ;;  %v617_v33 = vld [vmem:[%s784_s1 + $0xec] ss:$16 sps:$4 sm:$0xff]  }
  0x20   : > { %352 = vmatpush1.bf16.msra.mxu0 %v580_v9  ;;  %393 = vmatpush1.bf16.msra.mxu1 %v598_v16  ;;  %v154_v34 = vpack.c.bf16 %v153_v31, %v153_v31  ;;  %v619_v35 = vld [vmem:[%s784_s1 + $0xe8] ss:$16 sps:$4 sm:$0xff]   ;;  %v149_v36 = vld [vmem:[%s672_s16] sm:$0xff]  ;;  %v151_v52 = vld [vmem:[%s672_s16 + $0x10] sm:$0xff] }
  0x21   : > { %353 = vmatprep.subr.bf16.mxu0 %v581_v10  ;;  %394 = vmatprep.subr.bf16.mxu1 %v601_v17  ;;  %v152_v46 = vld [vmem:[%s672_s16 + $0x18] sm:$0xff]  ;;  %v452_v61 = vld [vmem:[#allocation3] sm:$0xff] }
  0x24   : > { %354 = vmatpush1.bf16.msra.mxu0 %v585_v13  ;;  %395 = vmatpush1.bf16.msra.mxu1 %v604_v20 }
  0x25   : > { %355 = vmatprep.subr.bf16.mxu0 %v587_v14  ;;  %396 = vmatprep.subr.bf16.mxu1 %v607_v21 }
  0x28   : > { %356 = vmatpush1.bf16.msra.mxu0 %v591_v18  ;;  %397 = vmatpush1.bf16.msra.mxu1 %v610_v24 }
  0x29   : > { %357 = vmatprep.subr.bf16.mxu0 %v593_v19  ;;  %398 = vmatprep.subr.bf16.mxu1 %v611_v25 }
  0x2c   : > { %358 = vmatpush1.bf16.msra.mxu0 %v597_v22  ;;  %399 = vmatpush1.bf16.msra.mxu1 %v613_v28 }
  0x2d   : > { %359 = vmatprep.subr.bf16.mxu0 %v599_v23  ;;  %400 = vmatprep.subr.bf16.mxu1 %v614_v29 }
  0x30   : > { %360 = vmatpush1.bf16.msra.mxu0 %v603_v26  ;;  %401 = vmatpush1.bf16.msra.mxu1 %v616_v32 }
  0x31   : > { %361 = vmatprep.subr.bf16.mxu0 %v605_v27  ;;  %402 = vmatprep.subr.bf16.mxu1 %v617_v33 }
  0x34   : > { %362 = vmatpush1.bf16.msra.mxu0 %v609_v30  ;;  %403 = vmatpush1.bf16.msra.mxu1 %v619_v35 }
  0x37   : > { %380 = vmatmul.mubr.bf16.vlgmr.msra.gmra.mrb[0].mxu0 %v154_v34  ;;  %421 = vmatmul.mubr.bf16.vlgmr.msra.gmra.mrb[0].mxu1 %v154_v34 }
 0x10a   : > { %v381_v38 = vpop.f32.mrb[0].mxu0  ;;  %v422_v47 = vpop.f32.mrb[0].mxu1 }
 0x10b   : > { %v429_v39 = vadd.f32 %v381_v38, %v149_v36  ;;  %v383_v40 = vpop.f32.mrb[1].mxu0  ;;  %v424_v48 = vpop.f32.mrb[1].mxu1  ;;  %v431_v54 = vadd.f32 %v422_v47, %v151_v52 }
 0x10c   : > { %v430_v41 = vadd.f32 %v383_v40, %v150_v37  ;;  %v385_v42 = vpop.f32.mrb[2].mxu0  ;;  %v432_v49 = vadd.f32 %v424_v48, %v152_v46  ;;  %v426_v50 = vpop.f32.mrb[2].mxu1 }
 0x10d   : > { %v556_v43 = vmul.f32 -1.442695, %v429_v39  ;;  %v386_v44 = vpop.f32.mrb[3].mxu0  ;;  %v427_v51 = vpop.f32.mrb[3].mxu1 }
 0x10e   : > { %v557_v45 = vmul.f32 -1.442695, %v430_v41  ;;  %v558_v53 = vmul.f32 -1.442695, %v432_v49 }
 0x10f   : > { %620 = vpow2.f32 %v556_v43 }
 0x110   : > { %622 = vpow2.f32 %v557_v45 }
 0x111   : > { %624 = vpow2.f32 %v558_v53 }
 0x112   : > { %626 = vtanh.f32 %v431_v54 }
 0x119   : > { %v621_v55 = vpop.eup %620 }
 0x11a   : > { %v623_v56 = vpop.eup %622  ;;  %v436_v57 = vadd.f32 1.0, %v621_v55 }
 0x11b   : > { %v442_v58 = vadd.f32 1.0, %v623_v56  ;;  %v625_v59 = vpop.eup %624 }
 0x11c   : > { %628 = vrcp.f32 %v436_v57  ;;  %v627_v60 = vpop.eup %626  ;;  %v449_v63 = vadd.f32 1.0, %v625_v59 }
 0x11d   : > { %630 = vrcp.f32 %v442_v58 }
 0x11e   : > { %632 = vrcp.f32 %v449_v63 }
 0x126   : > { %v629_v62 = vpop.eup %628 }
 0x127   : > { %v631_v0 = vpop.eup %630  ;;  %v454_v1 = vmul.f32 %v629_v62, %v627_v60 }
 0x128   : > { %v453_v2 = vmul.f32 %v631_v0, %v452_v61  ;;  %v633_v4 = vpop.eup %632 }
 0x12a   : > { %v455_v3 = vadd.f32 %v454_v1, %v453_v2 }
 0x12c   : > { %634 = vtanh.f32 %v455_v3  ;;  %458 = vst [vmem:[#allocation3] sm:$0xff] %v455_v3 }
 0x136   : > { %v635_v5 = vpop.eup %634 }
 0x137   : > { %v457_v6 = vmul.f32 %v635_v5, %v633_v4 }
 0x139   : > { %459 = vst [vmem:[#allocation2] sm:$0xff] %v457_v6  ;;  %v460_v7 = vpack.c.bf16 %v457_v6, %v457_v6 }
 0x13b   : > { %461 = vst [vmem:[%s677_s19] sm:$0xf] %v460_v7 }
 0x13c PF: > { %s12_s9 = sadd.s32 1, %s642_s9  }
 0x13d   : > { %p9_p5 = scmp.ge.s32.totalorder %s12_s9, 4  }
 0x13f   :  { %11 = sbr.rel (!%p9_p5) target bundleno = 1 (0x1), region = 62 }

</bundles_post_ra>
